<compile_context>
chip_gen: v7x
topology: tpu7x:2x2x1
jax: 0.10.0
libtpu: 0.0.40
codegen_flags: <defaults>
</compile_context>

<pallas_src>
import numpy as np
import jax
import jax.numpy as jnp
from jax.experimental import pallas as pl
from jax.experimental.pallas import tpu as pltpu

_EPS = 1e-5

# (dh, dw) neighbourhood offsets used by a stride-2 / kernel-4 / pad-1 deconv
_SHIFTS = ((-1, -1), (-1, 0), (-1, 1),
           (0, -1), (0, 0), (0, 1),
           (1, -1), (1, 0), (1, 1))
# kernel tap used by output sub-pixel r (resp. s) for input offset dh (resp. dw)
_KTAP = ({0: 1, -1: 3},   # r == 0 : kh=1 (dh=0), kh=3 (dh=-1)
         {0: 2, 1: 0})    # r == 1 : kh=2 (dh=0), kh=0 (dh=+1)


# ---------------------------------------------------------------------------
# host-side packing helpers
# ---------------------------------------------------------------------------
def _tap_weights(w):
    """Pack a ConvTranspose2d(k=4,s=2,p=1) weight (Cin,Cout,4,4) into 9
    per-shift matmul blocks (9, Cin, 4*Cout); columns ordered (2r+s)*Cout+co."""
    w = np.asarray(w, np.float32)
    cin, cout = w.shape[0], w.shape[1]
    out = np.zeros((9, cin, 4 * cout), np.float32)
    for t, (dh, dw) in enumerate(_SHIFTS):
        for r in (0, 1):
            kh = _KTAP[r].get(dh)
            if kh is None:
                continue
            for s in (0, 1):
                kw = _KTAP[s].get(dw)
                if kw is None:
                    continue
                rs = 2 * r + s
                out[t, :, rs * cout:(rs + 1) * cout] = w[:, :, kh, kw]
    return out


def _shift_masks(h, w):
    """(H*W, 9) validity mask for each neighbourhood offset."""
    m = np.zeros((h * w, 9), np.float32)
    for t, (dh, dw) in enumerate(_SHIFTS):
        for i in range(h):
            for j in range(w):
                if 0 <= i + dh < h and 0 <= j + dw < w:
                    m[i * w + j, t] = 1.0
    return m


def _shuffle_mats(h, w):
    """(4, 4*H*W, H*W) 0/1 matrices interleaving the 4 sub-pixel images."""
    hw = h * w
    p = np.zeros((4, 4 * hw, hw), np.float32)
    for r in (0, 1):
        for s in (0, 1):
            for i in range(h):
                for j in range(w):
                    p[2 * r + s, (2 * i + r) * (2 * w) + (2 * j + s), i * w + j] = 1.0
    return p


# ---------------------------------------------------------------------------
# Pallas kernel
# ---------------------------------------------------------------------------
def _deconv_block(pad_ref, H, W, w_ref, m_ref, sc_ref, sh_ref, relu):
    """One ConvTranspose2d(k=4,s=2,p=1) in sub-pixel form.

    pad_ref holds the (H*W, Cin) input at rows [W+1, W+1+H*W) of a zero-padded
    VMEM scratch, so each of the 9 shifted copies is a static slice of it."""
    hw = H * W
    base = W + 1
    m = m_ref[...]                                         # (hw, 9)
    acc = None
    for t, (dh, dw) in enumerate(_SHIFTS):
        k = dh * W + dw
        z = pad_ref[base + k:base + k + hw, :] * m[:, t:t + 1]
        part = jnp.dot(z, w_ref[t], preferred_element_type=jnp.float32)
        acc = part if acc is None else acc + part
    y = acc * sc_ref[...] + sh_ref[...]                    # folded bias + BN
    return jnp.maximum(y, 0.0) if relu else y              # (hw, 4*Cout)


def _pixel_shuffle(y, p_ref, cout):
    """Interleave the 4 sub-pixel images: (H*W, 4*Cout) -> (4*H*W, Cout)."""
    out = None
    for rs in range(4):
        part = jnp.dot(p_ref[rs], y[:, rs * cout:(rs + 1) * cout],
                       preferred_element_type=jnp.float32)
        out = part if out is None else out + part
    return out


def _decoder_kernel(x_ref, w1_ref, s1_ref, t1_ref,
                    w1d_ref, m1d_ref, sc1d_ref, sh1d_ref, p1d_ref,
                    w2d_ref, m2d_ref, sc2d_ref, sh2d_ref, p2d_ref,
                    w3d_ref, m3d_ref, sc3d_ref, sh3d_ref,
                    out_ref, pad1, pad2, pad3):
    # zero-padded spatial scratch buffers (borders stay zero, interiors are
    # overwritten below) - they implement the "shift with zero fill".
    pad1[...] = jnp.zeros(pad1.shape, jnp.float32)
    pad2[...] = jnp.zeros(pad2.shape, jnp.float32)
    pad3[...] = jnp.zeros(pad3.shape, jnp.float32)

    # ---- dnn: Linear(512,768) + folded BatchNorm1d + ReLU ------------------
    h = jnp.dot(x_ref[0], w1_ref[...], preferred_element_type=jnp.float32)
    h = jnp.maximum(h * s1_ref[...] + t1_ref[...], 0.0)        # (1, 768)

    # view(48,4,4) -> (16 spatial rows, 48 channels); dnn columns were
    # pre-permuted so row p is the contiguous slice [p*48, (p+1)*48).
    for p in range(16):
        pad1[5 + p:6 + p, :] = h[:, p * 48:(p + 1) * 48]

    # ---- ConvTranspose2d(48,24)+BN+ReLU : 4x4 -> 8x8 -----------------------
    y1 = _deconv_block(pad1, 4, 4, w1d_ref, m1d_ref, sc1d_ref, sh1d_ref, True)
    x2 = _pixel_shuffle(y1, p1d_ref, 24)                       # (64, 24)
    pad2[9:73, :] = x2

    # ---- ConvTranspose2d(24,12)+BN+ReLU : 8x8 -> 16x16 ---------------------
    y2 = _deconv_block(pad2, 8, 8, w2d_ref, m2d_ref, sc2d_ref, sh2d_ref, True)
    x3 = _pixel_shuffle(y2, p2d_ref, 12)                       # (256, 12)
    pad3[17:273, :] = x3

    # ---- ConvTranspose2d(12,3)+Sigmoid : 16x16 -> 32x32 (sub-pixel form) ---
    y3 = _deconv_block(pad3, 16, 16, w3d_ref, m3d_ref, sc3d_ref, sh3d_ref, False)
    out_ref[0] = 1.0 / (1.0 + jnp.exp(-y3))                    # (256, 12)


# ---------------------------------------------------------------------------
# model wrapper
# ---------------------------------------------------------------------------
class DecoderPallas:
    _CHANNELS = ((48, 24), (24, 12), (12, 3))
    _SPATIAL = ((4, 4), (8, 8), (16, 16))

    def __init__(self, key):
        ks = jax.random.split(key, 20)

        def unif(k, shape, bound):
            return jax.random.uniform(k, shape, jnp.float32, -bound, bound)

        p = {}
        b0 = 1.0 / float(np.sqrt(512.0))
        p["w1"] = unif(ks[0], (512, 768), b0)
        p["b1"] = unif(ks[1], (768,), b0)
        p["bn1_gamma"] = jax.random.uniform(ks[2], (768,), jnp.float32, 0.5, 1.5)
        p["bn1_beta"] = 0.1 * jax.random.normal(ks[3], (768,), jnp.float32)
        p["bn1_mean"] = 0.1 * jax.random.normal(ks[4], (768,), jnp.float32)
        p["bn1_var"] = jax.random.uniform(ks[5], (768,), jnp.float32, 0.5, 1.5)
        ki = 6
        for l, (cin, cout) in enumerate(self._CHANNELS):
            bw = 1.0 / float(np.sqrt(cin * 16.0))
            p[f"deconv{l}_w"] = unif(ks[ki], (cin, cout, 4, 4), bw); ki += 1
            p[f"deconv{l}_b"] = unif(ks[ki], (cout,), bw); ki += 1
            if l < 2:
                p[f"bn2_{l}_gamma"] = jax.random.uniform(ks[ki], (cout,), jnp.float32, 0.5, 1.5); ki += 1
                p[f"bn2_{l}_beta"] = 0.1 * jax.random.normal(ks[ki], (cout,), jnp.float32); ki += 1
                p[f"bn2_{l}_mean"] = 0.1 * jax.random.normal(ks[ki], (cout,), jnp.float32); ki += 1
                p[f"bn2_{l}_var"] = jax.random.uniform(ks[ki], (cout,), jnp.float32, 0.5, 1.5); ki += 1
        self.params = p

        # ---- fold & pack parameters for the fused kernel -------------------
        # TODO(synk): BatchNorm is folded in inference mode (running stats);
        # training-mode batch statistics are not implemented.
        w1 = np.asarray(p["w1"], np.float32)
        b1 = np.asarray(p["b1"], np.float32)
        s1 = (np.asarray(p["bn1_gamma"]) / np.sqrt(np.asarray(p["bn1_var"]) + _EPS)).astype(np.float32)
        t1 = ((b1 - np.asarray(p["bn1_mean"])) * s1 + np.asarray(p["bn1_beta"])).astype(np.float32)
        # permute dnn output columns from channel-major (c*16+p) to
        # position-major (p*48+c) so the (48,4,4) view is a row-slice pattern.
        self.w1 = jnp.asarray(w1.reshape(512, 48, 16).transpose(0, 2, 1).reshape(512, 768))
        self.s1 = jnp.asarray(s1.reshape(48, 16).T.reshape(1, 768))
        self.t1 = jnp.asarray(t1.reshape(48, 16).T.reshape(1, 768))

        self.layers = []
        for l, (cin, cout) in enumerate(self._CHANNELS):
            w = np.asarray(p[f"deconv{l}_w"], np.float32)
            b = np.asarray(p[f"deconv{l}_b"], np.float32)
            if l < 2:
                sc = (np.asarray(p[f"bn2_{l}_gamma"])
                      / np.sqrt(np.asarray(p[f"bn2_{l}_var"]) + _EPS)).astype(np.float32)
                sh = ((b - np.asarray(p[f"bn2_{l}_mean"])) * sc
                      + np.asarray(p[f"bn2_{l}_beta"])).astype(np.float32)
            else:
                sc = np.ones((cout,), np.float32)
                sh = b
            H, W = self._SPATIAL[l]
            layer = dict(
                w=jnp.asarray(_tap_weights(w)),                         # (9, Cin, 4*Cout)
                m=jnp.asarray(_shift_masks(H, W)),                      # (H*W, 9)
                sc=jnp.asarray(np.tile(sc, 4).reshape(1, 4 * cout)),    # (1, 4*Cout)
                sh=jnp.asarray(np.tile(sh, 4).reshape(1, 4 * cout)),    # (1, 4*Cout)
            )
            if l < 2:
                layer["p"] = jnp.asarray(_shuffle_mats(H, W))           # (4, 4HW, HW)
            self.layers.append(layer)

    def __call__(self, x):
        B = x.shape[0]
        l0, l1, l2 = self.layers
        operands = [x.reshape(B, 1, 512), self.w1, self.s1, self.t1,
                    l0["w"], l0["m"], l0["sc"], l0["sh"], l0["p"],
                    l1["w"], l1["m"], l1["sc"], l1["sh"], l1["p"],
                    l2["w"], l2["m"], l2["sc"], l2["sh"]]
        in_specs = [pl.BlockSpec((1, 1, 512), lambda b: (b, 0, 0))]
        for a in operands[1:]:
            in_specs.append(pl.BlockSpec(a.shape, lambda b, _n=a.ndim: (0,) * _n))

        y = pl.pallas_call(
            _decoder_kernel,
            out_shape=jax.ShapeDtypeStruct((B, 256, 12), jnp.float32),
            grid=(B,),
            in_specs=in_specs,
            out_specs=pl.BlockSpec((1, 256, 12), lambda b: (b, 0, 0)),
            scratch_shapes=[pltpu.VMEM((26, 48), jnp.float32),   # 4x4  + pad 5
                            pltpu.VMEM((82, 24), jnp.float32),   # 8x8  + pad 9
                            pltpu.VMEM((290, 12), jnp.float32)], # 16x16+ pad 17
            compiler_params=pltpu.CompilerParams(
                dimension_semantics=("parallel",)),
        )(*operands)

        # Final 2x2 sub-pixel interleave (pure permutation of the 24 KiB
        # result): free reshape/transpose instead of a 4 MiB in-kernel matmul.
        y = y.reshape(B, 16, 16, 2, 2, 3)       # [b, i, j, r, s, co]
        y = y.transpose(0, 5, 1, 3, 2, 4)       # [b, co, i, r, j, s]
        return y.reshape(B, 3, 32, 32)


# ---------------------------------------------------------------------------
# pure-JAX reference (eval-mode BN), for correctness checking
# ---------------------------------------------------------------------------
def reference_forward(params, x):
    hp = jax.lax.Precision.HIGHEST
    h = jnp.dot(x, params["w1"], precision=hp) + params["b1"]
    h = (h - params["bn1_mean"]) / jnp.sqrt(params["bn1_var"] + _EPS)
    h = h * params["bn1_gamma"] + params["bn1_beta"]
    h = jnp.maximum(h, 0.0)
    y = h.reshape(x.shape[0], 48, 4, 4)
    for l in range(3):
        w = params[f"deconv{l}_w"]
        b = params[f"deconv{l}_b"]
        y = jax.lax.conv_general_dilated(
            y, jnp.flip(w, (2, 3)), window_strides=(1, 1),
            padding=[(2, 2), (2, 2)], lhs_dilation=(2, 2),
            dimension_numbers=("NCHW", "IOHW", "NCHW"), precision=hp)
        y = y + b[None, :, None, None]
        if l < 2:
            g = params[f"bn2_{l}_gamma"][None, :, None, None]
            be = params[f"bn2_{l}_beta"][None, :, None, None]
            mu = params[f"bn2_{l}_mean"][None, :, None, None]
            var = params[f"bn2_{l}_var"][None, :, None, None]
            y = (y - mu) / jnp.sqrt(var + _EPS) * g + be
            y = jnp.maximum(y, 0.0)
        else:
            y = jax.nn.sigmoid(y)
    return y


# ---------------------------------------------------------------------------
if __name__ == "__main__":
    key = jax.random.PRNGKey(0)
    kx, kp = jax.random.split(key)
    B = 2
    x = jax.random.normal(kx, (B, 512), jnp.float32)

    model = DecoderPallas(kp)
    fwd = jax.jit(model.__call__)
    out = jax.block_until_ready(fwd(x))

    ref = jax.block_until_ready(reference_forward(model.params, x))
    assert out.shape == (B, 3, 32, 32), out.shape
    err = float(jnp.max(jnp.abs(out - ref)))
    assert err < 5e-3, f"max abs diff vs reference: {err}"
    print("KERNEL_OK")
</pallas_src>

<mosaic_0001>
module attributes {stable_mosaic.version = 11 : i64} {
  func.func @_decoder_kernel(%arg0: i32, %arg1: memref<1x1x512xf32, #tpu.memory_space<vmem>>, %arg2: memref<512x768xf32, #tpu.memory_space<vmem>>, %arg3: memref<1x768xf32, #tpu.memory_space<vmem>>, %arg4: memref<1x768xf32, #tpu.memory_space<vmem>>, %arg5: memref<9x48x96xf32, #tpu.memory_space<vmem>>, %arg6: memref<16x9xf32, #tpu.memory_space<vmem>>, %arg7: memref<1x96xf32, #tpu.memory_space<vmem>>, %arg8: memref<1x96xf32, #tpu.memory_space<vmem>>, %arg9: memref<4x64x16xf32, #tpu.memory_space<vmem>>, %arg10: memref<9x24x48xf32, #tpu.memory_space<vmem>>, %arg11: memref<64x9xf32, #tpu.memory_space<vmem>>, %arg12: memref<1x48xf32, #tpu.memory_space<vmem>>, %arg13: memref<1x48xf32, #tpu.memory_space<vmem>>, %arg14: memref<4x256x64xf32, #tpu.memory_space<vmem>>, %arg15: memref<9x12x12xf32, #tpu.memory_space<vmem>>, %arg16: memref<256x9xf32, #tpu.memory_space<vmem>>, %arg17: memref<1x12xf32, #tpu.memory_space<vmem>>, %arg18: memref<1x12xf32, #tpu.memory_space<vmem>>, %arg19: memref<1x256x12xf32, #tpu.memory_space<vmem>>, %arg20: memref<26x48xf32, #tpu.memory_space<vmem>>, %arg21: memref<82x24xf32, #tpu.memory_space<vmem>>, %arg22: memref<290x12xf32, #tpu.memory_space<vmem>>) attributes {dimension_semantics = [#tpu.dimension_semantics<parallel>], iteration_bounds = array<i64: 2>, scalar_prefetch = 0 : i64, scratch_operands = 3 : i64, tpu.core_type = #tpu.core_type<tc>, window_params = [{transform_indices = @transform_0, window_bounds = array<i64: 1, 1, 512>}, {pipeline_mode = #tpu.pipeline_mode<synchronous>, transform_indices = @transform_1, window_bounds = array<i64: 512, 768>}, {pipeline_mode = #tpu.pipeline_mode<synchronous>, transform_indices = @transform_2, window_bounds = array<i64: 1, 768>}, {pipeline_mode = #tpu.pipeline_mode<synchronous>, transform_indices = @transform_3, window_bounds = array<i64: 1, 768>}, {pipeline_mode = #tpu.pipeline_mode<synchronous>, transform_indices = @transform_4, window_bounds = array<i64: 9, 48, 96>}, {pipeline_mode = #tpu.pipeline_mode<synchronous>, transform_indices = @transform_5, window_bounds = array<i64: 16, 9>}, {pipeline_mode = #tpu.pipeline_mode<synchronous>, transform_indices = @transform_6, window_bounds = array<i64: 1, 96>}, {pipeline_mode = #tpu.pipeline_mode<synchronous>, transform_indices = @transform_7, window_bounds = array<i64: 1, 96>}, {pipeline_mode = #tpu.pipeline_mode<synchronous>, transform_indices = @transform_8, window_bounds = array<i64: 4, 64, 16>}, {pipeline_mode = #tpu.pipeline_mode<synchronous>, transform_indices = @transform_9, window_bounds = array<i64: 9, 24, 48>}, {pipeline_mode = #tpu.pipeline_mode<synchronous>, transform_indices = @transform_10, window_bounds = array<i64: 64, 9>}, {pipeline_mode = #tpu.pipeline_mode<synchronous>, transform_indices = @transform_11, window_bounds = array<i64: 1, 48>}, {pipeline_mode = #tpu.pipeline_mode<synchronous>, transform_indices = @transform_12, window_bounds = array<i64: 1, 48>}, {pipeline_mode = #tpu.pipeline_mode<synchronous>, transform_indices = @transform_13, window_bounds = array<i64: 4, 256, 64>}, {pipeline_mode = #tpu.pipeline_mode<synchronous>, transform_indices = @transform_14, window_bounds = array<i64: 9, 12, 12>}, {pipeline_mode = #tpu.pipeline_mode<synchronous>, transform_indices = @transform_15, window_bounds = array<i64: 256, 9>}, {pipeline_mode = #tpu.pipeline_mode<synchronous>, transform_indices = @transform_16, window_bounds = array<i64: 1, 12>}, {pipeline_mode = #tpu.pipeline_mode<synchronous>, transform_indices = @transform_17, window_bounds = array<i64: 1, 12>}, {transform_indices = @transform_18, window_bounds = array<i64: 1, 256, 12>}]} {
    %cst = arith.constant 0.000000e+00 : f32
    %0 = vector.broadcast %cst : f32 to vector<26x48xf32>
    %c0 = arith.constant 0 : index
    %c0_0 = arith.constant 0 : index
    %1 = vector.load %arg20[%c0, %c0_0] : memref<26x48xf32, #tpu.memory_space<vmem>>, vector<26x48xf32>
    tpu.vector_store %arg20[%c0, %c0_0], %0 {strides = array<i32>} : memref<26x48xf32, #tpu.memory_space<vmem>>, vector<26x48xf32>,
    %cst_1 = arith.constant 0.000000e+00 : f32
    %2 = vector.broadcast %cst_1 : f32 to vector<82x24xf32>
    %c0_2 = arith.constant 0 : index
    %c0_3 = arith.constant 0 : index
    %3 = vector.load %arg21[%c0_2, %c0_3] : memref<82x24xf32, #tpu.memory_space<vmem>>, vector<82x24xf32>
    tpu.vector_store %arg21[%c0_2, %c0_3], %2 {strides = array<i32>} : memref<82x24xf32, #tpu.memory_space<vmem>>, vector<82x24xf32>,
    %cst_4 = arith.constant 0.000000e+00 : f32
    %4 = vector.broadcast %cst_4 : f32 to vector<290x12xf32>
    %c0_5 = arith.constant 0 : index
    %c0_6 = arith.constant 0 : index
    %5 = vector.load %arg22[%c0_5, %c0_6] : memref<290x12xf32, #tpu.memory_space<vmem>>, vector<290x12xf32>
    tpu.vector_store %arg22[%c0_5, %c0_6], %4 {strides = array<i32>} : memref<290x12xf32, #tpu.memory_space<vmem>>, vector<290x12xf32>,
    %c0_7 = arith.constant 0 : index
    %c0_8 = arith.constant 0 : index
    %c0_9 = arith.constant 0 : index
    %6 = vector.load %arg1[%c0_7, %c0_8, %c0_9] : memref<1x1x512xf32, #tpu.memory_space<vmem>>, vector<1x1x512xf32>
    %7 = vector.shape_cast %6 : vector<1x1x512xf32> to vector<1x512xf32>
    %c0_10 = arith.constant 0 : index
    %c0_11 = arith.constant 0 : index
    %8 = vector.load %arg2[%c0_10, %c0_11] : memref<512x768xf32, #tpu.memory_space<vmem>>, vector<512x768xf32>
    %cst_12 = arith.constant dense<0.000000e+00> : vector<1x768xf32>
    %9 = tpu.matmul %7, %8, %cst_12 {dimension_numbers = #tpu.dot_dimension_numbers<[1], [0], [0], [1], [0, 0, 1, 1], [], []>} : vector<1x512xf32>, vector<512x768xf32>, vector<1x768xf32> -> vector<1x768xf32>
    %c0_13 = arith.constant 0 : index
    %c0_14 = arith.constant 0 : index
    %10 = vector.load %arg3[%c0_13, %c0_14] : memref<1x768xf32, #tpu.memory_space<vmem>>, vector<1x768xf32>
    %11 = arith.mulf %9, %10 : vector<1x768xf32>
    %c0_15 = arith.constant 0 : index
    %c0_16 = arith.constant 0 : index
    %12 = vector.load %arg4[%c0_15, %c0_16] : memref<1x768xf32, #tpu.memory_space<vmem>>, vector<1x768xf32>
    %13 = arith.addf %11, %12 : vector<1x768xf32>
    %cst_17 = arith.constant 0.000000e+00 : f32
    %14 = vector.broadcast %cst_17 : f32 to vector<1x768xf32>
    %15 = arith.maximumf %13, %14 : vector<1x768xf32>
    %16 = vector.extract_strided_slice %15 {offsets = [0, 0], sizes = [1, 48], strides = [1, 1]} : vector<1x768xf32> to vector<1x48xf32>
    %c5 = arith.constant 5 : index
    %c0_18 = arith.constant 0 : index
    %17 = vector.load %arg20[%c5, %c0_18] : memref<26x48xf32, #tpu.memory_space<vmem>>, vector<1x48xf32>
    tpu.vector_store %arg20[%c5, %c0_18], %16 {strides = array<i32>} : memref<26x48xf32, #tpu.memory_space<vmem>>, vector<1x48xf32>,
    %18 = vector.extract_strided_slice %15 {offsets = [0, 48], sizes = [1, 48], strides = [1, 1]} : vector<1x768xf32> to vector<1x48xf32>
    %c6 = arith.constant 6 : index
    %c0_19 = arith.constant 0 : index
    %19 = vector.load %arg20[%c6, %c0_19] : memref<26x48xf32, #tpu.memory_space<vmem>>, vector<1x48xf32>
    tpu.vector_store %arg20[%c6, %c0_19], %18 {strides = array<i32>} : memref<26x48xf32, #tpu.memory_space<vmem>>, vector<1x48xf32>,
    %20 = vector.extract_strided_slice %15 {offsets = [0, 96], sizes = [1, 48], strides = [1, 1]} : vector<1x768xf32> to vector<1x48xf32>
    %c7 = arith.constant 7 : index
    %c0_20 = arith.constant 0 : index
    %21 = vector.load %arg20[%c7, %c0_20] : memref<26x48xf32, #tpu.memory_space<vmem>>, vector<1x48xf32>
    tpu.vector_store %arg20[%c7, %c0_20], %20 {strides = array<i32>} : memref<26x48xf32, #tpu.memory_space<vmem>>, vector<1x48xf32>,
    %22 = vector.extract_strided_slice %15 {offsets = [0, 144], sizes = [1, 48], strides = [1, 1]} : vector<1x768xf32> to vector<1x48xf32>
    %c8 = arith.constant 8 : index
    %c0_21 = arith.constant 0 : index
    %23 = vector.load %arg20[%c8, %c0_21] : memref<26x48xf32, #tpu.memory_space<vmem>>, vector<1x48xf32>
    tpu.vector_store %arg20[%c8, %c0_21], %22 {strides = array<i32>} : memref<26x48xf32, #tpu.memory_space<vmem>>, vector<1x48xf32>,
    %24 = vector.extract_strided_slice %15 {offsets = [0, 192], sizes = [1, 48], strides = [1, 1]} : vector<1x768xf32> to vector<1x48xf32>
    %c9 = arith.constant 9 : index
    %c0_22 = arith.constant 0 : index
    %25 = vector.load %arg20[%c9, %c0_22] : memref<26x48xf32, #tpu.memory_space<vmem>>, vector<1x48xf32>
    tpu.vector_store %arg20[%c9, %c0_22], %24 {strides = array<i32>} : memref<26x48xf32, #tpu.memory_space<vmem>>, vector<1x48xf32>,
    %26 = vector.extract_strided_slice %15 {offsets = [0, 240], sizes = [1, 48], strides = [1, 1]} : vector<1x768xf32> to vector<1x48xf32>
    %c10 = arith.constant 10 : index
    %c0_23 = arith.constant 0 : index
    %27 = vector.load %arg20[%c10, %c0_23] : memref<26x48xf32, #tpu.memory_space<vmem>>, vector<1x48xf32>
    tpu.vector_store %arg20[%c10, %c0_23], %26 {strides = array<i32>} : memref<26x48xf32, #tpu.memory_space<vmem>>, vector<1x48xf32>,
    %28 = vector.extract_strided_slice %15 {offsets = [0, 288], sizes = [1, 48], strides = [1, 1]} : vector<1x768xf32> to vector<1x48xf32>
    %c11 = arith.constant 11 : index
    %c0_24 = arith.constant 0 : index
    %29 = vector.load %arg20[%c11, %c0_24] : memref<26x48xf32, #tpu.memory_space<vmem>>, vector<1x48xf32>
    tpu.vector_store %arg20[%c11, %c0_24], %28 {strides = array<i32>} : memref<26x48xf32, #tpu.memory_space<vmem>>, vector<1x48xf32>,
    %30 = vector.extract_strided_slice %15 {offsets = [0, 336], sizes = [1, 48], strides = [1, 1]} : vector<1x768xf32> to vector<1x48xf32>
    %c12 = arith.constant 12 : index
    %c0_25 = arith.constant 0 : index
    %31 = vector.load %arg20[%c12, %c0_25] : memref<26x48xf32, #tpu.memory_space<vmem>>, vector<1x48xf32>
    tpu.vector_store %arg20[%c12, %c0_25], %30 {strides = array<i32>} : memref<26x48xf32, #tpu.memory_space<vmem>>, vector<1x48xf32>,
    %32 = vector.extract_strided_slice %15 {offsets = [0, 384], sizes = [1, 48], strides = [1, 1]} : vector<1x768xf32> to vector<1x48xf32>
    %c13 = arith.constant 13 : index
    %c0_26 = arith.constant 0 : index
    %33 = vector.load %arg20[%c13, %c0_26] : memref<26x48xf32, #tpu.memory_space<vmem>>, vector<1x48xf32>
    tpu.vector_store %arg20[%c13, %c0_26], %32 {strides = array<i32>} : memref<26x48xf32, #tpu.memory_space<vmem>>, vector<1x48xf32>,
    %34 = vector.extract_strided_slice %15 {offsets = [0, 432], sizes = [1, 48], strides = [1, 1]} : vector<1x768xf32> to vector<1x48xf32>
    %c14 = arith.constant 14 : index
    %c0_27 = arith.constant 0 : index
    %35 = vector.load %arg20[%c14, %c0_27] : memref<26x48xf32, #tpu.memory_space<vmem>>, vector<1x48xf32>
    tpu.vector_store %arg20[%c14, %c0_27], %34 {strides = array<i32>} : memref<26x48xf32, #tpu.memory_space<vmem>>, vector<1x48xf32>,
    %36 = vector.extract_strided_slice %15 {offsets = [0, 480], sizes = [1, 48], strides = [1, 1]} : vector<1x768xf32> to vector<1x48xf32>
    %c15 = arith.constant 15 : index
    %c0_28 = arith.constant 0 : index
    %37 = vector.load %arg20[%c15, %c0_28] : memref<26x48xf32, #tpu.memory_space<vmem>>, vector<1x48xf32>
    tpu.vector_store %arg20[%c15, %c0_28], %36 {strides = array<i32>} : memref<26x48xf32, #tpu.memory_space<vmem>>, vector<1x48xf32>,
    %38 = vector.extract_strided_slice %15 {offsets = [0, 528], sizes = [1, 48], strides = [1, 1]} : vector<1x768xf32> to vector<1x48xf32>
    %c16 = arith.constant 16 : index
    %c0_29 = arith.constant 0 : index
    %39 = vector.load %arg20[%c16, %c0_29] : memref<26x48xf32, #tpu.memory_space<vmem>>, vector<1x48xf32>
    tpu.vector_store %arg20[%c16, %c0_29], %38 {strides = array<i32>} : memref<26x48xf32, #tpu.memory_space<vmem>>, vector<1x48xf32>,
    %40 = vector.extract_strided_slice %15 {offsets = [0, 576], sizes = [1, 48], strides = [1, 1]} : vector<1x768xf32> to vector<1x48xf32>
    %c17 = arith.constant 17 : index
    %c0_30 = arith.constant 0 : index
    %41 = vector.load %arg20[%c17, %c0_30] : memref<26x48xf32, #tpu.memory_space<vmem>>, vector<1x48xf32>
    tpu.vector_store %arg20[%c17, %c0_30], %40 {strides = array<i32>} : memref<26x48xf32, #tpu.memory_space<vmem>>, vector<1x48xf32>,
    %42 = vector.extract_strided_slice %15 {offsets = [0, 624], sizes = [1, 48], strides = [1, 1]} : vector<1x768xf32> to vector<1x48xf32>
    %c18 = arith.constant 18 : index
    %c0_31 = arith.constant 0 : index
    %43 = vector.load %arg20[%c18, %c0_31] : memref<26x48xf32, #tpu.memory_space<vmem>>, vector<1x48xf32>
    tpu.vector_store %arg20[%c18, %c0_31], %42 {strides = array<i32>} : memref<26x48xf32, #tpu.memory_space<vmem>>, vector<1x48xf32>,
    %44 = vector.extract_strided_slice %15 {offsets = [0, 672], sizes = [1, 48], strides = [1, 1]} : vector<1x768xf32> to vector<1x48xf32>
    %c19 = arith.constant 19 : index
    %c0_32 = arith.constant 0 : index
    %45 = vector.load %arg20[%c19, %c0_32] : memref<26x48xf32, #tpu.memory_space<vmem>>, vector<1x48xf32>
    tpu.vector_store %arg20[%c19, %c0_32], %44 {strides = array<i32>} : memref<26x48xf32, #tpu.memory_space<vmem>>, vector<1x48xf32>,
    %46 = vector.extract_strided_slice %15 {offsets = [0, 720], sizes = [1, 48], strides = [1, 1]} : vector<1x768xf32> to vector<1x48xf32>
    %c20 = arith.constant 20 : index
    %c0_33 = arith.constant 0 : index
    %47 = vector.load %arg20[%c20, %c0_33] : memref<26x48xf32, #tpu.memory_space<vmem>>, vector<1x48xf32>
    tpu.vector_store %arg20[%c20, %c0_33], %46 {strides = array<i32>} : memref<26x48xf32, #tpu.memory_space<vmem>>, vector<1x48xf32>,
    %c0_34 = arith.constant 0 : index
    %c0_35 = arith.constant 0 : index
    %48 = vector.load %arg6[%c0_34, %c0_35] : memref<16x9xf32, #tpu.memory_space<vmem>>, vector<16x9xf32>
    %c0_36 = arith.constant 0 : index
    %c0_37 = arith.constant 0 : index
    %49 = vector.load %arg20[%c0_36, %c0_37] : memref<26x48xf32, #tpu.memory_space<vmem>>, vector<16x48xf32>
    %50 = vector.extract_strided_slice %48 {offsets = [0, 0], sizes = [16, 1], strides = [1, 1]} : vector<16x9xf32> to vector<16x1xf32>
    %51 = vector.broadcast %50 : vector<16x1xf32> to vector<16x48xf32>
    %52 = arith.mulf %49, %51 : vector<16x48xf32>
    %c0_38 = arith.constant 0 : index
    %c0_39 = arith.constant 0 : index
    %c0_40 = arith.constant 0 : index
    %53 = vector.load %arg5[%c0_38, %c0_39, %c0_40] : memref<9x48x96xf32, #tpu.memory_space<vmem>>, vector<1x48x96xf32>
    %54 = vector.shape_cast %53 : vector<1x48x96xf32> to vector<48x96xf32>
    %cst_41 = arith.constant dense<0.000000e+00> : vector<16x96xf32>
    %55 = tpu.matmul %52, %54, %cst_41 {dimension_numbers = #tpu.dot_dimension_numbers<[1], [0], [0], [1], [0, 0, 1, 1], [], []>} : vector<16x48xf32>, vector<48x96xf32>, vector<16x96xf32> -> vector<16x96xf32>
    %c1 = arith.constant 1 : index
    %c0_42 = arith.constant 0 : index
    %56 = vector.load %arg20[%c1, %c0_42] : memref<26x48xf32, #tpu.memory_space<vmem>>, vector<16x48xf32>
    %57 = vector.extract_strided_slice %48 {offsets = [0, 1], sizes = [16, 1], strides = [1, 1]} : vector<16x9xf32> to vector<16x1xf32>
    %58 = vector.broadcast %57 : vector<16x1xf32> to vector<16x48xf32>
    %59 = arith.mulf %56, %58 : vector<16x48xf32>
    %c1_43 = arith.constant 1 : index
    %c0_44 = arith.constant 0 : index
    %c0_45 = arith.constant 0 : index
    %60 = vector.load %arg5[%c1_43, %c0_44, %c0_45] : memref<9x48x96xf32, #tpu.memory_space<vmem>>, vector<1x48x96xf32>
    %61 = vector.shape_cast %60 : vector<1x48x96xf32> to vector<48x96xf32>
    %cst_46 = arith.constant dense<0.000000e+00> : vector<16x96xf32>
    %62 = tpu.matmul %59, %61, %cst_46 {dimension_numbers = #tpu.dot_dimension_numbers<[1], [0], [0], [1], [0, 0, 1, 1], [], []>} : vector<16x48xf32>, vector<48x96xf32>, vector<16x96xf32> -> vector<16x96xf32>
    %63 = arith.addf %55, %62 : vector<16x96xf32>
    %c2 = arith.constant 2 : index
    %c0_47 = arith.constant 0 : index
    %64 = vector.load %arg20[%c2, %c0_47] : memref<26x48xf32, #tpu.memory_space<vmem>>, vector<16x48xf32>
    %65 = vector.extract_strided_slice %48 {offsets = [0, 2], sizes = [16, 1], strides = [1, 1]} : vector<16x9xf32> to vector<16x1xf32>
    %66 = vector.broadcast %65 : vector<16x1xf32> to vector<16x48xf32>
    %67 = arith.mulf %64, %66 : vector<16x48xf32>
    %c2_48 = arith.constant 2 : index
    %c0_49 = arith.constant 0 : index
    %c0_50 = arith.constant 0 : index
    %68 = vector.load %arg5[%c2_48, %c0_49, %c0_50] : memref<9x48x96xf32, #tpu.memory_space<vmem>>, vector<1x48x96xf32>
    %69 = vector.shape_cast %68 : vector<1x48x96xf32> to vector<48x96xf32>
    %cst_51 = arith.constant dense<0.000000e+00> : vector<16x96xf32>
    %70 = tpu.matmul %67, %69, %cst_51 {dimension_numbers = #tpu.dot_dimension_numbers<[1], [0], [0], [1], [0, 0, 1, 1], [], []>} : vector<16x48xf32>, vector<48x96xf32>, vector<16x96xf32> -> vector<16x96xf32>
    %71 = arith.addf %63, %70 : vector<16x96xf32>
    %c4 = arith.constant 4 : index
    %c0_52 = arith.constant 0 : index
    %72 = vector.load %arg20[%c4, %c0_52] : memref<26x48xf32, #tpu.memory_space<vmem>>, vector<16x48xf32>
    %73 = vector.extract_strided_slice %48 {offsets = [0, 3], sizes = [16, 1], strides = [1, 1]} : vector<16x9xf32> to vector<16x1xf32>
    %74 = vector.broadcast %73 : vector<16x1xf32> to vector<16x48xf32>
    %75 = arith.mulf %72, %74 : vector<16x48xf32>
    %c3 = arith.constant 3 : index
    %c0_53 = arith.constant 0 : index
    %c0_54 = arith.constant 0 : index
    %76 = vector.load %arg5[%c3, %c0_53, %c0_54] : memref<9x48x96xf32, #tpu.memory_space<vmem>>, vector<1x48x96xf32>
    %77 = vector.shape_cast %76 : vector<1x48x96xf32> to vector<48x96xf32>
    %cst_55 = arith.constant dense<0.000000e+00> : vector<16x96xf32>
    %78 = tpu.matmul %75, %77, %cst_55 {dimension_numbers = #tpu.dot_dimension_numbers<[1], [0], [0], [1], [0, 0, 1, 1], [], []>} : vector<16x48xf32>, vector<48x96xf32>, vector<16x96xf32> -> vector<16x96xf32>
    %79 = arith.addf %71, %78 : vector<16x96xf32>
    %c5_56 = arith.constant 5 : index
    %c0_57 = arith.constant 0 : index
    %80 = vector.load %arg20[%c5_56, %c0_57] : memref<26x48xf32, #tpu.memory_space<vmem>>, vector<16x48xf32>
    %81 = vector.extract_strided_slice %48 {offsets = [0, 4], sizes = [16, 1], strides = [1, 1]} : vector<16x9xf32> to vector<16x1xf32>
    %82 = vector.broadcast %81 : vector<16x1xf32> to vector<16x48xf32>
    %83 = arith.mulf %80, %82 : vector<16x48xf32>
    %c4_58 = arith.constant 4 : index
    %c0_59 = arith.constant 0 : index
    %c0_60 = arith.constant 0 : index
    %84 = vector.load %arg5[%c4_58, %c0_59, %c0_60] : memref<9x48x96xf32, #tpu.memory_space<vmem>>, vector<1x48x96xf32>
    %85 = vector.shape_cast %84 : vector<1x48x96xf32> to vector<48x96xf32>
    %cst_61 = arith.constant dense<0.000000e+00> : vector<16x96xf32>
    %86 = tpu.matmul %83, %85, %cst_61 {dimension_numbers = #tpu.dot_dimension_numbers<[1], [0], [0], [1], [0, 0, 1, 1], [], []>} : vector<16x48xf32>, vector<48x96xf32>, vector<16x96xf32> -> vector<16x96xf32>
    %87 = arith.addf %79, %86 : vector<16x96xf32>
    %c6_62 = arith.constant 6 : index
    %c0_63 = arith.constant 0 : index
    %88 = vector.load %arg20[%c6_62, %c0_63] : memref<26x48xf32, #tpu.memory_space<vmem>>, vector<16x48xf32>
    %89 = vector.extract_strided_slice %48 {offsets = [0, 5], sizes = [16, 1], strides = [1, 1]} : vector<16x9xf32> to vector<16x1xf32>
    %90 = vector.broadcast %89 : vector<16x1xf32> to vector<16x48xf32>
    %91 = arith.mulf %88, %90 : vector<16x48xf32>
    %c5_64 = arith.constant 5 : index
    %c0_65 = arith.constant 0 : index
    %c0_66 = arith.constant 0 : index
    %92 = vector.load %arg5[%c5_64, %c0_65, %c0_66] : memref<9x48x96xf32, #tpu.memory_space<vmem>>, vector<1x48x96xf32>
    %93 = vector.shape_cast %92 : vector<1x48x96xf32> to vector<48x96xf32>
    %cst_67 = arith.constant dense<0.000000e+00> : vector<16x96xf32>
    %94 = tpu.matmul %91, %93, %cst_67 {dimension_numbers = #tpu.dot_dimension_numbers<[1], [0], [0], [1], [0, 0, 1, 1], [], []>} : vector<16x48xf32>, vector<48x96xf32>, vector<16x96xf32> -> vector<16x96xf32>
    %95 = arith.addf %87, %94 : vector<16x96xf32>
    %c8_68 = arith.constant 8 : index
    %c0_69 = arith.constant 0 : index
    %96 = vector.load %arg20[%c8_68, %c0_69] : memref<26x48xf32, #tpu.memory_space<vmem>>, vector<16x48xf32>
    %97 = vector.extract_strided_slice %48 {offsets = [0, 6], sizes = [16, 1], strides = [1, 1]} : vector<16x9xf32> to vector<16x1xf32>
    %98 = vector.broadcast %97 : vector<16x1xf32> to vector<16x48xf32>
    %99 = arith.mulf %96, %98 : vector<16x48xf32>
    %c6_70 = arith.constant 6 : index
    %c0_71 = arith.constant 0 : index
    %c0_72 = arith.constant 0 : index
    %100 = vector.load %arg5[%c6_70, %c0_71, %c0_72] : memref<9x48x96xf32, #tpu.memory_space<vmem>>, vector<1x48x96xf32>
    %101 = vector.shape_cast %100 : vector<1x48x96xf32> to vector<48x96xf32>
    %cst_73 = arith.constant dense<0.000000e+00> : vector<16x96xf32>
    %102 = tpu.matmul %99, %101, %cst_73 {dimension_numbers = #tpu.dot_dimension_numbers<[1], [0], [0], [1], [0, 0, 1, 1], [], []>} : vector<16x48xf32>, vector<48x96xf32>, vector<16x96xf32> -> vector<16x96xf32>
    %103 = arith.addf %95, %102 : vector<16x96xf32>
    %c9_74 = arith.constant 9 : index
    %c0_75 = arith.constant 0 : index
    %104 = vector.load %arg20[%c9_74, %c0_75] : memref<26x48xf32, #tpu.memory_space<vmem>>, vector<16x48xf32>
    %105 = vector.extract_strided_slice %48 {offsets = [0, 7], sizes = [16, 1], strides = [1, 1]} : vector<16x9xf32> to vector<16x1xf32>
    %106 = vector.broadcast %105 : vector<16x1xf32> to vector<16x48xf32>
    %107 = arith.mulf %104, %106 : vector<16x48xf32>
    %c7_76 = arith.constant 7 : index
    %c0_77 = arith.constant 0 : index
    %c0_78 = arith.constant 0 : index
    %108 = vector.load %arg5[%c7_76, %c0_77, %c0_78] : memref<9x48x96xf32, #tpu.memory_space<vmem>>, vector<1x48x96xf32>
    %109 = vector.shape_cast %108 : vector<1x48x96xf32> to vector<48x96xf32>
    %cst_79 = arith.constant dense<0.000000e+00> : vector<16x96xf32>
    %110 = tpu.matmul %107, %109, %cst_79 {dimension_numbers = #tpu.dot_dimension_numbers<[1], [0], [0], [1], [0, 0, 1, 1], [], []>} : vector<16x48xf32>, vector<48x96xf32>, vector<16x96xf32> -> vector<16x96xf32>
    %111 = arith.addf %103, %110 : vector<16x96xf32>
    %c10_80 = arith.constant 10 : index
    %c0_81 = arith.constant 0 : index
    %112 = vector.load %arg20[%c10_80, %c0_81] : memref<26x48xf32, #tpu.memory_space<vmem>>, vector<16x48xf32>
    %113 = vector.extract_strided_slice %48 {offsets = [0, 8], sizes = [16, 1], strides = [1, 1]} : vector<16x9xf32> to vector<16x1xf32>
    %114 = vector.broadcast %113 : vector<16x1xf32> to vector<16x48xf32>
    %115 = arith.mulf %112, %114 : vector<16x48xf32>
    %c8_82 = arith.constant 8 : index
    %c0_83 = arith.constant 0 : index
    %c0_84 = arith.constant 0 : index
    %116 = vector.load %arg5[%c8_82, %c0_83, %c0_84] : memref<9x48x96xf32, #tpu.memory_space<vmem>>, vector<1x48x96xf32>
    %117 = vector.shape_cast %116 : vector<1x48x96xf32> to vector<48x96xf32>
    %cst_85 = arith.constant dense<0.000000e+00> : vector<16x96xf32>
    %118 = tpu.matmul %115, %117, %cst_85 {dimension_numbers = #tpu.dot_dimension_numbers<[1], [0], [0], [1], [0, 0, 1, 1], [], []>} : vector<16x48xf32>, vector<48x96xf32>, vector<16x96xf32> -> vector<16x96xf32>
    %119 = arith.addf %111, %118 : vector<16x96xf32>
    %c0_86 = arith.constant 0 : index
    %c0_87 = arith.constant 0 : index
    %120 = vector.load %arg7[%c0_86, %c0_87] : memref<1x96xf32, #tpu.memory_space<vmem>>, vector<1x96xf32>
    %121 = vector.broadcast %120 : vector<1x96xf32> to vector<16x96xf32>
    %122 = arith.mulf %119, %121 : vector<16x96xf32>
    %c0_88 = arith.constant 0 : index
    %c0_89 = arith.constant 0 : index
    %123 = vector.load %arg8[%c0_88, %c0_89] : memref<1x96xf32, #tpu.memory_space<vmem>>, vector<1x96xf32>
    %124 = vector.broadcast %123 : vector<1x96xf32> to vector<16x96xf32>
    %125 = arith.addf %122, %124 : vector<16x96xf32>
    %cst_90 = arith.constant 0.000000e+00 : f32
    %126 = vector.broadcast %cst_90 : f32 to vector<16x96xf32>
    %127 = arith.maximumf %125, %126 : vector<16x96xf32>
    %c0_91 = arith.constant 0 : index
    %c0_92 = arith.constant 0 : index
    %c0_93 = arith.constant 0 : index
    %128 = vector.load %arg9[%c0_91, %c0_92, %c0_93] : memref<4x64x16xf32, #tpu.memory_space<vmem>>, vector<1x64x16xf32>
    %129 = vector.shape_cast %128 : vector<1x64x16xf32> to vector<64x16xf32>
    %130 = vector.extract_strided_slice %127 {offsets = [0, 0], sizes = [16, 24], strides = [1, 1]} : vector<16x96xf32> to vector<16x24xf32>
    %cst_94 = arith.constant dense<0.000000e+00> : vector<64x24xf32>
    %131 = tpu.matmul %129, %130, %cst_94 {dimension_numbers = #tpu.dot_dimension_numbers<[1], [0], [0], [1], [0, 0, 1, 1], [], []>} : vector<64x16xf32>, vector<16x24xf32>, vector<64x24xf32> -> vector<64x24xf32>
    %c1_95 = arith.constant 1 : index
    %c0_96 = arith.constant 0 : index
    %c0_97 = arith.constant 0 : index
    %132 = vector.load %arg9[%c1_95, %c0_96, %c0_97] : memref<4x64x16xf32, #tpu.memory_space<vmem>>, vector<1x64x16xf32>
    %133 = vector.shape_cast %132 : vector<1x64x16xf32> to vector<64x16xf32>
    %134 = vector.extract_strided_slice %127 {offsets = [0, 24], sizes = [16, 24], strides = [1, 1]} : vector<16x96xf32> to vector<16x24xf32>
    %cst_98 = arith.constant dense<0.000000e+00> : vector<64x24xf32>
    %135 = tpu.matmul %133, %134, %cst_98 {dimension_numbers = #tpu.dot_dimension_numbers<[1], [0], [0], [1], [0, 0, 1, 1], [], []>} : vector<64x16xf32>, vector<16x24xf32>, vector<64x24xf32> -> vector<64x24xf32>
    %136 = arith.addf %131, %135 : vector<64x24xf32>
    %c2_99 = arith.constant 2 : index
    %c0_100 = arith.constant 0 : index
    %c0_101 = arith.constant 0 : index
    %137 = vector.load %arg9[%c2_99, %c0_100, %c0_101] : memref<4x64x16xf32, #tpu.memory_space<vmem>>, vector<1x64x16xf32>
    %138 = vector.shape_cast %137 : vector<1x64x16xf32> to vector<64x16xf32>
    %139 = vector.extract_strided_slice %127 {offsets = [0, 48], sizes = [16, 24], strides = [1, 1]} : vector<16x96xf32> to vector<16x24xf32>
    %cst_102 = arith.constant dense<0.000000e+00> : vector<64x24xf32>
    %140 = tpu.matmul %138, %139, %cst_102 {dimension_numbers = #tpu.dot_dimension_numbers<[1], [0], [0], [1], [0, 0, 1, 1], [], []>} : vector<64x16xf32>, vector<16x24xf32>, vector<64x24xf32> -> vector<64x24xf32>
    %141 = arith.addf %136, %140 : vector<64x24xf32>
    %c3_103 = arith.constant 3 : index
    %c0_104 = arith.constant 0 : index
    %c0_105 = arith.constant 0 : index
    %142 = vector.load %arg9[%c3_103, %c0_104, %c0_105] : memref<4x64x16xf32, #tpu.memory_space<vmem>>, vector<1x64x16xf32>
    %143 = vector.shape_cast %142 : vector<1x64x16xf32> to vector<64x16xf32>
    %144 = vector.extract_strided_slice %127 {offsets = [0, 72], sizes = [16, 24], strides = [1, 1]} : vector<16x96xf32> to vector<16x24xf32>
    %cst_106 = arith.constant dense<0.000000e+00> : vector<64x24xf32>
    %145 = tpu.matmul %143, %144, %cst_106 {dimension_numbers = #tpu.dot_dimension_numbers<[1], [0], [0], [1], [0, 0, 1, 1], [], []>} : vector<64x16xf32>, vector<16x24xf32>, vector<64x24xf32> -> vector<64x24xf32>
    %146 = arith.addf %141, %145 : vector<64x24xf32>
    %c9_107 = arith.constant 9 : index
    %c0_108 = arith.constant 0 : index
    %147 = vector.load %arg21[%c9_107, %c0_108] : memref<82x24xf32, #tpu.memory_space<vmem>>, vector<64x24xf32>
    tpu.vector_store %arg21[%c9_107, %c0_108], %146 {strides = array<i32>} : memref<82x24xf32, #tpu.memory_space<vmem>>, vector<64x24xf32>,
    %c0_109 = arith.constant 0 : index
    %c0_110 = arith.constant 0 : index
    %148 = vector.load %arg11[%c0_109, %c0_110] : memref<64x9xf32, #tpu.memory_space<vmem>>, vector<64x9xf32>
    %c0_111 = arith.constant 0 : index
    %c0_112 = arith.constant 0 : index
    %149 = vector.load %arg21[%c0_111, %c0_112] : memref<82x24xf32, #tpu.memory_space<vmem>>, vector<64x24xf32>
    %150 = vector.extract_strided_slice %148 {offsets = [0, 0], sizes = [64, 1], strides = [1, 1]} : vector<64x9xf32> to vector<64x1xf32>
    %151 = vector.broadcast %150 : vector<64x1xf32> to vector<64x24xf32>
    %152 = arith.mulf %149, %151 : vector<64x24xf32>
    %c0_113 = arith.constant 0 : index
    %c0_114 = arith.constant 0 : index
    %c0_115 = arith.constant 0 : index
    %153 = vector.load %arg10[%c0_113, %c0_114, %c0_115] : memref<9x24x48xf32, #tpu.memory_space<vmem>>, vector<1x24x48xf32>
    %154 = vector.shape_cast %153 : vector<1x24x48xf32> to vector<24x48xf32>
    %cst_116 = arith.constant dense<0.000000e+00> : vector<64x48xf32>
    %155 = tpu.matmul %152, %154, %cst_116 {dimension_numbers = #tpu.dot_dimension_numbers<[1], [0], [0], [1], [0, 0, 1, 1], [], []>} : vector<64x24xf32>, vector<24x48xf32>, vector<64x48xf32> -> vector<64x48xf32>
    %c1_117 = arith.constant 1 : index
    %c0_118 = arith.constant 0 : index
    %156 = vector.load %arg21[%c1_117, %c0_118] : memref<82x24xf32, #tpu.memory_space<vmem>>, vector<64x24xf32>
    %157 = vector.extract_strided_slice %148 {offsets = [0, 1], sizes = [64, 1], strides = [1, 1]} : vector<64x9xf32> to vector<64x1xf32>
    %158 = vector.broadcast %157 : vector<64x1xf32> to vector<64x24xf32>
    %159 = arith.mulf %156, %158 : vector<64x24xf32>
    %c1_119 = arith.constant 1 : index
    %c0_120 = arith.constant 0 : index
    %c0_121 = arith.constant 0 : index
    %160 = vector.load %arg10[%c1_119, %c0_120, %c0_121] : memref<9x24x48xf32, #tpu.memory_space<vmem>>, vector<1x24x48xf32>
    %161 = vector.shape_cast %160 : vector<1x24x48xf32> to vector<24x48xf32>
    %cst_122 = arith.constant dense<0.000000e+00> : vector<64x48xf32>
    %162 = tpu.matmul %159, %161, %cst_122 {dimension_numbers = #tpu.dot_dimension_numbers<[1], [0], [0], [1], [0, 0, 1, 1], [], []>} : vector<64x24xf32>, vector<24x48xf32>, vector<64x48xf32> -> vector<64x48xf32>
    %163 = arith.addf %155, %162 : vector<64x48xf32>
    %c2_123 = arith.constant 2 : index
    %c0_124 = arith.constant 0 : index
    %164 = vector.load %arg21[%c2_123, %c0_124] : memref<82x24xf32, #tpu.memory_space<vmem>>, vector<64x24xf32>
    %165 = vector.extract_strided_slice %148 {offsets = [0, 2], sizes = [64, 1], strides = [1, 1]} : vector<64x9xf32> to vector<64x1xf32>
    %166 = vector.broadcast %165 : vector<64x1xf32> to vector<64x24xf32>
    %167 = arith.mulf %164, %166 : vector<64x24xf32>
    %c2_125 = arith.constant 2 : index
    %c0_126 = arith.constant 0 : index
    %c0_127 = arith.constant 0 : index
    %168 = vector.load %arg10[%c2_125, %c0_126, %c0_127] : memref<9x24x48xf32, #tpu.memory_space<vmem>>, vector<1x24x48xf32>
    %169 = vector.shape_cast %168 : vector<1x24x48xf32> to vector<24x48xf32>
    %cst_128 = arith.constant dense<0.000000e+00> : vector<64x48xf32>
    %170 = tpu.matmul %167, %169, %cst_128 {dimension_numbers = #tpu.dot_dimension_numbers<[1], [0], [0], [1], [0, 0, 1, 1], [], []>} : vector<64x24xf32>, vector<24x48xf32>, vector<64x48xf32> -> vector<64x48xf32>
    %171 = arith.addf %163, %170 : vector<64x48xf32>
    %c8_129 = arith.constant 8 : index
    %c0_130 = arith.constant 0 : index
    %172 = vector.load %arg21[%c8_129, %c0_130] : memref<82x24xf32, #tpu.memory_space<vmem>>, vector<64x24xf32>
    %173 = vector.extract_strided_slice %148 {offsets = [0, 3], sizes = [64, 1], strides = [1, 1]} : vector<64x9xf32> to vector<64x1xf32>
    %174 = vector.broadcast %173 : vector<64x1xf32> to vector<64x24xf32>
    %175 = arith.mulf %172, %174 : vector<64x24xf32>
    %c3_131 = arith.constant 3 : index
    %c0_132 = arith.constant 0 : index
    %c0_133 = arith.constant 0 : index
    %176 = vector.load %arg10[%c3_131, %c0_132, %c0_133] : memref<9x24x48xf32, #tpu.memory_space<vmem>>, vector<1x24x48xf32>
    %177 = vector.shape_cast %176 : vector<1x24x48xf32> to vector<24x48xf32>
    %cst_134 = arith.constant dense<0.000000e+00> : vector<64x48xf32>
    %178 = tpu.matmul %175, %177, %cst_134 {dimension_numbers = #tpu.dot_dimension_numbers<[1], [0], [0], [1], [0, 0, 1, 1], [], []>} : vector<64x24xf32>, vector<24x48xf32>, vector<64x48xf32> -> vector<64x48xf32>
    %179 = arith.addf %171, %178 : vector<64x48xf32>
    %c9_135 = arith.constant 9 : index
    %c0_136 = arith.constant 0 : index
    %180 = vector.load %arg21[%c9_135, %c0_136] : memref<82x24xf32, #tpu.memory_space<vmem>>, vector<64x24xf32>
    %181 = vector.extract_strided_slice %148 {offsets = [0, 4], sizes = [64, 1], strides = [1, 1]} : vector<64x9xf32> to vector<64x1xf32>
    %182 = vector.broadcast %181 : vector<64x1xf32> to vector<64x24xf32>
    %183 = arith.mulf %180, %182 : vector<64x24xf32>
    %c4_137 = arith.constant 4 : index
    %c0_138 = arith.constant 0 : index
    %c0_139 = arith.constant 0 : index
    %184 = vector.load %arg10[%c4_137, %c0_138, %c0_139] : memref<9x24x48xf32, #tpu.memory_space<vmem>>, vector<1x24x48xf32>
    %185 = vector.shape_cast %184 : vector<1x24x48xf32> to vector<24x48xf32>
    %cst_140 = arith.constant dense<0.000000e+00> : vector<64x48xf32>
    %186 = tpu.matmul %183, %185, %cst_140 {dimension_numbers = #tpu.dot_dimension_numbers<[1], [0], [0], [1], [0, 0, 1, 1], [], []>} : vector<64x24xf32>, vector<24x48xf32>, vector<64x48xf32> -> vector<64x48xf32>
    %187 = arith.addf %179, %186 : vector<64x48xf32>
    %c10_141 = arith.constant 10 : index
    %c0_142 = arith.constant 0 : index
    %188 = vector.load %arg21[%c10_141, %c0_142] : memref<82x24xf32, #tpu.memory_space<vmem>>, vector<64x24xf32>
    %189 = vector.extract_strided_slice %148 {offsets = [0, 5], sizes = [64, 1], strides = [1, 1]} : vector<64x9xf32> to vector<64x1xf32>
    %190 = vector.broadcast %189 : vector<64x1xf32> to vector<64x24xf32>
    %191 = arith.mulf %188, %190 : vector<64x24xf32>
    %c5_143 = arith.constant 5 : index
    %c0_144 = arith.constant 0 : index
    %c0_145 = arith.constant 0 : index
    %192 = vector.load %arg10[%c5_143, %c0_144, %c0_145] : memref<9x24x48xf32, #tpu.memory_space<vmem>>, vector<1x24x48xf32>
    %193 = vector.shape_cast %192 : vector<1x24x48xf32> to vector<24x48xf32>
    %cst_146 = arith.constant dense<0.000000e+00> : vector<64x48xf32>
    %194 = tpu.matmul %191, %193, %cst_146 {dimension_numbers = #tpu.dot_dimension_numbers<[1], [0], [0], [1], [0, 0, 1, 1], [], []>} : vector<64x24xf32>, vector<24x48xf32>, vector<64x48xf32> -> vector<64x48xf32>
    %195 = arith.addf %187, %194 : vector<64x48xf32>
    %c16_147 = arith.constant 16 : index
    %c0_148 = arith.constant 0 : index
    %196 = vector.load %arg21[%c16_147, %c0_148] : memref<82x24xf32, #tpu.memory_space<vmem>>, vector<64x24xf32>
    %197 = vector.extract_strided_slice %148 {offsets = [0, 6], sizes = [64, 1], strides = [1, 1]} : vector<64x9xf32> to vector<64x1xf32>
    %198 = vector.broadcast %197 : vector<64x1xf32> to vector<64x24xf32>
    %199 = arith.mulf %196, %198 : vector<64x24xf32>
    %c6_149 = arith.constant 6 : index
    %c0_150 = arith.constant 0 : index
    %c0_151 = arith.constant 0 : index
    %200 = vector.load %arg10[%c6_149, %c0_150, %c0_151] : memref<9x24x48xf32, #tpu.memory_space<vmem>>, vector<1x24x48xf32>
    %201 = vector.shape_cast %200 : vector<1x24x48xf32> to vector<24x48xf32>
    %cst_152 = arith.constant dense<0.000000e+00> : vector<64x48xf32>
    %202 = tpu.matmul %199, %201, %cst_152 {dimension_numbers = #tpu.dot_dimension_numbers<[1], [0], [0], [1], [0, 0, 1, 1], [], []>} : vector<64x24xf32>, vector<24x48xf32>, vector<64x48xf32> -> vector<64x48xf32>
    %203 = arith.addf %195, %202 : vector<64x48xf32>
    %c17_153 = arith.constant 17 : index
    %c0_154 = arith.constant 0 : index
    %204 = vector.load %arg21[%c17_153, %c0_154] : memref<82x24xf32, #tpu.memory_space<vmem>>, vector<64x24xf32>
    %205 = vector.extract_strided_slice %148 {offsets = [0, 7], sizes = [64, 1], strides = [1, 1]} : vector<64x9xf32> to vector<64x1xf32>
    %206 = vector.broadcast %205 : vector<64x1xf32> to vector<64x24xf32>
    %207 = arith.mulf %204, %206 : vector<64x24xf32>
    %c7_155 = arith.constant 7 : index
    %c0_156 = arith.constant 0 : index
    %c0_157 = arith.constant 0 : index
    %208 = vector.load %arg10[%c7_155, %c0_156, %c0_157] : memref<9x24x48xf32, #tpu.memory_space<vmem>>, vector<1x24x48xf32>
    %209 = vector.shape_cast %208 : vector<1x24x48xf32> to vector<24x48xf32>
    %cst_158 = arith.constant dense<0.000000e+00> : vector<64x48xf32>
    %210 = tpu.matmul %207, %209, %cst_158 {dimension_numbers = #tpu.dot_dimension_numbers<[1], [0], [0], [1], [0, 0, 1, 1], [], []>} : vector<64x24xf32>, vector<24x48xf32>, vector<64x48xf32> -> vector<64x48xf32>
    %211 = arith.addf %203, %210 : vector<64x48xf32>
    %c18_159 = arith.constant 18 : index
    %c0_160 = arith.constant 0 : index
    %212 = vector.load %arg21[%c18_159, %c0_160] : memref<82x24xf32, #tpu.memory_space<vmem>>, vector<64x24xf32>
    %213 = vector.extract_strided_slice %148 {offsets = [0, 8], sizes = [64, 1], strides = [1, 1]} : vector<64x9xf32> to vector<64x1xf32>
    %214 = vector.broadcast %213 : vector<64x1xf32> to vector<64x24xf32>
    %215 = arith.mulf %212, %214 : vector<64x24xf32>
    %c8_161 = arith.constant 8 : index
    %c0_162 = arith.constant 0 : index
    %c0_163 = arith.constant 0 : index
    %216 = vector.load %arg10[%c8_161, %c0_162, %c0_163] : memref<9x24x48xf32, #tpu.memory_space<vmem>>, vector<1x24x48xf32>
    %217 = vector.shape_cast %216 : vector<1x24x48xf32> to vector<24x48xf32>
    %cst_164 = arith.constant dense<0.000000e+00> : vector<64x48xf32>
    %218 = tpu.matmul %215, %217, %cst_164 {dimension_numbers = #tpu.dot_dimension_numbers<[1], [0], [0], [1], [0, 0, 1, 1], [], []>} : vector<64x24xf32>, vector<24x48xf32>, vector<64x48xf32> -> vector<64x48xf32>
    %219 = arith.addf %211, %218 : vector<64x48xf32>
    %c0_165 = arith.constant 0 : index
    %c0_166 = arith.constant 0 : index
    %220 = vector.load %arg12[%c0_165, %c0_166] : memref<1x48xf32, #tpu.memory_space<vmem>>, vector<1x48xf32>
    %221 = vector.broadcast %220 : vector<1x48xf32> to vector<64x48xf32>
    %222 = arith.mulf %219, %221 : vector<64x48xf32>
    %c0_167 = arith.constant 0 : index
    %c0_168 = arith.constant 0 : index
    %223 = vector.load %arg13[%c0_167, %c0_168] : memref<1x48xf32, #tpu.memory_space<vmem>>, vector<1x48xf32>
    %224 = vector.broadcast %223 : vector<1x48xf32> to vector<64x48xf32>
    %225 = arith.addf %222, %224 : vector<64x48xf32>
    %cst_169 = arith.constant 0.000000e+00 : f32
    %226 = vector.broadcast %cst_169 : f32 to vector<64x48xf32>
    %227 = arith.maximumf %225, %226 : vector<64x48xf32>
    %c0_170 = arith.constant 0 : index
    %c0_171 = arith.constant 0 : index
    %c0_172 = arith.constant 0 : index
    %228 = vector.load %arg14[%c0_170, %c0_171, %c0_172] : memref<4x256x64xf32, #tpu.memory_space<vmem>>, vector<1x256x64xf32>
    %229 = vector.shape_cast %228 : vector<1x256x64xf32> to vector<256x64xf32>
    %230 = vector.extract_strided_slice %227 {offsets = [0, 0], sizes = [64, 12], strides = [1, 1]} : vector<64x48xf32> to vector<64x12xf32>
    %cst_173 = arith.constant dense<0.000000e+00> : vector<256x12xf32>
    %231 = tpu.matmul %229, %230, %cst_173 {dimension_numbers = #tpu.dot_dimension_numbers<[1], [0], [0], [1], [0, 0, 1, 1], [], []>} : vector<256x64xf32>, vector<64x12xf32>, vector<256x12xf32> -> vector<256x12xf32>
    %c1_174 = arith.constant 1 : index
    %c0_175 = arith.constant 0 : index
    %c0_176 = arith.constant 0 : index
    %232 = vector.load %arg14[%c1_174, %c0_175, %c0_176] : memref<4x256x64xf32, #tpu.memory_space<vmem>>, vector<1x256x64xf32>
    %233 = vector.shape_cast %232 : vector<1x256x64xf32> to vector<256x64xf32>
    %234 = vector.extract_strided_slice %227 {offsets = [0, 12], sizes = [64, 12], strides = [1, 1]} : vector<64x48xf32> to vector<64x12xf32>
    %cst_177 = arith.constant dense<0.000000e+00> : vector<256x12xf32>
    %235 = tpu.matmul %233, %234, %cst_177 {dimension_numbers = #tpu.dot_dimension_numbers<[1], [0], [0], [1], [0, 0, 1, 1], [], []>} : vector<256x64xf32>, vector<64x12xf32>, vector<256x12xf32> -> vector<256x12xf32>
    %236 = arith.addf %231, %235 : vector<256x12xf32>
    %c2_178 = arith.constant 2 : index
    %c0_179 = arith.constant 0 : index
    %c0_180 = arith.constant 0 : index
    %237 = vector.load %arg14[%c2_178, %c0_179, %c0_180] : memref<4x256x64xf32, #tpu.memory_space<vmem>>, vector<1x256x64xf32>
    %238 = vector.shape_cast %237 : vector<1x256x64xf32> to vector<256x64xf32>
    %239 = vector.extract_strided_slice %227 {offsets = [0, 24], sizes = [64, 12], strides = [1, 1]} : vector<64x48xf32> to vector<64x12xf32>
    %cst_181 = arith.constant dense<0.000000e+00> : vector<256x12xf32>
    %240 = tpu.matmul %238, %239, %cst_181 {dimension_numbers = #tpu.dot_dimension_numbers<[1], [0], [0], [1], [0, 0, 1, 1], [], []>} : vector<256x64xf32>, vector<64x12xf32>, vector<256x12xf32> -> vector<256x12xf32>
    %241 = arith.addf %236, %240 : vector<256x12xf32>
    %c3_182 = arith.constant 3 : index
    %c0_183 = arith.constant 0 : index
    %c0_184 = arith.constant 0 : index
    %242 = vector.load %arg14[%c3_182, %c0_183, %c0_184] : memref<4x256x64xf32, #tpu.memory_space<vmem>>, vector<1x256x64xf32>
    %243 = vector.shape_cast %242 : vector<1x256x64xf32> to vector<256x64xf32>
    %244 = vector.extract_strided_slice %227 {offsets = [0, 36], sizes = [64, 12], strides = [1, 1]} : vector<64x48xf32> to vector<64x12xf32>
    %cst_185 = arith.constant dense<0.000000e+00> : vector<256x12xf32>
    %245 = tpu.matmul %243, %244, %cst_185 {dimension_numbers = #tpu.dot_dimension_numbers<[1], [0], [0], [1], [0, 0, 1, 1], [], []>} : vector<256x64xf32>, vector<64x12xf32>, vector<256x12xf32> -> vector<256x12xf32>
    %246 = arith.addf %241, %245 : vector<256x12xf32>
    %c17_186 = arith.constant 17 : index
    %c0_187 = arith.constant 0 : index
    %247 = vector.load %arg22[%c17_186, %c0_187] : memref<290x12xf32, #tpu.memory_space<vmem>>, vector<256x12xf32>
    tpu.vector_store %arg22[%c17_186, %c0_187], %246 {strides = array<i32>} : memref<290x12xf32, #tpu.memory_space<vmem>>, vector<256x12xf32>,
    %c0_188 = arith.constant 0 : index
    %c0_189 = arith.constant 0 : index
    %248 = vector.load %arg16[%c0_188, %c0_189] : memref<256x9xf32, #tpu.memory_space<vmem>>, vector<256x9xf32>
    %c0_190 = arith.constant 0 : index
    %c0_191 = arith.constant 0 : index
    %249 = vector.load %arg22[%c0_190, %c0_191] : memref<290x12xf32, #tpu.memory_space<vmem>>, vector<256x12xf32>
    %250 = vector.extract_strided_slice %248 {offsets = [0, 0], sizes = [256, 1], strides = [1, 1]} : vector<256x9xf32> to vector<256x1xf32>
    %251 = vector.broadcast %250 : vector<256x1xf32> to vector<256x12xf32>
    %252 = arith.mulf %249, %251 : vector<256x12xf32>
    %c0_192 = arith.constant 0 : index
    %c0_193 = arith.constant 0 : index
    %c0_194 = arith.constant 0 : index
    %253 = vector.load %arg15[%c0_192, %c0_193, %c0_194] : memref<9x12x12xf32, #tpu.memory_space<vmem>>, vector<1x12x12xf32>
    %254 = vector.shape_cast %253 : vector<1x12x12xf32> to vector<12x12xf32>
    %cst_195 = arith.constant dense<0.000000e+00> : vector<256x12xf32>
    %255 = tpu.matmul %252, %254, %cst_195 {dimension_numbers = #tpu.dot_dimension_numbers<[1], [0], [0], [1], [0, 0, 1, 1], [], []>} : vector<256x12xf32>, vector<12x12xf32>, vector<256x12xf32> -> vector<256x12xf32>
    %c1_196 = arith.constant 1 : index
    %c0_197 = arith.constant 0 : index
    %256 = vector.load %arg22[%c1_196, %c0_197] : memref<290x12xf32, #tpu.memory_space<vmem>>, vector<256x12xf32>
    %257 = vector.extract_strided_slice %248 {offsets = [0, 1], sizes = [256, 1], strides = [1, 1]} : vector<256x9xf32> to vector<256x1xf32>
    %258 = vector.broadcast %257 : vector<256x1xf32> to vector<256x12xf32>
    %259 = arith.mulf %256, %258 : vector<256x12xf32>
    %c1_198 = arith.constant 1 : index
    %c0_199 = arith.constant 0 : index
    %c0_200 = arith.constant 0 : index
    %260 = vector.load %arg15[%c1_198, %c0_199, %c0_200] : memref<9x12x12xf32, #tpu.memory_space<vmem>>, vector<1x12x12xf32>
    %261 = vector.shape_cast %260 : vector<1x12x12xf32> to vector<12x12xf32>
    %cst_201 = arith.constant dense<0.000000e+00> : vector<256x12xf32>
    %262 = tpu.matmul %259, %261, %cst_201 {dimension_numbers = #tpu.dot_dimension_numbers<[1], [0], [0], [1], [0, 0, 1, 1], [], []>} : vector<256x12xf32>, vector<12x12xf32>, vector<256x12xf32> -> vector<256x12xf32>
    %263 = arith.addf %255, %262 : vector<256x12xf32>
    %c2_202 = arith.constant 2 : index
    %c0_203 = arith.constant 0 : index
    %264 = vector.load %arg22[%c2_202, %c0_203] : memref<290x12xf32, #tpu.memory_space<vmem>>, vector<256x12xf32>
    %265 = vector.extract_strided_slice %248 {offsets = [0, 2], sizes = [256, 1], strides = [1, 1]} : vector<256x9xf32> to vector<256x1xf32>
    %266 = vector.broadcast %265 : vector<256x1xf32> to vector<256x12xf32>
    %267 = arith.mulf %264, %266 : vector<256x12xf32>
    %c2_204 = arith.constant 2 : index
    %c0_205 = arith.constant 0 : index
    %c0_206 = arith.constant 0 : index
    %268 = vector.load %arg15[%c2_204, %c0_205, %c0_206] : memref<9x12x12xf32, #tpu.memory_space<vmem>>, vector<1x12x12xf32>
    %269 = vector.shape_cast %268 : vector<1x12x12xf32> to vector<12x12xf32>
    %cst_207 = arith.constant dense<0.000000e+00> : vector<256x12xf32>
    %270 = tpu.matmul %267, %269, %cst_207 {dimension_numbers = #tpu.dot_dimension_numbers<[1], [0], [0], [1], [0, 0, 1, 1], [], []>} : vector<256x12xf32>, vector<12x12xf32>, vector<256x12xf32> -> vector<256x12xf32>
    %271 = arith.addf %263, %270 : vector<256x12xf32>
    %c16_208 = arith.constant 16 : index
    %c0_209 = arith.constant 0 : index
    %272 = vector.load %arg22[%c16_208, %c0_209] : memref<290x12xf32, #tpu.memory_space<vmem>>, vector<256x12xf32>
    %273 = vector.extract_strided_slice %248 {offsets = [0, 3], sizes = [256, 1], strides = [1, 1]} : vector<256x9xf32> to vector<256x1xf32>
    %274 = vector.broadcast %273 : vector<256x1xf32> to vector<256x12xf32>
    %275 = arith.mulf %272, %274 : vector<256x12xf32>
    %c3_210 = arith.constant 3 : index
    %c0_211 = arith.constant 0 : index
    %c0_212 = arith.constant 0 : index
    %276 = vector.load %arg15[%c3_210, %c0_211, %c0_212] : memref<9x12x12xf32, #tpu.memory_space<vmem>>, vector<1x12x12xf32>
    %277 = vector.shape_cast %276 : vector<1x12x12xf32> to vector<12x12xf32>
    %cst_213 = arith.constant dense<0.000000e+00> : vector<256x12xf32>
    %278 = tpu.matmul %275, %277, %cst_213 {dimension_numbers = #tpu.dot_dimension_numbers<[1], [0], [0], [1], [0, 0, 1, 1], [], []>} : vector<256x12xf32>, vector<12x12xf32>, vector<256x12xf32> -> vector<256x12xf32>
    %279 = arith.addf %271, %278 : vector<256x12xf32>
    %c17_214 = arith.constant 17 : index
    %c0_215 = arith.constant 0 : index
    %280 = vector.load %arg22[%c17_214, %c0_215] : memref<290x12xf32, #tpu.memory_space<vmem>>, vector<256x12xf32>
    %281 = vector.extract_strided_slice %248 {offsets = [0, 4], sizes = [256, 1], strides = [1, 1]} : vector<256x9xf32> to vector<256x1xf32>
    %282 = vector.broadcast %281 : vector<256x1xf32> to vector<256x12xf32>
    %283 = arith.mulf %280, %282 : vector<256x12xf32>
    %c4_216 = arith.constant 4 : index
    %c0_217 = arith.constant 0 : index
    %c0_218 = arith.constant 0 : index
    %284 = vector.load %arg15[%c4_216, %c0_217, %c0_218] : memref<9x12x12xf32, #tpu.memory_space<vmem>>, vector<1x12x12xf32>
    %285 = vector.shape_cast %284 : vector<1x12x12xf32> to vector<12x12xf32>
    %cst_219 = arith.constant dense<0.000000e+00> : vector<256x12xf32>
    %286 = tpu.matmul %283, %285, %cst_219 {dimension_numbers = #tpu.dot_dimension_numbers<[1], [0], [0], [1], [0, 0, 1, 1], [], []>} : vector<256x12xf32>, vector<12x12xf32>, vector<256x12xf32> -> vector<256x12xf32>
    %287 = arith.addf %279, %286 : vector<256x12xf32>
    %c18_220 = arith.constant 18 : index
    %c0_221 = arith.constant 0 : index
    %288 = vector.load %arg22[%c18_220, %c0_221] : memref<290x12xf32, #tpu.memory_space<vmem>>, vector<256x12xf32>
    %289 = vector.extract_strided_slice %248 {offsets = [0, 5], sizes = [256, 1], strides = [1, 1]} : vector<256x9xf32> to vector<256x1xf32>
    %290 = vector.broadcast %289 : vector<256x1xf32> to vector<256x12xf32>
    %291 = arith.mulf %288, %290 : vector<256x12xf32>
    %c5_222 = arith.constant 5 : index
    %c0_223 = arith.constant 0 : index
    %c0_224 = arith.constant 0 : index
    %292 = vector.load %arg15[%c5_222, %c0_223, %c0_224] : memref<9x12x12xf32, #tpu.memory_space<vmem>>, vector<1x12x12xf32>
    %293 = vector.shape_cast %292 : vector<1x12x12xf32> to vector<12x12xf32>
    %cst_225 = arith.constant dense<0.000000e+00> : vector<256x12xf32>
    %294 = tpu.matmul %291, %293, %cst_225 {dimension_numbers = #tpu.dot_dimension_numbers<[1], [0], [0], [1], [0, 0, 1, 1], [], []>} : vector<256x12xf32>, vector<12x12xf32>, vector<256x12xf32> -> vector<256x12xf32>
    %295 = arith.addf %287, %294 : vector<256x12xf32>
    %c32 = arith.constant 32 : index
    %c0_226 = arith.constant 0 : index
    %296 = vector.load %arg22[%c32, %c0_226] : memref<290x12xf32, #tpu.memory_space<vmem>>, vector<256x12xf32>
    %297 = vector.extract_strided_slice %248 {offsets = [0, 6], sizes = [256, 1], strides = [1, 1]} : vector<256x9xf32> to vector<256x1xf32>
    %298 = vector.broadcast %297 : vector<256x1xf32> to vector<256x12xf32>
    %299 = arith.mulf %296, %298 : vector<256x12xf32>
    %c6_227 = arith.constant 6 : index
    %c0_228 = arith.constant 0 : index
    %c0_229 = arith.constant 0 : index
    %300 = vector.load %arg15[%c6_227, %c0_228, %c0_229] : memref<9x12x12xf32, #tpu.memory_space<vmem>>, vector<1x12x12xf32>
    %301 = vector.shape_cast %300 : vector<1x12x12xf32> to vector<12x12xf32>
    %cst_230 = arith.constant dense<0.000000e+00> : vector<256x12xf32>
    %302 = tpu.matmul %299, %301, %cst_230 {dimension_numbers = #tpu.dot_dimension_numbers<[1], [0], [0], [1], [0, 0, 1, 1], [], []>} : vector<256x12xf32>, vector<12x12xf32>, vector<256x12xf32> -> vector<256x12xf32>
    %303 = arith.addf %295, %302 : vector<256x12xf32>
    %c33 = arith.constant 33 : index
    %c0_231 = arith.constant 0 : index
    %304 = vector.load %arg22[%c33, %c0_231] : memref<290x12xf32, #tpu.memory_space<vmem>>, vector<256x12xf32>
    %305 = vector.extract_strided_slice %248 {offsets = [0, 7], sizes = [256, 1], strides = [1, 1]} : vector<256x9xf32> to vector<256x1xf32>
    %306 = vector.broadcast %305 : vector<256x1xf32> to vector<256x12xf32>
    %307 = arith.mulf %304, %306 : vector<256x12xf32>
    %c7_232 = arith.constant 7 : index
    %c0_233 = arith.constant 0 : index
    %c0_234 = arith.constant 0 : index
    %308 = vector.load %arg15[%c7_232, %c0_233, %c0_234] : memref<9x12x12xf32, #tpu.memory_space<vmem>>, vector<1x12x12xf32>
    %309 = vector.shape_cast %308 : vector<1x12x12xf32> to vector<12x12xf32>
    %cst_235 = arith.constant dense<0.000000e+00> : vector<256x12xf32>
    %310 = tpu.matmul %307, %309, %cst_235 {dimension_numbers = #tpu.dot_dimension_numbers<[1], [0], [0], [1], [0, 0, 1, 1], [], []>} : vector<256x12xf32>, vector<12x12xf32>, vector<256x12xf32> -> vector<256x12xf32>
    %311 = arith.addf %303, %310 : vector<256x12xf32>
    %c34 = arith.constant 34 : index
    %c0_236 = arith.constant 0 : index
    %312 = vector.load %arg22[%c34, %c0_236] : memref<290x12xf32, #tpu.memory_space<vmem>>, vector<256x12xf32>
    %313 = vector.extract_strided_slice %248 {offsets = [0, 8], sizes = [256, 1], strides = [1, 1]} : vector<256x9xf32> to vector<256x1xf32>
    %314 = vector.broadcast %313 : vector<256x1xf32> to vector<256x12xf32>
    %315 = arith.mulf %312, %314 : vector<256x12xf32>
    %c8_237 = arith.constant 8 : index
    %c0_238 = arith.constant 0 : index
    %c0_239 = arith.constant 0 : index
    %316 = vector.load %arg15[%c8_237, %c0_238, %c0_239] : memref<9x12x12xf32, #tpu.memory_space<vmem>>, vector<1x12x12xf32>
    %317 = vector.shape_cast %316 : vector<1x12x12xf32> to vector<12x12xf32>
    %cst_240 = arith.constant dense<0.000000e+00> : vector<256x12xf32>
    %318 = tpu.matmul %315, %317, %cst_240 {dimension_numbers = #tpu.dot_dimension_numbers<[1], [0], [0], [1], [0, 0, 1, 1], [], []>} : vector<256x12xf32>, vector<12x12xf32>, vector<256x12xf32> -> vector<256x12xf32>
    %319 = arith.addf %311, %318 : vector<256x12xf32>
    %c0_241 = arith.constant 0 : index
    %c0_242 = arith.constant 0 : index
    %320 = vector.load %arg17[%c0_241, %c0_242] : memref<1x12xf32, #tpu.memory_space<vmem>>, vector<1x12xf32>
    %321 = vector.broadcast %320 : vector<1x12xf32> to vector<256x12xf32>
    %322 = arith.mulf %319, %321 : vector<256x12xf32>
    %c0_243 = arith.constant 0 : index
    %c0_244 = arith.constant 0 : index
    %323 = vector.load %arg18[%c0_243, %c0_244] : memref<1x12xf32, #tpu.memory_space<vmem>>, vector<1x12xf32>
    %324 = vector.broadcast %323 : vector<1x12xf32> to vector<256x12xf32>
    %325 = arith.addf %322, %324 : vector<256x12xf32>
    %cst_245 = arith.constant 0.000000e+00 : f32
    %326 = vector.broadcast %cst_245 : f32 to vector<256x12xf32>
    %327 = arith.subf %326, %325 : vector<256x12xf32>
    %328 = math.exp %327 : vector<256x12xf32>
    %cst_246 = arith.constant 1.000000e+00 : f32
    %329 = vector.broadcast %cst_246 : f32 to vector<256x12xf32>
    %330 = arith.addf %329, %328 : vector<256x12xf32>
    %cst_247 = arith.constant 1.000000e+00 : f32
    %331 = vector.broadcast %cst_247 : f32 to vector<256x12xf32>
    %332 = arith.divf %331, %330 : vector<256x12xf32>
    %c0_248 = arith.constant 0 : index
    %c0_249 = arith.constant 0 : index
    %c0_250 = arith.constant 0 : index
    %333 = vector.load %arg19[%c0_248, %c0_249, %c0_250] : memref<1x256x12xf32, #tpu.memory_space<vmem>>, vector<1x256x12xf32>
    %334 = vector.shape_cast %333 : vector<1x256x12xf32> to vector<256x12xf32>
    %335 = vector.shape_cast %332 : vector<256x12xf32> to vector<1x256x12xf32>
    tpu.vector_store %arg19[%c0_248, %c0_249, %c0_250], %335 {strides = array<i32>} : memref<1x256x12xf32, #tpu.memory_space<vmem>>, vector<1x256x12xf32>,
    return
  }
  func.func @transform_0(%arg0: i32) -> (i32, i32, i32) {
    %c0_i32 = arith.constant 0 : i32
    %c0_i32_0 = arith.constant 0 : i32
    %c0_i32_1 = arith.constant 0 : i32
    return %arg0, %c0_i32, %c0_i32_0 : i32, i32, i32
  }
  func.func @transform_1(%arg0: i32) -> (i32, i32) {
    %c0_i32 = arith.constant 0 : i32
    %c0_i32_0 = arith.constant 0 : i32
    %c0_i32_1 = arith.constant 0 : i32
    return %c0_i32, %c0_i32_0 : i32, i32
  }
  func.func @transform_2(%arg0: i32) -> (i32, i32) {
    %c0_i32 = arith.constant 0 : i32
    %c0_i32_0 = arith.constant 0 : i32
    %c0_i32_1 = arith.constant 0 : i32
    return %c0_i32, %c0_i32_0 : i32, i32
  }
  func.func @transform_3(%arg0: i32) -> (i32, i32) {
    %c0_i32 = arith.constant 0 : i32
    %c0_i32_0 = arith.constant 0 : i32
    %c0_i32_1 = arith.constant 0 : i32
    return %c0_i32, %c0_i32_0 : i32, i32
  }
  func.func @transform_4(%arg0: i32) -> (i32, i32, i32) {
    %c0_i32 = arith.constant 0 : i32
    %c0_i32_0 = arith.constant 0 : i32
    %c0_i32_1 = arith.constant 0 : i32
    %c0_i32_2 = arith.constant 0 : i32
    return %c0_i32, %c0_i32_0, %c0_i32_1 : i32, i32, i32
  }
  func.func @transform_5(%arg0: i32) -> (i32, i32) {
    %c0_i32 = arith.constant 0 : i32
    %c0_i32_0 = arith.constant 0 : i32
    %c0_i32_1 = arith.constant 0 : i32
    return %c0_i32, %c0_i32_0 : i32, i32
  }
  func.func @transform_6(%arg0: i32) -> (i32, i32) {
    %c0_i32 = arith.constant 0 : i32
    %c0_i32_0 = arith.constant 0 : i32
    %c0_i32_1 = arith.constant 0 : i32
    return %c0_i32, %c0_i32_0 : i32, i32
  }
  func.func @transform_7(%arg0: i32) -> (i32, i32) {
    %c0_i32 = arith.constant 0 : i32
    %c0_i32_0 = arith.constant 0 : i32
    %c0_i32_1 = arith.constant 0 : i32
    return %c0_i32, %c0_i32_0 : i32, i32
  }
  func.func @transform_8(%arg0: i32) -> (i32, i32, i32) {
    %c0_i32 = arith.constant 0 : i32
    %c0_i32_0 = arith.constant 0 : i32
    %c0_i32_1 = arith.constant 0 : i32
    %c0_i32_2 = arith.constant 0 : i32
    return %c0_i32, %c0_i32_0, %c0_i32_1 : i32, i32, i32
  }
  func.func @transform_9(%arg0: i32) -> (i32, i32, i32) {
    %c0_i32 = arith.constant 0 : i32
    %c0_i32_0 = arith.constant 0 : i32
    %c0_i32_1 = arith.constant 0 : i32
    %c0_i32_2 = arith.constant 0 : i32
    return %c0_i32, %c0_i32_0, %c0_i32_1 : i32, i32, i32
  }
  func.func @transform_10(%arg0: i32) -> (i32, i32) {
    %c0_i32 = arith.constant 0 : i32
    %c0_i32_0 = arith.constant 0 : i32
    %c0_i32_1 = arith.constant 0 : i32
    return %c0_i32, %c0_i32_0 : i32, i32
  }
  func.func @transform_11(%arg0: i32) -> (i32, i32) {
    %c0_i32 = arith.constant 0 : i32
    %c0_i32_0 = arith.constant 0 : i32
    %c0_i32_1 = arith.constant 0 : i32
    return %c0_i32, %c0_i32_0 : i32, i32
  }
  func.func @transform_12(%arg0: i32) -> (i32, i32) {
    %c0_i32 = arith.constant 0 : i32
    %c0_i32_0 = arith.constant 0 : i32
    %c0_i32_1 = arith.constant 0 : i32
    return %c0_i32, %c0_i32_0 : i32, i32
  }
  func.func @transform_13(%arg0: i32) -> (i32, i32, i32) {
    %c0_i32 = arith.constant 0 : i32
    %c0_i32_0 = arith.constant 0 : i32
    %c0_i32_1 = arith.constant 0 : i32
    %c0_i32_2 = arith.constant 0 : i32
    return %c0_i32, %c0_i32_0, %c0_i32_1 : i32, i32, i32
  }
  func.func @transform_14(%arg0: i32) -> (i32, i32, i32) {
    %c0_i32 = arith.constant 0 : i32
    %c0_i32_0 = arith.constant 0 : i32
    %c0_i32_1 = arith.constant 0 : i32
    %c0_i32_2 = arith.constant 0 : i32
    return %c0_i32, %c0_i32_0, %c0_i32_1 : i32, i32, i32
  }
  func.func @transform_15(%arg0: i32) -> (i32, i32) {
    %c0_i32 = arith.constant 0 : i32
    %c0_i32_0 = arith.constant 0 : i32
    %c0_i32_1 = arith.constant 0 : i32
    return %c0_i32, %c0_i32_0 : i32, i32
  }
  func.func @transform_16(%arg0: i32) -> (i32, i32) {
    %c0_i32 = arith.constant 0 : i32
    %c0_i32_0 = arith.constant 0 : i32
    %c0_i32_1 = arith.constant 0 : i32
    return %c0_i32, %c0_i32_0 : i32, i32
  }
  func.func @transform_17(%arg0: i32) -> (i32, i32) {
    %c0_i32 = arith.constant 0 : i32
    %c0_i32_0 = arith.constant 0 : i32
    %c0_i32_1 = arith.constant 0 : i32
    return %c0_i32, %c0_i32_0 : i32, i32
  }
  func.func @transform_18(%arg0: i32) -> (i32, i32, i32) {
    %c0_i32 = arith.constant 0 : i32
    %c0_i32_0 = arith.constant 0 : i32
    %c0_i32_1 = arith.constant 0 : i32
    return %arg0, %c0_i32, %c0_i32_0 : i32, i32, i32
  }
}

</mosaic_0001>

<bundles_post_ra>
// kernel: a_call__.1
= control target key start
LH: loop header
LB: loop body
LE: loop exit
PB: predicated region body
PF: predicated region fallthrough
CT: control target
= control target key end

     0   :  { %s20232_s0 = inlined_call_operand.vmem [shape: f32[2,1,512], index: 0, kind: input, shape index: {}]   ;;  %s20233_s1 = inlined_call_operand.hbm [shape: f32[512,768], index: 1, kind: input, shape index: {}]   ;;  %s20234_s2 = inlined_call_operand.hbm [shape: f32[1,768], index: 2, kind: input, shape index: {}]   ;;  %s20235_s3 = inlined_call_operand.hbm [shape: f32[1,768], index: 3, kind: input, shape index: {}]   ;;  %s20236_s4 = inlined_call_operand.hbm [shape: f32[9,48,96], index: 4, kind: input, shape index: {}]   ;;  %s20237_s5 = inlined_call_operand.hbm [shape: f32[16,9], index: 5, kind: input, shape index: {}]   ;;  %s20238_s6 = inlined_call_operand.hbm [shape: f32[1,96], index: 6, kind: input, shape index: {}]   ;;  %s20239_s7 = inlined_call_operand.hbm [shape: f32[1,96], index: 7, kind: input, shape index: {}]   ;;  %s20240_s8 = inlined_call_operand.hbm [shape: f32[4,64,16], index: 8, kind: input, shape index: {}]   ;;  %s20241_s9 = inlined_call_operand.hbm [shape: f32[9,24,48], index: 9, kind: input, shape index: {}]   ;;  %s20242_s10 = inlined_call_operand.hbm [shape: f32[64,9], index: 10, kind: input, shape index: {}]   ;;  %s20243_s11 = inlined_call_operand.hbm [shape: f32[1,48], index: 11, kind: input, shape index: {}]   ;;  %s20244_s12 = inlined_call_operand.hbm [shape: f32[1,48], index: 12, kind: input, shape index: {}]   ;;  %s20245_s13 = inlined_call_operand.hbm [shape: f32[4,256,64], index: 13, kind: input, shape index: {}]   ;;  %s20246_s14 = inlined_call_operand.hbm [shape: f32[9,12,12], index: 14, kind: input, shape index: {}]   ;;  %s20247_s15 = inlined_call_operand.hbm [shape: f32[256,9], index: 15, kind: input, shape index: {}]   ;;  %s20248_s16 = inlined_call_operand.vmem [shape: f32[1,12], index: 16, kind: input, shape index: {}]   ;;  %s20249_s17 = inlined_call_operand.hbm [shape: f32[1,12], index: 17, kind: input, shape index: {}]   ;;  %s20250_s18 = inlined_call_operand.vmem [shape: f32[2,256,12], index: 18, kind: output, shape index: {}]  }
   0x1   :  { %20302 = sst [smem:[#allocation190_spill]] %s20232_s0 }
   0x2   :  { %20303 = sst [smem:[#allocation191_spill]] %s20233_s1 }
   0x3   :  { %20304 = sst [smem:[#allocation192_spill]] %s20234_s2 }
   0x4   :  { %20305 = sst [smem:[#allocation193_spill]] %s20236_s4 }
   0x5   :  { %20306 = sst [smem:[#allocation194_spill]] %s20238_s6 }
   0x6   :  { %20307 = sst [smem:[#allocation195_spill]] %s20240_s8 }
   0x7   :  { %20308 = sst [smem:[#allocation196_spill]] %s20248_s16 }
   0x8   :  { %20309 = sst [smem:[#allocation197_spill]] %s20250_s18 }
   0x9   :  { %23 = vsyncpa [#allocation6], 0 }
   0xa   :  { %24 = vsyncpa [#allocation8], 0 }
   0xb   :  { %25 = vsyncpa [#allocation11], 0 }
   0xc   :  { %26 = vsyncpa [#allocation14], 0 }
   0xd   :  { %27 = vsyncpa [#allocation17], 0 }
   0xe   :  { %28 = vsyncpa [#allocation20], 0 }
   0xf   :  { %29 = vsyncpa [#allocation23], 0 }
  0x10   :  { %30 = vsyncpa [#allocation26], 0 }
  0x11   :  { %31 = vsyncpa [#allocation29], 0  ;;  %s16829_s27 = smov 0  }
  0x12 LB: > { %20310 = sst [smem:[#allocation39_spill]] %s16690_s27  ;;  %s16692_s28 = smov [#allocation7]   ;;  %s16690_s27 = sphi %s16829_s27, %s37_s27  }
  0x13   : > { %s477_s29 = sshll.u32 %s16692_s28, 4  ;;  %s16835_s30 = sadd.s32 4294967295, %s16690_s27   ;;  %s16840_s29 = int_to_ptr.vmem [resolvable:$true] %s477_s29 }
  0x14   : > { %20311 = sst [smem:[#allocation40_spill]] %s16835_s30  ;;  %p12178_p0 = scmp.ge.s32.totalorder %s16690_s27, 1 }
  0x15   : > { %p451_p1 = scmp.lt.s32.totalorder %s16690_s27, 3  ;;  %p20257_p2 = scmp.eq.s32.totalorder %s16835_s30, 0 }
  0x16   : > { %s16693_s19 = smov [#allocation10]   ;;  %s16694_s21 = smov [#allocation13]  }
  0x17   : > { %p16842_p3 = pnand %p12178_p0, %p451_p1  ;;  %s498_s1 = sshll.u32 %s16693_s19, 4  ;;  %s16848_s1 = int_to_ptr.vmem [resolvable:$true] %s498_s1 }
  0x18   : > { %s525_s22 = sshll.u32 %s16694_s21, 4  ;;  %s16695_s2 = smov [#allocation16]   ;;  %s16856_s22 = int_to_ptr.vmem [resolvable:$true] %s525_s22 }
  0x19   : > { %s20312_s0 = scalar_select %p16842_p3, 1, 0 }
  0x1a   : > { %p15722_p4 = pneg %p16842_p3  ;;  %s16858_s23 = sshll.u32 %s16695_s2, 4  ;;  %s547_s23 = int_to_ptr.vmem [resolvable:$true] %s16858_s23 }
  0x1b   : > { %s20314_s26 = sld [smem:[#allocation192_spill]] }
  0x1c   : > { %p16852_p5 = pnand %p20257_p2, %p15722_p4 }
  0x1e   : > { %p16868_p7 = pneg %p16852_p5 }
  0x21   : > { %s16200_s28 = scalar_lea.hbm %s20314_s26, 96 }
  0x22   : > { %p16201_p6 = scmp.ne.s32.totalorder %s20314_s26, %s16200_s28  ;;  %p16207_p10 = scmp.lt.u32.totalorder %s16200_s28, %s20314_s26 }
  0x24   : > { %p16203_p8 = pnand %p16868_p7, %p16201_p6 }
  0x26   : > { %p16204_p9 = pneg %p16203_p8 }
  0x28   : > { %p16209_p11 = pnand %p16207_p10, %p16204_p9 }
  0x2a   : > { %16212 = shalt.err (!%p16209_p11)
}
  0x2b   : > { %s16213_s27 = scalar_lea.vmem %s16840_s29, 96  ;;  %p16221_p1 = scmp.lt.s32.totalorder %s16840_s29, %s16840_s29 }
  0x2c   : > { %p16214_p12 = scmp.ne.s32.totalorder %s16840_s29, %s16213_s27  ;;  %p16222_p4 = scmp.lt.s32.totalorder %s16213_s27, %s16213_s27 }
  0x2e   : > { %p16216_p13 = pnand %p16214_p12, %p16868_p7  ;;  %p16223_p6 = por %p16222_p4, %p16221_p1 }
  0x30   : > { %p16217_p0 = pneg %p16216_p13 }
  0x32   : > { %p16224_p8 = pnand %p16223_p6, %p16217_p0 }
  0x34   : > { %16227 = shalt.err (!%p16224_p8)
}
  0x35   : > { %15728 = dma.hbm_to_vmem [thread:$0]  (!%p16852_p5), %s20314_s26, 96, %s16840_s29, [#allocation8]  }
  0x36   : > { %s20316_s4 = sld [smem:[#allocation193_spill]] }
  0x3c   : > { %s16228_s21 = scalar_lea.hbm %s20316_s4, 6912 }
  0x3d   : > { %p16229_p9 = scmp.ne.s32.totalorder %s20316_s4, %s16228_s21  ;;  %p16235_p12 = scmp.lt.u32.totalorder %s16228_s21, %s20316_s4 }
  0x3f   : > { %p16231_p10 = pnand %p16229_p9, %p16868_p7 }
  0x41   : > { %p16232_p11 = pneg %p16231_p10 }
  0x43   : > { %p16237_p13 = pnand %p16235_p12, %p16232_p11 }
  0x45   : > { %16240 = shalt.err (!%p16237_p13)
}
  0x46   : > { %s16241_s29 = scalar_lea.vmem %s16848_s1, 6912  ;;  %p16249_p6 = scmp.lt.s32.totalorder %s16848_s1, %s16848_s1 }
  0x47   : > { %p16242_p0 = scmp.ne.s32.totalorder %s16848_s1, %s16241_s29  ;;  %p16250_p8 = scmp.lt.s32.totalorder %s16241_s29, %s16241_s29 }
  0x49   : > { %p16244_p1 = pnand %p16242_p0, %p16868_p7  ;;  %p16251_p9 = por %p16250_p8, %p16249_p6 }
  0x4b   : > { %p16245_p4 = pneg %p16244_p1 }
  0x4d   : > { %p16252_p10 = pnand %p16251_p9, %p16245_p4 }
  0x4f   : > { %16255 = shalt.err (!%p16252_p10)
}
  0x50   : > { %s20259_s16 = smov 128   ;;  %s20261_s30 = smov 8  }
  0x51   : > { %15734 = dma.hbm_to_vmem [thread:$0]  (!%p16852_p5), %s20316_s4, 6912, %s16848_s1, [#allocation11], %s20259_s16, %s20259_s16, %s20261_s30  }
  0x52   : > { %s20317_s6 = sld [smem:[#allocation194_spill]] }
  0x58   : > { %s16256_s21 = scalar_lea.hbm %s20317_s6, 16 }
  0x59   : > { %p16257_p11 = scmp.ne.s32.totalorder %s20317_s6, %s16256_s21  ;;  %p16263_p0 = scmp.lt.u32.totalorder %s16256_s21, %s20317_s6 }
  0x5b   : > { %p16259_p12 = pnand %p16257_p11, %p16868_p7 }
  0x5d   : > { %p16260_p13 = pneg %p16259_p12 }
  0x5f   : > { %p16265_p1 = pnand %p16263_p0, %p16260_p13 }
  0x61   : > { %16268 = shalt.err (!%p16265_p1)
}
  0x62   : > { %s16269_s1 = scalar_lea.vmem %s16856_s22, 16  ;;  %s16276_s24 = scalar_lea.vmem %s16856_s22, 32 }
  0x63   : > { %p16270_p4 = scmp.ne.s32.totalorder %s16856_s22, %s16269_s1  ;;  %p16277_p9 = scmp.lt.s32.totalorder %s16856_s22, %s16856_s22 }
  0x64   : > { %p16278_p10 = scmp.lt.s32.totalorder %s16276_s24, %s16269_s1 }
  0x65   : > { %p16272_p6 = pnand %p16270_p4, %p16868_p7 }
  0x66   : > { %p16279_p11 = por %p16278_p10, %p16277_p9 }
  0x67   : > { %p16273_p8 = pneg %p16272_p6 }
  0x69   : > { %p16280_p12 = pnand %p16279_p11, %p16273_p8 }
  0x6b   : > { %16283 = shalt.err (!%p16280_p12)
}
  0x6c   : > { %15740 = dma.hbm_to_vmem [thread:$0]  (!%p16852_p5), %s20317_s6, 16, %s16856_s22, [#allocation14]  }
  0x6d   : > { %s20318_s8 = sld [smem:[#allocation195_spill]] }
  0x73   : > { %s16284_s21 = scalar_lea.hbm %s20318_s8, 4096 }
  0x74   : > { %p16285_p13 = scmp.ne.s32.totalorder %s20318_s8, %s16284_s21  ;;  %p16291_p4 = scmp.lt.u32.totalorder %s16284_s21, %s20318_s8 }
  0x76   : > { %p16287_p0 = pnand %p16285_p13, %p16868_p7 }
  0x78   : > { %p16288_p1 = pneg %p16287_p0 }
  0x7a   : > { %p16293_p6 = pnand %p16291_p4, %p16288_p1 }
  0x7c   : > { %16296 = shalt.err (!%p16293_p6)
}
  0x7d   : > { %s16297_s24 = scalar_lea.vmem %s547_s23, 4096  ;;  %p16305_p11 = scmp.lt.s32.totalorder %s547_s23, %s547_s23 }
  0x7e   : > { %p16298_p8 = scmp.ne.s32.totalorder %s547_s23, %s16297_s24  ;;  %p16306_p12 = scmp.lt.s32.totalorder %s16297_s24, %s16297_s24 }
  0x80   : > { %p16300_p9 = pnand %p16298_p8, %p16868_p7  ;;  %p16307_p2 = por %p16306_p12, %p16305_p11 }
  0x82   : > { %p16301_p10 = pneg %p16300_p9 }
  0x84   : > { %p16308_p3 = pnand %p16307_p2, %p16301_p10 }
  0x86   : > { %16311 = shalt.err (!%p16308_p3)
}
  0x87   : > { %15746 = dma.hbm_to_vmem [thread:$0]  (!%p16852_p5), %s20318_s8, 4096, %s547_s23, [#allocation17], %s20259_s16, %s20259_s16, %s20261_s30  }
  0x88   : > { %s16698_s25 = smov [#allocation19]   ;;  %s16699_s19 = smov [#allocation22]  }
  0x89   : > { %s572_s28 = sshll.u32 %s16698_s25, 4  ;;  %s597_s21 = sshll.u32 %s16699_s19, 4  ;;  %s573_s28 = int_to_ptr.vmem [resolvable:$true] %s572_s28  ;;  %s598_s21 = int_to_ptr.vmem [resolvable:$true] %s597_s21 }
  0x8a   : > { %s16312_s29 = scalar_lea.hbm %s20242_s10, 1024 }
  0x8b   : > { %p16313_p2 = scmp.ne.s32.totalorder %s20242_s10, %s16312_s29  ;;  %p16319_p0 = scmp.lt.u32.totalorder %s16312_s29, %s20242_s10 }
  0x8d   : > { %p16315_p3 = pnand %p16313_p2, %p16868_p7 }
  0x8f   : > { %p16316_p13 = pneg %p16315_p3 }
  0x91   : > { %p16321_p1 = pnand %p16319_p0, %p16316_p13 }
  0x93   : > { %16324 = shalt.err (!%p16321_p1)
}
  0x94   : > { %s16325_s23 = scalar_lea.vmem %s573_s28, 1024  ;;  %p16333_p9 = scmp.lt.s32.totalorder %s573_s28, %s573_s28 }
  0x95   : > { %p16326_p4 = scmp.ne.s32.totalorder %s573_s28, %s16325_s23  ;;  %p16334_p10 = scmp.lt.s32.totalorder %s16325_s23, %s16325_s23 }
  0x97   : > { %p16328_p6 = pnand %p16326_p4, %p16868_p7  ;;  %p16335_p11 = por %p16334_p10, %p16333_p9 }
  0x99   : > { %p16329_p8 = pneg %p16328_p6 }
  0x9b   : > { %p16336_p12 = pnand %p16335_p11, %p16329_p8 }
  0x9d   : > { %16339 = shalt.err (!%p16336_p12)
}
  0x9e   : > { %15752 = dma.hbm_to_vmem [thread:$0]  (!%p16852_p5), %s20242_s10, 1024, %s573_s28, [#allocation20], %s20259_s16, %s20259_s16, %s20261_s30  }
  0x9f   : > { %s16340_s2 = scalar_lea.hbm %s20244_s12, 16 }
  0xa0   : > { %p16341_p2 = scmp.ne.s32.totalorder %s20244_s12, %s16340_s2  ;;  %p16347_p0 = scmp.lt.u32.totalorder %s16340_s2, %s20244_s12 }
  0xa2   : > { %p16343_p3 = pnand %p16341_p2, %p16868_p7 }
  0xa4   : > { %p16344_p13 = pneg %p16343_p3 }
  0xa6   : > { %p16349_p1 = pnand %p16347_p0, %p16344_p13 }
  0xa8   : > { %16352 = shalt.err (!%p16349_p1)
}
  0xa9   : > { %s16353_s22 = scalar_lea.vmem %s598_s21, 16  ;;  %s16360_s28 = scalar_lea.vmem %s598_s21, 32 }
  0xaa   : > { %p16354_p4 = scmp.ne.s32.totalorder %s598_s21, %s16353_s22  ;;  %p16361_p9 = scmp.lt.s32.totalorder %s598_s21, %s598_s21 }
  0xab   : > { %p16362_p10 = scmp.lt.s32.totalorder %s16360_s28, %s16353_s22 }
  0xac   : > { %p16356_p6 = pnand %p16354_p4, %p16868_p7 }
  0xad   : > { %p16363_p11 = por %p16362_p10, %p16361_p9 }
  0xae   : > { %p16357_p8 = pneg %p16356_p6 }
  0xb0   : > { %p16364_p12 = pnand %p16363_p11, %p16357_p8 }
  0xb2   : > { %16367 = shalt.err (!%p16364_p12)
}
  0xb3   : > { %15758 = dma.hbm_to_vmem [thread:$0]  (!%p16852_p5), %s20244_s12, 16, %s598_s21, [#allocation23]  }
  0xb4   : > { %s16700_s26 = smov [#allocation25]   ;;  %s16701_s19 = smov [#allocation5]  }
  0xb5   : > { %s620_s25 = sshll.u32 %s16700_s26, 4  ;;  %s463_s2 = sshll.u32 %s16701_s19, 4  ;;  %s621_s25 = int_to_ptr.vmem [resolvable:$true] %s620_s25  ;;  %s464_s2 = int_to_ptr.vmem [resolvable:$true] %s463_s2 }
  0xb6   : > { %s16368_s1 = scalar_lea.hbm %s20246_s14, 2304 }
  0xb7   : > { %p16369_p2 = scmp.ne.s32.totalorder %s20246_s14, %s16368_s1  ;;  %p16375_p0 = scmp.lt.u32.totalorder %s16368_s1, %s20246_s14 }
  0xb9   : > { %p16371_p3 = pnand %p16369_p2, %p16868_p7 }
  0xbb   : > { %p16372_p13 = pneg %p16371_p3 }
  0xbd   : > { %p16377_p1 = pnand %p16375_p0, %p16372_p13 }
  0xbf   : > { %16380 = shalt.err (!%p16377_p1)
}
  0xc0   : > { %s16381_s21 = scalar_lea.vmem %s621_s25, 2304  ;;  %p16389_p9 = scmp.lt.s32.totalorder %s621_s25, %s621_s25 }
  0xc1   : > { %p16382_p4 = scmp.ne.s32.totalorder %s621_s25, %s16381_s21  ;;  %p16390_p10 = scmp.lt.s32.totalorder %s16381_s21, %s16381_s21 }
  0xc3   : > { %p16384_p6 = pnand %p16382_p4, %p16868_p7  ;;  %p16391_p11 = por %p16390_p10, %p16389_p9 }
  0xc5   : > { %p16385_p8 = pneg %p16384_p6 }
  0xc7   : > { %p16392_p12 = pnand %p16391_p11, %p16385_p8 }
  0xc9   : > { %16395 = shalt.err (!%p16392_p12)
}
  0xca   : > { %15764 = dma.hbm_to_vmem [thread:$0]  (!%p16852_p5), %s20246_s14, 2304, %s621_s25, [#allocation26], %s20259_s16, %s20259_s16, %s20261_s30  }
  0xcb   : > { %s20319_s29 = sld [smem:[#allocation191_spill]] }
  0xd1   : > { %s16396_s1 = scalar_lea.hbm %s20319_s29, 49152 }
  0xd2   : > { %p16397_p2 = scmp.ne.s32.totalorder %s20319_s29, %s16396_s1  ;;  %p16403_p0 = scmp.lt.u32.totalorder %s16396_s1, %s20319_s29 }
  0xd4   : > { %p16399_p3 = pnand %p16397_p2, %p16868_p7 }
  0xd6   : > { %p16400_p13 = pneg %p16399_p3 }
  0xd8   : > { %p16405_p1 = pnand %p16403_p0, %p16400_p13 }
  0xda   : > { %16408 = shalt.err (!%p16405_p1)
}
  0xdb   : > { %s16409_s21 = scalar_lea.vmem %s464_s2, 49152  ;;  %p16417_p9 = scmp.lt.s32.totalorder %s464_s2, %s464_s2 }
  0xdc   : > { %p16410_p4 = scmp.ne.s32.totalorder %s464_s2, %s16409_s21  ;;  %p16418_p10 = scmp.lt.s32.totalorder %s16409_s21, %s16409_s21 }
  0xde   : > { %p16412_p6 = pnand %p16410_p4, %p16868_p7  ;;  %p16419_p11 = por %p16418_p10, %p16417_p9 }
  0xe0   : > { %p16413_p8 = pneg %p16412_p6 }
  0xe2   : > { %p16420_p12 = pnand %p16419_p11, %p16413_p8 }
  0xe4   : > { %16423 = shalt.err (!%p16420_p12)
}
  0xe5   : > { %s16702_s25 = smov 768   ;;  %s16703_s4 = smov 48  }
  0xe6   : > { %15725 = dma.hbm_to_vmem [thread:$0]  (!%p16852_p5), %s20319_s29, 49152, %s464_s2, [#allocation6], %s16702_s25, %s16702_s25, %s16703_s4  }
  0xe7   : > { %s16704_s27 = smov [#allocation9]   ;;  %s16705_s24 = smov [#allocation12]  }
  0xe8   : > { %s488_s1 = sshll.u32 %s16704_s27, 4  ;;  %s511_s22 = sshll.u32 %s16705_s24, 4  ;;  %s489_s1 = int_to_ptr.vmem [resolvable:$true] %s488_s1  ;;  %s512_s22 = int_to_ptr.vmem [resolvable:$true] %s511_s22 }
  0xe9   : > { %s16424_s21 = scalar_lea.hbm %s20235_s3, 96 }
  0xea   : > { %p16425_p2 = scmp.ne.s32.totalorder %s20235_s3, %s16424_s21  ;;  %p16431_p0 = scmp.lt.u32.totalorder %s16424_s21, %s20235_s3 }
  0xec   : > { %p16427_p3 = pnand %p16425_p2, %p16868_p7 }
  0xee   : > { %p16428_p13 = pneg %p16427_p3 }
  0xf0   : > { %p16433_p1 = pnand %p16431_p0, %p16428_p13 }
  0xf2   : > { %16436 = shalt.err (!%p16433_p1)
}
  0xf3   : > { %s16437_s2 = scalar_lea.vmem %s489_s1, 96  ;;  %p16445_p9 = scmp.lt.s32.totalorder %s489_s1, %s489_s1 }
  0xf4   : > { %p16438_p4 = scmp.ne.s32.totalorder %s489_s1, %s16437_s2  ;;  %p16446_p10 = scmp.lt.s32.totalorder %s16437_s2, %s16437_s2 }
  0xf6   : > { %p16440_p6 = pnand %p16438_p4, %p16868_p7  ;;  %p16447_p11 = por %p16446_p10, %p16445_p9 }
  0xf8   : > { %p16441_p8 = pneg %p16440_p6 }
  0xfa   : > { %p16448_p12 = pnand %p16447_p11, %p16441_p8 }
  0xfc   : > { %16451 = shalt.err (!%p16448_p12)
}
  0xfd   : > { %15731 = dma.hbm_to_vmem [thread:$0]  (!%p16852_p5), %s20235_s3, 96, %s489_s1, [#allocation8]  }
  0xfe   : > { %s16452_s25 = scalar_lea.hbm %s20237_s5, 256 }
  0xff   : > { %p16453_p2 = scmp.ne.s32.totalorder %s20237_s5, %s16452_s25  ;;  %p16459_p0 = scmp.lt.u32.totalorder %s16452_s25, %s20237_s5 }
 0x101   : > { %p16455_p3 = pnand %p16453_p2, %p16868_p7 }
 0x103   : > { %p16456_p13 = pneg %p16455_p3 }
 0x105   : > { %p16461_p1 = pnand %p16459_p0, %p16456_p13 }
 0x107   : > { %16464 = shalt.err (!%p16461_p1)
}
 0x108   : > { %s16465_s24 = scalar_lea.vmem %s512_s22, 256  ;;  %p16473_p9 = scmp.lt.s32.totalorder %s512_s22, %s512_s22 }
 0x109   : > { %p16466_p4 = scmp.ne.s32.totalorder %s512_s22, %s16465_s24  ;;  %p16474_p10 = scmp.lt.s32.totalorder %s16465_s24, %s16465_s24 }
 0x10b   : > { %p16468_p6 = pnand %p16466_p4, %p16868_p7  ;;  %p16475_p11 = por %p16474_p10, %p16473_p9 }
 0x10d   : > { %p16469_p8 = pneg %p16468_p6 }
 0x10f   : > { %p16476_p12 = pnand %p16475_p11, %p16469_p8 }
 0x111   : > { %16479 = shalt.err (!%p16476_p12)
}
 0x112   : > { %s20320_s1 = smov 8   ;;  %s20321_s28 = smov 128  }
 0x113   : > { %15737 = dma.hbm_to_vmem [thread:$0]  (!%p16852_p5), %s20237_s5, 256, %s512_s22, [#allocation11], %s20321_s28, %s20321_s28, %s20320_s1  }
 0x114   : > { %s16706_s2 = smov [#allocation15]   ;;  %s16707_s30 = smov [#allocation18]  }
 0x115   : > { %s536_s16 = sshll.u32 %s16706_s2, 4  ;;  %s559_s6 = sshll.u32 %s16707_s30, 4  ;;  %s537_s16 = int_to_ptr.vmem [resolvable:$true] %s536_s16  ;;  %s560_s6 = int_to_ptr.vmem [resolvable:$true] %s559_s6 }
 0x116   : > { %s16480_s4 = scalar_lea.hbm %s20239_s7, 16 }
 0x117   : > { %p16481_p2 = scmp.ne.s32.totalorder %s20239_s7, %s16480_s4  ;;  %p16487_p0 = scmp.lt.u32.totalorder %s16480_s4, %s20239_s7 }
 0x119   : > { %p16483_p3 = pnand %p16481_p2, %p16868_p7 }
 0x11b   : > { %p16484_p13 = pneg %p16483_p3 }
 0x11d   : > { %p16489_p1 = pnand %p16487_p0, %p16484_p13 }
 0x11f   : > { %16492 = shalt.err (!%p16489_p1)
}
 0x120   : > { %s16493_s22 = scalar_lea.vmem %s537_s16, 16  ;;  %s16500_s23 = scalar_lea.vmem %s537_s16, 32 }
 0x121   : > { %p16494_p4 = scmp.ne.s32.totalorder %s537_s16, %s16493_s22  ;;  %p16501_p9 = scmp.lt.s32.totalorder %s537_s16, %s537_s16 }
 0x122   : > { %p16502_p10 = scmp.lt.s32.totalorder %s16500_s23, %s16493_s22 }
 0x123   : > { %p16496_p6 = pnand %p16494_p4, %p16868_p7 }
 0x124   : > { %p16503_p11 = por %p16502_p10, %p16501_p9 }
 0x125   : > { %p16497_p8 = pneg %p16496_p6 }
 0x127   : > { %p16504_p12 = pnand %p16503_p11, %p16497_p8 }
 0x129   : > { %16507 = shalt.err (!%p16504_p12)
}
 0x12a   : > { %15743 = dma.hbm_to_vmem [thread:$0]  (!%p16852_p5), %s20239_s7, 16, %s537_s16, [#allocation14]  }
 0x12b   : > { %s16508_s25 = scalar_lea.hbm %s20241_s9, 3456 }
 0x12c   : > { %p16509_p2 = scmp.ne.s32.totalorder %s20241_s9, %s16508_s25  ;;  %p16515_p0 = scmp.lt.u32.totalorder %s16508_s25, %s20241_s9 }
 0x12e   : > { %p16511_p3 = pnand %p16509_p2, %p16868_p7 }
 0x130   : > { %p16512_p13 = pneg %p16511_p3 }
 0x132   : > { %p16517_p1 = pnand %p16515_p0, %p16512_p13 }
 0x134   : > { %16520 = shalt.err (!%p16517_p1)
}
 0x135   : > { %s16521_s24 = scalar_lea.vmem %s560_s6, 3456  ;;  %p16529_p9 = scmp.lt.s32.totalorder %s560_s6, %s560_s6 }
 0x136   : > { %p16522_p4 = scmp.ne.s32.totalorder %s560_s6, %s16521_s24  ;;  %p16530_p10 = scmp.lt.s32.totalorder %s16521_s24, %s16521_s24 }
 0x138   : > { %p16524_p6 = pnand %p16522_p4, %p16868_p7  ;;  %p16531_p11 = por %p16530_p10, %p16529_p9 }
 0x13a   : > { %p16525_p8 = pneg %p16524_p6 }
 0x13c   : > { %p16532_p12 = pnand %p16531_p11, %p16525_p8 }
 0x13e   : > { %16535 = shalt.err (!%p16532_p12)
}
 0x13f   : > { %15749 = dma.hbm_to_vmem [thread:$0]  (!%p16852_p5), %s20241_s9, 3456, %s560_s6, [#allocation17], %s20321_s28, %s20321_s28, %s20320_s1  }
 0x140   : > { %s16708_s23 = smov [#allocation21]   ;;  %s16709_s2 = smov [#allocation24]  }
 0x141   : > { %s586_s21 = sshll.u32 %s16708_s23, 4  ;;  %s607_s30 = sshll.u32 %s16709_s2, 4  ;;  %s587_s21 = int_to_ptr.vmem [resolvable:$true] %s586_s21  ;;  %s608_s30 = int_to_ptr.vmem [resolvable:$true] %s607_s30 }
 0x142   : > { %s16536_s4 = scalar_lea.hbm %s20243_s11, 16 }
 0x143   : > { %p16537_p2 = scmp.ne.s32.totalorder %s20243_s11, %s16536_s4  ;;  %p16543_p0 = scmp.lt.u32.totalorder %s16536_s4, %s20243_s11 }
 0x145   : > { %p16539_p3 = pnand %p16537_p2, %p16868_p7 }
 0x147   : > { %p16540_p13 = pneg %p16539_p3 }
 0x149   : > { %p16545_p1 = pnand %p16543_p0, %p16540_p13 }
 0x14b   : > { %16548 = shalt.err (!%p16545_p1)
}
 0x14c   : > { %s16549_s6 = scalar_lea.vmem %s587_s21, 16  ;;  %s16556_s16 = scalar_lea.vmem %s587_s21, 32 }
 0x14d   : > { %p16550_p4 = scmp.ne.s32.totalorder %s587_s21, %s16549_s6  ;;  %p16557_p9 = scmp.lt.s32.totalorder %s587_s21, %s587_s21 }
 0x14e   : > { %p16558_p10 = scmp.lt.s32.totalorder %s16556_s16, %s16549_s6 }
 0x14f   : > { %p16552_p6 = pnand %p16550_p4, %p16868_p7 }
 0x150   : > { %p16559_p11 = por %p16558_p10, %p16557_p9 }
 0x151   : > { %p16553_p8 = pneg %p16552_p6 }
 0x153   : > { %p16560_p12 = pnand %p16559_p11, %p16553_p8 }
 0x155   : > { %16563 = shalt.err (!%p16560_p12)
}
 0x156   : > { %15755 = dma.hbm_to_vmem [thread:$0]  (!%p16852_p5), %s20243_s11, 16, %s587_s21, [#allocation20]  }
 0x157   : > { %s16564_s25 = scalar_lea.hbm %s20245_s13, 16384 }
 0x158   : > { %p16565_p2 = scmp.ne.s32.totalorder %s20245_s13, %s16564_s25  ;;  %p16571_p0 = scmp.lt.u32.totalorder %s16564_s25, %s20245_s13 }
 0x15a   : > { %p16567_p3 = pnand %p16565_p2, %p16868_p7 }
 0x15c   : > { %p16568_p13 = pneg %p16567_p3 }
 0x15e   : > { %p16573_p1 = pnand %p16571_p0, %p16568_p13 }
 0x160   : > { %16576 = shalt.err (!%p16573_p1)
}
 0x161   : > { %s16577_s24 = scalar_lea.vmem %s608_s30, 16384  ;;  %p16585_p9 = scmp.lt.s32.totalorder %s608_s30, %s608_s30 }
 0x162   : > { %p16578_p4 = scmp.ne.s32.totalorder %s608_s30, %s16577_s24  ;;  %p16586_p10 = scmp.lt.s32.totalorder %s16577_s24, %s16577_s24 }
 0x164   : > { %p16580_p6 = pnand %p16578_p4, %p16868_p7  ;;  %p16587_p11 = por %p16586_p10, %p16585_p9 }
 0x166   : > { %p16581_p8 = pneg %p16580_p6 }
 0x168   : > { %p16588_p12 = pnand %p16587_p11, %p16581_p8 }
 0x16a   : > { %16591 = shalt.err (!%p16588_p12)
}
 0x16b   : > { %15761 = dma.hbm_to_vmem [thread:$0]  (!%p16852_p5), %s20245_s13, 16384, %s608_s30, [#allocation23], %s20321_s28, %s20321_s28, %s20320_s1  }
 0x16c   : > { %s16710_s16 = smov [#allocation27]   ;;  %s16711_s23 = smov [#allocation28]  }
 0x16d   : > { %s633_s22 = sshll.u32 %s16710_s16, 4  ;;  %s650_s2 = sshll.u32 %s16711_s23, 4  ;;  %s634_s22 = int_to_ptr.vmem [resolvable:$true] %s633_s22  ;;  %s651_s2 = int_to_ptr.vmem [resolvable:$true] %s650_s2 }
 0x16e   : > { %s16592_s4 = scalar_lea.hbm %s20247_s15, 4096 }
 0x16f   : > { %p16593_p2 = scmp.ne.s32.totalorder %s20247_s15, %s16592_s4  ;;  %p16599_p0 = scmp.lt.u32.totalorder %s16592_s4, %s20247_s15 }
 0x171   : > { %p16595_p3 = pnand %p16593_p2, %p16868_p7 }
 0x173   : > { %p16596_p13 = pneg %p16595_p3 }
 0x175   : > { %p16601_p1 = pnand %p16599_p0, %p16596_p13 }
 0x177   : > { %16604 = shalt.err (!%p16601_p1)
}
 0x178   : > { %s16605_s30 = scalar_lea.vmem %s634_s22, 4096  ;;  %p16613_p9 = scmp.lt.s32.totalorder %s634_s22, %s634_s22 }
 0x179   : > { %p16606_p4 = scmp.ne.s32.totalorder %s634_s22, %s16605_s30  ;;  %p16614_p10 = scmp.lt.s32.totalorder %s16605_s30, %s16605_s30 }
 0x17b   : > { %p16608_p6 = pnand %p16606_p4, %p16868_p7  ;;  %p16615_p11 = por %p16614_p10, %p16613_p9 }
 0x17d   : > { %p16609_p8 = pneg %p16608_p6 }
 0x17f   : > { %p16616_p12 = pnand %p16615_p11, %p16609_p8 }
 0x181   : > { %16619 = shalt.err (!%p16616_p12)
}
 0x182   : > { %15767 = dma.hbm_to_vmem [thread:$0]  (!%p16852_p5), %s20247_s15, 4096, %s634_s22, [#allocation26], %s20321_s28, %s20321_s28, %s20320_s1  }
 0x183   : > { %s16620_s8 = scalar_lea.hbm %s20249_s17, 16 }
 0x184   : > { %p16621_p2 = scmp.ne.s32.totalorder %s20249_s17, %s16620_s8  ;;  %p16627_p0 = scmp.lt.u32.totalorder %s16620_s8, %s20249_s17 }
 0x186   : > { %p16623_p3 = pnand %p16621_p2, %p16868_p7 }
 0x188   : > { %p16624_p13 = pneg %p16623_p3 }
 0x18a   : > { %p16629_p1 = pnand %p16627_p0, %p16624_p13 }
 0x18c   : > { %16632 = shalt.err (!%p16629_p1)
}
 0x18d   : > { %s16633_s27 = scalar_lea.vmem %s651_s2, 16  ;;  %s16640_s1 = scalar_lea.vmem %s651_s2, 32 }
 0x18e   : > { %p16634_p4 = scmp.ne.s32.totalorder %s651_s2, %s16633_s27  ;;  %p16641_p9 = scmp.lt.s32.totalorder %s651_s2, %s651_s2 }
 0x18f   : > { %p16642_p10 = scmp.lt.s32.totalorder %s16640_s1, %s16633_s27 }
 0x190   : > { %p16636_p6 = pnand %p16634_p4, %p16868_p7 }
 0x191   : > { %p16643_p11 = por %p16642_p10, %p16641_p9 }
 0x192   : > { %p16637_p8 = pneg %p16636_p6 }
 0x194   : > { %p16644_p12 = pnand %p16643_p11, %p16637_p8 }
 0x196   : > { %16647 = shalt.err (!%p16644_p12)
}
 0x197   : > { %15770 = dma.hbm_to_vmem [thread:$0]  (!%p16852_p5), %s20249_s17, 16, %s651_s2, [#allocation29]  }
 0x198   : > { %p20322_p2 = scmp.ne.s32.totalorder %s20312_s0, 0 }
 0x19a   : > { %670 = sbr.rel (%p20322_p2) target bundleno = 3545 (0xdd9), region = 92 }
 0x1a1   : > { %s20323_s24 = sld [smem:[#allocation40_spill]] }
 0x1a7   : > { %p20324_p3 = scmp.eq.s32.totalorder %s20323_s24, 0 }
 0x1a9   : > { %16653 = dma.done.wait (%p20324_p3), [#allocation6], 49152   ;;  %p20325_p7 = pmov %p20324_p3 }
 0x1aa   : > { %p20326_p13 = pmov %p20324_p3 }
 0x1ab   : > { %16655 = vsyncadd (%p20325_p7), [#allocation6], 4294918144 }
 0x1ac   : > { %16657 = dma.done.wait (%p20326_p13), [#allocation8], 192   ;;  %p20327_p0 = pmov %p20324_p3 }
 0x1ae   : > { %16659 = vsyncadd (%p20327_p0), [#allocation8], 4294967104  ;;  %p20328_p1 = pmov %p20327_p0 }
 0x1af   : > { %p20329_p5 = pmov %p20327_p0 }
 0x1b0   : > { %16661 = dma.done.wait (%p20328_p1), [#allocation11], 7168  }
 0x1b1   : > { %16663 = vsyncadd (%p20329_p5), [#allocation11], 4294960128  ;;  %p20330_p4 = pmov %p20327_p0 }
 0x1b2   : > { %p20331_p6 = pmov %p20327_p0 }
 0x1b3   : > { %16665 = dma.done.wait (%p20330_p4), [#allocation14], 32  }
 0x1b4   : > { %16667 = vsyncadd (%p20331_p6), [#allocation14], 4294967264  ;;  %p20332_p8 = pmov %p20327_p0 }
 0x1b5   : > { %p20333_p9 = pmov %p20327_p0 }
 0x1b6   : > { %16669 = dma.done.wait (%p20332_p8), [#allocation17], 7552  }
 0x1b7   : > { %16671 = vsyncadd (%p20333_p9), [#allocation17], 4294959744  ;;  %p20334_p10 = pmov %p20327_p0 }
 0x1b8   : > { %p20335_p11 = pmov %p20327_p0 }
 0x1b9   : > { %16673 = dma.done.wait (%p20334_p10), [#allocation20], 1040  }
 0x1ba   : > { %16675 = vsyncadd (%p20335_p11), [#allocation20], 4294966256  ;;  %p20336_p12 = pmov %p20327_p0 }
 0x1bb   : > { %p20337_p2 = pmov %p20327_p0 }
 0x1bc   : > { %16677 = dma.done.wait (%p20336_p12), [#allocation23], 16400  }
 0x1bd   : > { %16679 = vsyncadd (%p20337_p2), [#allocation23], 4294950896  ;;  %p20338_p3 = pmov %p20327_p0 }
 0x1be   : > { %p20339_p7 = pmov %p20327_p0 }
 0x1bf   : > { %16681 = dma.done.wait (%p20338_p3), [#allocation26], 6400  }
 0x1c0   : > { %16683 = vsyncadd (%p20339_p7), [#allocation26], 4294960896  ;;  %p20340_p13 = pmov %p20327_p0 }
 0x1c2   : > { %16685 = dma.done.wait (%p20340_p13), [#allocation29], 16  }
 0x1c3   : > { %16687 = vsyncadd (%p20327_p0), [#allocation29], 4294967280  ;;  %v852_v0 = vld [vmem:[#allocation5 + $0x8] sm:$0xff]  ;;  %v858_v1 = vld [vmem:[#allocation5 + $0x38] sm:$0xff]  ;;  %p783_p1 = scmp.lt.s32.totalorder %s20323_s24, 1  ;;  %v1236_v25 = vlaneseq  ;;  %s20341_s2 = sld [smem:[#allocation190_spill]] }
 0x1c4   : > { %v851_v2 = vld [vmem:[#allocation5] sm:$0xff]  ;;  %v14534_v3 = vpack.c.bf16 %v858_v1, %v852_v0  ;;  %v857_v4 = vld [vmem:[#allocation5 + $0x30] sm:$0xff]  ;;  %v864_v5 = vld [vmem:[#allocation5 + $0x68] sm:$0xff]  ;;  %vm792_vm0 = vcmask 392192   ;;  %vm1764_vm1 = vcmask 385024   ;;  %s16713_s21 = smov 80  }
 0x1c5   : > { %v870_v6 = vld [vmem:[#allocation5 + $0x98] sm:$0xff]  ;;  %v14536_v7 = vpack.c.bf16 %v857_v4, %v851_v2  ;;  %v863_v9 = vld [vmem:[#allocation5 + $0x60] sm:$0xff]  ;;  %v869_v10 = vld [vmem:[#allocation5 + $0x90] sm:$0xff]  ;;  %s20749_s24 = smov (!%p783_p1, %s20323_s24), 1  ;;  %v17237_v32 = vshrl.u32 %v1236_v25, 7  ;;  %s16714_s6 = smov 32  }
 0x1c6   : > { %v14538_v8 = vpack.c.bf16 %v870_v6, %v864_v5  ;;  %v876_v11 = vld [vmem:[#allocation5 + $0xc8] sm:$0xff]  ;;  %14535 = vmatprep.subr.bf16.mxu1 %v14534_v3  ;;  %v882_v12 = vld [vmem:[#allocation5 + $0xf8] sm:$0xff]  ;;  %v14540_v13 = vpack.c.bf16 %v869_v10, %v863_v9  ;;  %v875_v15 = vld [vmem:[#allocation5 + $0xc0] sm:$0xff]  ;;  %s12213_s18 = sshll.u32 %s20749_s24, 2  ;;  %s16715_s16 = smov 112   ;;  %vm1776_vm2 = vcmask 261120  }
 0x1c7   : > { %14537 = vmatpush1.bf16.msra.mxu1 %v14536_v7  ;;  %v14542_v14 = vpack.c.bf16 %v882_v12, %v876_v11  ;;  %v881_v16 = vld [vmem:[#allocation5 + $0xf0] sm:$0xff]  ;;  %v888_v17 = vld [vmem:[#allocation5 + $0x128] sm:$0xff]  ;;  %v894_v18 = vld [vmem:[#allocation5 + $0x158] sm:$0xff]  ;;  %v17244_v39 = vsub.s32 1, %v17237_v32  ;;  %v17247_v40 = vsub.s32 3, %v17237_v32  ;;  %s16716_s23 = smov 16  }
 0x1c8   : > { %14539 = vmatprep.subr.bf16.mxu1 %v14538_v8  ;;  %v14544_v19 = vpack.c.bf16 %v881_v16, %v875_v15  ;;  %v14546_v20 = vpack.c.bf16 %v894_v18, %v888_v17  ;;  %v887_v21 = vld [vmem:[#allocation5 + $0x120] sm:$0xff]  ;;  %v893_v22 = vld [vmem:[#allocation5 + $0x150] sm:$0xff]  ;;  %v900_v23 = vld [vmem:[#allocation5 + $0x188] sm:$0xff]  ;;  %s16717_s8 = smov 64   ;;  %s16719_s25 = smov 48   ;;  %vm796_vm3 = vcmask 386048  }
 0x1c9   : > { %v906_v24 = vld [vmem:[#allocation5 + $0x1b8] sm:$0xff]  ;;  %v14548_v26 = vpack.c.bf16 %v893_v22, %v887_v21  ;;  %v899_v28 = vld [vmem:[#allocation5 + $0x180] sm:$0xff]  ;;  %v905_v29 = vld [vmem:[#allocation5 + $0x1b0] sm:$0xff]  ;;  %s786_s30 = scalar_lea.vmem %s20341_s2, %s12213_s18  ;;  %s16720_s4 = smov 96   ;;  %vm1793_vm4 = vcmask 130048   ;;  %vm798_vm5 = vcmask 195584  }
 0x1ca   : > { %v14550_v27 = vpack.c.bf16 %v906_v24, %v900_v23  ;;  %v912_v30 = vld [vmem:[#allocation5 + $0x1e8] sm:$0xff]  ;;  %v918_v31 = vld [vmem:[#allocation5 + $0x218] sm:$0xff]  ;;  %v14552_v33 = vpack.c.bf16 %v905_v29, %v899_v28  ;;  %v911_v35 = vld [vmem:[#allocation5 + $0x1e0] sm:$0xff]  ;;  %s16729_s26 = smov 104   ;;  %s16730_s19 = smov 56   ;;  %vm809_vm6 = vcmask 189440  }
 0x1cb   : > { %14541 = vmatpush1.bf16.msra.mxu1 %v14540_v13  ;;  %v14554_v34 = vpack.c.bf16 %v918_v31, %v912_v30  ;;  %v917_v36 = vld [vmem:[#allocation5 + $0x210] sm:$0xff]  ;;  %v924_v37 = vld [vmem:[#allocation5 + $0x248] sm:$0xff]  ;;  %v930_v38 = vld [vmem:[#allocation5 + $0x278] sm:$0xff]  ;;  %s16731_s27 = smov 116   ;;  %vm5210_vm7 = vcmask 523264   ;;  %s16732_s1 = smov 92  }
 0x1cc   : > { %14543 = vmatprep.subr.bf16.mxu1 %v14542_v14  ;;  %v14556_v41 = vpack.c.bf16 %v917_v36, %v911_v35  ;;  %v14558_v42 = vpack.c.bf16 %v930_v38, %v924_v37  ;;  %v923_v43 = vld [vmem:[#allocation5 + $0x240] sm:$0xff]  ;;  %v929_v44 = vld [vmem:[#allocation5 + $0x270] sm:$0xff]  ;;  %v936_v46 = vld [vmem:[#allocation5 + $0x2a8] sm:$0xff]  ;;  %vm811_vm8 = vcmask 97280   ;;  %vm7254_vm9 = vcmask 1043456   ;;  %s20745_s18 = sld [smem:[#allocation196_spill]] }
 0x1cd   : > { %v17249_v45 = vld [vmem:[%s786_s30] sm:$0xf]  ;;  %v942_v47 = vld [vmem:[#allocation5 + $0x2d8] sm:$0xff]  ;;  %v14560_v50 = vpack.c.bf16 %v929_v44, %v923_v43  ;;  %v941_v53 = vld [vmem:[#allocation5 + $0x2d0] sm:$0xff]  ;;  %v17262_v43 = vsub.s32 0, %v17237_v32  ;;  %vm16733_vm10 = vmmov 1  }
 0x1ce   : > { %v17253_v48 = vrot.slane %v17249_v45, %v17244_v39  ;;  %v17257_v49 = vrot.slane %v17249_v45, %v17247_v40  ;;  %v14562_v51 = vpack.c.bf16 %v942_v47, %v936_v46  ;;  %v935_v52 = vld [vmem:[#allocation5 + $0x2a0] sm:$0xff]  ;;  %v948_v54 = vld [vmem:[#allocation5 + $0x308] sm:$0xff]  ;;  %v954_v55 = vld [vmem:[#allocation5 + $0x338] sm:$0xff]  ;;  %vm848_vm12 = vcmask 91136   ;;  %s12771_s0 = sshll.u32 %s20749_s24, 8  ;;  %s20746_s24 = sld [smem:[#allocation197_spill]] }
 0x1cf   : > { %14545 = vmatpush1.bf16.msra.mxu1 %v14544_v19  ;;  %v14564_v56 = vpack.c.bf16 %v941_v53, %v935_v52  ;;  %v14566_v57 = vpack.c.bf16 %v954_v55, %v948_v54  ;;  %v947_v58 = vld [vmem:[#allocation5 + $0x300] sm:$0xff]  ;;  %v953_v59 = vld [vmem:[#allocation5 + $0x330] sm:$0xff]  ;;  %v960_v60 = vld [vmem:[#allocation5 + $0x368] sm:$0xff]  ;;  %v17266_v53 = vrot.slane %v17249_v45, %v17262_v43 }
 0x1d0   : > { %14547 = vmatprep.subr.bf16.mxu1 %v14546_v20  ;;  %1320 = vmatprep.mubr.f32.mxu1 %v17253_v48  ;;  %v966_v61 = vld [vmem:[#allocation5 + $0x398] sm:$0xff]  ;;  %v14568_v62 = vpack.c.bf16 %v953_v59, %v947_v58  ;;  %v959_v0 = vld [vmem:[#allocation5 + $0x360] sm:$0xff]  ;;  %v965_v1 = vld [vmem:[#allocation5 + $0x390] sm:$0xff] }
 0x1d1   : > { %1675 = vmatprep.mubr.f32.mxu0 %v17257_v49  ;;  %v14570_v63 = vpack.c.bf16 %v966_v61, %v960_v60  ;;  %v972_v2 = vld [vmem:[#allocation5 + $0x3c8] sm:$0xff]  ;;  %v978_v3 = vld [vmem:[#allocation5 + $0x3f8] sm:$0xff]  ;;  %v14572_v4 = vpack.c.bf16 %v965_v1, %v959_v0  ;;  %v971_v6 = vld [vmem:[#allocation5 + $0x3c0] sm:$0xff] }
 0x1d2   : > { %v14574_v5 = vpack.c.bf16 %v978_v3, %v972_v2  ;;  %v977_v7 = vld [vmem:[#allocation5 + $0x3f0] sm:$0xff]  ;;  %v984_v8 = vld [vmem:[#allocation5 + $0x428] sm:$0xff]  ;;  %v990_v9 = vld [vmem:[#allocation5 + $0x458] sm:$0xff] }
 0x1d3   : > { %14549 = vmatpush1.bf16.msra.mxu1 %v14548_v26  ;;  %v14576_v10 = vpack.c.bf16 %v977_v7, %v971_v6  ;;  %v14578_v11 = vpack.c.bf16 %v990_v9, %v984_v8  ;;  %v983_v12 = vld [vmem:[#allocation5 + $0x420] sm:$0xff]  ;;  %v989_v13 = vld [vmem:[#allocation5 + $0x450] sm:$0xff]  ;;  %v996_v14 = vld [vmem:[#allocation5 + $0x488] sm:$0xff] }
 0x1d4   : > { %14551 = vmatprep.subr.bf16.mxu1 %v14550_v27  ;;  %v1002_v15 = vld [vmem:[#allocation5 + $0x4b8] sm:$0xff]  ;;  %v14580_v16 = vpack.c.bf16 %v989_v13, %v983_v12  ;;  %v995_v18 = vld [vmem:[#allocation5 + $0x480] sm:$0xff]  ;;  %v1001_v19 = vld [vmem:[#allocation5 + $0x4b0] sm:$0xff]  ;;  %s20128_s30 = scalar_lea.vmem %s20746_s24, %s12771_s0 }
 0x1d5   : > { %v14582_v17 = vpack.c.bf16 %v1002_v15, %v996_v14  ;;  %v1008_v20 = vld [vmem:[#allocation5 + $0x4e8] sm:$0xff]  ;;  %v1014_v21 = vld [vmem:[#allocation5 + $0x518] sm:$0xff]  ;;  %v14584_v22 = vpack.c.bf16 %v1001_v19, %v995_v18  ;;  %v1007_v24 = vld [vmem:[#allocation5 + $0x4e0] sm:$0xff] }
 0x1d6   : > { %v14586_v23 = vpack.c.bf16 %v1014_v21, %v1008_v20  ;;  %v1013_v25 = vld [vmem:[#allocation5 + $0x510] sm:$0xff]  ;;  %v1020_v26 = vld [vmem:[#allocation5 + $0x548] sm:$0xff]  ;;  %v1026_v27 = vld [vmem:[#allocation5 + $0x578] sm:$0xff] }
 0x1d7   : > { %14553 = vmatpush1.bf16.msra.mxu1 %v14552_v33  ;;  %v14588_v28 = vpack.c.bf16 %v1013_v25, %v1007_v24  ;;  %v14590_v29 = vpack.c.bf16 %v1026_v27, %v1020_v26  ;;  %v1019_v30 = vld [vmem:[#allocation5 + $0x540] sm:$0xff]  ;;  %v1025_v31 = vld [vmem:[#allocation5 + $0x570] sm:$0xff]  ;;  %v1032_v33 = vld [vmem:[#allocation5 + $0x5a8] sm:$0xff] }
 0x1d8   : > { %14555 = vmatprep.subr.bf16.mxu1 %v14554_v34  ;;  %v1038_v34 = vld [vmem:[#allocation5 + $0x5d8] sm:$0xff]  ;;  %v14592_v35 = vpack.c.bf16 %v1025_v31, %v1019_v30  ;;  %v1031_v37 = vld [vmem:[#allocation5 + $0x5a0] sm:$0xff]  ;;  %v1037_v38 = vld [vmem:[#allocation5 + $0x5d0] sm:$0xff] }
 0x1d9   : > { %v14594_v36 = vpack.c.bf16 %v1038_v34, %v1032_v33  ;;  %v14596_v44 = vpack.c.bf16 %v1037_v38, %v1031_v37  ;;  %v1043_v47 = vld [vmem:[#allocation5 + $0x600] sm:$0xff]  ;;  %v1062_v52 = vld [vmem:[#allocation5 + $0x698] sm:$0xff]  ;;  %v1068_v58 = vld [vmem:[#allocation5 + $0x6c8] sm:$0xff] }
 0x1da   : > { %v1074_v59 = vld [vmem:[#allocation5 + $0x6f8] sm:$0xff]  ;;  %v1080_v0 = vld [vmem:[#allocation5 + $0x728] sm:$0xff]  ;;  %vm18790_vm11 = vmpackc.low %vm7254_vm9, %vm16733_vm10 }
 0x1db   : > { %14557 = vmatpush1.bf16.msra.mxu1 %v14556_v41  ;;  %v1044_v41 = vld [vmem:[#allocation5 + $0x608] sm:$0xff]  ;;  %v14606_v61 = vpack.c.bf16 %v1074_v59, %v1068_v58  ;;  %v1086_v1 = vld [vmem:[#allocation5 + $0x758] sm:$0xff] }
 0x1dc   : > { %14559 = vmatprep.subr.bf16.mxu1 %v14558_v42  ;;  %v1050_v42 = vld [vmem:[#allocation5 + $0x638] sm:$0xff]  ;;  %v14610_v3 = vpack.c.bf16 %v1086_v1, %v1080_v0  ;;  %v1092_v6 = vld [vmem:[#allocation5 + $0x788] sm:$0xff] }
 0x1dd   : > { %v14598_v46 = vpack.c.bf16 %v1050_v42, %v1044_v41  ;;  %v1098_v7 = vld [vmem:[#allocation5 + $0x7b8] sm:$0xff]  ;;  %v1104_v12 = vld [vmem:[#allocation5 + $0x7e8] sm:$0xff] }
 0x1de   : > { %v14614_v9 = vpack.c.bf16 %v1098_v7, %v1092_v6  ;;  %v1110_v13 = vld [vmem:[#allocation5 + $0x818] sm:$0xff]  ;;  %v1116_v18 = vld [vmem:[#allocation5 + $0x848] sm:$0xff] }
 0x1df   : > { %14561 = vmatpush1.bf16.msra.mxu1 %v14560_v50  ;;  %v1049_v50 = vld [vmem:[#allocation5 + $0x630] sm:$0xff]  ;;  %v14618_v15 = vpack.c.bf16 %v1110_v13, %v1104_v12  ;;  %v1122_v19 = vld [vmem:[#allocation5 + $0x878] sm:$0xff]  ;;  %v1128_v24 = vld [vmem:[#allocation5 + $0x8a8] sm:$0xff] }
 0x1e0   : > { %14563 = vmatprep.subr.bf16.mxu1 %v14562_v51  ;;  %v1056_v51 = vld [vmem:[#allocation5 + $0x668] sm:$0xff]  ;;  %v14600_v54 = vpack.c.bf16 %v1049_v50, %v1043_v47  ;;  %v14622_v21 = vpack.c.bf16 %v1122_v19, %v1116_v18  ;;  %v1134_v25 = vld [vmem:[#allocation5 + $0x8d8] sm:$0xff] }
 0x1e1   : > { %v14602_v55 = vpack.c.bf16 %v1062_v52, %v1056_v51  ;;  %v14626_v27 = vpack.c.bf16 %v1134_v25, %v1128_v24  ;;  %v1140_v30 = vld [vmem:[#allocation5 + $0x908] sm:$0xff]  ;;  %v1146_v31 = vld [vmem:[#allocation5 + $0x938] sm:$0xff]  ;;  %v17271_v24 = vsub.s32 2, %v17237_v32 }
 0x1e2   : > { %v14630_v34 = vpack.c.bf16 %v1146_v31, %v1140_v30  ;;  %v1152_v37 = vld [vmem:[#allocation5 + $0x968] sm:$0xff]  ;;  %v1158_v38 = vld [vmem:[#allocation5 + $0x998] sm:$0xff] }
 0x1e3   : > { %14565 = vmatpush1.bf16.msra.mxu1 %v14564_v56  ;;  %v1055_v56 = vld [vmem:[#allocation5 + $0x660] sm:$0xff]  ;;  %v14634_v42 = vpack.c.bf16 %v1158_v38, %v1152_v37  ;;  %v1164_v47 = vld [vmem:[#allocation5 + $0x9c8] sm:$0xff]  ;;  %v1170_v50 = vld [vmem:[#allocation5 + $0x9f8] sm:$0xff]  ;;  %v17275_v31 = vrot.slane %v17249_v45, %v17271_v24 }
 0x1e4   : > { %14567 = vmatprep.subr.bf16.mxu1 %v14566_v57  ;;  %v1061_v57 = vld [vmem:[#allocation5 + $0x690] sm:$0xff]  ;;  %v14638_v52 = vpack.c.bf16 %v1170_v50, %v1164_v47  ;;  %v872_v30 = vld [vmem:[#allocation5 + $0xa8] sm:$0xff]  ;;  %v1047_v37 = vld [vmem:[#allocation5 + $0x620] sm:$0xff] }
 0x1e5   : > { %v14604_v60 = vpack.c.bf16 %v1061_v57, %v1055_v56  ;;  %v1176_v56 = vld [vmem:[#allocation5 + $0xa28] sm:$0xff]  ;;  %v1182_v57 = vld [vmem:[#allocation5 + $0xa58] sm:$0xff] }
 0x1e6   : > { %v14642_v59 = vpack.c.bf16 %v1182_v57, %v1176_v56  ;;  %v884_v47 = vld [vmem:[#allocation5 + $0x108] sm:$0xff]  ;;  %v1066_v45 = vld [vmem:[#allocation5 + $0x6b8] sm:$0xff]  ;;  %v877_v57 = vld [vmem:[#allocation5 + $0xd0] sm:$0xff] }
 0x1e7   : > { %14569 = vmatpush1.bf16.msra.mxu1 %v14568_v62  ;;  %v1067_v62 = vld [vmem:[#allocation5 + $0x6c0] sm:$0xff] }
 0x1e8   : > { %14571 = vmatprep.subr.bf16.mxu1 %v14570_v63  ;;  %v1073_v63 = vld [vmem:[#allocation5 + $0x6f0] sm:$0xff] }
 0x1e9   : > { %v14608_v2 = vpack.c.bf16 %v1073_v63, %v1067_v62  ;;  %v1188_v62 = vld [vmem:[#allocation5 + $0xa88] sm:$0xff]  ;;  %v1194_v63 = vld [vmem:[#allocation5 + $0xab8] sm:$0xff] }
 0x1ea   : > { %v14646_v1 = vpack.c.bf16 %v1194_v63, %v1188_v62  ;;  %v1072_v63 = vld [vmem:[#allocation5 + $0x6e8] sm:$0xff] }
 0x1eb   : > { %14573 = vmatpush1.bf16.msra.mxu1 %v14572_v4  ;;  %v1079_v4 = vld [vmem:[#allocation5 + $0x720] sm:$0xff] }
 0x1ec   : > { %14575 = vmatprep.subr.bf16.mxu1 %v14574_v5  ;;  %v1085_v5 = vld [vmem:[#allocation5 + $0x750] sm:$0xff] }
 0x1ed   : > { %v14612_v8 = vpack.c.bf16 %v1085_v5, %v1079_v4  ;;  %v1200_v4 = vld [vmem:[#allocation5 + $0xae8] sm:$0xff]  ;;  %v1206_v5 = vld [vmem:[#allocation5 + $0xb18] sm:$0xff] }
 0x1ee   : > { %v14650_v7 = vpack.c.bf16 %v1206_v5, %v1200_v4  ;;  %v889_v5 = vld [vmem:[#allocation5 + $0x130] sm:$0xff] }
 0x1ef   : > { %14577 = vmatpush1.bf16.msra.mxu1 %v14576_v10  ;;  %v1091_v10 = vld [vmem:[#allocation5 + $0x780] sm:$0xff] }
 0x1f0   : > { %14579 = vmatprep.subr.bf16.mxu1 %v14578_v11  ;;  %v1097_v11 = vld [vmem:[#allocation5 + $0x7b0] sm:$0xff] }
 0x1f1   : > { %v14616_v14 = vpack.c.bf16 %v1097_v11, %v1091_v10  ;;  %v1212_v10 = vld [vmem:[#allocation5 + $0xb48] sm:$0xff]  ;;  %v1218_v11 = vld [vmem:[#allocation5 + $0xb78] sm:$0xff] }
 0x1f2   : > { %v14654_v13 = vpack.c.bf16 %v1218_v11, %v1212_v10  ;;  %v1084_v11 = vld [vmem:[#allocation5 + $0x748] sm:$0xff] }
 0x1f3   : > { %14581 = vmatpush1.bf16.msra.mxu1 %v14580_v16  ;;  %v1103_v16 = vld [vmem:[#allocation5 + $0x7e0] sm:$0xff] }
 0x1f4   : > { %14583 = vmatprep.subr.bf16.mxu1 %v14582_v17  ;;  %v1109_v17 = vld [vmem:[#allocation5 + $0x810] sm:$0xff] }
 0x1f5   : > { %v14620_v20 = vpack.c.bf16 %v1109_v17, %v1103_v16  ;;  %v1224_v16 = vld [vmem:[#allocation5 + $0xba8] sm:$0xff]  ;;  %v1230_v17 = vld [vmem:[#allocation5 + $0xbd8] sm:$0xff] }
 0x1f6   : > { %v14658_v19 = vpack.c.bf16 %v1230_v17, %v1224_v16  ;;  %v901_v17 = vld [vmem:[#allocation5 + $0x190] sm:$0xff] }
 0x1f7   : > { %14585 = vmatpush1.bf16.msra.mxu1 %v14584_v22  ;;  %v1115_v22 = vld [vmem:[#allocation5 + $0x840] sm:$0xff] }
 0x1f8   : > { %14587 = vmatprep.subr.bf16.mxu1 %v14586_v23  ;;  %v1121_v23 = vld [vmem:[#allocation5 + $0x870] sm:$0xff] }
 0x1f9   : > { %v14624_v26 = vpack.c.bf16 %v1121_v23, %v1115_v22  ;;  %v854_v22 = vld [vmem:[#allocation5 + $0x18] sm:$0xff]  ;;  %v860_v23 = vld [vmem:[#allocation5 + $0x48] sm:$0xff] }
 0x1fb   : > { %14589 = vmatpush1.bf16.msra.mxu1 %v14588_v28  ;;  %v1127_v28 = vld [vmem:[#allocation5 + $0x8a0] sm:$0xff] }
 0x1fc   : > { %14591 = vmatprep.subr.bf16.mxu1 %v14590_v29  ;;  %v1133_v29 = vld [vmem:[#allocation5 + $0x8d0] sm:$0xff] }
 0x1fd   : > { %v14628_v33 = vpack.c.bf16 %v1133_v29, %v1127_v28  ;;  %v859_v28 = vld [vmem:[#allocation5 + $0x40] sm:$0xff]  ;;  %v866_v29 = vld [vmem:[#allocation5 + $0x78] sm:$0xff] }
 0x1fe   : > { %v14666_v38 = vpack.c.bf16 %v872_v30, %v866_v29  ;;  %v913_v30 = vld [vmem:[#allocation5 + $0x1f0] sm:$0xff] }
 0x1ff   : > { %14593 = vmatpush1.bf16.msra.mxu1 %v14592_v35  ;;  %v1139_v35 = vld [vmem:[#allocation5 + $0x900] sm:$0xff] }
 0x200   : > { %14595 = vmatprep.subr.bf16.mxu1 %v14594_v36  ;;  %v1145_v36 = vld [vmem:[#allocation5 + $0x930] sm:$0xff] }
 0x201   : > { %v14632_v41 = vpack.c.bf16 %v1145_v36, %v1139_v35 }
 0x203   : > { %14597 = vmatpush1.bf16.msra.mxu1 %v14596_v44  ;;  %v1151_v44 = vld [vmem:[#allocation5 + $0x960] sm:$0xff] }
 0x204   : > { %14599 = vmatprep.subr.bf16.mxu1 %v14598_v46  ;;  %v1157_v46 = vld [vmem:[#allocation5 + $0x990] sm:$0xff] }
 0x205   : > { %v14636_v51 = vpack.c.bf16 %v1157_v46, %v1151_v44  ;;  %v1053_v44 = vld [vmem:[#allocation5 + $0x650] sm:$0xff]  ;;  %v878_v46 = vld [vmem:[#allocation5 + $0xd8] sm:$0xff] }
 0x206   : > { %1321 = vmatmul.mubr.f32.vlgmr.msra.gmra.mrb[0].mxu1 %v17266_v53  ;;  %v14856_v50 = vpack.c.bf16 %v1053_v44, %v1047_v37  ;;  %v14670_v56 = vpack.c.bf16 %v884_v47, %v878_v46  ;;  %v1107_v46 = vld [vmem:[#allocation5 + $0x800] sm:$0xff] }
 0x207   : > { %14601 = vmatpush1.bf16.msra.mxu1 %v14600_v54  ;;  %1391 = vmatprep.mubr.f32.mxu1 %v17257_v49  ;;  %v1163_v54 = vld [vmem:[#allocation5 + $0x9c0] sm:$0xff] }
 0x208   : > { %14603 = vmatprep.subr.bf16.mxu1 %v14602_v55  ;;  %v1169_v55 = vld [vmem:[#allocation5 + $0x9f0] sm:$0xff] }
 0x209   : > { %v14640_v58 = vpack.c.bf16 %v1169_v55, %v1163_v54  ;;  %v1059_v55 = vld [vmem:[#allocation5 + $0x680] sm:$0xff] }
 0x20b   : > { %14605 = vmatpush1.bf16.msra.mxu1 %v14604_v60  ;;  %v1175_v60 = vld [vmem:[#allocation5 + $0xa20] sm:$0xff] }
 0x20c   : > { %14607 = vmatprep.subr.bf16.mxu1 %v14606_v61  ;;  %v1181_v61 = vld [vmem:[#allocation5 + $0xa50] sm:$0xff] }
 0x20d   : > { %v14644_v0 = vpack.c.bf16 %v1181_v61, %v1175_v60  ;;  %v890_v60 = vld [vmem:[#allocation5 + $0x138] sm:$0xff]  ;;  %v896_v61 = vld [vmem:[#allocation5 + $0x168] sm:$0xff] }
 0x20e   : > { %v14674_v4 = vpack.c.bf16 %v896_v61, %v890_v60  ;;  %v1119_v60 = vld [vmem:[#allocation5 + $0x860] sm:$0xff] }
 0x20f   : > { %14609 = vmatpush1.bf16.msra.mxu1 %v14608_v2  ;;  %v1187_v2 = vld [vmem:[#allocation5 + $0xa80] sm:$0xff] }
 0x210   : > { %14611 = vmatprep.subr.bf16.mxu1 %v14610_v3  ;;  %v1193_v3 = vld [vmem:[#allocation5 + $0xab0] sm:$0xff] }
 0x211   : > { %v14648_v6 = vpack.c.bf16 %v1193_v3, %v1187_v2  ;;  %v1071_v3 = vld [vmem:[#allocation5 + $0x6e0] sm:$0xff] }
 0x213   : > { %14613 = vmatpush1.bf16.msra.mxu1 %v14612_v8  ;;  %v1199_v8 = vld [vmem:[#allocation5 + $0xae0] sm:$0xff] }
 0x214   : > { %14615 = vmatprep.subr.bf16.mxu1 %v14614_v9  ;;  %v1205_v9 = vld [vmem:[#allocation5 + $0xb10] sm:$0xff] }
 0x215   : > { %v14652_v12 = vpack.c.bf16 %v1205_v9, %v1199_v8  ;;  %v902_v8 = vld [vmem:[#allocation5 + $0x198] sm:$0xff]  ;;  %v908_v9 = vld [vmem:[#allocation5 + $0x1c8] sm:$0xff] }
 0x216   : > { %v14678_v16 = vpack.c.bf16 %v908_v9, %v902_v8  ;;  %v1131_v8 = vld [vmem:[#allocation5 + $0x8c0] sm:$0xff] }
 0x217   : > { %14617 = vmatpush1.bf16.msra.mxu1 %v14616_v14  ;;  %v1211_v14 = vld [vmem:[#allocation5 + $0xb40] sm:$0xff] }
 0x218   : > { %14619 = vmatprep.subr.bf16.mxu1 %v14618_v15  ;;  %v1217_v15 = vld [vmem:[#allocation5 + $0xb70] sm:$0xff] }
 0x219   : > { %v14656_v18 = vpack.c.bf16 %v1217_v15, %v1211_v14  ;;  %v1083_v15 = vld [vmem:[#allocation5 + $0x740] sm:$0xff] }
 0x21b   : > { %14621 = vmatpush1.bf16.msra.mxu1 %v14620_v20  ;;  %v1223_v20 = vld [vmem:[#allocation5 + $0xba0] sm:$0xff] }
 0x21c   : > { %14623 = vmatprep.subr.bf16.mxu1 %v14622_v21  ;;  %v1229_v21 = vld [vmem:[#allocation5 + $0xbd0] sm:$0xff] }
 0x21d   : > { %v14660_v25 = vpack.c.bf16 %v1229_v21, %v1223_v20  ;;  %v914_v20 = vld [vmem:[#allocation5 + $0x1f8] sm:$0xff]  ;;  %v920_v21 = vld [vmem:[#allocation5 + $0x228] sm:$0xff] }
 0x21e   : > { %v14682_v29 = vpack.c.bf16 %v920_v21, %v914_v20  ;;  %v1143_v20 = vld [vmem:[#allocation5 + $0x920] sm:$0xff] }
 0x21f   : > { %14625 = vmatpush1.bf16.msra.mxu1 %v14624_v26  ;;  %v14662_v26 = vpack.c.bf16 %v860_v23, %v854_v22  ;;  %v1096_v23 = vld [vmem:[#allocation5 + $0x7a8] sm:$0xff] }
 0x220   : > { %14627 = vmatprep.subr.bf16.mxu1 %v14626_v27  ;;  %v853_v27 = vld [vmem:[#allocation5 + $0x10] sm:$0xff] }
 0x221   : > { %v14664_v35 = vpack.c.bf16 %v859_v28, %v853_v27  ;;  %v1095_v28 = vld [vmem:[#allocation5 + $0x7a0] sm:$0xff] }
 0x223   : > { %14629 = vmatpush1.bf16.msra.mxu1 %v14628_v33  ;;  %v1048_v33 = vld [vmem:[#allocation5 + $0x628] sm:$0xff] }
 0x224   : > { %14631 = vmatprep.subr.bf16.mxu1 %v14630_v34  ;;  %v1054_v34 = vld [vmem:[#allocation5 + $0x658] sm:$0xff] }
 0x225   : > { %v14854_v36 = vpack.c.bf16 %v1054_v34, %v1048_v33  ;;  %v919_v33 = vld [vmem:[#allocation5 + $0x220] sm:$0xff]  ;;  %v1101_v34 = vld [vmem:[#allocation5 + $0x7d0] sm:$0xff] }
 0x226   : > { %v14872_v37 = vpack.c.bf16 %v1101_v34, %v1095_v28 }
 0x227   : > { %14633 = vmatpush1.bf16.msra.mxu1 %v14632_v41  ;;  %v865_v41 = vld [vmem:[#allocation5 + $0x70] sm:$0xff]  ;;  %14855 = vmatprep.subr.bf16.mxu0 %v14854_v36  ;;  %v932_v36 = vld [vmem:[#allocation5 + $0x288] sm:$0xff] }
 0x228   : > { %14635 = vmatprep.subr.bf16.mxu1 %v14634_v42  ;;  %v871_v42 = vld [vmem:[#allocation5 + $0xa0] sm:$0xff]  ;;  %14857 = vmatpush1.bf16.msra.mxu0 %v14856_v50  ;;  %v925_v50 = vld [vmem:[#allocation5 + $0x250] sm:$0xff] }
 0x22b   : > { %14637 = vmatpush1.bf16.msra.mxu1 %v14636_v51  ;;  %v1060_v51 = vld [vmem:[#allocation5 + $0x688] sm:$0xff] }
 0x22c   : > { %14639 = vmatprep.subr.bf16.mxu1 %v14638_v52  ;;  %v14668_v52 = vpack.c.bf16 %v871_v42, %v865_v41  ;;  %v14858_v54 = vpack.c.bf16 %v1066_v45, %v1060_v51  ;;  %v1114_v41 = vld [vmem:[#allocation5 + $0x838] sm:$0xff]  ;;  %v14684_v42 = vpack.c.bf16 %v919_v33, %v913_v30  ;;  %v931_v51 = vld [vmem:[#allocation5 + $0x280] sm:$0xff]  ;;  %v1113_v45 = vld [vmem:[#allocation5 + $0x830] sm:$0xff] }
 0x22d   : > { %v1162_v30 = vld [vmem:[#allocation5 + $0x9b8] sm:$0xff] }
 0x22e   : > { %14859 = vmatprep.subr.bf16.mxu0 %v14858_v54  ;;  %v944_v54 = vld [vmem:[#allocation5 + $0x2e8] sm:$0xff] }
 0x22f   : > { %14641 = vmatpush1.bf16.msra.mxu1 %v14640_v58  ;;  %v883_v58 = vld [vmem:[#allocation5 + $0x100] sm:$0xff] }
 0x230   : > { %14643 = vmatprep.subr.bf16.mxu1 %v14642_v59  ;;  %v1065_v59 = vld [vmem:[#allocation5 + $0x6b0] sm:$0xff] }
 0x231   : > { %v14860_v62 = vpack.c.bf16 %v1065_v59, %v1059_v55  ;;  %v14876_v55 = vpack.c.bf16 %v1113_v45, %v1107_v46 }
 0x233   : > { %14645 = vmatpush1.bf16.msra.mxu1 %v14644_v0  ;;  %v1078_v0 = vld [vmem:[#allocation5 + $0x718] sm:$0xff]  ;;  %14861 = vmatpush1.bf16.msra.mxu0 %v14860_v62  ;;  %v937_v62 = vld [vmem:[#allocation5 + $0x2b0] sm:$0xff] }
 0x234   : > { %14647 = vmatprep.subr.bf16.mxu1 %v14646_v1  ;;  %v14672_v1 = vpack.c.bf16 %v883_v58, %v877_v57  ;;  %v14862_v2 = vpack.c.bf16 %v1078_v0, %v1072_v63  ;;  %v1126_v57 = vld [vmem:[#allocation5 + $0x898] sm:$0xff]  ;;  %v14688_v58 = vpack.c.bf16 %v931_v51, %v925_v50  ;;  %v943_v63 = vld [vmem:[#allocation5 + $0x2e0] sm:$0xff]  ;;  %v1125_v0 = vld [vmem:[#allocation5 + $0x890] sm:$0xff] }
 0x235   : > { %v1174_v50 = vld [vmem:[#allocation5 + $0xa18] sm:$0xff] }
 0x236   : > { %14863 = vmatprep.subr.bf16.mxu0 %v14862_v2  ;;  %v956_v2 = vld [vmem:[#allocation5 + $0x348] sm:$0xff] }
 0x237   : > { %14649 = vmatpush1.bf16.msra.mxu1 %v14648_v6  ;;  %v895_v6 = vld [vmem:[#allocation5 + $0x160] sm:$0xff] }
 0x238   : > { %14651 = vmatprep.subr.bf16.mxu1 %v14650_v7  ;;  %v1077_v7 = vld [vmem:[#allocation5 + $0x710] sm:$0xff] }
 0x239   : > { %v14864_v10 = vpack.c.bf16 %v1077_v7, %v1071_v3  ;;  %v14880_v3 = vpack.c.bf16 %v1125_v0, %v1119_v60 }
 0x23b   : > { %14653 = vmatpush1.bf16.msra.mxu1 %v14652_v12  ;;  %v1090_v12 = vld [vmem:[#allocation5 + $0x778] sm:$0xff]  ;;  %14865 = vmatpush1.bf16.msra.mxu0 %v14864_v10  ;;  %v949_v10 = vld [vmem:[#allocation5 + $0x310] sm:$0xff] }
 0x23c   : > { %14655 = vmatprep.subr.bf16.mxu1 %v14654_v13  ;;  %v14676_v13 = vpack.c.bf16 %v895_v6, %v889_v5  ;;  %v14866_v14 = vpack.c.bf16 %v1090_v12, %v1084_v11  ;;  %v1138_v5 = vld [vmem:[#allocation5 + $0x8f8] sm:$0xff]  ;;  %v14692_v6 = vpack.c.bf16 %v943_v63, %v937_v62  ;;  %v955_v11 = vld [vmem:[#allocation5 + $0x340] sm:$0xff]  ;;  %v1137_v12 = vld [vmem:[#allocation5 + $0x8f0] sm:$0xff] }
 0x23d   : > { %v1186_v62 = vld [vmem:[#allocation5 + $0xa78] sm:$0xff] }
 0x23e   : > { %14867 = vmatprep.subr.bf16.mxu0 %v14866_v14  ;;  %v968_v14 = vld [vmem:[#allocation5 + $0x3a8] sm:$0xff] }
 0x23f   : > { %14657 = vmatpush1.bf16.msra.mxu1 %v14656_v18  ;;  %v907_v18 = vld [vmem:[#allocation5 + $0x1c0] sm:$0xff] }
 0x240   : > { %14659 = vmatprep.subr.bf16.mxu1 %v14658_v19  ;;  %v1089_v19 = vld [vmem:[#allocation5 + $0x770] sm:$0xff] }
 0x241   : > { %v14868_v22 = vpack.c.bf16 %v1089_v19, %v1083_v15  ;;  %v14884_v15 = vpack.c.bf16 %v1137_v12, %v1131_v8 }
 0x243   : > { %14661 = vmatpush1.bf16.msra.mxu1 %v14660_v25  ;;  %v1102_v25 = vld [vmem:[#allocation5 + $0x7d8] sm:$0xff]  ;;  %14869 = vmatpush1.bf16.msra.mxu0 %v14868_v22  ;;  %v961_v22 = vld [vmem:[#allocation5 + $0x370] sm:$0xff] }
 0x244   : > { %14663 = vmatprep.subr.bf16.mxu1 %v14662_v26  ;;  %v14680_v26 = vpack.c.bf16 %v907_v18, %v901_v17  ;;  %v14870_v27 = vpack.c.bf16 %v1102_v25, %v1096_v23  ;;  %v1150_v17 = vld [vmem:[#allocation5 + $0x958] sm:$0xff]  ;;  %v14696_v18 = vpack.c.bf16 %v955_v11, %v949_v10  ;;  %v967_v23 = vld [vmem:[#allocation5 + $0x3a0] sm:$0xff]  ;;  %v1149_v25 = vld [vmem:[#allocation5 + $0x950] sm:$0xff] }
 0x245   : > { %v14888_v28 = vpack.c.bf16 %v1149_v25, %v1143_v20  ;;  %v14700_v33 = vpack.c.bf16 %v967_v23, %v961_v22  ;;  %v1198_v10 = vld [vmem:[#allocation5 + $0xad8] sm:$0xff] }
 0x246   : > { %1392 = vmatmul.mubr.f32.vlgmr.msra.gmra.mrb[0].mxu1 %v17275_v31  ;;  %14871 = vmatprep.subr.bf16.mxu0 %v14870_v27  ;;  %v980_v27 = vld [vmem:[#allocation5 + $0x408] sm:$0xff]  ;;  %v1210_v22 = vld [vmem:[#allocation5 + $0xb38] sm:$0xff] }
 0x247   : > { %14665 = vmatpush1.bf16.msra.mxu1 %v14664_v35  ;;  %1462 = vmatprep.mubr.f32.mxu1 %v17253_v48  ;;  %v926_v35 = vld [vmem:[#allocation5 + $0x258] sm:$0xff] }
 0x248   : > { %14667 = vmatprep.subr.bf16.mxu1 %v14666_v38  ;;  %v1108_v38 = vld [vmem:[#allocation5 + $0x808] sm:$0xff]  ;;  %v14686_v47 = vpack.c.bf16 %v932_v36, %v926_v35  ;;  %14873 = vmatpush1.bf16.msra.mxu0 %v14872_v37  ;;  %v1155_v35 = vld [vmem:[#allocation5 + $0x980] sm:$0xff]  ;;  %v973_v37 = vld [vmem:[#allocation5 + $0x3d0] sm:$0xff] }
 0x249   : > { %v14874_v44 = vpack.c.bf16 %v1114_v41, %v1108_v38  ;;  %v979_v38 = vld [vmem:[#allocation5 + $0x400] sm:$0xff]  ;;  %v1161_v41 = vld [vmem:[#allocation5 + $0x9b0] sm:$0xff] }
 0x24a   : > { %v14892_v46 = vpack.c.bf16 %v1161_v41, %v1155_v35  ;;  %v14704_v51 = vpack.c.bf16 %v979_v38, %v973_v37  ;;  %v1222_v37 = vld [vmem:[#allocation5 + $0xb98] sm:$0xff] }
 0x24b   : > { %14669 = vmatpush1.bf16.msra.mxu1 %v14668_v52  ;;  %v938_v52 = vld [vmem:[#allocation5 + $0x2b8] sm:$0xff]  ;;  %14875 = vmatprep.subr.bf16.mxu0 %v14874_v44  ;;  %v992_v44 = vld [vmem:[#allocation5 + $0x468] sm:$0xff] }
 0x24c   : > { %14671 = vmatprep.subr.bf16.mxu1 %v14670_v56  ;;  %v1120_v56 = vld [vmem:[#allocation5 + $0x868] sm:$0xff]  ;;  %v14690_v61 = vpack.c.bf16 %v944_v54, %v938_v52  ;;  %14877 = vmatpush1.bf16.msra.mxu0 %v14876_v55  ;;  %v1167_v52 = vld [vmem:[#allocation5 + $0x9e0] sm:$0xff]  ;;  %v985_v55 = vld [vmem:[#allocation5 + $0x430] sm:$0xff] }
 0x24d   : > { %v14878_v59 = vpack.c.bf16 %v1126_v57, %v1120_v56  ;;  %v991_v56 = vld [vmem:[#allocation5 + $0x460] sm:$0xff]  ;;  %v1173_v57 = vld [vmem:[#allocation5 + $0xa10] sm:$0xff] }
 0x24e   : > { %v14896_v60 = vpack.c.bf16 %v1173_v57, %v1167_v52  ;;  %v14708_v63 = vpack.c.bf16 %v991_v56, %v985_v55  ;;  %v1234_v55 = vld [vmem:[#allocation5 + $0xbf8] sm:$0xff] }
 0x24f   : > { %14673 = vmatpush1.bf16.msra.mxu1 %v14672_v1  ;;  %v950_v1 = vld [vmem:[#allocation5 + $0x318] sm:$0xff]  ;;  %14879 = vmatprep.subr.bf16.mxu0 %v14878_v59  ;;  %v1004_v59 = vld [vmem:[#allocation5 + $0x4c8] sm:$0xff] }
 0x250   : > { %14675 = vmatprep.subr.bf16.mxu1 %v14674_v4  ;;  %v1132_v4 = vld [vmem:[#allocation5 + $0x8c8] sm:$0xff]  ;;  %v14694_v9 = vpack.c.bf16 %v956_v2, %v950_v1  ;;  %14881 = vmatpush1.bf16.msra.mxu0 %v14880_v3  ;;  %v1179_v1 = vld [vmem:[#allocation5 + $0xa40] sm:$0xff]  ;;  %v997_v3 = vld [vmem:[#allocation5 + $0x490] sm:$0xff] }
 0x251   : > { %v14882_v7 = vpack.c.bf16 %v1138_v5, %v1132_v4  ;;  %v1003_v4 = vld [vmem:[#allocation5 + $0x4c0] sm:$0xff]  ;;  %v1185_v5 = vld [vmem:[#allocation5 + $0xa70] sm:$0xff] }
 0x252   : > { %v14900_v8 = vpack.c.bf16 %v1185_v5, %v1179_v1  ;;  %v14712_v11 = vpack.c.bf16 %v1003_v4, %v997_v3  ;;  %v1057_v4 = vld [vmem:[#allocation5 + $0x670] sm:$0xff]  ;;  %v1063_v5 = vld [vmem:[#allocation5 + $0x6a0] sm:$0xff] }
 0x253   : > { %14677 = vmatpush1.bf16.msra.mxu1 %v14676_v13  ;;  %v962_v13 = vld [vmem:[#allocation5 + $0x378] sm:$0xff]  ;;  %14883 = vmatprep.subr.bf16.mxu0 %v14882_v7  ;;  %v1016_v7 = vld [vmem:[#allocation5 + $0x528] sm:$0xff] }
 0x254   : > { %14679 = vmatprep.subr.bf16.mxu1 %v14678_v16  ;;  %v1144_v16 = vld [vmem:[#allocation5 + $0x928] sm:$0xff]  ;;  %v14698_v21 = vpack.c.bf16 %v968_v14, %v962_v13  ;;  %14885 = vmatpush1.bf16.msra.mxu0 %v14884_v15  ;;  %v1191_v13 = vld [vmem:[#allocation5 + $0xaa0] sm:$0xff]  ;;  %v1009_v15 = vld [vmem:[#allocation5 + $0x4f0] sm:$0xff] }
 0x255   : > { %v14886_v19 = vpack.c.bf16 %v1150_v17, %v1144_v16  ;;  %v1015_v16 = vld [vmem:[#allocation5 + $0x520] sm:$0xff]  ;;  %v1197_v17 = vld [vmem:[#allocation5 + $0xad0] sm:$0xff] }
 0x256   : > { %v14904_v20 = vpack.c.bf16 %v1197_v17, %v1191_v13  ;;  %v14716_v23 = vpack.c.bf16 %v1015_v16, %v1009_v15  ;;  %v1082_v13 = vld [vmem:[#allocation5 + $0x738] sm:$0xff]  ;;  %v1081_v16 = vld [vmem:[#allocation5 + $0x730] sm:$0xff]  ;;  %v1087_v17 = vld [vmem:[#allocation5 + $0x760] sm:$0xff] }
 0x257   : > { %14681 = vmatpush1.bf16.msra.mxu1 %v14680_v26  ;;  %v974_v26 = vld [vmem:[#allocation5 + $0x3d8] sm:$0xff]  ;;  %14887 = vmatprep.subr.bf16.mxu0 %v14886_v19  ;;  %v1028_v19 = vld [vmem:[#allocation5 + $0x588] sm:$0xff] }
 0x258   : > { %14683 = vmatprep.subr.bf16.mxu1 %v14682_v29  ;;  %v1156_v29 = vld [vmem:[#allocation5 + $0x988] sm:$0xff]  ;;  %v14702_v36 = vpack.c.bf16 %v980_v27, %v974_v26  ;;  %14889 = vmatpush1.bf16.msra.mxu0 %v14888_v28  ;;  %v1203_v26 = vld [vmem:[#allocation5 + $0xb00] sm:$0xff]  ;;  %v1021_v28 = vld [vmem:[#allocation5 + $0x550] sm:$0xff] }
 0x259   : > { %v14890_v34 = vpack.c.bf16 %v1162_v30, %v1156_v29  ;;  %v1027_v29 = vld [vmem:[#allocation5 + $0x580] sm:$0xff]  ;;  %v1209_v30 = vld [vmem:[#allocation5 + $0xb30] sm:$0xff] }
 0x25a   : > { %v14908_v35 = vpack.c.bf16 %v1209_v30, %v1203_v26  ;;  %v14720_v38 = vpack.c.bf16 %v1027_v29, %v1021_v28  ;;  %v1112_v26 = vld [vmem:[#allocation5 + $0x828] sm:$0xff]  ;;  %v1105_v29 = vld [vmem:[#allocation5 + $0x7f0] sm:$0xff]  ;;  %v1111_v30 = vld [vmem:[#allocation5 + $0x820] sm:$0xff] }
 0x25b   : > { %14685 = vmatpush1.bf16.msra.mxu1 %v14684_v42  ;;  %v986_v42 = vld [vmem:[#allocation5 + $0x438] sm:$0xff]  ;;  %14891 = vmatprep.subr.bf16.mxu0 %v14890_v34  ;;  %v1040_v34 = vld [vmem:[#allocation5 + $0x5e8] sm:$0xff] }
 0x25c   : > { %14687 = vmatprep.subr.bf16.mxu1 %v14686_v47  ;;  %v1168_v47 = vld [vmem:[#allocation5 + $0x9e8] sm:$0xff]  ;;  %v14706_v54 = vpack.c.bf16 %v992_v44, %v986_v42  ;;  %14893 = vmatpush1.bf16.msra.mxu0 %v14892_v46  ;;  %v1215_v42 = vld [vmem:[#allocation5 + $0xb60] sm:$0xff]  ;;  %v1033_v46 = vld [vmem:[#allocation5 + $0x5b0] sm:$0xff] }
 0x25d   : > { %v14894_v45 = vpack.c.bf16 %v1174_v50, %v1168_v47  ;;  %v1039_v47 = vld [vmem:[#allocation5 + $0x5e0] sm:$0xff]  ;;  %v1221_v50 = vld [vmem:[#allocation5 + $0xb90] sm:$0xff] }
 0x25e   : > { %v14912_v52 = vpack.c.bf16 %v1221_v50, %v1215_v42  ;;  %v14724_v56 = vpack.c.bf16 %v1039_v47, %v1033_v46  ;;  %v1136_v42 = vld [vmem:[#allocation5 + $0x8e8] sm:$0xff]  ;;  %v1129_v47 = vld [vmem:[#allocation5 + $0x8b0] sm:$0xff]  ;;  %v1135_v50 = vld [vmem:[#allocation5 + $0x8e0] sm:$0xff] }
 0x25f   : > { %14689 = vmatpush1.bf16.msra.mxu1 %v14688_v58  ;;  %v998_v58 = vld [vmem:[#allocation5 + $0x498] sm:$0xff]  ;;  %14895 = vmatprep.subr.bf16.mxu0 %v14894_v45  ;;  %v1052_v45 = vld [vmem:[#allocation5 + $0x648] sm:$0xff] }
 0x260   : > { %14691 = vmatprep.subr.bf16.mxu1 %v14690_v61  ;;  %v1180_v61 = vld [vmem:[#allocation5 + $0xa48] sm:$0xff]  ;;  %v14710_v2 = vpack.c.bf16 %v1004_v59, %v998_v58  ;;  %14897 = vmatpush1.bf16.msra.mxu0 %v14896_v60  ;;  %v1227_v58 = vld [vmem:[#allocation5 + $0xbc0] sm:$0xff]  ;;  %v1045_v60 = vld [vmem:[#allocation5 + $0x610] sm:$0xff] }
 0x261   : > { %v14898_v0 = vpack.c.bf16 %v1186_v62, %v1180_v61  ;;  %v1051_v61 = vld [vmem:[#allocation5 + $0x640] sm:$0xff]  ;;  %v1233_v62 = vld [vmem:[#allocation5 + $0xbf0] sm:$0xff] }
 0x262   : > { %v14916_v1 = vpack.c.bf16 %v1233_v62, %v1227_v58  ;;  %v1160_v58 = vld [vmem:[#allocation5 + $0x9a8] sm:$0xff]  ;;  %v1159_v62 = vld [vmem:[#allocation5 + $0x9a0] sm:$0xff] }
 0x263   : > { %14693 = vmatpush1.bf16.msra.mxu1 %v14692_v6  ;;  %v1010_v6 = vld [vmem:[#allocation5 + $0x4f8] sm:$0xff]  ;;  %14899 = vmatprep.subr.bf16.mxu0 %v14898_v0  ;;  %v1064_v0 = vld [vmem:[#allocation5 + $0x6a8] sm:$0xff] }
 0x264   : > { %14695 = vmatprep.subr.bf16.mxu1 %v14694_v9  ;;  %v1192_v9 = vld [vmem:[#allocation5 + $0xaa8] sm:$0xff]  ;;  %v14714_v14 = vpack.c.bf16 %v1016_v7, %v1010_v6  ;;  %14901 = vmatpush1.bf16.msra.mxu0 %v14900_v8  ;;  %v1070_v6 = vld [vmem:[#allocation5 + $0x6d8] sm:$0xff]  ;;  %v14732_v8 = vpack.c.bf16 %v1063_v5, %v1057_v4  ;;  %v1171_v4 = vld [vmem:[#allocation5 + $0xa00] sm:$0xff] }
 0x265   : > { %v14902_v12 = vpack.c.bf16 %v1198_v10, %v1192_v9  ;;  %v1076_v7 = vld [vmem:[#allocation5 + $0x708] sm:$0xff]  ;;  %v20279_v9 = vmov 0.0   ;;  %v1178_v5 = vld [vmem:[#allocation5 + $0xa38] sm:$0xff] }
 0x266   : > { %793 = vst.msk [vmem:[#allocation2] sm:$0xff] %vm792_vm0, %v20279_v9  ;;  %794 = vst.msk [vmem:[#allocation2 + $0x8] sm:$0xff] %vm792_vm0, %v20279_v9  ;;  %v14734_v10 = vpack.c.bf16 %v1076_v7, %v1070_v6  ;;  %v1184_v6 = vld [vmem:[#allocation5 + $0xa68] sm:$0xff] }
 0x267   : > { %14697 = vmatpush1.bf16.msra.mxu1 %v14696_v18  ;;  %v1022_v18 = vld [vmem:[#allocation5 + $0x558] sm:$0xff]  ;;  %14903 = vmatprep.subr.bf16.mxu0 %v14902_v12  ;;  %795 = vst.msk [vmem:[#allocation2 + $0x10] sm:$0xff] %vm792_vm0, %v20279_v9  ;;  %v1075_v12 = vld [vmem:[#allocation5 + $0x700] sm:$0xff] }
 0x268   : > { %14699 = vmatprep.subr.bf16.mxu1 %v14698_v21  ;;  %v1204_v21 = vld [vmem:[#allocation5 + $0xb08] sm:$0xff]  ;;  %v14718_v27 = vpack.c.bf16 %v1028_v19, %v1022_v18  ;;  %14905 = vmatpush1.bf16.msra.mxu0 %v14904_v20  ;;  %v1094_v18 = vld [vmem:[#allocation5 + $0x798] sm:$0xff]  ;;  %v14740_v20 = vpack.c.bf16 %v1087_v17, %v1081_v16  ;;  %v1195_v16 = vld [vmem:[#allocation5 + $0xac0] sm:$0xff]  ;;  %797 = vst.msk [vmem:[#allocation2 + $0x18] sm:$0x3] %vm796_vm3, %v20279_v9 }
 0x269   : > { %v14906_v25 = vpack.c.bf16 %v1210_v22, %v1204_v21  ;;  %v1100_v19 = vld [vmem:[#allocation5 + $0x7c8] sm:$0xff]  ;;  %v1093_v22 = vld [vmem:[#allocation5 + $0x790] sm:$0xff]  ;;  %v1202_v17 = vld [vmem:[#allocation5 + $0xaf8] sm:$0xff]  ;;  %799 = vst.msk [vmem:[#allocation3] sm:$0xff] %vm798_vm5, %v20279_v9 }
 0x26a   : > { %v14742_v21 = vpack.c.bf16 %v1100_v19, %v1094_v18  ;;  %v1208_v18 = vld [vmem:[#allocation5 + $0xb28] sm:$0xff]  ;;  %800 = vst.msk [vmem:[#allocation3 + $0x8] sm:$0xff] %vm798_vm5, %v20279_v9  ;;  %801 = vst.msk [vmem:[#allocation3 + $0x10] sm:$0xff] %vm798_vm5, %v20279_v9 }
 0x26b   : > { %14701 = vmatpush1.bf16.msra.mxu1 %v14700_v33  ;;  %v1034_v33 = vld [vmem:[#allocation5 + $0x5b8] sm:$0xff]  ;;  %14907 = vmatprep.subr.bf16.mxu0 %v14906_v25  ;;  %802 = vst.msk [vmem:[#allocation3 + $0x18] sm:$0xff] %vm798_vm5, %v20279_v9  ;;  %803 = vst.msk [vmem:[#allocation3 + $0x20] sm:$0xff] %vm798_vm5, %v20279_v9 }
 0x26c   : > { %14703 = vmatprep.subr.bf16.mxu1 %v14702_v36  ;;  %v1216_v36 = vld [vmem:[#allocation5 + $0xb68] sm:$0xff]  ;;  %v14722_v44 = vpack.c.bf16 %v1040_v34, %v1034_v33  ;;  %14909 = vmatpush1.bf16.msra.mxu0 %v14908_v35  ;;  %v1106_v25 = vld [vmem:[#allocation5 + $0x7f8] sm:$0xff]  ;;  %v14748_v35 = vpack.c.bf16 %v1111_v30, %v1105_v29  ;;  %v1219_v29 = vld [vmem:[#allocation5 + $0xb80] sm:$0xff]  ;;  %804 = vst.msk [vmem:[#allocation3 + $0x28] sm:$0xff] %vm798_vm5, %v20279_v9 }
 0x26d   : > { %v14910_v41 = vpack.c.bf16 %v1222_v37, %v1216_v36  ;;  %v14746_v28 = vpack.c.bf16 %v1112_v26, %v1106_v25  ;;  %v1118_v33 = vld [vmem:[#allocation5 + $0x858] sm:$0xff]  ;;  %v1124_v34 = vld [vmem:[#allocation5 + $0x888] sm:$0xff]  ;;  %v1117_v37 = vld [vmem:[#allocation5 + $0x850] sm:$0xff]  ;;  %805 = vst.msk [vmem:[#allocation3 + $0x30] sm:$0xff] %vm798_vm5, %v20279_v9 }
 0x26e   : > { %v14750_v36 = vpack.c.bf16 %v1124_v34, %v1118_v33  ;;  %v1220_v25 = vld [vmem:[#allocation5 + $0xb88] sm:$0xff]  ;;  %v1226_v30 = vld [vmem:[#allocation5 + $0xbb8] sm:$0xff]  ;;  %806 = vst.msk [vmem:[#allocation3 + $0x38] sm:$0xff] %vm798_vm5, %v20279_v9  ;;  %807 = vst.msk [vmem:[#allocation3 + $0x40] sm:$0xff] %vm798_vm5, %v20279_v9 }
 0x26f   : > { %14705 = vmatpush1.bf16.msra.mxu1 %v14704_v51  ;;  %v1046_v51 = vld [vmem:[#allocation5 + $0x618] sm:$0xff]  ;;  %14911 = vmatprep.subr.bf16.mxu0 %v14910_v41  ;;  %v1232_v33 = vld [vmem:[#allocation5 + $0xbe8] sm:$0xff]  ;;  %808 = vst.msk [vmem:[#allocation3 + $0x48] sm:$0xff] %vm798_vm5, %v20279_v9 }
 0x270   : > { %14707 = vmatprep.subr.bf16.mxu1 %v14706_v54  ;;  %v1228_v54 = vld [vmem:[#allocation5 + $0xbc8] sm:$0xff]  ;;  %v14726_v59 = vpack.c.bf16 %v1052_v45, %v1046_v51  ;;  %14913 = vmatpush1.bf16.msra.mxu0 %v14912_v52  ;;  %v1130_v41 = vld [vmem:[#allocation5 + $0x8b8] sm:$0xff]  ;;  %v14756_v52 = vpack.c.bf16 %v1135_v50, %v1129_v47  ;;  %v861_v47 = vld [vmem:[#allocation5 + $0x50] sm:$0xff]  ;;  %810 = vst.msk [vmem:[#allocation3 + $0x50] sm:$0x3] %vm809_vm6, %v20279_v9 }
 0x271   : > { %v14914_v57 = vpack.c.bf16 %v1234_v55, %v1228_v54  ;;  %v14754_v46 = vpack.c.bf16 %v1136_v42, %v1130_v41  ;;  %v1142_v51 = vld [vmem:[#allocation5 + $0x918] sm:$0xff]  ;;  %v1148_v45 = vld [vmem:[#allocation5 + $0x948] sm:$0xff]  ;;  %v1141_v55 = vld [vmem:[#allocation5 + $0x910] sm:$0xff] }
 0x272   : > { %v14758_v54 = vpack.c.bf16 %v1148_v45, %v1142_v51  ;;  %v862_v41 = vld [vmem:[#allocation5 + $0x58] sm:$0xff]  ;;  %v868_v50 = vld [vmem:[#allocation5 + $0x88] sm:$0xff] }
 0x273   : > { %14709 = vmatpush1.bf16.msra.mxu1 %v14708_v63  ;;  %v1058_v63 = vld [vmem:[#allocation5 + $0x678] sm:$0xff]  ;;  %14915 = vmatprep.subr.bf16.mxu0 %v14914_v57 }
 0x274   : > { %14711 = vmatprep.subr.bf16.mxu1 %v14710_v2  ;;  %v14728_v2 = vpack.c.bf16 %v1051_v61, %v1045_v60  ;;  %v14730_v3 = vpack.c.bf16 %v1064_v0, %v1058_v63  ;;  %14917 = vmatpush1.bf16.msra.mxu0 %v14916_v1  ;;  %v1154_v57 = vld [vmem:[#allocation5 + $0x978] sm:$0xff]  ;;  %v1153_v61 = vld [vmem:[#allocation5 + $0x970] sm:$0xff]  ;;  %v1172_v0 = vld [vmem:[#allocation5 + $0xa08] sm:$0xff] }
 0x275   : > { %v14762_v60 = vpack.c.bf16 %v1160_v58, %v1154_v57  ;;  %v1166_v63 = vld [vmem:[#allocation5 + $0x9d8] sm:$0xff]  ;;  %v14764_v1 = vpack.c.bf16 %v1159_v62, %v1153_v61  ;;  %v885_v61 = vld [vmem:[#allocation5 + $0x110] sm:$0xff]  ;;  %v892_v62 = vld [vmem:[#allocation5 + $0x148] sm:$0xff] }
 0x276   : > { %v874_v51 = vld [vmem:[#allocation5 + $0xb8] sm:$0xff] }
 0x277   : > { %14713 = vmatpush1.bf16.msra.mxu1 %v14712_v11  ;;  %v1069_v11 = vld [vmem:[#allocation5 + $0x6d0] sm:$0xff]  ;;  %1676 = vmatmul.mubr.f32.vlgmr.msra.gmra.mrb[0].mxu0 %v17275_v31  ;;  %v886_v57 = vld [vmem:[#allocation5 + $0x118] sm:$0xff] }
 0x278   : > { %14715 = vmatprep.subr.bf16.mxu1 %v14714_v14  ;;  %v1088_v14 = vld [vmem:[#allocation5 + $0x768] sm:$0xff] }
 0x279   : > { %v14738_v15 = vpack.c.bf16 %v1088_v14, %v1082_v13  ;;  %v1196_v13 = vld [vmem:[#allocation5 + $0xac8] sm:$0xff] }
 0x27b   : > { %14717 = vmatpush1.bf16.msra.mxu1 %v14716_v23  ;;  %v1099_v23 = vld [vmem:[#allocation5 + $0x7c0] sm:$0xff] }
 0x27c   : > { %14719 = vmatprep.subr.bf16.mxu1 %v14718_v27  ;;  %v14744_v27 = vpack.c.bf16 %v1099_v23, %v1093_v22  ;;  %v1207_v22 = vld [vmem:[#allocation5 + $0xb20] sm:$0xff]  ;;  %v1214_v23 = vld [vmem:[#allocation5 + $0xb58] sm:$0xff] }
 0x27f   : > { %14721 = vmatpush1.bf16.msra.mxu1 %v14720_v38  ;;  %v1123_v38 = vld [vmem:[#allocation5 + $0x880] sm:$0xff] }
 0x280   : > { %14723 = vmatprep.subr.bf16.mxu1 %v14722_v44  ;;  %v14752_v44 = vpack.c.bf16 %v1123_v38, %v1117_v37  ;;  %v1231_v37 = vld [vmem:[#allocation5 + $0xbe0] sm:$0xff]  ;;  %v856_v38 = vld [vmem:[#allocation5 + $0x28] sm:$0xff] }
 0x283   : > { %14725 = vmatpush1.bf16.msra.mxu1 %v14724_v56  ;;  %v1147_v56 = vld [vmem:[#allocation5 + $0x940] sm:$0xff] }
 0x284   : > { %14727 = vmatprep.subr.bf16.mxu1 %v14726_v59  ;;  %v14760_v59 = vpack.c.bf16 %v1147_v56, %v1141_v55  ;;  %v873_v55 = vld [vmem:[#allocation5 + $0xb0] sm:$0xff]  ;;  %v880_v56 = vld [vmem:[#allocation5 + $0xe8] sm:$0xff] }
 0x286   : > { %1463 = vmatmul.mubr.f32.vlgmr.msra.gmra.mrb[2].mxu1 %v17266_v53 }
 0x287   : > { %14729 = vmatpush1.bf16.msra.mxu1 %v14728_v2  ;;  %1533 = vmatprep.mubr.f32.mxu1 %v17257_v49  ;;  %v14736_v49 = vpack.c.bf16 %v1075_v12, %v1069_v11  ;;  %v14766_v2 = vpack.c.bf16 %v1172_v0, %v1166_v63  ;;  %v1183_v11 = vld [vmem:[#allocation5 + $0xa60] sm:$0xff]  ;;  %v1190_v12 = vld [vmem:[#allocation5 + $0xa98] sm:$0xff] }
 0x288   : > { %14731 = vmatprep.subr.bf16.mxu1 %v14730_v3  ;;  %v1165_v3 = vld [vmem:[#allocation5 + $0x9d0] sm:$0xff]  ;;  %v898_v63 = vld [vmem:[#allocation5 + $0x178] sm:$0xff] }
 0x289   : > { %v14768_v7 = vpack.c.bf16 %v1171_v4, %v1165_v3  ;;  %v897_v3 = vld [vmem:[#allocation5 + $0x170] sm:$0xff]  ;;  %v904_v4 = vld [vmem:[#allocation5 + $0x1a8] sm:$0xff] }
 0x28b   : > { %14733 = vmatpush1.bf16.msra.mxu1 %v14732_v8  ;;  %v14770_v8 = vpack.c.bf16 %v1184_v6, %v1178_v5  ;;  %v910_v5 = vld [vmem:[#allocation5 + $0x1d8] sm:$0xff] }
 0x28c   : > { %14735 = vmatprep.subr.bf16.mxu1 %v14734_v10  ;;  %v1177_v10 = vld [vmem:[#allocation5 + $0xa30] sm:$0xff]  ;;  %v14806_v6 = vpack.c.bf16 %v910_v5, %v904_v4  ;;  %v1011_v5 = vld [vmem:[#allocation5 + $0x500] sm:$0xff] }
 0x28d   : > { %v14772_v14 = vpack.c.bf16 %v1183_v11, %v1177_v10  ;;  %v922_v10 = vld [vmem:[#allocation5 + $0x238] sm:$0xff] }
 0x28f   : > { %14737 = vmatpush1.bf16.msra.mxu1 %v14736_v49  ;;  %v14774_v49 = vpack.c.bf16 %v1196_v13, %v1190_v12  ;;  %v915_v13 = vld [vmem:[#allocation5 + $0x200] sm:$0xff] }
 0x290   : > { %14739 = vmatprep.subr.bf16.mxu1 %v14738_v15  ;;  %v1189_v15 = vld [vmem:[#allocation5 + $0xa90] sm:$0xff] }
 0x291   : > { %v14776_v19 = vpack.c.bf16 %v1195_v16, %v1189_v15  ;;  %v934_v15 = vld [vmem:[#allocation5 + $0x298] sm:$0xff] }
 0x293   : > { %14741 = vmatpush1.bf16.msra.mxu1 %v14740_v20  ;;  %v14778_v20 = vpack.c.bf16 %v1208_v18, %v1202_v17  ;;  %v927_v18 = vld [vmem:[#allocation5 + $0x260] sm:$0xff] }
 0x294   : > { %14743 = vmatprep.subr.bf16.mxu1 %v14742_v21  ;;  %v1201_v21 = vld [vmem:[#allocation5 + $0xaf0] sm:$0xff] }
 0x295   : > { %v14780_v26 = vpack.c.bf16 %v1207_v22, %v1201_v21  ;;  %v946_v21 = vld [vmem:[#allocation5 + $0x2f8] sm:$0xff] }
 0x297   : > { %14745 = vmatpush1.bf16.msra.mxu1 %v14744_v27  ;;  %v14782_v27 = vpack.c.bf16 %v1220_v25, %v1214_v23  ;;  %v939_v25 = vld [vmem:[#allocation5 + $0x2c0] sm:$0xff] }
 0x298   : > { %14747 = vmatprep.subr.bf16.mxu1 %v14746_v28  ;;  %v1213_v28 = vld [vmem:[#allocation5 + $0xb50] sm:$0xff] }
 0x299   : > { %v14784_v34 = vpack.c.bf16 %v1219_v29, %v1213_v28  ;;  %v958_v28 = vld [vmem:[#allocation5 + $0x358] sm:$0xff] }
 0x29b   : > { %14749 = vmatpush1.bf16.msra.mxu1 %v14748_v35  ;;  %v14786_v35 = vpack.c.bf16 %v1232_v33, %v1226_v30  ;;  %v951_v33 = vld [vmem:[#allocation5 + $0x320] sm:$0xff] }
 0x29c   : > { %14751 = vmatprep.subr.bf16.mxu1 %v14750_v36  ;;  %v1225_v36 = vld [vmem:[#allocation5 + $0xbb0] sm:$0xff] }
 0x29d   : > { %v14788_v42 = vpack.c.bf16 %v1231_v37, %v1225_v36  ;;  %v970_v36 = vld [vmem:[#allocation5 + $0x3b8] sm:$0xff] }
 0x29f   : > { %14753 = vmatpush1.bf16.msra.mxu1 %v14752_v44  ;;  %v14790_v44 = vpack.c.bf16 %v862_v41, %v856_v38  ;;  %v963_v41 = vld [vmem:[#allocation5 + $0x380] sm:$0xff] }
 0x2a0   : > { %14755 = vmatprep.subr.bf16.mxu1 %v14754_v46  ;;  %v855_v46 = vld [vmem:[#allocation5 + $0x20] sm:$0xff] }
 0x2a1   : > { %v14792_v45 = vpack.c.bf16 %v861_v47, %v855_v46  ;;  %v982_v46 = vld [vmem:[#allocation5 + $0x418] sm:$0xff] }
 0x2a3   : > { %14757 = vmatpush1.bf16.msra.mxu1 %v14756_v52  ;;  %v14794_v52 = vpack.c.bf16 %v874_v51, %v868_v50  ;;  %v975_v51 = vld [vmem:[#allocation5 + $0x3e0] sm:$0xff] }
 0x2a4   : > { %14759 = vmatprep.subr.bf16.mxu1 %v14758_v54  ;;  %v867_v54 = vld [vmem:[#allocation5 + $0x80] sm:$0xff] }
 0x2a5   : > { %v14796_v58 = vpack.c.bf16 %v873_v55, %v867_v54  ;;  %v994_v54 = vld [vmem:[#allocation5 + $0x478] sm:$0xff] }
 0x2a7   : > { %14761 = vmatpush1.bf16.msra.mxu1 %v14760_v59  ;;  %v14798_v59 = vpack.c.bf16 %v886_v57, %v880_v56  ;;  %v987_v57 = vld [vmem:[#allocation5 + $0x440] sm:$0xff] }
 0x2a8   : > { %14763 = vmatprep.subr.bf16.mxu1 %v14762_v60  ;;  %v879_v60 = vld [vmem:[#allocation5 + $0xe0] sm:$0xff] }
 0x2a9   : > { %v14800_v0 = vpack.c.bf16 %v885_v61, %v879_v60  ;;  %v1006_v60 = vld [vmem:[#allocation5 + $0x4d8] sm:$0xff] }
 0x2ab   : > { %14765 = vmatpush1.bf16.msra.mxu1 %v14764_v1  ;;  %v14802_v1 = vpack.c.bf16 %v898_v63, %v892_v62  ;;  %v999_v63 = vld [vmem:[#allocation5 + $0x4a0] sm:$0xff] }
 0x2ac   : > { %14767 = vmatprep.subr.bf16.mxu1 %v14766_v2  ;;  %v891_v2 = vld [vmem:[#allocation5 + $0x140] sm:$0xff] }
 0x2af   : > { %14769 = vmatpush1.bf16.msra.mxu1 %v14768_v7  ;;  %v903_v7 = vld [vmem:[#allocation5 + $0x1a0] sm:$0xff] }
 0x2b0   : > { %14771 = vmatprep.subr.bf16.mxu1 %v14770_v8  ;;  %v916_v8 = vld [vmem:[#allocation5 + $0x208] sm:$0xff] }
 0x2b1   : > { %v14810_v12 = vpack.c.bf16 %v922_v10, %v916_v8  ;;  %v1023_v10 = vld [vmem:[#allocation5 + $0x560] sm:$0xff] }
 0x2b3   : > { %14773 = vmatpush1.bf16.msra.mxu1 %v14772_v14  ;;  %v921_v14 = vld [vmem:[#allocation5 + $0x230] sm:$0xff] }
 0x2b4   : > { %14775 = vmatprep.subr.bf16.mxu1 %v14774_v49  ;;  %v928_v49 = vld [vmem:[#allocation5 + $0x268] sm:$0xff]  ;;  %v14812_v16 = vpack.c.bf16 %v921_v14, %v915_v13  ;;  %v1042_v13 = vld [vmem:[#allocation5 + $0x5f8] sm:$0xff] }
 0x2b5   : > { %v14814_v17 = vpack.c.bf16 %v934_v15, %v928_v49  ;;  %v1035_v15 = vld [vmem:[#allocation5 + $0x5c0] sm:$0xff] }
 0x2b7   : > { %14777 = vmatpush1.bf16.msra.mxu1 %v14776_v19  ;;  %v933_v19 = vld [vmem:[#allocation5 + $0x290] sm:$0xff] }
 0x2b8   : > { %14779 = vmatprep.subr.bf16.mxu1 %v14778_v20  ;;  %v940_v20 = vld [vmem:[#allocation5 + $0x2c8] sm:$0xff]  ;;  %v14816_v22 = vpack.c.bf16 %v933_v19, %v927_v18  ;;  %v17291_v18 = vld [vmem:[#allocation7] sm:$0x3f] }
 0x2b9   : > { %v14818_v23 = vpack.c.bf16 %v946_v21, %v940_v20  ;;  %v17293_v19 = vld [vmem:[#allocation9] sm:$0x3f]  ;;  %v1687_v20 = vrot.slane %v17291_v18, %v17262_v43  ;;  %v1691_v21 = vrot.slane %v17291_v18, %v17244_v39 }
 0x2bb   : > { %14781 = vmatpush1.bf16.msra.mxu1 %v14780_v26  ;;  %v945_v26 = vld [vmem:[#allocation5 + $0x2f0] sm:$0xff] }
 0x2bc   : > { %14783 = vmatprep.subr.bf16.mxu1 %v14782_v27  ;;  %v952_v27 = vld [vmem:[#allocation5 + $0x328] sm:$0xff]  ;;  %v14820_v29 = vpack.c.bf16 %v945_v26, %v939_v25 }
 0x2bd   : > { %v14822_v30 = vpack.c.bf16 %v958_v28, %v952_v27  ;;  %v1729_v27 = vrot.slane %v17293_v19, %v17244_v39 }
 0x2bf   : > { %14785 = vmatpush1.bf16.msra.mxu1 %v14784_v34  ;;  %v957_v34 = vld [vmem:[#allocation5 + $0x350] sm:$0xff] }
 0x2c0   : > { %14787 = vmatprep.subr.bf16.mxu1 %v14786_v35  ;;  %v964_v35 = vld [vmem:[#allocation5 + $0x388] sm:$0xff]  ;;  %v14824_v37 = vpack.c.bf16 %v957_v34, %v951_v33  ;;  %v20277_v34 = vmov 1  }
 0x2c1   : > { %v14826_v38 = vpack.c.bf16 %v970_v36, %v964_v35  ;;  %15854 = vset.pattern.permute.xlu0 %v20277_v34  ;;  %15853 = vset.pattern.permute.xlu1 %v20277_v34 }
 0x2c3   : > { %14789 = vmatpush1.bf16.msra.mxu1 %v14788_v42  ;;  %v969_v42 = vld [vmem:[#allocation5 + $0x3b0] sm:$0xff] }
 0x2c4   : > { %14791 = vmatprep.subr.bf16.mxu1 %v14790_v44  ;;  %v976_v44 = vld [vmem:[#allocation5 + $0x3e8] sm:$0xff]  ;;  %v14828_v47 = vpack.c.bf16 %v969_v42, %v963_v41  ;;  %v1695_v41 = vrot.slane %v17291_v18, %v17271_v24 }
 0x2c5   : > { %v14830_v50 = vpack.c.bf16 %v982_v46, %v976_v44  ;;  %v1699_v44 = vrot.slane %v17291_v18, %v17247_v40  ;;  %v1733_v46 = vrot.slane %v17293_v19, %v17271_v24  ;;  %v1878_v24 = vld [vmem:[#allocation10 + $0x30] sm:$0xff] }
 0x2c6   : > { %1534 = vmatmul.mubr.f32.vlgmr.msra.gmra.mrb[2].mxu1 %v17275_v31  ;;  %v14804_v31 = vpack.c.bf16 %v897_v3, %v891_v2  ;;  %v1018_v2 = vld [vmem:[#allocation5 + $0x538] sm:$0xff] }
 0x2c7   : > { %14793 = vmatpush1.bf16.msra.mxu1 %v14792_v45  ;;  %1604 = vmatprep.mubr.f32.mxu1 %v17253_v48  ;;  %v909_v48 = vld [vmem:[#allocation5 + $0x1d0] sm:$0xff] }
 0x2c8   : > { %14795 = vmatprep.subr.bf16.mxu1 %v14794_v52  ;;  %v14808_v11 = vpack.c.bf16 %v909_v48, %v903_v7  ;;  %v981_v45 = vld [vmem:[#allocation5 + $0x410] sm:$0xff]  ;;  %v988_v52 = vld [vmem:[#allocation5 + $0x448] sm:$0xff]  ;;  %v1030_v7 = vld [vmem:[#allocation5 + $0x598] sm:$0xff] }
 0x2c9   : > { %v14832_v55 = vpack.c.bf16 %v981_v45, %v975_v51  ;;  %v14834_v56 = vpack.c.bf16 %v994_v54, %v988_v52 }
 0x2cb   : > { %14797 = vmatpush1.bf16.msra.mxu1 %v14796_v58  ;;  %v993_v58 = vld [vmem:[#allocation5 + $0x470] sm:$0xff] }
 0x2cc   : > { %14799 = vmatprep.subr.bf16.mxu1 %v14798_v59  ;;  %v1000_v59 = vld [vmem:[#allocation5 + $0x4a8] sm:$0xff]  ;;  %v14836_v61 = vpack.c.bf16 %v993_v58, %v987_v57 }
 0x2cd   : > { %v14838_v62 = vpack.c.bf16 %v1006_v60, %v1000_v59  ;;  %v1879_v60 = vld [vmem:[#allocation10 + $0x38] sm:$0xff] }
 0x2cf   : > { %14801 = vmatpush1.bf16.msra.mxu1 %v14800_v0  ;;  %v1005_v0 = vld [vmem:[#allocation5 + $0x4d0] sm:$0xff] }
 0x2d0   : > { %14803 = vmatprep.subr.bf16.mxu1 %v14802_v1  ;;  %v1012_v1 = vld [vmem:[#allocation5 + $0x508] sm:$0xff]  ;;  %v14840_v3 = vpack.c.bf16 %v1005_v0, %v999_v63  ;;  %v1881_v63 = vld [vmem:[#allocation10 + $0x48] sm:$0xff] }
 0x2d1   : > { %v14842_v4 = vpack.c.bf16 %v1018_v2, %v1012_v1  ;;  %v1882_v2 = vld [vmem:[#allocation10 + $0x50] sm:$0xff] }
 0x2d3   : > { %14805 = vmatpush1.bf16.msra.mxu1 %v14804_v31  ;;  %v1017_v31 = vld [vmem:[#allocation5 + $0x530] sm:$0xff] }
 0x2d4   : > { %14807 = vmatprep.subr.bf16.mxu1 %v14806_v6  ;;  %v1024_v6 = vld [vmem:[#allocation5 + $0x568] sm:$0xff]  ;;  %v14844_v48 = vpack.c.bf16 %v1017_v31, %v1011_v5 }
 0x2d5   : > { %v14846_v8 = vpack.c.bf16 %v1030_v7, %v1024_v6 }
 0x2d7   : > { %14809 = vmatpush1.bf16.msra.mxu1 %v14808_v11  ;;  %v1029_v11 = vld [vmem:[#allocation5 + $0x590] sm:$0xff] }
 0x2d8   : > { %14811 = vmatprep.subr.bf16.mxu1 %v14810_v12  ;;  %v1036_v12 = vld [vmem:[#allocation5 + $0x5c8] sm:$0xff]  ;;  %v14848_v14 = vpack.c.bf16 %v1029_v11, %v1023_v10 }
 0x2d9   : > { %v14850_v49 = vpack.c.bf16 %v1042_v13, %v1036_v12  ;;  %v1706_v12 = vsub.s32 5, %v17237_v32  ;;  %v17339_v13 = vld [vmem:[#allocation12 + $0x8] sm:$0xff] }
 0x2db   : > { %14813 = vmatpush1.bf16.msra.mxu1 %v14812_v16  ;;  %v1041_v16 = vld [vmem:[#allocation5 + $0x5f0] sm:$0xff] }
 0x2dc   : > { %14815 = vmatprep.subr.bf16.mxu1 %v14814_v17  ;;  %v14852_v17 = vpack.c.bf16 %v1041_v16, %v1035_v15  ;;  %v1859_v15 = vld [vmem:[#allocation10] sm:$0xff]  ;;  %v1860_v16 = vld [vmem:[#allocation10 + $0x8] sm:$0xff] }
 0x2df   : > { %14817 = vmatpush1.bf16.msra.mxu1 %v14816_v22  ;;  %v1725_v22 = vrot.slane %v17293_v19, %v17262_v43 }
 0x2e0   : > { %14819 = vmatprep.subr.bf16.mxu1 %v14818_v23 }
 0x2e3   : > { %14821 = vmatpush1.bf16.msra.mxu1 %v14820_v29 }
 0x2e4   : > { %14823 = vmatprep.subr.bf16.mxu1 %v14822_v30 }
 0x2e7   : > { %14825 = vmatpush1.bf16.msra.mxu1 %v14824_v37 }
 0x2e8   : > { %14827 = vmatprep.subr.bf16.mxu1 %v14826_v38 }
 0x2eb   : > { %14829 = vmatpush1.bf16.msra.mxu1 %v14828_v47 }
 0x2ec   : > { %14831 = vmatprep.subr.bf16.mxu1 %v14830_v50  ;;  %v1737_v50 = vrot.slane %v17293_v19, %v17247_v40  ;;  %v1702_v40 = vsub.s32 4, %v17237_v32 }
 0x2ee   : > { %v1703_v0 = vrot.slane %v17291_v18, %v1702_v40  ;;  %v1741_v31 = vrot.slane %v17293_v19, %v1702_v40 }
 0x2ef   : > { %14833 = vmatpush1.bf16.msra.mxu1 %v14832_v55 }
 0x2f0   : > { %14835 = vmatprep.subr.bf16.mxu1 %v14834_v56 }
 0x2f3   : > { %14837 = vmatpush1.bf16.msra.mxu1 %v14836_v61  ;;  %v1880_v61 = vld [vmem:[#allocation10 + $0x40] sm:$0xff] }
 0x2f4   : > { %14839 = vmatprep.subr.bf16.mxu1 %v14838_v62  ;;  %v14918_v62 = vpack.c.bf16 %v1879_v60, %v1878_v24  ;;  %v14922_v1 = vpack.c.bf16 %v1881_v63, %v1880_v61  ;;  %v2059_v24 = vld [vmem:[#allocation10 + $0x60] sm:$0xff]  ;;  %v2060_v60 = vld [vmem:[#allocation10 + $0x68] sm:$0xff] }
 0x2f5   : > { %v14942_v63 = vpack.c.bf16 %v2060_v60, %v2059_v24  ;;  %v2367_v60 = vld [vmem:[#allocation10 + $0x100] sm:$0xff] }
 0x2f7   : > { %14841 = vmatpush1.bf16.msra.mxu1 %v14840_v3  ;;  %v1883_v3 = vld [vmem:[#allocation10 + $0x58] sm:$0xff] }
 0x2f8   : > { %14843 = vmatprep.subr.bf16.mxu1 %v14842_v4 }
 0x2fb   : > { %14845 = vmatpush1.bf16.msra.mxu1 %v14844_v48  ;;  %v14926_v48 = vpack.c.bf16 %v1883_v3, %v1882_v2 }
 0x2fc   : > { %14847 = vmatprep.subr.bf16.mxu1 %v14846_v8 }
 0x2ff   : > { %14849 = vmatpush1.bf16.msra.mxu1 %v14848_v14  ;;  %v17341_v14 = vld [vmem:[#allocation12] sm:$0xff] }
 0x300   : > { %14851 = vmatprep.subr.bf16.mxu1 %v14850_v49  ;;  %v1707_v49 = vrot.slane %v17291_v18, %v1706_v12  ;;  %v20275_v18 = vmov 2  }
 0x303   : > { %14853 = vmatpush1.bf16.msra.mxu1 %v14852_v17  ;;  %v17346_v17 = vpack.c.bf16 %v1860_v16, %v1859_v15 }
 0x304   : > { %14919 = vmatprep.subr.bf16.mxu1 %v14918_v62 }
 0x306   : > { %1605 = vmatmul.mubr.f32.vlgmr.msra.gmra.mrb[4].mxu1 %v17266_v53 }
 0x307   : > { %14921 = vmatpush3.bf16.msra.mxu1 %v14918_v62 }
 0x308   : > { %14923 = vmatprep.subr.bf16.mxu1 %v14922_v1 }
 0x30b   : > { %14925 = vmatpush3.bf16.msra.mxu1 %v14922_v1  ;;  %v2062_v1 = vld [vmem:[#allocation10 + $0x78] sm:$0xff] }
 0x30c   : > { %14927 = vmatprep.subr.bf16.mxu1 %v14926_v48 }
 0x30f   : > { %14929 = vmatpush3.bf16.msra.mxu1 %v14926_v48  ;;  %v2063_v48 = vld [vmem:[#allocation10 + $0x80] sm:$0xff] }
 0x310   : > { %14931 = vmatprep.subr.bf16.mxu1 %v17346_v17 }
 0x319   : > { %v1393_v23 = vpop.f32.mrb[0].mxu1 }
 0x31a   : > { %v1714_v25 = vmul.f32 %v1687_v20, %v1393_v23  ;;  %v1395_v26 = vpop.f32.mrb[1].mxu1  ;;  %v1745_v20 = vrot.slane %v17293_v19, %v1706_v12  ;;  %v20273_v19 = vmov 3   ;;  %v2161_v12 = vld [vmem:[#allocation10 + $0x90] sm:$0xff] }
 0x31b   : > { %v1715_v53 = vmul.f32 %v1691_v21, %v1395_v26  ;;  %v16721_v21 = vmov 0   ;;  %v20267_v26 = vmov 6  }
 0x31c   : > { %v1752_v28 = vadd.f32 %v1725_v22, %v1714_v25  ;;  %v20271_v25 = vmov 4  }
 0x31d   : > { %v1753_v30 = vadd.f32 %v1729_v27, %v1715_v53  ;;  %v20265_v27 = vmov 7   ;;  %v20269_v53 = vmov 5  }
 0x31e   : > { %v1758_v29 = vmax.f32 %v1752_v28, 0.0 }
 0x31f   : > { %v1759_v43 = vmax.f32 %v1753_v30, 0.0 }
 0x320   : > { %1765 = vst.msk [vmem:[#allocation2 + $0x5] sm:$0x1] %vm1764_vm1, %v1758_v29  ;;  %1767 = vrot.lane.b32.xlu1 %v1758_v29, %s16713_s21  ;;  %1772 = vrot.lane.b32.xlu0 %v1758_v29, %s16714_s6 }
 0x324   : > { %1780 = vrot.lane.b32.xlu1 %v1759_v43, %s16715_s16  ;;  %1774 = vrot.lane.b32.xlu0 %v1759_v43, %s16714_s6 }
 0x328   : > { %1789 = vrot.lane.b32.xlu0 %v1759_v43, %s16716_s23 }
 0x32c   : > { %1784 = vrot.lane.b32.xlu0 %v1759_v43, %s16717_s8 }
 0x34a   : > { %v1677_v39 = vpop.f32.mrb[0].mxu0 }
 0x34b   : > { %v1679_v33 = vpop.f32.mrb[1].mxu0 }
 0x392   : > { %v1768_v35 = vpop.permute.xlu1 %1767  ;;  %v1773_v36 = vpop.permute.xlu0 %1772 }
 0x393   : > { %1770 = vst.msk [vmem:[#allocation2 + $0x6] sm:$0x1] %vm1764_vm1, %v1768_v35 }
 0x396   : > { %v1781_v37 = vpop.permute.xlu1 %1780  ;;  %v1775_v38 = vpop.permute.xlu0 %1774 }
 0x397   : > { %1783 = vst.msk [vmem:[#allocation2 + $0x8] sm:$0x1] %vm1764_vm1, %v1781_v37  ;;  %v1777_v42 = vsel %vm1776_vm2, %v1773_v36, %v1775_v38 }
 0x398   : > { %1779 = vst.msk [vmem:[#allocation2 + $0x7] sm:$0x1] %vm1764_vm1, %v1777_v42  ;;  %v1862_v42 = vld [vmem:[#allocation10 + $0x18] sm:$0xff] }
 0x399   : > { %v1535_v47 = vpop.f32.mrb[2].mxu1 }
 0x39a   : > { %v1716_v51 = vmul.f32 %v1695_v41, %v1535_v47  ;;  %v17324_v45 = vpop.permute.xlu0 %1789  ;;  %v1537_v52 = vpop.f32.mrb[3].mxu1  ;;  %v1861_v41 = vld [vmem:[#allocation10 + $0x10] sm:$0xff] }
 0x39b   : > { %v1717_v54 = vmul.f32 %v1699_v44, %v1537_v52  ;;  %v14934_v52 = vpack.c.bf16 %v1862_v42, %v1861_v41  ;;  %v2265_v42 = vld [vmem:[#allocation10 + $0xd0] sm:$0xff] }
 0x39c   : > { %v1754_v55 = vadd.f32 %v1733_v46, %v1716_v51 }
 0x39d   : > { %v1755_v56 = vadd.f32 %v1737_v50, %v1717_v54  ;;  %v1863_v54 = vld [vmem:[#allocation10 + $0x20] sm:$0xff] }
 0x39e   : > { %v1760_v57 = vmax.f32 %v1754_v55, 0.0  ;;  %v1785_v58 = vpop.permute.xlu0 %1784  ;;  %v1864_v55 = vld [vmem:[#allocation10 + $0x28] sm:$0xff] }
 0x39f   : > { %v1761_v59 = vmax.f32 %v1755_v56, 0.0  ;;  %1787 = vst.msk [vmem:[#allocation2 + $0x9] sm:$0x1] %vm1764_vm1, %v1785_v58  ;;  %v1865_v50 = vld [vmem:[#allocation2 + $0x1] sm:$0xff]  ;;  %v14938_v40 = vpack.c.bf16 %v1864_v55, %v1863_v54  ;;  %v2267_v55 = vld [vmem:[#allocation10 + $0xe0] sm:$0xff] }
 0x3a0   : > { %1801 = vrot.lane.b32.xlu0 %v1760_v57, %s16719_s25  ;;  %1791 = vrot.lane.b32.xlu1 %v1760_v57, %s16716_s23  ;;  %v1845_v58 = vld [vmem:[#allocation2] sm:$0xff] }
 0x3a1   : > { %1805 = vst.msk [vmem:[#allocation2 + $0xd] sm:$0x1] %vm1764_vm1, %v1761_v59 }
 0x3a4   : > { %1797 = vrot.lane.b32.xlu1 %v1760_v57, %s16720_s4  ;;  %1812 = vrot.lane.b32.xlu0 %v1761_v59, %s16714_s6 }
 0x3a8   : > { %1807 = vrot.lane.b32.xlu1 %v1761_v59, %s16713_s21 }
 0x3d9   : > { %v1606_v4 = vpop.f32.mrb[4].mxu1 }
 0x3da   : > { %v1678_v5 = vadd.f32 %v1677_v39, %v1606_v4  ;;  %v1608_v6 = vpop.f32.mrb[5].mxu1 }
 0x3db   : > { %v1680_v7 = vadd.f32 %v1679_v33, %v1608_v6  ;;  %v20263_v33 = vmov 8  }
 0x3dc   : > { %v1718_v8 = vmul.f32 %v1703_v0, %v1678_v5  ;;  %v2061_v0 = vld [vmem:[#allocation10 + $0x70] sm:$0xff] }
 0x3dd   : > { %v1719_v32 = vmul.f32 %v1707_v49, %v1680_v7  ;;  %v14946_v6 = vpack.c.bf16 %v2062_v1, %v2061_v0 }
 0x3de   : > { %v1756_v10 = vadd.f32 %v1741_v31, %v1718_v8  ;;  %v2046_v31 = vld [vmem:[#allocation2 + $0x2] sm:$0xff]  ;;  %v2064_v8 = vld [vmem:[#allocation10 + $0x88] sm:$0xff] }
 0x3df   : > { %v1757_v22 = vadd.f32 %v1745_v20, %v1719_v32  ;;  %v2164_v32 = vld [vmem:[#allocation10 + $0xa8] sm:$0xff] }
 0x3e0   : > { %v1762_v11 = vmax.f32 %v1756_v10, 0.0 }
 0x3e1   : > { %v1763_v23 = vmax.f32 %v1757_v22, 0.0 }
 0x3e2   : > { %1819 = vrot.lane.b32.xlu0 %v1762_v11, %s16715_s16  ;;  %1814 = vrot.lane.b32.xlu1 %v1762_v11, %s16714_s6 }
 0x3e6   : > { %1872 = vperm.xlu0 %15854, %v17339_v13   ;;  %1868 = vperm.xlu1 %15853, %v17341_v14  }
 0x3ea   : > { %1823 = vrot.lane.b32.xlu0 %v1762_v11, %s16717_s8  ;;  %15855 = vset.pattern.permute.xlu1 %v16721_v21 }
 0x3eb   : > { %1849 = vperm.xlu1 %15855, %v17341_v14   ;;  %15857 = vset.pattern.permute.xlu0 %v20275_v18 }
 0x3ee   : > { %2053 = vperm.xlu0 %15857, %v17339_v13  }
 0x3ef   : > { %1854 = vperm.xlu1 %15855, %v17339_v13  }
 0x3f2   : > { %1835 = vrot.lane.b32.xlu0 %v1763_v23, %s16720_s4 }
 0x3f3   : > { %15856 = vset.pattern.permute.xlu1 %v20275_v18  ;;  %15859 = vset.pattern.permute.xlu0 %v20273_v19 }
 0x3f4   : > { %2049 = vperm.xlu1 %15856, %v17341_v14  }
 0x3f6   : > { %2155 = vperm.xlu0 %15859, %v17339_v13  }
 0x3f8   : > { %1828 = vrot.lane.b32.xlu1 %v1762_v11, %s16716_s23  ;;  %v14950_v11 = vpack.c.bf16 %v2064_v8, %v2063_v48  ;;  %v2468_v48 = vld [vmem:[#allocation10 + $0x128] sm:$0xff] }
 0x3f9   : > { %15858 = vset.pattern.permute.xlu1 %v20273_v19 }
 0x3fa   : > { %15861 = vset.pattern.permute.xlu0 %v20271_v25 }
 0x3fb   : > { %2257 = vperm.xlu0 %15861, %v17339_v13  }
 0x3fc   : > { %1830 = vrot.lane.b32.xlu1 %v1763_v23, %s16716_s23 }
 0x3ff   : > { %15863 = vset.pattern.permute.xlu0 %v20267_v26 }
 0x400   : > { %2457 = vperm.xlu0 %15863, %v17341_v14   ;;  %2151 = vperm.xlu1 %15858, %v17341_v14  }
 0x404   : > { %1839 = vrot.lane.b32.xlu1 %v1763_v23, %s16719_s25  ;;  %15866 = vset.pattern.permute.xlu0 %v20265_v27 }
 0x405   : > { %15860 = vset.pattern.permute.xlu1 %v20271_v25  ;;  %2563 = vperm.xlu0 %15866, %v17339_v13  }
 0x408   : > { %2253 = vperm.xlu1 %15860, %v17341_v14  }
 0x409   : > { %15884 = vset.pattern.permute.xlu0 %v16721_v21 }
 0x40c   : > { %15862 = vset.pattern.permute.xlu1 %v20269_v53 }
 0x40d   : > { %2355 = vperm.xlu1 %15862, %v17341_v14  }
 0x411   : > { %2359 = vperm.xlu1 %15862, %v17339_v13  }
 0x412   : > { %v1802_v28 = vpop.permute.xlu0 %1801  ;;  %v1792_v29 = vpop.permute.xlu1 %1791 }
 0x413   : > { %1804 = vst.msk [vmem:[#allocation2 + $0xc] sm:$0x1] %vm1764_vm1, %v1802_v28  ;;  %v1794_v30 = vsel %vm1793_vm4, %v17324_v45, %v1792_v29 }
 0x414   : > { %1796 = vst.msk [vmem:[#allocation2 + $0xa] sm:$0x1] %vm1764_vm1, %v1794_v30  ;;  %v2165_v30 = vld [vmem:[#allocation10 + $0xb0] sm:$0xff] }
 0x415   : > { %15864 = vset.pattern.permute.xlu1 %v20267_v26 }
 0x416   : > { %v1798_v43 = vpop.permute.xlu1 %1797  ;;  %2461 = vperm.xlu1 %15864, %v17339_v13   ;;  %v1813_v35 = vpop.permute.xlu0 %1812 }
 0x417   : > { %1800 = vst.msk [vmem:[#allocation2 + $0xb] sm:$0x1] %vm1764_vm1, %v1798_v43  ;;  %v2166_v43 = vld [vmem:[#allocation10 + $0xb8] sm:$0xff] }
 0x41a   : > { %v1808_v39 = vpop.permute.xlu1 %1807  ;;  %15865 = vset.pattern.permute.xlu1 %v20265_v27 }
 0x41b   : > { %1810 = vst.msk [vmem:[#allocation2 + $0xe] sm:$0x1] %vm1764_vm1, %v1808_v39  ;;  %2559 = vperm.xlu1 %15865, %v17341_v14  }
 0x41e   : > { %v2148_v23 = vld [vmem:[#allocation2 + $0x4] sm:$0xff] }
 0x41f   : > { %15867 = vset.pattern.permute.xlu1 %v20263_v33  ;;  %v2352_v0 = vld [vmem:[#allocation2 + $0x6] sm:$0xff] }
 0x420   : > { %2661 = vperm.xlu1 %15867, %v17341_v14  }
 0x424   : > { %2665 = vperm.xlu1 %15867, %v17339_v13   ;;  %v2162_v13 = vld [vmem:[#allocation10 + $0x98] sm:$0xff] }
 0x425   : > { %v14954_v49 = vpack.c.bf16 %v2162_v13, %v2161_v12  ;;  %v2470_v12 = vld [vmem:[#allocation10 + $0x138] sm:$0xff] }
 0x428   : > { %15883 = vset.pattern.permute.xlu1 %v16721_v21 }
 0x454   : > { %v1820_v36 = vpop.permute.xlu0 %1819  ;;  %v1815_v37 = vpop.permute.xlu1 %1814 }
 0x455   : > { %1822 = vst.msk [vmem:[#allocation2 + $0x10] sm:$0x1] %vm1764_vm1, %v1820_v36  ;;  %v1816_v38 = vsel %vm1776_vm2, %v1813_v35, %v1815_v37  ;;  %v14962_v35 = vpack.c.bf16 %v2166_v43, %v2165_v30  ;;  %v2263_v36 = vld [vmem:[#allocation10 + $0xc0] sm:$0xff]  ;;  %v2264_v37 = vld [vmem:[#allocation10 + $0xc8] sm:$0xff] }
 0x456   : > { %1818 = vst.msk [vmem:[#allocation2 + $0xf] sm:$0x1] %vm1764_vm1, %v1816_v38  ;;  %v14966_v38 = vpack.c.bf16 %v2264_v37, %v2263_v36  ;;  %v2571_v43 = vld [vmem:[#allocation10 + $0x160] sm:$0xff] }
 0x45d   : > { %v17396_v46 = vld [vmem:[#allocation2 + $0x9] sm:$0xff] }
 0x45e   : > { %v17404_v3 = vld [vmem:[#allocation2 + $0x8] sm:$0xff] }
 0x465   : > { %v1873_v44 = vpop.permute.xlu0 %1872  ;;  %v1869_v47 = vpop.permute.xlu1 %1868 }
 0x466   : > { %v1876_v51 = vmul.f32 %v1873_v44, %v17396_v46  ;;  %v1875_v45 = vmul.f32 %v1869_v47, %v1865_v50  ;;  %v2266_v44 = vld [vmem:[#allocation10 + $0xd8] sm:$0xff] }
 0x468   : > { %13461 = vmatprep.mubr.msk.f32.mxu1 %vm792_vm0, %v1875_v45 }
 0x469   : > { %v1824_v56 = vpop.permute.xlu0 %1823  ;;  %13462 = vmatmul.mubr.msk.f32.vlgmr.msra.gmra.mrb[6].mxu1 %vm792_vm0, %v1876_v51  ;;  %v2250_v51 = vld [vmem:[#allocation2 + $0x5] sm:$0xff] }
 0x46a   : > { %1826 = vst.msk [vmem:[#allocation2 + $0x11] sm:$0x1] %vm1764_vm1, %v1824_v56  ;;  %14933 = vmatpush3.bf16.msra.mxu1 %v17346_v17  ;;  %v1850_v57 = vpop.permute.xlu1 %1849  ;;  %v2163_v17 = vld [vmem:[#allocation10 + $0xa0] sm:$0xff]  ;;  %v2268_v56 = vld [vmem:[#allocation10 + $0xe8] sm:$0xff] }
 0x46b   : > { %v1857_v59 = vmul.f32 %v1850_v57, %v1845_v58  ;;  %14935 = vmatprep.subr.bf16.mxu1 %v14934_v52  ;;  %v14958_v28 = vpack.c.bf16 %v2164_v32, %v2163_v17  ;;  %v14974_v57 = vpack.c.bf16 %v2268_v56, %v2267_v55  ;;  %v2365_v58 = vld [vmem:[#allocation10 + $0xf0] sm:$0xff]  ;;  %v2471_v32 = vld [vmem:[#allocation10 + $0x140] sm:$0xff]  ;;  %v2674_v55 = vld [vmem:[#allocation10 + $0x198] sm:$0xff] }
 0x46d   : > { %v2054_v61 = vpop.permute.xlu0 %2053  ;;  %13476 = vmatprep.mubr.msk.f32.mxu1 %vm792_vm0, %v1857_v59  ;;  %v2366_v59 = vld [vmem:[#allocation10 + $0xf8] sm:$0xff] }
 0x46e   : > { %14937 = vmatpush3.bf16.msra.mxu1 %v14934_v52  ;;  %v1855_v62 = vpop.permute.xlu1 %1854  ;;  %v14970_v52 = vpack.c.bf16 %v2266_v44, %v2265_v42  ;;  %v2574_v42 = vld [vmem:[#allocation10 + $0x178] sm:$0xff] }
 0x46f   : > { %14939 = vmatprep.subr.bf16.mxu1 %v14938_v40  ;;  %v1858_v4 = vmul.f32 %v1855_v62, %v17404_v3 }
 0x471   : > { %v1836_v2 = vpop.permute.xlu0 %1835  ;;  %v17410_v15 = vld [vmem:[#allocation2 + $0xa] sm:$0xff] }
 0x472   : > { %1838 = vst.msk [vmem:[#allocation2 + $0x13] sm:$0x1] %vm1764_vm1, %v1836_v2  ;;  %14941 = vmatpush3.bf16.msra.mxu1 %v14938_v40  ;;  %v2057_v20 = vmul.f32 %v2054_v61, %v17410_v15  ;;  %v14978_v40 = vpack.c.bf16 %v2366_v59, %v2365_v58  ;;  %v2368_v61 = vld [vmem:[#allocation10 + $0x108] sm:$0xff]  ;;  %v2675_v59 = vld [vmem:[#allocation10 + $0x1a0] sm:$0xff] }
 0x473   : > { %v2050_v5 = vpop.permute.xlu1 %2049  ;;  %14943 = vmatprep.subr.bf16.mxu1 %v14942_v63  ;;  %v14982_v2 = vpack.c.bf16 %v2368_v61, %v2367_v60 }
 0x474   : > { %v2056_v7 = vmul.f32 %v2050_v5, %v2046_v31  ;;  %v2369_v5 = vld [vmem:[#allocation10 + $0x110] sm:$0xff]  ;;  %v2370_v31 = vld [vmem:[#allocation10 + $0x118] sm:$0xff] }
 0x475   : > { %13477 = vmatmul.mubr.msk.f32.vlgmr.msra.gmra.mrb[6].mxu1 %vm792_vm0, %v1858_v4  ;;  %v2156_v50 = vpop.permute.xlu0 %2155 }
 0x476   : > { %14945 = vmatpush3.bf16.msra.mxu1 %v14942_v63  ;;  %13491 = vmatprep.mubr.msk.f32.mxu1 %vm792_vm0, %v2056_v7  ;;  %v2467_v7 = vld [vmem:[#allocation10 + $0x120] sm:$0xff] }
 0x477   : > { %v1829_v10 = vpop.permute.xlu1 %1828  ;;  %14947 = vmatprep.subr.bf16.mxu1 %v14946_v6  ;;  %v14990_v8 = vpack.c.bf16 %v2468_v48, %v2467_v7 }
 0x47a   : > { %14949 = vmatpush3.bf16.msra.mxu1 %v14946_v6  ;;  %v2258_v63 = vpop.permute.xlu0 %2257  ;;  %v14986_v6 = vpack.c.bf16 %v2370_v31, %v2369_v5  ;;  %v2789_v31 = vld [vmem:[#allocation16 + $0x40] sm:$0xff] }
 0x47b   : > { %v1831_v14 = vpop.permute.xlu1 %1830  ;;  %14951 = vmatprep.subr.bf16.mxu1 %v14950_v11 }
 0x47c   : > { %v1832_v16 = vsel %vm1793_vm4, %v1829_v10, %v1831_v14 }
 0x47d   : > { %1834 = vst.msk [vmem:[#allocation2 + $0x12] sm:$0x1] %vm1764_vm1, %v1832_v16 }
 0x47e   : > { %14953 = vmatpush3.bf16.msra.mxu1 %v14950_v11  ;;  %v2469_v11 = vld [vmem:[#allocation10 + $0x130] sm:$0xff] }
 0x47f   : > { %v2152_v22 = vpop.permute.xlu1 %2151  ;;  %14955 = vmatprep.subr.bf16.mxu1 %v14954_v49  ;;  %v2458_v13 = vpop.permute.xlu0 %2457  ;;  %v14994_v16 = vpack.c.bf16 %v2470_v12, %v2469_v11  ;;  %v17437_v11 = vld [vmem:[#allocation19] sm:$0xff]  ;;  %v17440_v12 = vld [vmem:[#allocation19 + $0x10] sm:$0xff] }
 0x480   : > { %v2158_v29 = vmul.f32 %v2152_v22, %v2148_v23  ;;  %v2464_v17 = vmul.f32 %v2458_v13, %v17404_v3  ;;  %v17442_v13 = vld [vmem:[#allocation19 + $0x8] sm:$0xff] }
 0x481   : > { %13492 = vmatmul.mubr.msk.f32.vlgmr.msra.gmra.mrb[6].mxu1 %vm792_vm0, %v2057_v20  ;;  %v2472_v20 = vld [vmem:[#allocation10 + $0x148] sm:$0xff] }
 0x482   : > { %14957 = vmatpush3.bf16.msra.mxu1 %v14954_v49  ;;  %13506 = vmatprep.mubr.msk.f32.mxu1 %vm792_vm0, %v2158_v29  ;;  %v14998_v23 = vpack.c.bf16 %v2472_v20, %v2471_v32  ;;  %v2570_v29 = vld [vmem:[#allocation10 + $0x158] sm:$0xff] }
 0x483   : > { %v1840_v39 = vpop.permute.xlu1 %1839  ;;  %14959 = vmatprep.subr.bf16.mxu1 %v14958_v28  ;;  %v17458_v32 = vld [vmem:[#allocation19 + $0x38] sm:$0xff] }
 0x484   : > { %1842 = vst.msk [vmem:[#allocation2 + $0x14] sm:$0x1] %vm1764_vm1, %v1840_v39  ;;  %v2149_v41 = vld [vmem:[#allocation2 + $0xc] sm:$0xff]  ;;  %v2572_v39 = vld [vmem:[#allocation10 + $0x168] sm:$0xff] }
 0x485   : > { %v2159_v45 = vmul.f32 %v2156_v50, %v2149_v41  ;;  %v15006_v37 = vpack.c.bf16 %v2572_v39, %v2571_v43  ;;  %v2573_v41 = vld [vmem:[#allocation10 + $0x170] sm:$0xff]  ;;  %v2672_v50 = vld [vmem:[#allocation10 + $0x188] sm:$0xff] }
 0x486   : > { %14961 = vmatpush3.bf16.msra.mxu1 %v14958_v28  ;;  %v2569_v28 = vld [vmem:[#allocation10 + $0x150] sm:$0xff]  ;;  %v15010_v44 = vpack.c.bf16 %v2574_v42, %v2573_v41 }
 0x487   : > { %14963 = vmatprep.subr.bf16.mxu1 %v14962_v35  ;;  %v2254_v47 = vpop.permute.xlu1 %2253  ;;  %v15002_v30 = vpack.c.bf16 %v2570_v29, %v2569_v28  ;;  %v2790_v39 = vld [vmem:[#allocation16 + $0x48] sm:$0xff]  ;;  %v2795_v41 = vld [vmem:[#allocation16 + $0x70] sm:$0xff] }
 0x488   : > { %v2260_v54 = vmul.f32 %v2254_v47, %v2250_v51  ;;  %v2671_v47 = vld [vmem:[#allocation10 + $0x180] sm:$0xff]  ;;  %v3383_v42 = vld [vmem:[#allocation3] sm:$0xff] }
 0x489   : > { %v15014_v51 = vpack.c.bf16 %v2672_v50, %v2671_v47  ;;  %v2796_v50 = vld [vmem:[#allocation16 + $0x78] sm:$0xff] }
 0x48a   : > { %14965 = vmatpush3.bf16.msra.mxu1 %v14962_v35 }
 0x48b   : > { %14967 = vmatprep.subr.bf16.mxu1 %v14966_v38  ;;  %v2251_v24 = vld [vmem:[#allocation2 + $0xd] sm:$0xff] }
 0x48c   : > { %v2356_v62 = vpop.permute.xlu1 %2355  ;;  %v2261_v1 = vmul.f32 %v2258_v63, %v2251_v24  ;;  %v2353_v14 = vld [vmem:[#allocation2 + $0xe] sm:$0xff]  ;;  %v12234_v63 = vld [vmem:[#allocation13] ss:$0 sm:$0xff] }
 0x48d   : > { %13507 = vmatmul.mubr.msk.f32.vlgmr.msra.gmra.mrb[6].mxu1 %vm792_vm0, %v2159_v45  ;;  %v2362_v4 = vmul.f32 %v2356_v62, %v2352_v0  ;;  %v2455_v36 = vld [vmem:[#allocation2 + $0x10] sm:$0xff]  ;;  %v2564_v45 = vpop.permute.xlu0 %2563 }
 0x48e   : > { %14969 = vmatpush3.bf16.msra.mxu1 %v14966_v38  ;;  %13521 = vmatprep.mubr.msk.f32.mxu1 %vm792_vm0, %v2260_v54  ;;  %v2673_v54 = vld [vmem:[#allocation10 + $0x190] sm:$0xff]  ;;  %v2659_v61 = vld [vmem:[#allocation2 + $0x12] sm:$0xff] }
 0x48f   : > { %14971 = vmatprep.subr.bf16.mxu1 %v14970_v52 }
 0x490   : > { %v2360_v10 = vpop.permute.xlu1 %2359 }
 0x491   : > { %v2363_v49 = vmul.f32 %v2360_v10, %v2353_v14  ;;  %v17446_v14 = vld [vmem:[#allocation19 + $0x18] sm:$0xff] }
 0x492   : > { %14973 = vmatpush3.bf16.msra.mxu1 %v14970_v52  ;;  %v2557_v52 = vld [vmem:[#allocation2 + $0x11] sm:$0xff] }
 0x493   : > { %14975 = vmatprep.subr.bf16.mxu1 %v14974_v57 }
 0x495   : > { %v2462_v22 = vpop.permute.xlu1 %2461 }
 0x496   : > { %14977 = vmatpush3.bf16.msra.mxu1 %v14974_v57  ;;  %v2465_v3 = vmul.f32 %v2462_v22, %v2455_v36  ;;  %v15018_v57 = vpack.c.bf16 %v2674_v55, %v2673_v54 }
 0x497   : > { %14979 = vmatprep.subr.bf16.mxu1 %v14978_v40 }
 0x499   : > { %13522 = vmatmul.mubr.msk.f32.vlgmr.msra.gmra.mrb[6].mxu1 %vm792_vm0, %v2261_v1 }
 0x49a   : > { %14981 = vmatpush3.bf16.msra.mxu1 %v14978_v40  ;;  %13536 = vmatprep.mubr.msk.f32.mxu1 %vm792_vm0, %v2362_v4  ;;  %v2560_v35 = vpop.permute.xlu1 %2559  ;;  %v2676_v40 = vld [vmem:[#allocation10 + $0x1a8] sm:$0xff] }
 0x49b   : > { %14983 = vmatprep.subr.bf16.mxu1 %v14982_v2  ;;  %v2566_v38 = vmul.f32 %v2560_v35, %v17396_v46  ;;  %v2567_v46 = vmul.f32 %v2564_v45, %v2557_v52  ;;  %v15022_v24 = vpack.c.bf16 %v2676_v40, %v2675_v59  ;;  %v2791_v35 = vld [vmem:[#allocation16 + $0x50] sm:$0xff]  ;;  %v2780_v45 = vld [vmem:[#allocation16] sm:$0xff]  ;;  %v2783_v59 = vld [vmem:[#allocation16 + $0x18] sm:$0xff] }
 0x49c   : > { %v2784_v40 = vld [vmem:[#allocation16 + $0x20] sm:$0xff] }
 0x49e   : > { %14985 = vmatpush3.bf16.msra.mxu1 %v14982_v2 }
 0x49f   : > { %14987 = vmatprep.subr.bf16.mxu1 %v14986_v6  ;;  %v2662_v56 = vpop.permute.xlu1 %2661 }
 0x4a0   : > { %v2668_v58 = vmul.f32 %v2662_v56, %v17410_v15  ;;  %v12235_v15 = vld [vmem:[#allocation15] ss:$0 sm:$0xff]  ;;  %v2781_v56 = vld [vmem:[#allocation16 + $0x8] sm:$0xff] }
 0x4a2   : > { %14989 = vmatpush3.bf16.msra.mxu1 %v14986_v6 }
 0x4a3   : > { %14991 = vmatprep.subr.bf16.mxu1 %v14990_v8  ;;  %v2666_v60 = vpop.permute.xlu1 %2665 }
 0x4a4   : > { %v2669_v62 = vmul.f32 %v2666_v60, %v2659_v61  ;;  %v2785_v60 = vld [vmem:[#allocation16 + $0x28] sm:$0xff]  ;;  %v2786_v61 = vld [vmem:[#allocation16 + $0x30] sm:$0xff] }
 0x4a5   : > { %13537 = vmatmul.mubr.msk.f32.vlgmr.msra.gmra.mrb[6].mxu1 %vm792_vm0, %v2363_v49  ;;  %v17448_v49 = vld [vmem:[#allocation19 + $0x20] sm:$0xff] }
 0x4a6   : > { %14993 = vmatpush3.bf16.msra.mxu1 %v14990_v8  ;;  %13551 = vmatprep.mubr.msk.f32.mxu1 %vm792_vm0, %v2464_v17  ;;  %v17454_v17 = vld [vmem:[#allocation19 + $0x30] sm:$0xff] }
 0x4a7   : > { %14995 = vmatprep.subr.bf16.mxu1 %v14994_v16 }
 0x4aa   : > { %14997 = vmatpush3.bf16.msra.mxu1 %v14994_v16  ;;  %v17452_v16 = vld [vmem:[#allocation19 + $0x28] sm:$0xff] }
 0x4ab   : > { %14999 = vmatprep.subr.bf16.mxu1 %v14998_v23 }
 0x4ae   : > { %15001 = vmatpush3.bf16.msra.mxu1 %v14998_v23 }
 0x4af   : > { %15003 = vmatprep.subr.bf16.mxu1 %v15002_v30 }
 0x4b1   : > { %13552 = vmatmul.mubr.msk.f32.vlgmr.msra.gmra.mrb[6].mxu1 %vm792_vm0, %v2465_v3  ;;  %v2792_v3 = vld [vmem:[#allocation16 + $0x58] sm:$0xff] }
 0x4b2   : > { %15005 = vmatpush3.bf16.msra.mxu1 %v15002_v30  ;;  %13566 = vmatprep.mubr.msk.f32.mxu1 %vm792_vm0, %v2566_v38  ;;  %v2794_v38 = vld [vmem:[#allocation16 + $0x68] sm:$0xff] }
 0x4b3   : > { %15007 = vmatprep.subr.bf16.mxu1 %v15006_v37 }
 0x4b6   : > { %15009 = vmatpush3.bf16.msra.mxu1 %v15006_v37  ;;  %v2793_v37 = vld [vmem:[#allocation16 + $0x60] sm:$0xff] }
 0x4b7   : > { %15011 = vmatprep.subr.bf16.mxu1 %v15010_v44 }
 0x4ba   : > { %15013 = vmatpush3.bf16.msra.mxu1 %v15010_v44 }
 0x4bb   : > { %15015 = vmatprep.subr.bf16.mxu1 %v15014_v51 }
 0x4bd   : > { %13567 = vmatmul.mubr.msk.f32.vlgmr.msra.gmra.mrb[6].mxu1 %vm792_vm0, %v2567_v46  ;;  %v2782_v46 = vld [vmem:[#allocation16 + $0x10] sm:$0xff] }
 0x4be   : > { %15017 = vmatpush3.bf16.msra.mxu1 %v15014_v51  ;;  %13581 = vmatprep.mubr.msk.f32.mxu1 %vm792_vm0, %v2668_v58 }
 0x4bf   : > { %15019 = vmatprep.subr.bf16.mxu1 %v15018_v57 }
 0x4c2   : > { %15021 = vmatpush3.bf16.msra.mxu1 %v15018_v57 }
 0x4c3   : > { %15023 = vmatprep.subr.bf16.mxu1 %v15022_v24 }
 0x4c6   : > { %15025 = vmatpush3.bf16.msra.mxu1 %v15022_v24 }
 0x4c9   : > { %13582 = vmatmul.mubr.msk.f32.vlgmr.msra.gmra.mrb[6].mxu1 %vm792_vm0, %v2669_v62  ;;  %v2787_v62 = vld [vmem:[#allocation16 + $0x38] sm:$0xff] }
 0x4ca   : > { %13588 = vmatprep.mubr.msk.f32.mxu1 %vm1793_vm4, %v2789_v31  ;;  %v3068_v31 = vld [vmem:[#allocation16 + $0xa0] sm:$0xff] }
 0x59c   : > { %v13583_v0 = vpop.f32.mrb[6].mxu1 }
 0x59d   : > { %v2768_v1 = vmul.f32 %v13583_v0, %v12234_v63  ;;  %v2749_v2 = vpop.f32.mrb[7].mxu1  ;;  %v3064_v0 = vld [vmem:[#allocation16 + $0x80] sm:$0xff] }
 0x59e   : > { %v2767_v4 = vmul.f32 %v12234_v63, %v2749_v2  ;;  %v3066_v2 = vld [vmem:[#allocation16 + $0x90] sm:$0xff] }
 0x59f   : > { %v2777_v5 = vadd.f32 %v12235_v15, %v2768_v1 }
 0x5a0   : > { %v2776_v6 = vadd.f32 %v12235_v15, %v2767_v4  ;;  %v3065_v15 = vld [vmem:[#allocation16 + $0x88] sm:$0xff]  ;;  %v3067_v4 = vld [vmem:[#allocation16 + $0x98] sm:$0xff] }
 0x5a1   : > { %v2779_v7 = vmax.f32 %v2777_v5, 0.0 }
 0x5a2   : > { %v2778_v48 = vmax.f32 %v2776_v6, 0.0  ;;  %v3069_v6 = vld [vmem:[#allocation16 + $0xa8] sm:$0xff] }
 0x5a4   : > { %v15873_v8 = vpack.i.bf16 %v2779_v7, %v2778_v48  ;;  %v17433_v10 = vpack.c.bf16 %v2779_v7, %v2778_v48  ;;  %v3070_v48 = vld [vmem:[#allocation16 + $0xb0] sm:$0xff] }
 0x5a6   : > { %15874 = vrot.lane.b32.xlu1 %v15873_v8, %s16713_s21  ;;  %15869 = vrot.lane.b32.xlu0 %v15873_v8, %s16729_s26 }
 0x5aa   : > { %15879 = vrot.lane.b32.xlu0 %v15873_v8, %s16730_s19  ;;  %3393 = vperm.xlu1 %15883, %v17437_v11  }
 0x5ae   : > { %3403 = vperm.xlu1 %15883, %v17440_v12   ;;  %3398 = vperm.xlu0 %15884, %v17442_v13  }
 0x5b2   : > { %3408 = vperm.xlu1 %15883, %v17446_v14   ;;  %3413 = vperm.xlu0 %15884, %v17448_v49  }
 0x5b6   : > { %3418 = vperm.xlu1 %15883, %v17452_v16   ;;  %3423 = vperm.xlu0 %15884, %v17454_v17  }
 0x5ba   : > { %3428 = vperm.xlu1 %15883, %v17458_v32   ;;  %15885 = vset.pattern.permute.xlu0 %v20275_v18 }
 0x5bb   : > { %3761 = vperm.xlu0 %15885, %v17437_v11  }
 0x5be   : > { %15886 = vset.pattern.permute.xlu1 %v20275_v18 }
 0x5bf   : > { %3765 = vperm.xlu1 %15886, %v17442_v13   ;;  %3773 = vperm.xlu0 %15885, %v17446_v14  }
 0x5c3   : > { %3769 = vperm.xlu1 %15886, %v17440_v12   ;;  %3781 = vperm.xlu0 %15885, %v17452_v16  }
 0x5c7   : > { %3777 = vperm.xlu1 %15886, %v17448_v49   ;;  %3789 = vperm.xlu0 %15885, %v17458_v32  }
 0x5cb   : > { %3785 = vperm.xlu1 %15886, %v17454_v17   ;;  %15888 = vset.pattern.permute.xlu0 %v20273_v19 }
 0x5cc   : > { %3954 = vperm.xlu0 %15888, %v17442_v13  }
 0x5cf   : > { %15887 = vset.pattern.permute.xlu1 %v20273_v19 }
 0x5d0   : > { %3950 = vperm.xlu1 %15887, %v17437_v11   ;;  %3966 = vperm.xlu0 %15888, %v17448_v49  }
 0x5d4   : > { %3958 = vperm.xlu1 %15887, %v17440_v12   ;;  %3974 = vperm.xlu0 %15888, %v17454_v17  }
 0x5d8   : > { %3962 = vperm.xlu1 %15887, %v17446_v14   ;;  %15889 = vset.pattern.permute.xlu0 %v20271_v25 }
 0x5d9   : > { %4139 = vperm.xlu0 %15889, %v17437_v11  }
 0x5dc   : > { %3970 = vperm.xlu1 %15887, %v17452_v16  }
 0x5dd   : > { %4151 = vperm.xlu0 %15889, %v17446_v14  }
 0x5e0   : > { %3978 = vperm.xlu1 %15887, %v17458_v32  }
 0x5e1   : > { %4159 = vperm.xlu0 %15889, %v17452_v16  }
 0x5e4   : > { %15890 = vset.pattern.permute.xlu1 %v20271_v25 }
 0x5e5   : > { %4143 = vperm.xlu1 %15890, %v17442_v13   ;;  %4167 = vperm.xlu0 %15889, %v17458_v32  }
 0x5e9   : > { %4147 = vperm.xlu1 %15890, %v17440_v12   ;;  %15892 = vset.pattern.permute.xlu0 %v20269_v53 }
 0x5ea   : > { %4332 = vperm.xlu0 %15892, %v17442_v13  }
 0x5ed   : > { %4155 = vperm.xlu1 %15890, %v17448_v49  }
 0x5ee   : > { %4344 = vperm.xlu0 %15892, %v17448_v49  }
 0x5f1   : > { %4163 = vperm.xlu1 %15890, %v17454_v17  }
 0x5f2   : > { %4352 = vperm.xlu0 %15892, %v17454_v17  }
 0x5f5   : > { %15891 = vset.pattern.permute.xlu1 %v20269_v53 }
 0x5f6   : > { %4328 = vperm.xlu1 %15891, %v17437_v11   ;;  %15893 = vset.pattern.permute.xlu0 %v20267_v26 }
 0x5f7   : > { %4517 = vperm.xlu0 %15893, %v17437_v11  }
 0x5fa   : > { %4336 = vperm.xlu1 %15891, %v17440_v12  }
 0x5fb   : > { %4529 = vperm.xlu0 %15893, %v17446_v14  }
 0x5fe   : > { %4340 = vperm.xlu1 %15891, %v17446_v14  }
 0x5ff   : > { %4537 = vperm.xlu0 %15893, %v17452_v16  }
 0x602   : > { %4348 = vperm.xlu1 %15891, %v17452_v16  }
 0x603   : > { %4545 = vperm.xlu0 %15893, %v17458_v32  }
 0x606   : > { %4356 = vperm.xlu1 %15891, %v17458_v32  }
 0x607   : > { %15896 = vset.pattern.permute.xlu0 %v20265_v27 }
 0x608   : > { %4710 = vperm.xlu0 %15896, %v17442_v13  }
 0x60a   : > { %15894 = vset.pattern.permute.xlu1 %v20267_v26 }
 0x60b   : > { %4521 = vperm.xlu1 %15894, %v17442_v13  }
 0x60c   : > { %4722 = vperm.xlu0 %15896, %v17448_v49  }
 0x60f   : > { %4525 = vperm.xlu1 %15894, %v17440_v12  }
 0x610   : > { %4730 = vperm.xlu0 %15896, %v17454_v17  }
 0x613   : > { %4533 = vperm.xlu1 %15894, %v17448_v49  }
 0x614   : > { %15899 = vset.pattern.permute.xlu0 %v20263_v33 }
 0x615   : > { %4899 = vperm.xlu0 %15899, %v17442_v13  }
 0x617   : > { %4541 = vperm.xlu1 %15894, %v17454_v17  }
 0x618   : > { %v15870_v20 = vpop.permute.xlu0 %15869  ;;  %v15875_v28 = vpop.permute.xlu1 %15874 }
 0x619   : > { %v15872_v22 = vunpack.i.h.bf16 %v15870_v20  ;;  %v15871_v23 = vunpack.i.l.bf16 %v15870_v20  ;;  %4911 = vperm.xlu0 %15899, %v17448_v49   ;;  %v15877_v30 = vunpack.i.h.bf16 %v15875_v28  ;;  %v15876_v43 = vunpack.i.l.bf16 %v15875_v28  ;;  %v3218_v20 = vld [vmem:[#allocation16 + $0xd0] sm:$0xff] }
 0x61b   : > { %v15026_v29 = vpack.c.bf16 %v15872_v22, %v15871_v23  ;;  %15895 = vset.pattern.permute.xlu1 %v20265_v27  ;;  %v15034_v36 = vpack.c.bf16 %v15877_v30, %v15876_v43  ;;  %v3220_v23 = vld [vmem:[#allocation16 + $0xe0] sm:$0xff]  ;;  %v3221_v30 = vld [vmem:[#allocation16 + $0xe8] sm:$0xff]  ;;  %v3222_v43 = vld [vmem:[#allocation16 + $0xf0] sm:$0xff] }
 0x61c   : > { %4706 = vperm.xlu1 %15895, %v17437_v11   ;;  %v15880_v44 = vpop.permute.xlu0 %15879 }
 0x61d   : > { %15027 = vmatprep.subr.bf16.mxu1 %v15026_v29  ;;  %15902 = vset.pattern.permute.xlu0 %v20277_v34  ;;  %v15882_v52 = vunpack.i.h.bf16 %v15880_v44  ;;  %v15881_v54 = vunpack.i.l.bf16 %v15880_v44 }
 0x61e   : > { %15029 = vmatpush3.bf16.msra.mxu1 %v15026_v29  ;;  %3451 = vperm.xlu0 %15902, %v17437_v11  }
 0x61f   : > { %15031 = vmatprep.subr.bf16.mxu1 %v17433_v10  ;;  %v15038_v57 = vpack.c.bf16 %v15882_v52, %v15881_v54 }
 0x620   : > { %4714 = vperm.xlu1 %15895, %v17440_v12  }
 0x621   : > { %13589 = vmatmul.mubr.msk.f32.vlgmr.msra.gmra.mrb[8].mxu1 %vm1793_vm4, %v2790_v39 }
 0x622   : > { %15033 = vmatpush3.bf16.msra.mxu1 %v17433_v10  ;;  %13591 = vmatprep.mubr.msk.f32.mxu1 %vm1793_vm4, %v2791_v35  ;;  %v3071_v10 = vld [vmem:[#allocation16 + $0xb8] sm:$0xff] }
 0x623   : > { %15035 = vmatprep.subr.bf16.mxu1 %v15034_v36  ;;  %3463 = vperm.xlu0 %15902, %v17446_v14   ;;  %v3223_v35 = vld [vmem:[#allocation16 + $0xf8] sm:$0xff] }
 0x624   : > { %4718 = vperm.xlu1 %15895, %v17446_v14  }
 0x625   : > { %13592 = vmatmul.mubr.msk.f32.gmra.mrb[10].mxu1 %vm1793_vm4, %v2792_v3 }
 0x626   : > { %13594 = vmatprep.mubr.msk.f32.mxu1 %vm1793_vm4, %v2793_v37 }
 0x627   : > { %3475 = vperm.xlu0 %15902, %v17454_v17  }
 0x628   : > { %4726 = vperm.xlu1 %15895, %v17452_v16  }
 0x629   : > { %13595 = vmatmul.mubr.msk.f32.gmra.mrb[12].mxu1 %vm1793_vm4, %v2794_v38  ;;  %v3394_v47 = vpop.permute.xlu1 %3393 }
 0x62a   : > { %13597 = vmatprep.mubr.msk.f32.mxu1 %vm1793_vm4, %v2795_v41  ;;  %v3431_v51 = vmul.f32 %v3394_v47, %v3383_v42 }
 0x62b   : > { %15905 = vset.pattern.permute.xlu0 %v20263_v33 }
 0x62c   : > { %4734 = vperm.xlu1 %15895, %v17458_v32   ;;  %13672 = vmatprep.mubr.msk.f32.mxu0 %vm798_vm5, %v3431_v51 }
 0x62d   : > { %13598 = vmatmul.mubr.msk.f32.gmra.mrb[14].mxu1 %vm1793_vm4, %v2796_v50  ;;  %v17560_v55 = vpop.permute.xlu0 %3398  ;;  %4923 = vperm.xlu0 %15905, %v17458_v32   ;;  %v17597_v8 = vpop.permute.xlu1 %3403 }
 0x62e   : > { %13604 = vmatprep.mubr.msk.f32.mxu1 %vm1793_vm4, %v2780_v45 }
 0x630   : > { %15897 = vset.pattern.permute.xlu1 %v20263_v33 }
 0x631   : > { %13605 = vmatmul.mubr.msk.f32.vlgmr.msra.gmra.mrb[8].mxu1 %vm1793_vm4, %v2781_v56  ;;  %4895 = vperm.xlu1 %15897, %v17437_v11   ;;  %v17567_v58 = vpop.permute.xlu0 %3413  ;;  %v3216_v11 = vld [vmem:[#allocation16 + $0xc0] sm:$0xff] }
 0x632   : > { %15037 = vmatpush3.bf16.msra.mxu1 %v15034_v36  ;;  %13607 = vmatprep.mubr.msk.f32.mxu1 %vm1793_vm4, %v2782_v46 }
 0x633   : > { %15039 = vmatprep.subr.bf16.mxu1 %v15038_v57  ;;  %15966 = vset.pattern.permute.xlu0 %v16721_v21 }
 0x635   : > { %13608 = vmatmul.mubr.msk.f32.gmra.mrb[10].mxu1 %vm1793_vm4, %v2783_v59  ;;  %15898 = vset.pattern.permute.xlu1 %v20277_v34  ;;  %v17573_v24 = vpop.permute.xlu0 %3423 }
 0x636   : > { %13610 = vmatprep.mubr.msk.f32.mxu1 %vm1793_vm4, %v2784_v40  ;;  %3455 = vperm.xlu1 %15898, %v17442_v13   ;;  %v17607_v13 = vpop.permute.xlu1 %3408 }
 0x639   : > { %13611 = vmatmul.mubr.msk.f32.gmra.mrb[12].mxu1 %vm1793_vm4, %v2785_v60 }
 0x63a   : > { %13613 = vmatprep.mubr.msk.f32.mxu1 %vm1793_vm4, %v2786_v61  ;;  %3459 = vperm.xlu1 %15898, %v17440_v12   ;;  %v17580_v63 = vpop.permute.xlu0 %3761  ;;  %v17616_v28 = vpop.permute.xlu1 %3418 }
 0x63d   : > { %13614 = vmatmul.mubr.msk.f32.gmra.mrb[14].mxu1 %vm1793_vm4, %v2787_v62 }
 0x63e   : > { %13620 = vmatprep.mubr.msk.f32.mxu1 %vm1793_vm4, %v3064_v0  ;;  %15900 = vset.pattern.permute.xlu1 %v20263_v33  ;;  %v17585_v1 = vpop.permute.xlu0 %3773 }
 0x63f   : > { %4903 = vperm.xlu1 %15900, %v17440_v12  }
 0x641   : > { %13621 = vmatmul.mubr.msk.f32.vlgmr.msra.gmra.mrb[8].mxu1 %vm1793_vm4, %v3065_v15 }
 0x642   : > { %15041 = vmatpush3.bf16.msra.mxu1 %v15038_v57  ;;  %13623 = vmatprep.mubr.msk.f32.mxu1 %vm1793_vm4, %v3066_v2  ;;  %v17590_v5 = vpop.permute.xlu0 %3781 }
 0x643   : > { %4907 = vperm.xlu1 %15900, %v17446_v14   ;;  %v3217_v14 = vld [vmem:[#allocation16 + $0xc8] sm:$0xff] }
 0x645   : > { %13624 = vmatmul.mubr.msk.f32.gmra.mrb[10].mxu1 %vm1793_vm4, %v3067_v4 }
 0x646   : > { %13626 = vmatprep.mubr.msk.f32.mxu1 %vm1793_vm4, %v3068_v31  ;;  %v17595_v7 = vpop.permute.xlu0 %3789  ;;  %v3439_v31 = vld [vmem:[#allocation18] sm:$0xff] }
 0x647   : > { %15901 = vset.pattern.permute.xlu1 %v20277_v34 }
 0x648   : > { %3467 = vperm.xlu1 %15901, %v17448_v49   ;;  %v3219_v49 = vld [vmem:[#allocation16 + $0xd8] sm:$0xff] }
 0x649   : > { %13627 = vmatmul.mubr.msk.f32.gmra.mrb[12].mxu1 %vm1793_vm4, %v3069_v6  ;;  %v3440_v6 = vld [vmem:[#allocation18 + $0x8] sm:$0xff] }
 0x64a   : > { %13629 = vmatprep.mubr.msk.f32.mxu1 %vm1793_vm4, %v3070_v48  ;;  %v3491_v48 = vld [vmem:[#allocation18 + $0x18] sm:$0xff] }
 0x64b   : > { %v17603_v12 = vpop.permute.xlu0 %3954 }
 0x64c   : > { %3471 = vperm.xlu1 %15901, %v17452_v16  }
 0x64d   : > { %13630 = vmatmul.mubr.msk.f32.gmra.mrb[14].mxu1 %vm1793_vm4, %v3071_v10  ;;  %v15046_v10 = vpack.c.bf16 %v3440_v6, %v3439_v31  ;;  %v3801_v31 = vld [vmem:[#allocation18 + $0x30] sm:$0xff]  ;;  %v3802_v6 = vld [vmem:[#allocation18 + $0x38] sm:$0xff] }
 0x64e   : > { %13636 = vmatprep.mubr.msk.f32.mxu1 %vm1793_vm4, %v3216_v11  ;;  %v3492_v11 = vld [vmem:[#allocation18 + $0x20] sm:$0xff] }
 0x64f   : > { %v17610_v22 = vpop.permute.xlu0 %3966  ;;  %15047 = vmatprep.subr.bf16.mxu0 %v15046_v10 }
 0x650   : > { %15903 = vset.pattern.permute.xlu1 %v20263_v33  ;;  %15049 = vmatpush3.bf16.msra.mxu0 %v15046_v10 }
 0x651   : > { %13637 = vmatmul.mubr.msk.f32.vlgmr.msra.gmra.mrb[8].mxu1 %vm1793_vm4, %v3217_v14  ;;  %4915 = vperm.xlu1 %15903, %v17452_v16   ;;  %v17626_v16 = vpop.permute.xlu1 %3428  ;;  %v15042_v14 = vpack.c.bf16 %v3492_v11, %v3491_v48  ;;  %v15050_v48 = vpack.c.bf16 %v3802_v6, %v3801_v31 }
 0x652   : > { %13639 = vmatprep.mubr.msk.f32.mxu1 %vm1793_vm4, %v3218_v20 }
 0x653   : > { %v17618_v29 = vpop.permute.xlu0 %3974  ;;  %15043 = vmatprep.subr.bf16.mxu1 %v15042_v14 }
 0x654   : > { %15045 = vmatpush3.bf16.msra.mxu1 %v15042_v14 }
 0x655   : > { %13640 = vmatmul.mubr.msk.f32.gmra.mrb[10].mxu1 %vm1793_vm4, %v3219_v49  ;;  %4919 = vperm.xlu1 %15903, %v17454_v17   ;;  %v17635_v17 = vpop.permute.xlu1 %3765  ;;  %v3442_v49 = vld [vmem:[#allocation3 + $0x1] sm:$0xff] }
 0x656   : > { %13642 = vmatprep.mubr.msk.f32.mxu1 %vm1793_vm4, %v3220_v23 }
 0x658   : > { %v17623_v39 = vpop.permute.xlu0 %4139 }
 0x659   : > { %13643 = vmatmul.mubr.msk.f32.gmra.mrb[12].mxu1 %vm1793_vm4, %v3221_v30  ;;  %15904 = vset.pattern.permute.xlu1 %v20277_v34  ;;  %v17641_v38 = vpop.permute.xlu1 %3769 }
 0x65a   : > { %13645 = vmatprep.mubr.msk.f32.mxu1 %vm1793_vm4, %v3222_v43  ;;  %3479 = vperm.xlu1 %15904, %v17458_v32   ;;  %v3493_v43 = vld [vmem:[#allocation18 + $0x28] sm:$0xff] }
 0x65b   : > { %13652 = vmatprep.subr.mxu1 %v3493_v43 }
 0x65c   : > { %v17631_v36 = vpop.permute.xlu0 %4151  ;;  %13653 = vmatpush3.msra.mxu1 %v3493_v43 }
 0x65d   : > { %13646 = vmatmul.mubr.msk.f32.gmra.mrb[14].mxu1 %vm1793_vm4, %v3223_v35  ;;  %v17645_v42 = vpop.permute.xlu1 %3777  ;;  %v3441_v35 = vld [vmem:[#allocation18 + $0x10] sm:$0xff] }
 0x65e   : > { %15967 = vset.pattern.permute.xlu1 %v16721_v21  ;;  %13670 = vmatprep.subr.mxu0 %v3441_v35 }
 0x65f   : > { %13671 = vmatpush3.msra.mxu0 %v3441_v35 }
 0x660   : > { %v17637_v3 = vpop.permute.xlu0 %4159  ;;  %15051 = vmatprep.subr.bf16.mxu0 %v15050_v48 }
 0x661   : > { %v17649_v32 = vpop.permute.xlu1 %3785 }
 0x664   : > { %v17639_v37 = vpop.permute.xlu0 %4167 }
 0x665   : > { %v17653_v50 = vpop.permute.xlu1 %3950 }
 0x669   : > { %v17643_v41 = vpop.permute.xlu0 %4332  ;;  %v17657_v51 = vpop.permute.xlu1 %3958 }
 0x66d   : > { %v17647_v44 = vpop.permute.xlu0 %4344  ;;  %v17661_v52 = vpop.permute.xlu1 %3962 }
 0x671   : > { %v17651_v47 = vpop.permute.xlu0 %4352  ;;  %v17665_v56 = vpop.permute.xlu1 %3970 }
 0x675   : > { %v17669_v57 = vpop.permute.xlu1 %3978 }
 0x676   : > { %v17655_v21 = vpop.permute.xlu0 %4517 }
 0x679   : > { %v17673_v40 = vpop.permute.xlu1 %4143 }
 0x67a   : > { %v17659_v45 = vpop.permute.xlu0 %4529 }
 0x67b   : > { %20342 = vst [vmem:[#allocation41_spill] sm:$0xff] %v17659_v45 }
 0x67d   : > { %v17677_v61 = vpop.permute.xlu1 %4147 }
 0x67e   : > { %v17663_v54 = vpop.permute.xlu0 %4537 }
 0x67f   : > { %20343 = vst [vmem:[#allocation42_spill] sm:$0xff] %v17663_v54 }
 0x681   : > { %v17681_v0 = vpop.permute.xlu1 %4155 }
 0x682   : > { %v17667_v46 = vpop.permute.xlu0 %4545 }
 0x683   : > { %20344 = vst [vmem:[#allocation43_spill] sm:$0xff] %v17667_v46 }
 0x685   : > { %v17685_v2 = vpop.permute.xlu1 %4163 }
 0x687   : > { %v17671_v59 = vpop.permute.xlu0 %4710 }
 0x688   : > { %20345 = vst [vmem:[#allocation44_spill] sm:$0xff] %v17671_v59  ;;  %v3803_v59 = vld [vmem:[#allocation18 + $0x40] sm:$0xff] }
 0x689   : > { %v17689_v20 = vpop.permute.xlu1 %4328 }
 0x68b   : > { %v17675_v60 = vpop.permute.xlu0 %4722 }
 0x68c   : > { %20346 = vst [vmem:[#allocation45_spill] sm:$0xff] %v17675_v60 }
 0x68d   : > { %v17692_v11 = vpop.permute.xlu1 %4336 }
 0x68f   : > { %v17679_v62 = vpop.permute.xlu0 %4730 }
 0x690   : > { %20347 = vst [vmem:[#allocation46_spill] sm:$0xff] %v17679_v62 }
 0x691   : > { %v17694_v10 = vpop.permute.xlu1 %4340 }
 0x694   : > { %v17683_v15 = vpop.permute.xlu0 %4899 }
 0x695   : > { %20348 = vst [vmem:[#allocation47_spill] sm:$0xff] %v17683_v15  ;;  %v17696_v14 = vpop.permute.xlu1 %4348 }
 0x698   : > { %v17687_v4 = vpop.permute.xlu0 %4911 }
 0x699   : > { %20349 = vst [vmem:[#allocation48_spill] sm:$0xff] %v17687_v4  ;;  %v17698_v33 = vpop.permute.xlu1 %4356 }
 0x69d   : > { %v3452_v23 = vpop.permute.xlu0 %3451 }
 0x69e   : > { %v3482_v30 = vmul.f32 %v3452_v23, %v3442_v49  ;;  %v17700_v49 = vpop.permute.xlu1 %4521 }
 0x6a0   : > { %13654 = vmatprep.mubr.msk.f32.mxu1 %vm798_vm5, %v3482_v30 }
 0x6a2   : > { %v17702_v23 = vpop.permute.xlu1 %4525 }
 0x6a6   : > { %v17704_v27 = vpop.permute.xlu1 %4533 }
 0x6a7   : > { %20350 = vst [vmem:[#allocation49_spill] sm:$0xff] %v17704_v27 }
 0x6aa   : > { %v17706_v30 = vpop.permute.xlu1 %4541 }
 0x6ab   : > { %20351 = vst [vmem:[#allocation50_spill] sm:$0xff] %v17706_v30  ;;  %v3991_v30 = vld [vmem:[#allocation18 + $0x50] sm:$0xff] }
 0x6ae   : > { %v17708_v43 = vpop.permute.xlu1 %4706 }
 0x6af   : > { %20352 = vst [vmem:[#allocation51_spill] sm:$0xff] %v17708_v43 }
 0x6b2   : > { %v17710_v35 = vpop.permute.xlu1 %4714 }
 0x6b3   : > { %20353 = vst [vmem:[#allocation52_spill] sm:$0xff] %v17710_v35 }
 0x6b6   : > { %v17712_v31 = vpop.permute.xlu1 %4718 }
 0x6b7   : > { %20354 = vst [vmem:[#allocation53_spill] sm:$0xff] %v17712_v31 }
 0x6ba   : > { %v17714_v6 = vpop.permute.xlu1 %4726 }
 0x6bb   : > { %20355 = vst [vmem:[#allocation54_spill] sm:$0xff] %v17714_v6 }
 0x6be   : > { %v17716_v26 = vpop.permute.xlu1 %4734 }
 0x6bf   : > { %20356 = vst [vmem:[#allocation55_spill] sm:$0xff] %v17716_v26 }
 0x6c2   : > { %v17718_v53 = vpop.permute.xlu1 %4895 }
 0x6c3   : > { %20357 = vst [vmem:[#allocation56_spill] sm:$0xff] %v17718_v53 }
 0x6c6   : > { %v3456_v25 = vpop.permute.xlu1 %3455 }
 0x6ca   : > { %v3460_v19 = vpop.permute.xlu1 %3459 }
 0x6ce   : > { %v17720_v18 = vpop.permute.xlu1 %4903 }
 0x6cf   : > { %20358 = vst [vmem:[#allocation57_spill] sm:$0xff] %v17720_v18 }
 0x6d2   : > { %v17722_v34 = vpop.permute.xlu1 %4907 }
 0x6d3   : > { %20359 = vst [vmem:[#allocation58_spill] sm:$0xff] %v17722_v34 }
 0x6d6   : > { %v3468_v9 = vpop.permute.xlu1 %3467 }
 0x6da   : > { %v3472_v62 = vpop.permute.xlu1 %3471 }
 0x6de   : > { %v17728_v53 = vpop.permute.xlu1 %4915 }
 0x6df   : > { %20360 = vst [vmem:[#allocation59_spill] sm:$0xff] %v17728_v53 }
 0x724   : > { %v13638_v4 = vpop.f32.mrb[8].mxu1 }
 0x725   : > { %3368 = vst.msk [vmem:[#allocation3 + $0x11] sm:$0xff] %vm798_vm5, %v13638_v4  ;;  %v3320_v15 = vpop.f32.mrb[9].mxu1 }
 0x726   : > { %3367 = vst.msk [vmem:[#allocation3 + $0x9] sm:$0xff] %vm798_vm5, %v3320_v15 }
 0x728   : > { %v13641_v60 = vpop.f32.mrb[10].mxu1 }
 0x729   : > { %3370 = vst.msk [vmem:[#allocation3 + $0x21] sm:$0xff] %vm798_vm5, %v13641_v60  ;;  %v3330_v26 = vpop.f32.mrb[11].mxu1  ;;  %v3464_v60 = vpop.permute.xlu0 %3463 }
 0x72a   : > { %3369 = vst.msk [vmem:[#allocation3 + $0x19] sm:$0xff] %vm798_vm5, %v3330_v26 }
 0x72c   : > { %v13644_v6 = vpop.f32.mrb[12].mxu1  ;;  %v17730_v18 = vld [vmem:[#allocation3 + $0x11] sm:$0xff] }
 0x72d   : > { %3372 = vst.msk [vmem:[#allocation3 + $0x31] sm:$0xff] %vm798_vm5, %v13644_v6  ;;  %v3340_v34 = vpop.f32.mrb[13].mxu1  ;;  %v17733_v31 = vld [vmem:[#allocation3 + $0x9] sm:$0xff]  ;;  %v3484_v6 = vmul.f32 %v3460_v19, %v17730_v18  ;;  %v3476_v27 = vpop.permute.xlu0 %3475 }
 0x72e   : > { %v17735_v4 = vld [vmem:[#allocation3 + $0x8] sm:$0xff]  ;;  %v17737_v35 = vld [vmem:[#allocation3 + $0x10] sm:$0xff]  ;;  %3371 = vst.msk [vmem:[#allocation3 + $0x29] sm:$0xff] %vm798_vm5, %v3340_v34  ;;  %v3483_v15 = vmul.f32 %v3456_v25, %v17733_v31  ;;  %v3990_v34 = vld [vmem:[#allocation18 + $0x48] sm:$0xff] }
 0x72f   : > { %v3432_v26 = vmul.f32 %v17560_v55, %v17735_v4  ;;  %v3433_v53 = vmul.f32 %v17597_v8, %v17737_v35  ;;  %v17757_v55 = vpop.permute.xlu1 %4919 }
 0x730   : > { %v17746_v43 = vld [vmem:[#allocation3 + $0x21] sm:$0xff]  ;;  %v13647_v46 = vpop.f32.mrb[14].mxu1  ;;  %13655 = vmatmul.mubr.msk.f32.vlgmr.msra.gmra.mrb[16].mxu1 %vm798_vm5, %v3483_v15 }
 0x731   : > { %13673 = vmatmul.mubr.msk.f32.vlgmr.msra.gmra.mrb[2].mxu0 %vm798_vm5, %v3432_v26  ;;  %v17750_v54 = vld [vmem:[#allocation3 + $0x19] sm:$0xff]  ;;  %3374 = vst.msk [vmem:[#allocation3 + $0x41] sm:$0xff] %vm798_vm5, %v13647_v46  ;;  %v3350_v25 = vpop.f32.mrb[15].mxu1  ;;  %13657 = vmatprep.mubr.msk.f32.mxu1 %vm798_vm5, %v3484_v6  ;;  %v3486_v6 = vmul.f32 %v3468_v9, %v17746_v43 }
 0x732   : > { %13675 = vmatprep.mubr.msk.f32.mxu0 %vm798_vm5, %v3433_v53  ;;  %v17755_v19 = vld [vmem:[#allocation3 + $0x18] sm:$0xff]  ;;  %v17759_v8 = vld [vmem:[#allocation3 + $0x20] sm:$0xff]  ;;  %v3485_v15 = vmul.f32 %v3464_v60, %v17750_v54  ;;  %3373 = vst.msk [vmem:[#allocation3 + $0x39] sm:$0xff] %vm798_vm5, %v3350_v25  ;;  %15053 = vmatpush3.bf16.msra.mxu0 %v15050_v48  ;;  %v15054_v53 = vpack.c.bf16 %v3991_v30, %v3990_v34 }
 0x733   : > { %v3434_v26 = vmul.f32 %v17607_v13, %v17755_v19  ;;  %v3435_v46 = vmul.f32 %v17567_v58, %v17759_v8  ;;  %13688 = vmatprep.subr.mxu0 %v3803_v59  ;;  %v3480_v25 = vpop.permute.xlu1 %3479 }
 0x734   : > { %v17768_v45 = vld [vmem:[#allocation3 + $0x31] sm:$0xff]  ;;  %13658 = vmatmul.mubr.msk.f32.gmra.mrb[18].mxu1 %vm798_vm5, %v3485_v15  ;;  %v3752_v15 = vld [vmem:[#allocation3 + $0x2] sm:$0xff] }
 0x735   : > { %13676 = vmatmul.mubr.msk.f32.gmra.mrb[4].mxu0 %vm798_vm5, %v3434_v26  ;;  %13660 = vmatprep.mubr.msk.f32.mxu1 %vm798_vm5, %v3486_v6  ;;  %v17774_v48 = vld [vmem:[#allocation3 + $0x29] sm:$0xff]  ;;  %v3488_v34 = vmul.f32 %v3476_v27, %v17768_v45 }
 0x736   : > { %13678 = vmatprep.mubr.msk.f32.mxu0 %vm798_vm5, %v3435_v46  ;;  %v17776_v13 = vld [vmem:[#allocation3 + $0x28] sm:$0xff]  ;;  %v17778_v58 = vld [vmem:[#allocation3 + $0x30] sm:$0xff]  ;;  %v3487_v9 = vmul.f32 %v3472_v62, %v17774_v48  ;;  %13689 = vmatpush3.msra.mxu0 %v3803_v59  ;;  %v3792_v59 = vmul.f32 %v17580_v63, %v3752_v15 }
 0x737   : > { %v3436_v30 = vmul.f32 %v17616_v28, %v17776_v13  ;;  %v3437_v60 = vmul.f32 %v17573_v24, %v17778_v58  ;;  %15055 = vmatprep.subr.bf16.mxu0 %v15054_v53  ;;  %v17798_v62 = vld [vmem:[#allocation3 + $0xa] sm:$0xff]  ;;  %v17802_v46 = vld [vmem:[#allocation3 + $0x12] sm:$0xff] }
 0x738   : > { %13661 = vmatmul.mubr.msk.f32.gmra.mrb[20].mxu1 %vm798_vm5, %v3487_v9  ;;  %v3793_v6 = vmul.f32 %v17635_v17, %v17798_v62  ;;  %v3992_v9 = vld [vmem:[#allocation18 + $0x58] sm:$0xff]  ;;  %v4179_v63 = vld [vmem:[#allocation18 + $0x60] sm:$0xff] }
 0x739   : > { %13679 = vmatmul.mubr.msk.f32.gmra.mrb[6].mxu0 %vm798_vm5, %v3436_v30  ;;  %v17788_v26 = vld [vmem:[#allocation3 + $0x39] sm:$0xff]  ;;  %13663 = vmatprep.mubr.msk.f32.mxu1 %vm798_vm5, %v3488_v34  ;;  %v3794_v30 = vmul.f32 %v17641_v38, %v17802_v46  ;;  %v17812_v34 = vld [vmem:[#allocation3 + $0x22] sm:$0xff]  ;;  %v17819_v38 = vld [vmem:[#allocation3 + $0x2a] sm:$0xff] }
 0x73a   : > { %13681 = vmatprep.mubr.msk.f32.mxu0 %vm798_vm5, %v3437_v60  ;;  %v17792_v28 = vld [vmem:[#allocation3 + $0x38] sm:$0xff]  ;;  %v3489_v24 = vmul.f32 %v3480_v25, %v17788_v26  ;;  %v3796_v15 = vmul.f32 %v17645_v42, %v17812_v34 }
 0x73b   : > { %v3438_v27 = vmul.f32 %v17626_v16, %v17792_v28  ;;  %v17809_v16 = vld [vmem:[#allocation3 + $0x1a] sm:$0xff] }
 0x73c   : > { %13664 = vmatmul.mubr.msk.f32.gmra.mrb[22].mxu1 %vm798_vm5, %v3489_v24  ;;  %v4180_v60 = vld [vmem:[#allocation18 + $0x68] sm:$0xff]  ;;  %v3795_v25 = vmul.f32 %v17585_v1, %v17809_v16 }
 0x73d   : > { %13682 = vmatmul.mubr.msk.f32.gmra.mrb[8].mxu0 %vm798_vm5, %v3438_v27  ;;  %v15058_v17 = vpack.c.bf16 %v4180_v60, %v4179_v63  ;;  %v17822_v24 = vld [vmem:[#allocation3 + $0x32] sm:$0xff]  ;;  %v17829_v27 = vld [vmem:[#allocation3 + $0x3a] sm:$0xff] }
 0x73e   : > { %13690 = vmatprep.mubr.msk.f32.mxu0 %vm798_vm5, %v3792_v59  ;;  %v3798_v1 = vmul.f32 %v17649_v32, %v17822_v24  ;;  %v3799_v42 = vmul.f32 %v17595_v7, %v17829_v27  ;;  %v3981_v59 = vmul.f32 %v17653_v50, %v17735_v4  ;;  %v3983_v32 = vmul.f32 %v17657_v51, %v17755_v19  ;;  %v17855_v63 = vld [vmem:[#allocation3 + $0x40] sm:$0xff]  ;;  %v4370_v60 = vld [vmem:[#allocation18 + $0x88] sm:$0xff] }
 0x73f   : > { %v3984_v7 = vmul.f32 %v17661_v52, %v17759_v8  ;;  %v3985_v4 = vmul.f32 %v17610_v22, %v17776_v13  ;;  %v3987_v51 = vmul.f32 %v17618_v29, %v17792_v28  ;;  %v3988_v22 = vmul.f32 %v17669_v57, %v17855_v63 }
 0x740   : > { %v4170_v52 = vmul.f32 %v17623_v39, %v17733_v31  ;;  %v4172_v29 = vmul.f32 %v17677_v61, %v17750_v54  ;;  %v4173_v39 = vmul.f32 %v17631_v36, %v17746_v43  ;;  %v4174_v31 = vmul.f32 %v17681_v0, %v17774_v48 }
 0x741   : > { %13691 = vmatmul.mubr.msk.f32.vlgmr.msra.gmra.mrb[2].mxu0 %vm798_vm5, %v3793_v6  ;;  %v4181_v6 = vld [vmem:[#allocation18 + $0x70] sm:$0xff]  ;;  %v4176_v61 = vmul.f32 %v17685_v2, %v17788_v26  ;;  %v4359_v0 = vmul.f32 %v17689_v20, %v17798_v62  ;;  %v4361_v2 = vmul.f32 %v17692_v11, %v17809_v16  ;;  %v4363_v62 = vmul.f32 %v17647_v44, %v17819_v38 }
 0x742   : > { %13693 = vmatprep.mubr.msk.f32.mxu0 %vm798_vm5, %v3794_v30  ;;  %15057 = vmatpush3.bf16.msra.mxu0 %v15054_v53  ;;  %v3797_v53 = vmul.f32 %v17590_v5, %v17819_v38  ;;  %v3982_v5 = vmul.f32 %v17603_v12, %v17737_v35  ;;  %v4369_v30 = vld [vmem:[#allocation18 + $0x80] sm:$0xff]  ;;  %v3986_v12 = vmul.f32 %v17665_v56, %v17778_v58  ;;  %v17905_v11 = vld [vmem:[#allocation3 + $0x42] sm:$0xff] }
 0x743   : > { %13706 = vmatprep.subr.mxu0 %v3992_v9  ;;  %v4171_v56 = vmul.f32 %v17673_v40, %v17730_v18  ;;  %v4175_v40 = vmul.f32 %v17637_v3, %v17768_v45  ;;  %v4360_v3 = vmul.f32 %v17643_v41, %v17802_v46  ;;  %v4364_v41 = vmul.f32 %v17696_v14, %v17822_v24 }
 0x744   : > { %v4366_v44 = vmul.f32 %v17905_v11, %v17698_v33  ;;  %v4549_v14 = vmul.f32 %v17700_v49, %v17755_v19  ;;  %v20361_v33 = vld [vmem:[#allocation41_spill] sm:$0xff]  ;;  %v20363_v49 = vld [vmem:[#allocation42_spill] sm:$0xff] }
 0x745   : > { %13694 = vmatmul.mubr.msk.f32.gmra.mrb[4].mxu0 %vm798_vm5, %v3795_v25  ;;  %v4557_v25 = vld [vmem:[#allocation18 + $0x90] sm:$0xff] }
 0x746   : > { %13696 = vmatprep.mubr.msk.f32.mxu0 %vm798_vm5, %v3796_v15  ;;  %13707 = vmatpush3.msra.mxu0 %v3992_v9  ;;  %v4368_v9 = vld [vmem:[#allocation18 + $0x78] sm:$0xff] }
 0x747   : > { %15059 = vmatprep.subr.bf16.mxu0 %v15058_v17  ;;  %v15062_v50 = vpack.c.bf16 %v4369_v30, %v4368_v9  ;;  %v17881_v15 = vld [vmem:[#allocation3 + $0x41] sm:$0xff] }
 0x748   : > { %v4177_v36 = vmul.f32 %v17639_v37, %v17881_v15  ;;  %v4362_v37 = vmul.f32 %v17694_v10, %v17812_v34  ;;  %v4548_v10 = vmul.f32 %v17655_v21, %v17737_v35  ;;  %v4551_v21 = vmul.f32 %v20361_v33, %v17776_v13  ;;  %v20362_v9 = vld [vmem:[#allocation49_spill] sm:$0xff]  ;;  %v20364_v19 = vld [vmem:[#allocation50_spill] sm:$0xff]  ;;  %v20365_v13 = vld [vmem:[#allocation43_spill] sm:$0xff] }
 0x749   : > { %13697 = vmatmul.mubr.msk.f32.gmra.mrb[6].mxu0 %vm798_vm5, %v3797_v53  ;;  %v4559_v53 = vld [vmem:[#allocation18 + $0xa0] sm:$0xff]  ;;  %v4552_v30 = vmul.f32 %v20362_v9, %v17778_v58 }
 0x74a   : > { %13699 = vmatprep.mubr.msk.f32.mxu0 %vm798_vm5, %v3798_v1  ;;  %v4746_v1 = vld [vmem:[#allocation18 + $0xa8] sm:$0xff]  ;;  %v20366_v58 = vld [vmem:[#allocation51_spill] sm:$0xff] }
 0x74d   : > { %13700 = vmatmul.mubr.msk.f32.gmra.mrb[8].mxu0 %vm798_vm5, %v3799_v42  ;;  %v4747_v42 = vld [vmem:[#allocation18 + $0xb0] sm:$0xff] }
 0x74e   : > { %13708 = vmatprep.mubr.msk.f32.mxu0 %vm798_vm5, %v3981_v59  ;;  %v15070_v20 = vpack.c.bf16 %v4747_v42, %v4746_v1  ;;  %v4365_v59 = vmul.f32 %v17651_v47, %v17829_v27  ;;  %v4550_v47 = vmul.f32 %v17702_v23, %v17759_v8  ;;  %v4553_v23 = vmul.f32 %v20363_v49, %v17792_v28  ;;  %v20367_v28 = vld [vmem:[#allocation44_spill] sm:$0xff] }
 0x74f   : > { %v4554_v8 = vmul.f32 %v20364_v19, %v17855_v63 }
 0x751   : > { %13709 = vmatmul.mubr.msk.f32.vlgmr.msra.gmra.mrb[2].mxu0 %vm798_vm5, %v3982_v5  ;;  %v4748_v5 = vld [vmem:[#allocation18 + $0xb8] sm:$0xff] }
 0x752   : > { %13711 = vmatprep.mubr.msk.f32.mxu0 %vm798_vm5, %v3983_v32  ;;  %15061 = vmatpush3.bf16.msra.mxu0 %v15058_v17  ;;  %v4558_v17 = vld [vmem:[#allocation18 + $0x98] sm:$0xff]  ;;  %v4935_v32 = vld [vmem:[#allocation18 + $0xc0] sm:$0xff] }
 0x753   : > { %13724 = vmatprep.subr.mxu0 %v4181_v6  ;;  %v15066_v57 = vpack.c.bf16 %v4558_v17, %v4557_v25  ;;  %v20372_v25 = vld [vmem:[#allocation46_spill] sm:$0xff] }
 0x754   : > { %v4743_v17 = vmul.f32 %v20372_v25, %v17881_v15  ;;  %v20377_v15 = vld [vmem:[#allocation58_spill] sm:$0xff] }
 0x755   : > { %13712 = vmatmul.mubr.msk.f32.gmra.mrb[4].mxu0 %vm798_vm5, %v3984_v7  ;;  %v4515_v7 = vld [vmem:[#allocation3 + $0x48] sm:$0xff] }
 0x756   : > { %13714 = vmatprep.mubr.msk.f32.mxu0 %vm798_vm5, %v3985_v4  ;;  %13725 = vmatpush3.msra.mxu0 %v4181_v6  ;;  %v4936_v6 = vld [vmem:[#allocation18 + $0xc8] sm:$0xff]  ;;  %v4737_v4 = vmul.f32 %v20366_v58, %v17730_v18 }
 0x757   : > { %15063 = vmatprep.subr.bf16.mxu0 %v15062_v50  ;;  %v15074_v35 = vpack.c.bf16 %v4936_v6, %v4935_v32  ;;  %v20370_v18 = vld [vmem:[#allocation45_spill] sm:$0xff] }
 0x759   : > { %13715 = vmatmul.mubr.msk.f32.gmra.mrb[6].mxu0 %vm798_vm5, %v3986_v12  ;;  %v4738_v12 = vmul.f32 %v20367_v28, %v17750_v54  ;;  %v20371_v54 = vld [vmem:[#allocation54_spill] sm:$0xff] }
 0x75a   : > { %13717 = vmatprep.mubr.msk.f32.mxu0 %vm798_vm5, %v3987_v51  ;;  %v20368_v51 = vld [vmem:[#allocation52_spill] sm:$0xff] }
 0x75b   : > { %v4739_v63 = vmul.f32 %v20368_v51, %v17746_v43  ;;  %v4742_v43 = vmul.f32 %v20371_v54, %v17788_v26 }
 0x75d   : > { %13718 = vmatmul.mubr.msk.f32.gmra.mrb[8].mxu0 %vm798_vm5, %v3988_v22  ;;  %v4937_v22 = vld [vmem:[#allocation18 + $0xd0] sm:$0xff] }
 0x75e   : > { %13726 = vmatprep.mubr.msk.f32.mxu0 %vm798_vm5, %v4170_v52  ;;  %v20369_v52 = vld [vmem:[#allocation53_spill] sm:$0xff] }
 0x761   : > { %13727 = vmatmul.mubr.msk.f32.vlgmr.msra.gmra.mrb[2].mxu0 %vm798_vm5, %v4171_v56  ;;  %v4740_v56 = vmul.f32 %v20369_v52, %v17774_v48  ;;  %v20373_v48 = vld [vmem:[#allocation55_spill] sm:$0xff] }
 0x762   : > { %13729 = vmatprep.mubr.msk.f32.mxu0 %vm798_vm5, %v4172_v29  ;;  %15065 = vmatpush3.bf16.msra.mxu0 %v15062_v50  ;;  %v4555_v50 = vmul.f32 %v20365_v13, %v4515_v7  ;;  %v4741_v29 = vmul.f32 %v20370_v18, %v17768_v45  ;;  %v20374_v45 = vld [vmem:[#allocation56_spill] sm:$0xff] }
 0x763   : > { %13742 = vmatprep.subr.mxu0 %v4370_v60 }
 0x765   : > { %13730 = vmatmul.mubr.msk.f32.gmra.mrb[4].mxu0 %vm798_vm5, %v4173_v39 }
 0x766   : > { %13732 = vmatprep.mubr.msk.f32.mxu0 %vm798_vm5, %v4174_v31  ;;  %13743 = vmatpush3.msra.mxu0 %v4370_v60  ;;  %v4704_v60 = vld [vmem:[#allocation3 + $0x49] sm:$0xff] }
 0x767   : > { %15067 = vmatprep.subr.bf16.mxu0 %v15066_v57  ;;  %v4744_v39 = vmul.f32 %v20373_v48, %v4704_v60  ;;  %v20375_v31 = vld [vmem:[#allocation47_spill] sm:$0xff] }
 0x768   : > { %v4927_v26 = vmul.f32 %v20375_v31, %v17809_v16  ;;  %v20379_v16 = vld [vmem:[#allocation59_spill] sm:$0xff] }
 0x769   : > { %13733 = vmatmul.mubr.msk.f32.gmra.mrb[6].mxu0 %vm798_vm5, %v4175_v40  ;;  %v20376_v40 = vld [vmem:[#allocation57_spill] sm:$0xff] }
 0x76a   : > { %13735 = vmatprep.mubr.msk.f32.mxu0 %vm798_vm5, %v4176_v61  ;;  %v4928_v61 = vmul.f32 %v20376_v40, %v17812_v34  ;;  %v4932_v34 = vmul.f32 %v17757_v55, %v17905_v11  ;;  %v12341_v55 = vld [vmem:[#allocation22] ss:$0 sm:$0xff] }
 0x76d   : > { %13736 = vmatmul.mubr.msk.f32.gmra.mrb[8].mxu0 %vm798_vm5, %v4177_v36  ;;  %v4929_v36 = vmul.f32 %v20377_v15, %v17819_v38 }
 0x76e   : > { %13744 = vmatprep.mubr.msk.f32.mxu0 %vm798_vm5, %v4359_v0  ;;  %v20378_v0 = vld [vmem:[#allocation48_spill] sm:$0xff] }
 0x771   : > { %13745 = vmatmul.mubr.msk.f32.vlgmr.msra.gmra.mrb[2].mxu0 %vm798_vm5, %v4360_v3  ;;  %v4893_v3 = vld [vmem:[#allocation3 + $0x4a] sm:$0xff] }
 0x772   : > { %13747 = vmatprep.mubr.msk.f32.mxu0 %vm798_vm5, %v4361_v2  ;;  %15069 = vmatpush3.bf16.msra.mxu0 %v15066_v57  ;;  %v4926_v57 = vmul.f32 %v20374_v45, %v17802_v46  ;;  %v4930_v46 = vmul.f32 %v20378_v0, %v17822_v24  ;;  %v4924_v2 = vpop.permute.xlu0 %4923 }
 0x773   : > { %13760 = vmatprep.subr.mxu0 %v4559_v53  ;;  %v4933_v1 = vmul.f32 %v4924_v2, %v4893_v3  ;;  %v17995_v2 = vld [vmem:[#allocation27] sm:$0xff] }
 0x775   : > { %13748 = vmatmul.mubr.msk.f32.gmra.mrb[4].mxu0 %vm798_vm5, %v4362_v37 }
 0x776   : > { %13750 = vmatprep.mubr.msk.f32.mxu0 %vm798_vm5, %v4363_v62  ;;  %13761 = vmatpush3.msra.mxu0 %v4559_v53  ;;  %v4931_v53 = vmul.f32 %v20379_v16, %v17829_v27  ;;  %v12340_v27 = vld [vmem:[#allocation21] ss:$0 sm:$0xff]  ;;  %v17998_v16 = vld [vmem:[#allocation27 + $0x18] sm:$0xff] }
 0x777   : > { %15071 = vmatprep.subr.bf16.mxu0 %v15070_v20 }
 0x779   : > { %13751 = vmatmul.mubr.msk.f32.gmra.mrb[6].mxu0 %vm798_vm5, %v4364_v41 }
 0x77a   : > { %13753 = vmatprep.mubr.msk.f32.mxu0 %vm798_vm5, %v4365_v59 }
 0x77d   : > { %13754 = vmatmul.mubr.msk.f32.gmra.mrb[8].mxu0 %vm798_vm5, %v4366_v44 }
 0x77e   : > { %13762 = vmatprep.mubr.msk.f32.mxu0 %vm798_vm5, %v4548_v10 }
 0x781   : > { %13763 = vmatmul.mubr.msk.f32.vlgmr.msra.gmra.mrb[2].mxu0 %vm798_vm5, %v4549_v14 }
 0x782   : > { %13765 = vmatprep.mubr.msk.f32.mxu0 %vm798_vm5, %v4550_v47  ;;  %15073 = vmatpush3.bf16.msra.mxu0 %v15070_v20 }
 0x783   : > { %13778 = vmatprep.subr.mxu0 %v4748_v5 }
 0x785   : > { %13766 = vmatmul.mubr.msk.f32.gmra.mrb[4].mxu0 %vm798_vm5, %v4551_v21 }
 0x786   : > { %13768 = vmatprep.mubr.msk.f32.mxu0 %vm798_vm5, %v4552_v30  ;;  %13779 = vmatpush3.msra.mxu0 %v4748_v5 }
 0x787   : > { %15075 = vmatprep.subr.bf16.mxu0 %v15074_v35 }
 0x789   : > { %13769 = vmatmul.mubr.msk.f32.gmra.mrb[6].mxu0 %vm798_vm5, %v4553_v23 }
 0x78a   : > { %13771 = vmatprep.mubr.msk.f32.mxu0 %vm798_vm5, %v4554_v8 }
 0x78d   : > { %13772 = vmatmul.mubr.msk.f32.gmra.mrb[8].mxu0 %vm798_vm5, %v4555_v50 }
 0x78e   : > { %13780 = vmatprep.mubr.msk.f32.mxu0 %vm798_vm5, %v4737_v4 }
 0x791   : > { %13781 = vmatmul.mubr.msk.f32.vlgmr.msra.gmra.mrb[2].mxu0 %vm798_vm5, %v4738_v12 }
 0x792   : > { %13783 = vmatprep.mubr.msk.f32.mxu0 %vm798_vm5, %v4739_v63  ;;  %15077 = vmatpush3.bf16.msra.mxu0 %v15074_v35 }
 0x793   : > { %13796 = vmatprep.subr.mxu0 %v4937_v22 }
 0x795   : > { %13784 = vmatmul.mubr.msk.f32.gmra.mrb[4].mxu0 %vm798_vm5, %v4740_v56 }
 0x796   : > { %13786 = vmatprep.mubr.msk.f32.mxu0 %vm798_vm5, %v4741_v29  ;;  %13797 = vmatpush3.msra.mxu0 %v4937_v22 }
 0x799   : > { %13787 = vmatmul.mubr.msk.f32.gmra.mrb[6].mxu0 %vm798_vm5, %v4742_v43 }
 0x79a   : > { %13789 = vmatprep.mubr.msk.f32.mxu0 %vm798_vm5, %v4743_v17 }
 0x79d   : > { %13790 = vmatmul.mubr.msk.f32.gmra.mrb[8].mxu0 %vm798_vm5, %v4744_v39 }
 0x79e   : > { %13798 = vmatprep.mubr.msk.f32.mxu0 %vm798_vm5, %v4926_v57 }
 0x7a1   : > { %13799 = vmatmul.mubr.msk.f32.vlgmr.msra.gmra.mrb[2].mxu0 %vm798_vm5, %v4927_v26 }
 0x7a2   : > { %13801 = vmatprep.mubr.msk.f32.mxu0 %vm798_vm5, %v4928_v61  ;;  %v5146_v61 = vld [vmem:[#allocation24 + $0x100] sm:$0xff] }
 0x7a3   : > { %13826 = vmatprep.mubr.msk.f32.mxu1 %vm5210_vm7, %v5146_v61 }
 0x7a5   : > { %13802 = vmatmul.mubr.msk.f32.gmra.mrb[4].mxu0 %vm798_vm5, %v4929_v36 }
 0x7a6   : > { %13804 = vmatprep.mubr.msk.f32.mxu0 %vm798_vm5, %v4930_v46 }
 0x7a9   : > { %13805 = vmatmul.mubr.msk.f32.gmra.mrb[6].mxu0 %vm798_vm5, %v4931_v53  ;;  %v18000_v53 = vld [vmem:[#allocation27 + $0x8] sm:$0xff] }
 0x7aa   : > { %13807 = vmatprep.mubr.msk.f32.mxu0 %vm798_vm5, %v4932_v34  ;;  %v18004_v34 = vld [vmem:[#allocation27 + $0x28] sm:$0xff] }
 0x7ad   : > { %13808 = vmatmul.mubr.msk.f32.gmra.mrb[8].mxu0 %vm798_vm5, %v4933_v1  ;;  %v18006_v1 = vld [vmem:[#allocation27 + $0x10] sm:$0xff] }
 0x803   : > { %v13656_v38 = vpop.f32.mrb[16].mxu1 }
 0x804   : > { %v3584_v24 = vpop.f32.mrb[17].mxu1 }
 0x807   : > { %v13659_v42 = vpop.f32.mrb[18].mxu1 }
 0x808   : > { %v3594_v37 = vpop.f32.mrb[19].mxu1 }
 0x80b   : > { %v13662_v20 = vpop.f32.mrb[20].mxu1 }
 0x80c   : > { %v3604_v62 = vpop.f32.mrb[21].mxu1 }
 0x80f   : > { %v13665_v41 = vpop.f32.mrb[22].mxu1 }
 0x810   : > { %v3614_v59 = vpop.f32.mrb[23].mxu1 }
 0x874   : > { %v13800_v44 = vpop.f32.mrb[2].mxu0 }
 0x875   : > { %v15198_v10 = vadd.f32 %v13800_v44, %v13656_v38  ;;  %v5028_v14 = vpop.f32.mrb[3].mxu0  ;;  %v20380_v38 = vmov 0.0   ;;  %v18102_v44 = vld [vmem:[#allocation27 + $0x50] sm:$0xff] }
 0x876   : > { %v15199_v11 = vadd.f32 %v5028_v14, %v3584_v24  ;;  %812 = vst.msk [vmem:[#allocation4] sm:$0xff] %vm811_vm8, %v20380_v38  ;;  %813 = vst.msk [vmem:[#allocation4 + $0x8] sm:$0xff] %vm811_vm8, %v20380_v38  ;;  %v18082_v24 = vld [vmem:[#allocation27 + $0x38] sm:$0xff]  ;;  %v18112_v14 = vld [vmem:[#allocation27 + $0x88] sm:$0xff] }
 0x877   : > { %v5083_v47 = vmul.f32 %v15198_v10, %v12340_v27  ;;  %814 = vst.msk [vmem:[#allocation4 + $0x10] sm:$0xff] %vm811_vm8, %v20380_v38  ;;  %815 = vst.msk [vmem:[#allocation4 + $0x18] sm:$0xff] %vm811_vm8, %v20380_v38  ;;  %v18108_v10 = vld [vmem:[#allocation27 + $0x60] sm:$0xff] }
 0x878   : > { %v5082_v5 = vmul.f32 %v15199_v11, %v12340_v27  ;;  %v13803_v32 = vpop.f32.mrb[4].mxu0  ;;  %816 = vst.msk [vmem:[#allocation4 + $0x20] sm:$0xff] %vm811_vm8, %v20380_v38  ;;  %817 = vst.msk [vmem:[#allocation4 + $0x28] sm:$0xff] %vm811_vm8, %v20380_v38  ;;  %v18118_v11 = vld [vmem:[#allocation27 + $0x98] sm:$0xff] }
 0x879   : > { %v5098_v6 = vadd.f32 %v12341_v55, %v5083_v47  ;;  %v15200_v33 = vadd.f32 %v13803_v32, %v13659_v42  ;;  %v5038_v21 = vpop.f32.mrb[5].mxu0  ;;  %818 = vst.msk [vmem:[#allocation4 + $0x30] sm:$0xff] %vm811_vm8, %v20380_v38  ;;  %819 = vst.msk [vmem:[#allocation4 + $0x38] sm:$0xff] %vm811_vm8, %v20380_v38  ;;  %v18084_v42 = vld [vmem:[#allocation27 + $0x20] sm:$0xff]  ;;  %v18126_v32 = vld [vmem:[#allocation27 + $0x90] sm:$0xff] }
 0x87a   : > { %v5097_v35 = vadd.f32 %v12341_v55, %v5082_v5  ;;  %v15201_v9 = vadd.f32 %v5038_v21, %v3594_v37  ;;  %820 = vst.msk [vmem:[#allocation4 + $0x40] sm:$0xff] %vm811_vm8, %v20380_v38  ;;  %821 = vst.msk [vmem:[#allocation4 + $0x48] sm:$0xff] %vm811_vm8, %v20380_v38  ;;  %v18088_v37 = vld [vmem:[#allocation27 + $0x48] sm:$0xff]  ;;  %v18120_v47 = vld [vmem:[#allocation27 + $0x80] sm:$0xff] }
 0x87b   : > { %v5106_v30 = vmax.f32 %v5098_v6, 0.0  ;;  %v5085_v49 = vmul.f32 %v15200_v33, %v12340_v27  ;;  %822 = vst.msk [vmem:[#allocation4 + $0x50] sm:$0xff] %vm811_vm8, %v20380_v38  ;;  %823 = vst.msk [vmem:[#allocation4 + $0x58] sm:$0xff] %vm811_vm8, %v20380_v38  ;;  %v18124_v5 = vld [vmem:[#allocation27 + $0xa8] sm:$0xff]  ;;  %v18130_v6 = vld [vmem:[#allocation27 + $0xb8] sm:$0xff] }
 0x87c   : > { %v5105_v23 = vmax.f32 %v5097_v35, 0.0  ;;  %v5084_v19 = vmul.f32 %v15201_v9, %v12340_v27  ;;  %v13806_v8 = vpop.f32.mrb[6].mxu0  ;;  %824 = vst.msk [vmem:[#allocation4 + $0x60] sm:$0xff] %vm811_vm8, %v20380_v38  ;;  %825 = vst.msk [vmem:[#allocation4 + $0x68] sm:$0xff] %vm811_vm8, %v20380_v38  ;;  %v18132_v33 = vld [vmem:[#allocation27 + $0xa0] sm:$0xff]  ;;  %v18136_v21 = vld [vmem:[#allocation27 + $0xc8] sm:$0xff] }
 0x87d   : > { %v5100_v7 = vadd.f32 %v12341_v55, %v5085_v49  ;;  %v15202_v13 = vadd.f32 %v13806_v8, %v13662_v20  ;;  %v5048_v50 = vpop.f32.mrb[7].mxu0  ;;  %826 = vst.msk [vmem:[#allocation4 + $0x70] sm:$0xff] %vm811_vm8, %v20380_v38  ;;  %827 = vst.msk [vmem:[#allocation4 + $0x78] sm:$0xff] %vm811_vm8, %v20380_v38  ;;  %v18090_v20 = vld [vmem:[#allocation27 + $0x30] sm:$0xff]  ;;  %v18142_v9 = vld [vmem:[#allocation27 + $0xd8] sm:$0xff] }
 0x87e   : > { %v5099_v58 = vadd.f32 %v12341_v55, %v5084_v19  ;;  %v15203_v4 = vadd.f32 %v5048_v50, %v3604_v62  ;;  %v15906_v28 = vpack.i.bf16 %v5106_v30, %v5105_v23  ;;  %v17982_v63 = vpack.c.bf16 %v5106_v30, %v5105_v23  ;;  %828 = vst.msk [vmem:[#allocation4 + $0x80] sm:$0xff] %vm811_vm8, %v20380_v38  ;;  %v18094_v62 = vld [vmem:[#allocation27 + $0x58] sm:$0xff]  ;;  %v18138_v35 = vld [vmem:[#allocation27 + $0xb0] sm:$0xff]  ;;  %v18144_v30 = vld [vmem:[#allocation27 + $0xc0] sm:$0xff] }
 0x87f   : > { %v5108_v12 = vmax.f32 %v5100_v7, 0.0  ;;  %v5087_v51 = vmul.f32 %v15202_v13, %v12340_v27  ;;  %829 = vst.msk [vmem:[#allocation4 + $0x88] sm:$0xff] %vm811_vm8, %v20380_v38  ;;  %830 = vst.msk [vmem:[#allocation4 + $0x90] sm:$0xff] %vm811_vm8, %v20380_v38  ;;  %v18148_v49 = vld [vmem:[#allocation27 + $0xe8] sm:$0xff]  ;;  %v18150_v23 = vld [vmem:[#allocation27 + $0xd0] sm:$0xff]  ;;  %v20381_v13 = vmov 1  }
 0x880   : > { %v5107_v22 = vmax.f32 %v5099_v58, 0.0  ;;  %v5086_v52 = vmul.f32 %v15203_v4, %v12340_v27  ;;  %15907 = vrot.lane.b32.xlu1 %v15906_v28, %s16731_s27  ;;  %v13809_v56 = vpop.f32.mrb[8].mxu0  ;;  %831 = vst.msk [vmem:[#allocation4 + $0x98] sm:$0xff] %vm811_vm8, %v20380_v38  ;;  %832 = vst.msk [vmem:[#allocation4 + $0xa0] sm:$0xff] %vm811_vm8, %v20380_v38  ;;  %v18154_v19 = vld [vmem:[#allocation27 + $0xf8] sm:$0xff]  ;;  %v18156_v8 = vld [vmem:[#allocation27 + $0xe0] sm:$0xff] }
 0x881   : > { %v5102_v18 = vadd.f32 %v12341_v55, %v5087_v51  ;;  %v15204_v29 = vadd.f32 %v13809_v56, %v13665_v41  ;;  %v5058_v54 = vpop.f32.mrb[9].mxu0  ;;  %833 = vst.msk [vmem:[#allocation4 + $0xa8] sm:$0xff] %vm811_vm8, %v20380_v38  ;;  %834 = vst.msk [vmem:[#allocation4 + $0xb0] sm:$0xff] %vm811_vm8, %v20380_v38  ;;  %v18096_v41 = vld [vmem:[#allocation27 + $0x40] sm:$0xff]  ;;  %v18160_v7 = vld [vmem:[#allocation27 + $0xf0] sm:$0xff] }
 0x882   : > { %v5101_v43 = vadd.f32 %v12341_v55, %v5086_v52  ;;  %v15205_v60 = vadd.f32 %v5058_v54, %v3614_v59  ;;  %v15911_v25 = vpack.i.bf16 %v5108_v12, %v5107_v22  ;;  %v17984_v39 = vpack.c.bf16 %v5108_v12, %v5107_v22  ;;  %835 = vst.msk [vmem:[#allocation4 + $0xb8] sm:$0xff] %vm811_vm8, %v20380_v38  ;;  %v18100_v59 = vld [vmem:[#allocation27 + $0x68] sm:$0xff] }
 0x883   : > { %v5110_v17 = vmax.f32 %v5102_v18, 0.0  ;;  %v5089_v48 = vmul.f32 %v15204_v29, %v12340_v27  ;;  %836 = vst.msk [vmem:[#allocation4 + $0xc0] sm:$0xff] %vm811_vm8, %v20380_v38  ;;  %837 = vst.msk [vmem:[#allocation4 + $0xc8] sm:$0xff] %vm811_vm8, %v20380_v38 }
 0x884   : > { %v5109_v45 = vmax.f32 %v5101_v43, 0.0  ;;  %v5088_v57 = vmul.f32 %v15205_v60, %v12340_v27  ;;  %15912 = vrot.lane.b32.xlu1 %v15911_v25, %s16731_s27  ;;  %838 = vst.msk [vmem:[#allocation4 + $0xd0] sm:$0xff] %vm811_vm8, %v20380_v38  ;;  %839 = vst.msk [vmem:[#allocation4 + $0xd8] sm:$0xff] %vm811_vm8, %v20380_v38  ;;  %v18106_v27 = vld [vmem:[#allocation27 + $0x78] sm:$0xff] }
 0x885   : > { %v5104_v31 = vadd.f32 %v12341_v55, %v5089_v48  ;;  %840 = vst.msk [vmem:[#allocation4 + $0xe0] sm:$0xff] %vm811_vm8, %v20380_v38  ;;  %841 = vst.msk [vmem:[#allocation4 + $0xe8] sm:$0xff] %vm811_vm8, %v20380_v38  ;;  %v5147_v48 = vld [vmem:[#allocation24 + $0x108] sm:$0xff] }
 0x886   : > { %v5103_v26 = vadd.f32 %v12341_v55, %v5088_v57  ;;  %v15916_v40 = vpack.i.bf16 %v5110_v17, %v5109_v45  ;;  %v17986_v36 = vpack.c.bf16 %v5110_v17, %v5109_v45  ;;  %842 = vst.msk [vmem:[#allocation4 + $0xf0] sm:$0xff] %vm811_vm8, %v20380_v38  ;;  %843 = vst.msk [vmem:[#allocation4 + $0xf8] sm:$0xff] %vm811_vm8, %v20380_v38  ;;  %v18114_v55 = vld [vmem:[#allocation27 + $0x70] sm:$0xff]  ;;  %v5148_v57 = vld [vmem:[#allocation24 + $0x110] sm:$0xff] }
 0x887   : > { %v5112_v15 = vmax.f32 %v5104_v31, 0.0  ;;  %844 = vst.msk [vmem:[#allocation4 + $0x100] sm:$0xff] %vm811_vm8, %v20380_v38  ;;  %845 = vst.msk [vmem:[#allocation4 + $0x108] sm:$0xff] %vm811_vm8, %v20380_v38  ;;  %v5149_v31 = vld [vmem:[#allocation24 + $0x118] sm:$0xff] }
 0x888   : > { %v5111_v0 = vmax.f32 %v5103_v26, 0.0  ;;  %15917 = vrot.lane.b32.xlu0 %v15916_v40, %s16731_s27  ;;  %846 = vst.msk [vmem:[#allocation4 + $0x110] sm:$0xff] %vm811_vm8, %v20380_v38  ;;  %847 = vst.msk [vmem:[#allocation4 + $0x118] sm:$0xff] %vm811_vm8, %v20380_v38 }
 0x889   : > { %849 = vst.msk [vmem:[#allocation4 + $0x120] sm:$0x3] %vm848_vm12, %v20380_v38 }
 0x88a   : > { %v15921_v46 = vpack.i.bf16 %v5112_v15, %v5111_v0  ;;  %v17989_v3 = vpack.c.bf16 %v5112_v15, %v5111_v0  ;;  %v5152_v15 = vld [vmem:[#allocation24 + $0x130] sm:$0xff] }
 0x88c   : > { %15927 = vrot.lane.b32.xlu0 %v15906_v28, %s16729_s26  ;;  %15922 = vrot.lane.b32.xlu1 %v15921_v46, %s16731_s27 }
 0x890   : > { %15937 = vrot.lane.b32.xlu0 %v15916_v40, %s16729_s26  ;;  %15932 = vrot.lane.b32.xlu1 %v15911_v25, %s16729_s26 }
 0x894   : > { %15947 = vrot.lane.b32.xlu0 %v15906_v28, %s16732_s1  ;;  %15942 = vrot.lane.b32.xlu1 %v15921_v46, %s16729_s26 }
 0x898   : > { %15957 = vrot.lane.b32.xlu0 %v15916_v40, %s16732_s1  ;;  %15952 = vrot.lane.b32.xlu1 %v15911_v25, %s16732_s1  ;;  %v5150_v40 = vld [vmem:[#allocation24 + $0x120] sm:$0xff] }
 0x89c   : > { %6771 = vperm.xlu0 %15966, %v17995_v2   ;;  %15962 = vrot.lane.b32.xlu1 %v15921_v46, %s16732_s1 }
 0x8a0   : > { %6786 = vperm.xlu0 %15966, %v17998_v16   ;;  %6776 = vperm.xlu1 %15967, %v18000_v53  }
 0x8a4   : > { %6796 = vperm.xlu0 %15966, %v18004_v34   ;;  %6781 = vperm.xlu1 %15967, %v18006_v1  }
 0x8a8   : > { %6806 = vperm.xlu0 %15966, %v18082_v24   ;;  %6791 = vperm.xlu1 %15967, %v18084_v42  }
 0x8ac   : > { %6816 = vperm.xlu0 %15966, %v18088_v37   ;;  %6801 = vperm.xlu1 %15967, %v18090_v20  }
 0x8b0   : > { %6826 = vperm.xlu0 %15966, %v18094_v62   ;;  %6811 = vperm.xlu1 %15967, %v18096_v41  }
 0x8b4   : > { %6836 = vperm.xlu0 %15966, %v18100_v59   ;;  %6821 = vperm.xlu1 %15967, %v18102_v44  }
 0x8b8   : > { %6846 = vperm.xlu0 %15966, %v18106_v27   ;;  %6831 = vperm.xlu1 %15967, %v18108_v10  }
 0x8bc   : > { %6856 = vperm.xlu0 %15966, %v18112_v14   ;;  %6841 = vperm.xlu1 %15967, %v18114_v55  }
 0x8c0   : > { %6866 = vperm.xlu0 %15966, %v18118_v11   ;;  %6851 = vperm.xlu1 %15967, %v18120_v47  }
 0x8c4   : > { %6876 = vperm.xlu0 %15966, %v18124_v5   ;;  %6861 = vperm.xlu1 %15967, %v18126_v32  }
 0x8c8   : > { %6886 = vperm.xlu0 %15966, %v18130_v6   ;;  %6871 = vperm.xlu1 %15967, %v18132_v33  }
 0x8cc   : > { %6896 = vperm.xlu0 %15966, %v18136_v21   ;;  %6881 = vperm.xlu1 %15967, %v18138_v35  }
 0x8d0   : > { %6906 = vperm.xlu0 %15966, %v18142_v9   ;;  %6891 = vperm.xlu1 %15967, %v18144_v30  }
 0x8d4   : > { %6916 = vperm.xlu0 %15966, %v18148_v49   ;;  %6901 = vperm.xlu1 %15967, %v18150_v23  }
 0x8d8   : > { %6926 = vperm.xlu0 %15966, %v18154_v19   ;;  %6911 = vperm.xlu1 %15967, %v18156_v8  }
 0x8dc   : > { %15969 = vset.pattern.permute.xlu0 %v20381_v13  ;;  %6921 = vperm.xlu1 %15967, %v18160_v7  }
 0x8dd   : > { %7000 = vperm.xlu0 %15969, %v18000_v53  }
 0x8e0   : > { %15968 = vset.pattern.permute.xlu1 %v20381_v13 }
 0x8e1   : > { %7012 = vperm.xlu0 %15969, %v18084_v42   ;;  %6996 = vperm.xlu1 %15968, %v17995_v2  }
 0x8e5   : > { %7020 = vperm.xlu0 %15969, %v18090_v20   ;;  %7004 = vperm.xlu1 %15968, %v18006_v1  }
 0x8e9   : > { %7028 = vperm.xlu0 %15969, %v18096_v41   ;;  %7008 = vperm.xlu1 %15968, %v17998_v16  }
 0x8ed   : > { %7036 = vperm.xlu0 %15969, %v18102_v44   ;;  %7016 = vperm.xlu1 %15968, %v18004_v34  }
 0x8f1   : > { %7044 = vperm.xlu0 %15969, %v18108_v10   ;;  %7024 = vperm.xlu1 %15968, %v18082_v24  }
 0x8f2   : > { %v15908_v50 = vpop.permute.xlu1 %15907 }
 0x8f3   : > { %v15910_v58 = vunpack.i.h.bf16 %v15908_v50  ;;  %v15909_v4 = vunpack.i.l.bf16 %v15908_v50 }
 0x8f5   : > { %7052 = vperm.xlu0 %15969, %v18114_v55   ;;  %7032 = vperm.xlu1 %15968, %v18088_v37   ;;  %v15078_v28 = vpack.c.bf16 %v15910_v58, %v15909_v4  ;;  %v5154_v58 = vld [vmem:[#allocation24 + $0x140] sm:$0xff] }
 0x8f6   : > { %v15913_v12 = vpop.permute.xlu1 %15912 }
 0x8f7   : > { %v15915_v51 = vunpack.i.h.bf16 %v15913_v12  ;;  %v15914_v22 = vunpack.i.l.bf16 %v15913_v12  ;;  %15079 = vmatprep.subr.bf16.mxu1 %v15078_v28  ;;  %v5156_v12 = vld [vmem:[#allocation24 + $0x150] sm:$0xff] }
 0x8f8   : > { %15081 = vmatpush3.bf16.msra.mxu1 %v15078_v28 }
 0x8f9   : > { %7060 = vperm.xlu0 %15969, %v18120_v47   ;;  %7040 = vperm.xlu1 %15968, %v18094_v62   ;;  %v15082_v52 = vpack.c.bf16 %v15915_v51, %v15914_v22  ;;  %v20382_v22 = vmov 2  }
 0x8fa   : > { %v15918_v56 = vpop.permute.xlu0 %15917 }
 0x8fb   : > { %v15920_v18 = vunpack.i.h.bf16 %v15918_v56  ;;  %v15919_v29 = vunpack.i.l.bf16 %v15918_v56  ;;  %15083 = vmatprep.subr.bf16.mxu1 %v15082_v52 }
 0x8fc   : > { %15085 = vmatpush3.bf16.msra.mxu1 %v15082_v52  ;;  %v5158_v52 = vld [vmem:[#allocation24 + $0x160] sm:$0xff] }
 0x8fd   : > { %7068 = vperm.xlu0 %15969, %v18126_v32   ;;  %7048 = vperm.xlu1 %15968, %v18100_v59   ;;  %v15086_v54 = vpack.c.bf16 %v15920_v18, %v15919_v29  ;;  %v5159_v29 = vld [vmem:[#allocation24 + $0x168] sm:$0xff] }
 0x8fe   : > { %v15923_v43 = vpop.permute.xlu1 %15922  ;;  %v15928_v45 = vpop.permute.xlu0 %15927 }
 0x8ff   : > { %v15925_v60 = vunpack.i.h.bf16 %v15923_v43  ;;  %v15924_v25 = vunpack.i.l.bf16 %v15923_v43  ;;  %15087 = vmatprep.subr.bf16.mxu1 %v15086_v54  ;;  %v15930_v46 = vunpack.i.h.bf16 %v15928_v45  ;;  %v15929_v13 = vunpack.i.l.bf16 %v15928_v45 }
 0x900   : > { %15089 = vmatpush3.bf16.msra.mxu1 %v15086_v54  ;;  %v5160_v54 = vld [vmem:[#allocation24 + $0x170] sm:$0xff] }
 0x901   : > { %7076 = vperm.xlu0 %15969, %v18132_v33   ;;  %7056 = vperm.xlu1 %15968, %v18106_v27   ;;  %v15090_v17 = vpack.c.bf16 %v15925_v60, %v15924_v25  ;;  %v18215_v4 = vpack.c.bf16 %v15930_v46, %v15929_v13  ;;  %v5161_v25 = vld [vmem:[#allocation24 + $0x178] sm:$0xff]  ;;  %v5166_v46 = vld [vmem:[#allocation24 + $0x1a0] sm:$0xff] }
 0x902   : > { %v18190_v26 = vpop.permute.xlu1 %15932  ;;  %v18195_v61 = vpop.permute.xlu0 %15937 }
 0x903   : > { %15091 = vmatprep.subr.bf16.mxu1 %v15090_v17 }
 0x904   : > { %15093 = vmatpush3.bf16.msra.mxu1 %v15090_v17  ;;  %v5162_v17 = vld [vmem:[#allocation24 + $0x180] sm:$0xff] }
 0x905   : > { %7084 = vperm.xlu0 %15969, %v18138_v35   ;;  %7064 = vperm.xlu1 %15968, %v18112_v14  }
 0x906   : > { %15095 = vmatprep.subr.bf16.mxu1 %v17982_v63  ;;  %v18203_v0 = vpop.permute.xlu1 %15942  ;;  %v18208_v50 = vpop.permute.xlu0 %15947 }
 0x907   : > { %13827 = vmatmul.mubr.msk.f32.vlgmr.msra.gmra.mrb[24].mxu1 %vm5210_vm7, %v5147_v48 }
 0x908   : > { %15097 = vmatpush3.bf16.msra.mxu1 %v17982_v63  ;;  %13829 = vmatprep.mubr.msk.f32.mxu1 %vm5210_vm7, %v5148_v57  ;;  %v5151_v63 = vld [vmem:[#allocation24 + $0x128] sm:$0xff] }
 0x909   : > { %7092 = vperm.xlu0 %15969, %v18144_v30   ;;  %7072 = vperm.xlu1 %15968, %v18118_v11   ;;  %v5163_v57 = vld [vmem:[#allocation24 + $0x188] sm:$0xff] }
 0x90a   : > { %15099 = vmatprep.subr.bf16.mxu1 %v17984_v39  ;;  %v18218_v28 = vpop.permute.xlu1 %15952  ;;  %v18223_v51 = vpop.permute.xlu0 %15957 }
 0x90b   : > { %13830 = vmatmul.mubr.msk.f32.gmra.mrb[26].mxu1 %vm5210_vm7, %v5149_v31  ;;  %v5164_v31 = vld [vmem:[#allocation24 + $0x190] sm:$0xff] }
 0x90c   : > { %15101 = vmatpush3.bf16.msra.mxu1 %v17984_v39  ;;  %13832 = vmatprep.mubr.msk.f32.mxu1 %vm5210_vm7, %v5150_v40  ;;  %v5153_v39 = vld [vmem:[#allocation24 + $0x138] sm:$0xff] }
 0x90d   : > { %7100 = vperm.xlu0 %15969, %v18150_v23   ;;  %7080 = vperm.xlu1 %15968, %v18124_v5  }
 0x90e   : > { %15103 = vmatprep.subr.bf16.mxu1 %v17986_v36  ;;  %v18230_v56 = vpop.permute.xlu1 %15962 }
 0x90f   : > { %13833 = vmatmul.mubr.msk.f32.gmra.mrb[28].mxu1 %vm5210_vm7, %v5151_v63 }
 0x910   : > { %15105 = vmatpush3.bf16.msra.mxu1 %v17986_v36  ;;  %13835 = vmatprep.mubr.msk.f32.mxu1 %vm5210_vm7, %v5152_v15  ;;  %v5155_v36 = vld [vmem:[#allocation24 + $0x148] sm:$0xff]  ;;  %v5165_v15 = vld [vmem:[#allocation24 + $0x198] sm:$0xff] }
 0x911   : > { %7108 = vperm.xlu0 %15969, %v18156_v8   ;;  %7088 = vperm.xlu1 %15968, %v18130_v6  }
 0x912   : > { %15107 = vmatprep.subr.bf16.mxu1 %v17989_v3 }
 0x913   : > { %13836 = vmatmul.mubr.msk.f32.gmra.mrb[30].mxu1 %vm5210_vm7, %v5153_v39 }
 0x914   : > { %15109 = vmatpush3.bf16.msra.mxu1 %v17989_v3  ;;  %13838 = vmatprep.mubr.msk.f32.mxu1 %vm5210_vm7, %v5154_v58  ;;  %v5157_v3 = vld [vmem:[#allocation24 + $0x158] sm:$0xff]  ;;  %v5167_v58 = vld [vmem:[#allocation24 + $0x1a8] sm:$0xff] }
 0x915   : > { %7116 = vperm.xlu0 %15969, %v18160_v7   ;;  %7096 = vperm.xlu1 %15968, %v18136_v21  }
 0x916   : > { %15111 = vmatprep.subr.bf16.mxu1 %v18215_v4 }
 0x917   : > { %13839 = vmatmul.mubr.msk.f32.gmra.mrb[32].mxu1 %vm5210_vm7, %v5155_v36  ;;  %v5168_v36 = vld [vmem:[#allocation24 + $0x1b0] sm:$0xff] }
 0x918   : > { %13841 = vmatprep.mubr.msk.f32.mxu1 %vm5210_vm7, %v5156_v12 }
 0x919   : > { %15970 = vset.pattern.permute.xlu0 %v20382_v22  ;;  %7104 = vperm.xlu1 %15968, %v18142_v9  }
 0x91a   : > { %7840 = vperm.xlu0 %15970, %v17995_v2  }
 0x91b   : > { %13842 = vmatmul.mubr.msk.f32.gmra.mrb[34].mxu1 %vm5210_vm7, %v5157_v3  ;;  %v18233_v18 = vpop.permute.xlu0 %6771 }
 0x91c   : > { %20383 = vst [vmem:[#allocation41_spill] sm:$0xff] %v18233_v18  ;;  %13844 = vmatprep.mubr.msk.f32.mxu1 %vm5210_vm7, %v5158_v52  ;;  %v5170_v52 = vld [vmem:[#allocation24 + $0x1c0] sm:$0xff]  ;;  %v7157_v18 = vld [vmem:[#allocation25 + $0x18] sm:$0xf] }
 0x91d   : > { %7112 = vperm.xlu1 %15968, %v18148_v49  }
 0x91e   : > { %7852 = vperm.xlu0 %15970, %v17998_v16  }
 0x91f   : > { %13845 = vmatmul.mubr.msk.f32.gmra.mrb[36].mxu1 %vm5210_vm7, %v5159_v29  ;;  %v18239_v43 = vpop.permute.xlu1 %6776  ;;  %v18241_v60 = vpop.permute.xlu0 %6786 }
 0x920   : > { %20384 = vst [vmem:[#allocation49_spill] sm:$0xff] %v18239_v43  ;;  %20385 = vst [vmem:[#allocation42_spill] sm:$0xff] %v18241_v60  ;;  %13847 = vmatprep.mubr.msk.f32.mxu1 %vm5210_vm7, %v5160_v54  ;;  %v6294_v60 = vld [vmem:[#allocation24 + $0x3f0] sm:$0xff] }
 0x921   : > { %7120 = vperm.xlu1 %15968, %v18154_v19   ;;  %v6964_v43 = vld [vmem:[#allocation4 + $0x9] sm:$0xff] }
 0x922   : > { %7860 = vperm.xlu0 %15970, %v18004_v34  }
 0x923   : > { %13848 = vmatmul.mubr.msk.f32.gmra.mrb[38].mxu1 %vm5210_vm7, %v5161_v25  ;;  %v18247_v48 = vpop.permute.xlu1 %6781  ;;  %v18249_v45 = vpop.permute.xlu0 %6796  ;;  %v5171_v25 = vld [vmem:[#allocation24 + $0x1c8] sm:$0xff] }
 0x924   : > { %20386 = vst [vmem:[#allocation50_spill] sm:$0xff] %v18247_v48  ;;  %20387 = vst [vmem:[#allocation43_spill] sm:$0xff] %v18249_v45  ;;  %13850 = vmatprep.mubr.msk.f32.mxu1 %vm5210_vm7, %v5162_v17  ;;  %v5172_v17 = vld [vmem:[#allocation24 + $0x1d0] sm:$0xff] }
 0x925   : > { %15971 = vset.pattern.permute.xlu1 %v20382_v22  ;;  %v5169_v22 = vld [vmem:[#allocation24 + $0x1b8] sm:$0xff] }
 0x926   : > { %7868 = vperm.xlu0 %15970, %v18082_v24   ;;  %7844 = vperm.xlu1 %15971, %v18000_v53  }
 0x927   : > { %13851 = vmatmul.mubr.msk.f32.gmra.mrb[40].mxu1 %vm5210_vm7, %v5163_v57  ;;  %v18256_v40 = vpop.permute.xlu1 %6791  ;;  %v18258_v63 = vpop.permute.xlu0 %6806 }
 0x928   : > { %20388 = vst [vmem:[#allocation51_spill] sm:$0xff] %v18256_v40  ;;  %20389 = vst [vmem:[#allocation44_spill] sm:$0xff] %v18258_v63  ;;  %13853 = vmatprep.mubr.msk.f32.mxu1 %vm5210_vm7, %v5164_v31  ;;  %v6292_v40 = vld [vmem:[#allocation24 + $0x3e0] sm:$0xff] }
 0x92a   : > { %7876 = vperm.xlu0 %15970, %v18088_v37   ;;  %7848 = vperm.xlu1 %15971, %v18006_v1  }
 0x92b   : > { %13854 = vmatmul.mubr.msk.f32.gmra.mrb[42].mxu1 %vm5210_vm7, %v5165_v15  ;;  %v18264_v13 = vpop.permute.xlu1 %6801  ;;  %v18266_v39 = vpop.permute.xlu0 %6816  ;;  %v5173_v15 = vld [vmem:[#allocation24 + $0x1d8] sm:$0xff] }
 0x92c   : > { %20390 = vst [vmem:[#allocation52_spill] sm:$0xff] %v18264_v13  ;;  %20391 = vst [vmem:[#allocation53_spill] sm:$0xff] %v18266_v39  ;;  %13856 = vmatprep.mubr.msk.f32.mxu1 %vm5210_vm7, %v5166_v46  ;;  %v5174_v46 = vld [vmem:[#allocation24 + $0x1e0] sm:$0xff]  ;;  %v5855_v39 = vld [vmem:[#allocation24 + $0x208] sm:$0xff] }
 0x92e   : > { %7884 = vperm.xlu0 %15970, %v18094_v62   ;;  %7856 = vperm.xlu1 %15971, %v18084_v42  }
 0x92f   : > { %13857 = vmatmul.mubr.msk.f32.gmra.mrb[44].mxu1 %vm5210_vm7, %v5167_v58  ;;  %v18272_v12 = vpop.permute.xlu1 %6811  ;;  %v18274_v3 = vpop.permute.xlu0 %6826 }
 0x930   : > { %20392 = vst [vmem:[#allocation45_spill] sm:$0xff] %v18272_v12  ;;  %20393 = vst [vmem:[#allocation54_spill] sm:$0xff] %v18274_v3  ;;  %13859 = vmatprep.mubr.msk.f32.mxu1 %vm5210_vm7, %v5168_v36  ;;  %v5854_v3 = vld [vmem:[#allocation24 + $0x200] sm:$0xff]  ;;  %v15959_v12 = vunpack.i.l.bf16 %v18223_v51 }
 0x932   : > { %7892 = vperm.xlu0 %15970, %v18100_v59   ;;  %7864 = vperm.xlu1 %15971, %v18090_v20  }
 0x933   : > { %13860 = vmatmul.mubr.msk.f32.gmra.mrb[46].mxu1 %vm5210_vm7, %v5169_v22  ;;  %v18280_v29 = vpop.permute.xlu1 %6821  ;;  %v18282_v54 = vpop.permute.xlu0 %6836  ;;  %v5175_v22 = vld [vmem:[#allocation24 + $0x1e8] sm:$0xff] }
 0x934   : > { %20394 = vst [vmem:[#allocation46_spill] sm:$0xff] %v18280_v29  ;;  %20395 = vst [vmem:[#allocation55_spill] sm:$0xff] %v18282_v54  ;;  %13862 = vmatprep.mubr.msk.f32.mxu1 %vm5210_vm7, %v5170_v52  ;;  %v5176_v52 = vld [vmem:[#allocation24 + $0x1f0] sm:$0xff]  ;;  %v15939_v54 = vunpack.i.l.bf16 %v18195_v61 }
 0x936   : > { %7900 = vperm.xlu0 %15970, %v18106_v27   ;;  %7872 = vperm.xlu1 %15971, %v18096_v41  }
 0x937   : > { %13863 = vmatmul.mubr.msk.f32.gmra.mrb[48].mxu1 %vm5210_vm7, %v5171_v25  ;;  %v18288_v57 = vpop.permute.xlu1 %6831  ;;  %v18290_v31 = vpop.permute.xlu0 %6846 }
 0x938   : > { %20396 = vst [vmem:[#allocation56_spill] sm:$0xff] %v18288_v57  ;;  %20397 = vst [vmem:[#allocation47_spill] sm:$0xff] %v18290_v31  ;;  %13865 = vmatprep.mubr.msk.f32.mxu1 %vm5210_vm7, %v5172_v17  ;;  %v5113_v31 = vld [vmem:[#allocation24] sm:$0xff]  ;;  %v5143_v57 = vld [vmem:[#allocation24 + $0xf0] sm:$0xff] }
 0x93a   : > { %7908 = vperm.xlu0 %15970, %v18112_v14   ;;  %7880 = vperm.xlu1 %15971, %v18102_v44  }
 0x93b   : > { %13866 = vmatmul.mubr.msk.f32.gmra.mrb[50].mxu1 %vm5210_vm7, %v5173_v15  ;;  %v18296_v58 = vpop.permute.xlu1 %6841  ;;  %v18298_v36 = vpop.permute.xlu0 %6856  ;;  %v5177_v15 = vld [vmem:[#allocation24 + $0x1f8] sm:$0xff] }
 0x93c   : > { %20398 = vst [vmem:[#allocation57_spill] sm:$0xff] %v18296_v58  ;;  %20399 = vst [vmem:[#allocation58_spill] sm:$0xff] %v18298_v36  ;;  %13868 = vmatprep.mubr.msk.f32.mxu1 %vm5210_vm7, %v5174_v46  ;;  %v15935_v46 = vunpack.i.h.bf16 %v18190_v26  ;;  %v15934_v36 = vunpack.i.l.bf16 %v18190_v26 }
 0x93e   : > { %7916 = vperm.xlu0 %15970, %v18118_v11   ;;  %7888 = vperm.xlu1 %15971, %v18108_v10   ;;  %v15114_v26 = vpack.c.bf16 %v15935_v46, %v15934_v36 }
 0x93f   : > { %13869 = vmatmul.mubr.msk.f32.gmra.mrb[52].mxu1 %vm5210_vm7, %v5175_v22  ;;  %v18304_v25 = vpop.permute.xlu1 %6851  ;;  %v18306_v17 = vpop.permute.xlu0 %6866 }
 0x940   : > { %20400 = vst [vmem:[#allocation48_spill] sm:$0xff] %v18304_v25  ;;  %20401 = vst [vmem:[#allocation59_spill] sm:$0xff] %v18306_v17  ;;  %13871 = vmatprep.mubr.msk.f32.mxu1 %vm5210_vm7, %v5176_v52  ;;  %v5114_v17 = vld [vmem:[#allocation24 + $0x8] sm:$0xff]  ;;  %v5115_v52 = vld [vmem:[#allocation24 + $0x10] sm:$0xff]  ;;  %v15940_v25 = vunpack.i.h.bf16 %v18195_v61  ;;  %v15945_v61 = vunpack.i.h.bf16 %v18203_v0 }
 0x942   : > { %7924 = vperm.xlu0 %15970, %v18124_v5   ;;  %7896 = vperm.xlu1 %15971, %v18114_v55   ;;  %v15118_v36 = vpack.c.bf16 %v15940_v25, %v15939_v54 }
 0x943   : > { %13872 = vmatmul.mubr.msk.f32.gmra.mrb[54].mxu1 %vm5210_vm7, %v5177_v15  ;;  %v18314_v58 = vpop.permute.xlu1 %6861  ;;  %v18316_v22 = vpop.permute.xlu0 %6876 }
 0x944   : > { %20402 = vst [vmem:[#allocation60_spill] sm:$0xff] %v18314_v58  ;;  %20403 = vst [vmem:[#allocation61_spill] sm:$0xff] %v18316_v22  ;;  %13890 = vmatprep.mubr.msk.f32.mxu1 %vm5210_vm7, %v5113_v31  ;;  %v5116_v31 = vld [vmem:[#allocation24 + $0x18] sm:$0xff]  ;;  %v5117_v22 = vld [vmem:[#allocation24 + $0x20] sm:$0xff] }
 0x946   : > { %7932 = vperm.xlu0 %15970, %v18130_v6   ;;  %7904 = vperm.xlu1 %15971, %v18120_v47  }
 0x947   : > { %13891 = vmatmul.mubr.msk.f32.vlgmr.msra.gmra.mrb[24].mxu1 %vm5210_vm7, %v5114_v17  ;;  %v18324_v15 = vpop.permute.xlu1 %6871  ;;  %v18326_v58 = vpop.permute.xlu0 %6886  ;;  %v15944_v17 = vunpack.i.l.bf16 %v18203_v0  ;;  %v15949_v0 = vunpack.i.l.bf16 %v18208_v50 }
 0x948   : > { %20404 = vst [vmem:[#allocation62_spill] sm:$0xff] %v18324_v15  ;;  %20405 = vst [vmem:[#allocation63_spill] sm:$0xff] %v18326_v58  ;;  %15113 = vmatpush3.bf16.msra.mxu1 %v18215_v4  ;;  %13893 = vmatprep.mubr.msk.f32.mxu1 %vm5210_vm7, %v5115_v52  ;;  %v5118_v4 = vld [vmem:[#allocation24 + $0x28] sm:$0xff]  ;;  %v5119_v52 = vld [vmem:[#allocation24 + $0x30] sm:$0xff]  ;;  %v15950_v15 = vunpack.i.h.bf16 %v18208_v50 }
 0x949   : > { %15115 = vmatprep.subr.bf16.mxu1 %v15114_v26  ;;  %v15122_v54 = vpack.c.bf16 %v15945_v61, %v15944_v17  ;;  %v5122_v17 = vld [vmem:[#allocation24 + $0x48] sm:$0xff] }
 0x94a   : > { %7940 = vperm.xlu0 %15970, %v18136_v21   ;;  %7912 = vperm.xlu1 %15971, %v18126_v32   ;;  %v18353_v50 = vpack.c.bf16 %v15950_v15, %v15949_v0  ;;  %v5124_v0 = vld [vmem:[#allocation24 + $0x58] sm:$0xff] }
 0x94b   : > { %13894 = vmatmul.mubr.msk.f32.gmra.mrb[26].mxu1 %vm5210_vm7, %v5116_v31  ;;  %v18335_v46 = vpop.permute.xlu1 %6881  ;;  %v18337_v58 = vpop.permute.xlu0 %6896 }
 0x94c   : > { %20406 = vst [vmem:[#allocation64_spill] sm:$0xff] %v18335_v46  ;;  %20407 = vst [vmem:[#allocation65_spill] sm:$0xff] %v18337_v58  ;;  %15117 = vmatpush3.bf16.msra.mxu1 %v15114_v26  ;;  %13896 = vmatprep.mubr.msk.f32.mxu1 %vm5210_vm7, %v5117_v22  ;;  %v5120_v22 = vld [vmem:[#allocation24 + $0x38] sm:$0xff]  ;;  %v5121_v26 = vld [vmem:[#allocation24 + $0x40] sm:$0xff] }
 0x94d   : > { %15119 = vmatprep.subr.bf16.mxu1 %v15118_v36  ;;  %v5135_v58 = vld [vmem:[#allocation24 + $0xb0] sm:$0xff]  ;;  %v5141_v46 = vld [vmem:[#allocation24 + $0xe0] sm:$0xff] }
 0x94e   : > { %7948 = vperm.xlu0 %15970, %v18142_v9   ;;  %7920 = vperm.xlu1 %15971, %v18132_v33  }
 0x94f   : > { %13897 = vmatmul.mubr.msk.f32.gmra.mrb[28].mxu1 %vm5210_vm7, %v5118_v4  ;;  %v18345_v25 = vpop.permute.xlu1 %6891  ;;  %v18347_v31 = vpop.permute.xlu0 %6906 }
 0x950   : > { %20408 = vst [vmem:[#allocation66_spill] sm:$0xff] %v18345_v25  ;;  %20409 = vst [vmem:[#allocation67_spill] sm:$0xff] %v18347_v31  ;;  %15121 = vmatpush3.bf16.msra.mxu1 %v15118_v36  ;;  %13899 = vmatprep.mubr.msk.f32.mxu1 %vm5210_vm7, %v5119_v52  ;;  %v5123_v36 = vld [vmem:[#allocation24 + $0x50] sm:$0xff]  ;;  %v5129_v31 = vld [vmem:[#allocation24 + $0x80] sm:$0xff] }
 0x951   : > { %15123 = vmatprep.subr.bf16.mxu1 %v15122_v54  ;;  %v5139_v25 = vld [vmem:[#allocation24 + $0xd0] sm:$0xff] }
 0x952   : > { %7956 = vperm.xlu0 %15970, %v18148_v49   ;;  %7928 = vperm.xlu1 %15971, %v18138_v35  }
 0x953   : > { %13900 = vmatmul.mubr.msk.f32.gmra.mrb[30].mxu1 %vm5210_vm7, %v5120_v22  ;;  %v18355_v4 = vpop.permute.xlu1 %6901  ;;  %v18357_v61 = vpop.permute.xlu0 %6916  ;;  %v20414_v22 = vmov 3  }
 0x954   : > { %20410 = vst [vmem:[#allocation68_spill] sm:$0xff] %v18355_v4  ;;  %20411 = vst [vmem:[#allocation69_spill] sm:$0xff] %v18357_v61  ;;  %15125 = vmatpush3.bf16.msra.mxu1 %v15122_v54  ;;  %13902 = vmatprep.mubr.msk.f32.mxu1 %vm5210_vm7, %v5121_v26  ;;  %v5125_v54 = vld [vmem:[#allocation24 + $0x60] sm:$0xff] }
 0x955   : > { %15127 = vmatprep.subr.bf16.mxu1 %v18353_v50 }
 0x956   : > { %7964 = vperm.xlu0 %15970, %v18154_v19   ;;  %7936 = vperm.xlu1 %15971, %v18144_v30  }
 0x957   : > { %13903 = vmatmul.mubr.msk.f32.gmra.mrb[32].mxu1 %vm5210_vm7, %v5122_v17  ;;  %v18364_v52 = vpop.permute.xlu1 %6911  ;;  %v18366_v15 = vpop.permute.xlu0 %6926  ;;  %v5126_v17 = vld [vmem:[#allocation24 + $0x68] sm:$0xff] }
 0x958   : > { %20412 = vst [vmem:[#allocation70_spill] sm:$0xff] %v18364_v52  ;;  %20413 = vst [vmem:[#allocation71_spill] sm:$0xff] %v18366_v15  ;;  %13905 = vmatprep.mubr.msk.f32.mxu1 %vm5210_vm7, %v5123_v36  ;;  %v5127_v15 = vld [vmem:[#allocation24 + $0x70] sm:$0xff] }
 0x959   : > { %v6963_v36 = vld [vmem:[#allocation4 + $0x1] sm:$0xff] }
 0x95a   : > { %15973 = vset.pattern.permute.xlu0 %v20414_v22  ;;  %7944 = vperm.xlu1 %15971, %v18150_v23  }
 0x95b   : > { %8395 = vperm.xlu0 %15973, %v18000_v53   ;;  %13906 = vmatmul.mubr.msk.f32.gmra.mrb[34].mxu1 %vm5210_vm7, %v5124_v0  ;;  %v18373_v26 = vpop.permute.xlu1 %6921  ;;  %v5128_v53 = vld [vmem:[#allocation24 + $0x78] sm:$0xff] }
 0x95c   : > { %20415 = vst [vmem:[#allocation72_spill] sm:$0xff] %v18373_v26  ;;  %13908 = vmatprep.mubr.msk.f32.mxu1 %vm5210_vm7, %v5125_v54  ;;  %v18376_v61 = vpop.permute.xlu0 %7000 }
 0x95e   : > { %7952 = vperm.xlu1 %15971, %v18156_v8  }
 0x95f   : > { %8407 = vperm.xlu0 %15973, %v18084_v42   ;;  %13909 = vmatmul.mubr.msk.f32.gmra.mrb[36].mxu1 %vm5210_vm7, %v5126_v17  ;;  %v5131_v17 = vld [vmem:[#allocation24 + $0x90] sm:$0xff] }
 0x960   : > { %13911 = vmatprep.mubr.msk.f32.mxu1 %vm5210_vm7, %v5127_v15  ;;  %v6997_v52 = vpop.permute.xlu1 %6996  ;;  %v18382_v0 = vpop.permute.xlu0 %7012  ;;  %v5130_v15 = vld [vmem:[#allocation24 + $0x88] sm:$0xff] }
 0x961   : > { %v7123_v26 = vmul.f32 %v6997_v52, %v6963_v36 }
 0x962   : > { %7960 = vperm.xlu1 %15971, %v18160_v7  }
 0x963   : > { %8415 = vperm.xlu0 %15973, %v18090_v20   ;;  %13912 = vmatmul.mubr.msk.f32.gmra.mrb[38].mxu1 %vm5210_vm7, %v5128_v53  ;;  %v5133_v53 = vld [vmem:[#allocation24 + $0xa0] sm:$0xff] }
 0x964   : > { %13914 = vmatprep.mubr.msk.f32.mxu1 %vm5210_vm7, %v5129_v31  ;;  %v18388_v54 = vpop.permute.xlu1 %7004  ;;  %v18390_v4 = vpop.permute.xlu0 %7020  ;;  %14070 = vmatprep.mubr.msk.f32.mxu0 %vm811_vm8, %v7123_v26  ;;  %v5132_v31 = vld [vmem:[#allocation24 + $0x98] sm:$0xff] }
 0x966   : > { %15972 = vset.pattern.permute.xlu1 %v20414_v22 }
 0x967   : > { %8423 = vperm.xlu0 %15973, %v18096_v41   ;;  %8391 = vperm.xlu1 %15972, %v17995_v2  }
 0x968   : > { %13915 = vmatmul.mubr.msk.f32.gmra.mrb[40].mxu1 %vm5210_vm7, %v5130_v15  ;;  %v18397_v52 = vpop.permute.xlu1 %7008  ;;  %v18399_v36 = vpop.permute.xlu0 %7028  ;;  %v5134_v15 = vld [vmem:[#allocation24 + $0xa8] sm:$0xff] }
 0x969   : > { %13917 = vmatprep.mubr.msk.f32.mxu1 %vm5210_vm7, %v5131_v17 }
 0x96b   : > { %8431 = vperm.xlu0 %15973, %v18102_v44   ;;  %8399 = vperm.xlu1 %15972, %v18006_v1   ;;  %v5136_v1 = vld [vmem:[#allocation24 + $0xb8] sm:$0xff] }
 0x96c   : > { %13918 = vmatmul.mubr.msk.f32.gmra.mrb[42].mxu1 %vm5210_vm7, %v5132_v31  ;;  %v18405_v22 = vpop.permute.xlu1 %7016  ;;  %v18407_v26 = vpop.permute.xlu0 %7036  ;;  %v5137_v31 = vld [vmem:[#allocation24 + $0xc0] sm:$0xff] }
 0x96d   : > { %13920 = vmatprep.mubr.msk.f32.mxu1 %vm5210_vm7, %v5133_v53 }
 0x96f   : > { %8439 = vperm.xlu0 %15973, %v18108_v10   ;;  %8403 = vperm.xlu1 %15972, %v17998_v16  }
 0x970   : > { %13921 = vmatmul.mubr.msk.f32.gmra.mrb[44].mxu1 %vm5210_vm7, %v5134_v15  ;;  %v18413_v17 = vpop.permute.xlu1 %7024  ;;  %v18415_v44 = vpop.permute.xlu0 %7044  ;;  %v5138_v15 = vld [vmem:[#allocation24 + $0xc8] sm:$0xff] }
 0x971   : > { %13923 = vmatprep.mubr.msk.f32.mxu1 %vm5210_vm7, %v5135_v58 }
 0x973   : > { %8447 = vperm.xlu0 %15973, %v18114_v55   ;;  %8411 = vperm.xlu1 %15972, %v18004_v34  }
 0x974   : > { %13924 = vmatmul.mubr.msk.f32.gmra.mrb[46].mxu1 %vm5210_vm7, %v5136_v1  ;;  %v18421_v53 = vpop.permute.xlu1 %7032  ;;  %v18423_v10 = vpop.permute.xlu0 %7052  ;;  %v5140_v1 = vld [vmem:[#allocation24 + $0xd8] sm:$0xff] }
 0x975   : > { %13926 = vmatprep.mubr.msk.f32.mxu1 %vm5210_vm7, %v5137_v31 }
 0x977   : > { %8455 = vperm.xlu0 %15973, %v18120_v47   ;;  %8419 = vperm.xlu1 %15972, %v18082_v24  }
 0x978   : > { %13927 = vmatmul.mubr.msk.f32.gmra.mrb[48].mxu1 %vm5210_vm7, %v5138_v15  ;;  %v18429_v58 = vpop.permute.xlu1 %7040  ;;  %v18431_v55 = vpop.permute.xlu0 %7060  ;;  %v5142_v15 = vld [vmem:[#allocation24 + $0xe8] sm:$0xff] }
 0x979   : > { %13929 = vmatprep.mubr.msk.f32.mxu1 %vm5210_vm7, %v5139_v25 }
 0x97b   : > { %8463 = vperm.xlu0 %15973, %v18126_v32   ;;  %8427 = vperm.xlu1 %15972, %v18088_v37  }
 0x97c   : > { %13930 = vmatmul.mubr.msk.f32.gmra.mrb[50].mxu1 %vm5210_vm7, %v5140_v1  ;;  %v18437_v31 = vpop.permute.xlu1 %7048  ;;  %v18439_v47 = vpop.permute.xlu0 %7068  ;;  %v5144_v1 = vld [vmem:[#allocation24 + $0xf8] sm:$0xff] }
 0x97d   : > { %13932 = vmatprep.mubr.msk.f32.mxu1 %vm5210_vm7, %v5141_v46  ;;  %v15955_v46 = vunpack.i.h.bf16 %v18218_v28 }
 0x97f   : > { %8471 = vperm.xlu0 %15973, %v18132_v33   ;;  %8435 = vperm.xlu1 %15972, %v18094_v62   ;;  %v15954_v33 = vunpack.i.l.bf16 %v18218_v28 }
 0x980   : > { %13933 = vmatmul.mubr.msk.f32.gmra.mrb[52].mxu1 %vm5210_vm7, %v5142_v15  ;;  %v18445_v25 = vpop.permute.xlu1 %7056  ;;  %v18447_v32 = vpop.permute.xlu0 %7076 }
 0x981   : > { %13935 = vmatprep.mubr.msk.f32.mxu1 %vm5210_vm7, %v5143_v57  ;;  %v5856_v57 = vld [vmem:[#allocation24 + $0x210] sm:$0xff]  ;;  %v15130_v28 = vpack.c.bf16 %v15955_v46, %v15954_v33 }
 0x983   : > { %8479 = vperm.xlu0 %15973, %v18138_v35   ;;  %8443 = vperm.xlu1 %15972, %v18100_v59   ;;  %v15960_v35 = vunpack.i.h.bf16 %v18223_v51  ;;  %v15965_v51 = vunpack.i.h.bf16 %v18230_v56 }
 0x984   : > { %13936 = vmatmul.mubr.msk.f32.gmra.mrb[54].mxu1 %vm5210_vm7, %v5144_v1  ;;  %v18455_v29 = vpop.permute.xlu1 %7064  ;;  %v18457_v15 = vpop.permute.xlu0 %7084 }
 0x985   : > { %13954 = vmatprep.mubr.msk.f32.mxu1 %vm5210_vm7, %v5854_v3  ;;  %v5857_v3 = vld [vmem:[#allocation24 + $0x218] sm:$0xff]  ;;  %v15134_v46 = vpack.c.bf16 %v15960_v35, %v15959_v12 }
 0x986   : > { %v5861_v35 = vld [vmem:[#allocation24 + $0x238] sm:$0xff] }
 0x987   : > { %8487 = vperm.xlu0 %15973, %v18144_v30   ;;  %8451 = vperm.xlu1 %15972, %v18106_v27   ;;  %v5858_v30 = vld [vmem:[#allocation24 + $0x220] sm:$0xff] }
 0x988   : > { %13955 = vmatmul.mubr.msk.f32.vlgmr.msra.gmra.mrb[24].mxu1 %vm5210_vm7, %v5855_v39  ;;  %v18465_v1 = vpop.permute.xlu1 %7072  ;;  %v18467_v63 = vpop.permute.xlu0 %7092  ;;  %v15964_v39 = vunpack.i.l.bf16 %v18230_v56 }
 0x989   : > { %20416 = vst [vmem:[#allocation73_spill] sm:$0xff] %v18467_v63  ;;  %15129 = vmatpush3.bf16.msra.mxu1 %v18353_v50  ;;  %13957 = vmatprep.mubr.msk.f32.mxu1 %vm5210_vm7, %v5856_v57  ;;  %v5859_v50 = vld [vmem:[#allocation24 + $0x228] sm:$0xff]  ;;  %v5860_v57 = vld [vmem:[#allocation24 + $0x230] sm:$0xff] }
 0x98a   : > { %15131 = vmatprep.subr.bf16.mxu1 %v15130_v28 }
 0x98b   : > { %8495 = vperm.xlu0 %15973, %v18150_v23   ;;  %8459 = vperm.xlu1 %15972, %v18112_v14   ;;  %v15138_v23 = vpack.c.bf16 %v15965_v51, %v15964_v39  ;;  %v5864_v51 = vld [vmem:[#allocation24 + $0x250] sm:$0xff]  ;;  %v20421_v39 = vmov 4  }
 0x98c   : > { %13958 = vmatmul.mubr.msk.f32.gmra.mrb[26].mxu1 %vm5210_vm7, %v5857_v3  ;;  %v18476_v33 = vpop.permute.xlu1 %7080  ;;  %v18478_v13 = vpop.permute.xlu0 %7100 }
 0x98d   : > { %20417 = vst [vmem:[#allocation74_spill] sm:$0xff] %v18478_v13  ;;  %15133 = vmatpush3.bf16.msra.mxu1 %v15130_v28  ;;  %13960 = vmatprep.mubr.msk.f32.mxu1 %vm5210_vm7, %v5858_v30  ;;  %v5862_v28 = vld [vmem:[#allocation24 + $0x240] sm:$0xff]  ;;  %v5863_v30 = vld [vmem:[#allocation24 + $0x248] sm:$0xff] }
 0x98e   : > { %15135 = vmatprep.subr.bf16.mxu1 %v15134_v46 }
 0x98f   : > { %8503 = vperm.xlu0 %15973, %v18156_v8   ;;  %8467 = vperm.xlu1 %15972, %v18118_v11  }
 0x990   : > { %13961 = vmatmul.mubr.msk.f32.gmra.mrb[28].mxu1 %vm5210_vm7, %v5859_v50  ;;  %v18484_v56 = vpop.permute.xlu1 %7088  ;;  %v18486_v12 = vpop.permute.xlu0 %7108 }
 0x991   : > { %20418 = vst [vmem:[#allocation75_spill] sm:$0xff] %v18486_v12  ;;  %15137 = vmatpush3.bf16.msra.mxu1 %v15134_v46  ;;  %13963 = vmatprep.mubr.msk.f32.mxu1 %vm5210_vm7, %v5860_v57  ;;  %v5865_v46 = vld [vmem:[#allocation24 + $0x258] sm:$0xff]  ;;  %v5866_v57 = vld [vmem:[#allocation24 + $0x260] sm:$0xff]  ;;  %v20484_v12 = vmov 6  }
 0x992   : > { %15139 = vmatprep.subr.bf16.mxu1 %v15138_v23 }
 0x993   : > { %8511 = vperm.xlu0 %15973, %v18160_v7   ;;  %8475 = vperm.xlu1 %15972, %v18124_v5  }
 0x994   : > { %13964 = vmatmul.mubr.msk.f32.gmra.mrb[30].mxu1 %vm5210_vm7, %v5861_v35  ;;  %v18492_v8 = vpop.permute.xlu1 %7096  ;;  %v18494_v3 = vpop.permute.xlu0 %7116  ;;  %v5867_v35 = vld [vmem:[#allocation24 + $0x268] sm:$0xff] }
 0x995   : > { %20419 = vst [vmem:[#allocation76_spill] sm:$0xff] %v18492_v8  ;;  %20420 = vst [vmem:[#allocation77_spill] sm:$0xff] %v18494_v3  ;;  %15141 = vmatpush3.bf16.msra.mxu1 %v15138_v23  ;;  %13966 = vmatprep.mubr.msk.f32.mxu1 %vm5210_vm7, %v5862_v28  ;;  %v5868_v28 = vld [vmem:[#allocation24 + $0x270] sm:$0xff]  ;;  %v18785_v3 = vld [vmem:[#allocation27 + $0x88] sm:$0xff] }
 0x997   : > { %15974 = vset.pattern.permute.xlu0 %v20421_v39  ;;  %8483 = vperm.xlu1 %15972, %v18130_v6  }
 0x998   : > { %13967 = vmatmul.mubr.msk.f32.gmra.mrb[32].mxu1 %vm5210_vm7, %v5863_v30  ;;  %8942 = vperm.xlu0 %15974, %v17995_v2   ;;  %v18501_v7 = vpop.permute.xlu1 %7104 }
 0x999   : > { %20422 = vst [vmem:[#allocation78_spill] sm:$0xff] %v18501_v7  ;;  %13969 = vmatprep.mubr.msk.f32.mxu1 %vm5210_vm7, %v5864_v51  ;;  %v18504_v50 = vpop.permute.xlu0 %7840  ;;  %v5869_v51 = vld [vmem:[#allocation24 + $0x278] sm:$0xff]  ;;  %v6961_v7 = vld [vmem:[#allocation25] sm:$0xff] }
 0x99a   : > { %20423 = vst [vmem:[#allocation79_spill] sm:$0xff] %v18504_v50 }
 0x99b   : > { %8491 = vperm.xlu1 %15972, %v18136_v21  }
 0x99c   : > { %13970 = vmatmul.mubr.msk.f32.gmra.mrb[34].mxu1 %vm5210_vm7, %v5865_v46  ;;  %8954 = vperm.xlu0 %15974, %v17998_v16   ;;  %v18509_v23 = vpop.permute.xlu1 %7112  ;;  %v5870_v46 = vld [vmem:[#allocation24 + $0x280] sm:$0xff] }
 0x99d   : > { %20424 = vst [vmem:[#allocation80_spill] sm:$0xff] %v18509_v23  ;;  %13972 = vmatprep.mubr.msk.f32.mxu1 %vm5210_vm7, %v5866_v57  ;;  %v18512_v2 = vpop.permute.xlu0 %7852  ;;  %v5871_v57 = vld [vmem:[#allocation24 + $0x288] sm:$0xff] }
 0x99e   : > { %20425 = vst [vmem:[#allocation81_spill] sm:$0xff] %v18512_v2  ;;  %v5872_v2 = vld [vmem:[#allocation24 + $0x290] sm:$0xff] }
 0x99f   : > { %8499 = vperm.xlu1 %15972, %v18142_v9  }
 0x9a0   : > { %13973 = vmatmul.mubr.msk.f32.gmra.mrb[36].mxu1 %vm5210_vm7, %v5867_v35  ;;  %8962 = vperm.xlu0 %15974, %v18004_v34   ;;  %v18517_v30 = vpop.permute.xlu1 %7120 }
 0x9a1   : > { %20426 = vst [vmem:[#allocation82_spill] sm:$0xff] %v18517_v30  ;;  %13975 = vmatprep.mubr.msk.f32.mxu1 %vm5210_vm7, %v5868_v28  ;;  %v18520_v16 = vpop.permute.xlu0 %7860 }
 0x9a2   : > { %20427 = vst [vmem:[#allocation83_spill] sm:$0xff] %v18520_v16  ;;  %v6279_v16 = vld [vmem:[#allocation24 + $0x378] sm:$0xff] }
 0x9a3   : > { %8507 = vperm.xlu1 %15972, %v18148_v49   ;;  %v5873_v49 = vld [vmem:[#allocation24 + $0x298] sm:$0xff] }
 0x9a4   : > { %13976 = vmatmul.mubr.msk.f32.gmra.mrb[38].mxu1 %vm5210_vm7, %v5869_v51  ;;  %8970 = vperm.xlu0 %15974, %v18082_v24   ;;  %v5874_v51 = vld [vmem:[#allocation24 + $0x2a0] sm:$0xff] }
 0x9a5   : > { %13978 = vmatprep.mubr.msk.f32.mxu1 %vm5210_vm7, %v5870_v46  ;;  %v18526_v35 = vpop.permute.xlu1 %7844  ;;  %v18528_v34 = vpop.permute.xlu0 %7868  ;;  %v18541_v46 = vld [vmem:[#allocation27 + $0x8] sm:$0xff] }
 0x9a6   : > { %20428 = vst [vmem:[#allocation84_spill] sm:$0xff] %v18526_v35  ;;  %20429 = vst [vmem:[#allocation85_spill] sm:$0xff] %v18528_v34  ;;  %v6277_v34 = vld [vmem:[#allocation24 + $0x368] sm:$0xff] }
 0x9a7   : > { %8515 = vperm.xlu1 %15972, %v18154_v19  }
 0x9a8   : > { %13979 = vmatmul.mubr.msk.f32.gmra.mrb[40].mxu1 %vm5210_vm7, %v5871_v57  ;;  %8978 = vperm.xlu0 %15974, %v18088_v37   ;;  %v5875_v37 = vld [vmem:[#allocation24 + $0x2a8] sm:$0xff]  ;;  %v5876_v57 = vld [vmem:[#allocation24 + $0x2b0] sm:$0xff] }
 0x9a9   : > { %13981 = vmatprep.mubr.msk.f32.mxu1 %vm5210_vm7, %v5872_v2  ;;  %v18534_v28 = vpop.permute.xlu1 %7848  ;;  %v18536_v24 = vpop.permute.xlu0 %7876 }
 0x9aa   : > { %20430 = vst [vmem:[#allocation86_spill] sm:$0xff] %v18534_v28  ;;  %20431 = vst [vmem:[#allocation87_spill] sm:$0xff] %v18536_v24  ;;  %v5878_v24 = vld [vmem:[#allocation24 + $0x2c0] sm:$0xff]  ;;  %v6281_v28 = vld [vmem:[#allocation24 + $0x388] sm:$0xff] }
 0x9ab   : > { %15975 = vset.pattern.permute.xlu1 %v20421_v39  ;;  %v18551_v39 = vld [vmem:[#allocation27 + $0x10] sm:$0xff] }
 0x9ac   : > { %13982 = vmatmul.mubr.msk.f32.gmra.mrb[42].mxu1 %vm5210_vm7, %v5873_v49  ;;  %8986 = vperm.xlu0 %15974, %v18094_v62   ;;  %v5877_v62 = vld [vmem:[#allocation24 + $0x2b8] sm:$0xff] }
 0x9ad   : > { %8946 = vperm.xlu1 %15975, %v18541_v46   ;;  %13984 = vmatprep.mubr.msk.f32.mxu1 %vm5210_vm7, %v5874_v51  ;;  %v18545_v19 = vpop.permute.xlu1 %7856  ;;  %v18547_v2 = vpop.permute.xlu0 %7884 }
 0x9ae   : > { %20432 = vst [vmem:[#allocation88_spill] sm:$0xff] %v18545_v19  ;;  %20433 = vst [vmem:[#allocation89_spill] sm:$0xff] %v18547_v2 }
 0x9b0   : > { %13985 = vmatmul.mubr.msk.f32.gmra.mrb[44].mxu1 %vm5210_vm7, %v5875_v37  ;;  %8994 = vperm.xlu0 %15974, %v18100_v59   ;;  %v5879_v59 = vld [vmem:[#allocation24 + $0x2c8] sm:$0xff] }
 0x9b1   : > { %8950 = vperm.xlu1 %15975, %v18551_v39   ;;  %13987 = vmatprep.mubr.msk.f32.mxu1 %vm5210_vm7, %v5876_v57  ;;  %v18555_v49 = vpop.permute.xlu1 %7864  ;;  %v18557_v51 = vpop.permute.xlu0 %7892  ;;  %v5880_v57 = vld [vmem:[#allocation24 + $0x2d0] sm:$0xff] }
 0x9b2   : > { %20434 = vst [vmem:[#allocation90_spill] sm:$0xff] %v18555_v49  ;;  %20435 = vst [vmem:[#allocation91_spill] sm:$0xff] %v18557_v51  ;;  %v6273_v51 = vld [vmem:[#allocation24 + $0x348] sm:$0xff] }
 0x9b4   : > { %13988 = vmatmul.mubr.msk.f32.gmra.mrb[46].mxu1 %vm5210_vm7, %v5877_v62  ;;  %9002 = vperm.xlu0 %15974, %v18106_v27   ;;  %v5881_v62 = vld [vmem:[#allocation24 + $0x2d8] sm:$0xff] }
 0x9b5   : > { %8958 = vperm.xlu1 %15975, %v18084_v42   ;;  %13990 = vmatprep.mubr.msk.f32.mxu1 %vm5210_vm7, %v5878_v24  ;;  %v18563_v37 = vpop.permute.xlu1 %7872  ;;  %v18565_v2 = vpop.permute.xlu0 %7900  ;;  %v5882_v24 = vld [vmem:[#allocation24 + $0x2e0] sm:$0xff] }
 0x9b6   : > { %20436 = vst [vmem:[#allocation92_spill] sm:$0xff] %v18563_v37  ;;  %20437 = vst [vmem:[#allocation93_spill] sm:$0xff] %v18565_v2  ;;  %v6266_v2 = vld [vmem:[#allocation24 + $0x310] sm:$0xff] }
 0x9b8   : > { %13991 = vmatmul.mubr.msk.f32.gmra.mrb[48].mxu1 %vm5210_vm7, %v5879_v59  ;;  %9010 = vperm.xlu0 %15974, %v18112_v14   ;;  %v5883_v59 = vld [vmem:[#allocation24 + $0x2e8] sm:$0xff] }
 0x9b9   : > { %8966 = vperm.xlu1 %15975, %v18090_v20   ;;  %13993 = vmatprep.mubr.msk.f32.mxu1 %vm5210_vm7, %v5880_v57  ;;  %v18571_v27 = vpop.permute.xlu1 %7880  ;;  %v18573_v42 = vpop.permute.xlu0 %7908  ;;  %v5884_v57 = vld [vmem:[#allocation24 + $0x2f0] sm:$0xff] }
 0x9ba   : > { %20438 = vst [vmem:[#allocation94_spill] sm:$0xff] %v18571_v27  ;;  %20439 = vst [vmem:[#allocation95_spill] sm:$0xff] %v18573_v42  ;;  %v18585_v42 = vld [vmem:[#allocation27 + $0x50] sm:$0xff]  ;;  %v6275_v27 = vld [vmem:[#allocation24 + $0x358] sm:$0xff] }
 0x9bc   : > { %13994 = vmatmul.mubr.msk.f32.gmra.mrb[50].mxu1 %vm5210_vm7, %v5881_v62  ;;  %9018 = vperm.xlu0 %15974, %v18118_v11   ;;  %v5885_v11 = vld [vmem:[#allocation24 + $0x2f8] sm:$0xff] }
 0x9bd   : > { %8974 = vperm.xlu1 %15975, %v18096_v41   ;;  %13996 = vmatprep.mubr.msk.f32.mxu1 %vm5210_vm7, %v5882_v24  ;;  %v18579_v14 = vpop.permute.xlu1 %7888  ;;  %v18581_v20 = vpop.permute.xlu0 %7916  ;;  %v6264_v24 = vld [vmem:[#allocation24 + $0x300] sm:$0xff] }
 0x9be   : > { %20440 = vst [vmem:[#allocation96_spill] sm:$0xff] %v18579_v14  ;;  %20441 = vst [vmem:[#allocation97_spill] sm:$0xff] %v18581_v20  ;;  %v18595_v20 = vld [vmem:[#allocation27 + $0x60] sm:$0xff] }
 0x9c0   : > { %13997 = vmatmul.mubr.msk.f32.gmra.mrb[52].mxu1 %vm5210_vm7, %v5883_v59  ;;  %9026 = vperm.xlu0 %15974, %v18124_v5   ;;  %v6265_v5 = vld [vmem:[#allocation24 + $0x308] sm:$0xff] }
 0x9c1   : > { %8982 = vperm.xlu1 %15975, %v18585_v42   ;;  %13999 = vmatprep.mubr.msk.f32.mxu1 %vm5210_vm7, %v5884_v57  ;;  %v18589_v41 = vpop.permute.xlu1 %7896  ;;  %v18591_v62 = vpop.permute.xlu0 %7924 }
 0x9c2   : > { %20442 = vst [vmem:[#allocation98_spill] sm:$0xff] %v18589_v41  ;;  %20443 = vst [vmem:[#allocation99_spill] sm:$0xff] %v18591_v62  ;;  %v18605_v62 = vld [vmem:[#allocation27 + $0x70] sm:$0xff] }
 0x9c3   : > { %v6268_v41 = vld [vmem:[#allocation24 + $0x320] sm:$0xff] }
 0x9c4   : > { %14000 = vmatmul.mubr.msk.f32.gmra.mrb[54].mxu1 %vm5210_vm7, %v5885_v11  ;;  %9034 = vperm.xlu0 %15974, %v18130_v6   ;;  %v6267_v6 = vld [vmem:[#allocation24 + $0x318] sm:$0xff] }
 0x9c5   : > { %8990 = vperm.xlu1 %15975, %v18595_v20   ;;  %14018 = vmatprep.mubr.msk.f32.mxu1 %vm5210_vm7, %v6264_v24  ;;  %v18599_v59 = vpop.permute.xlu1 %7904  ;;  %v18601_v57 = vpop.permute.xlu0 %7932 }
 0x9c6   : > { %20444 = vst [vmem:[#allocation100_spill] sm:$0xff] %v18599_v59  ;;  %20445 = vst [vmem:[#allocation101_spill] sm:$0xff] %v18601_v57  ;;  %v18615_v57 = vld [vmem:[#allocation27 + $0x80] sm:$0xff] }
 0x9c7   : > { %v6270_v59 = vld [vmem:[#allocation24 + $0x330] sm:$0xff] }
 0x9c8   : > { %14019 = vmatmul.mubr.msk.f32.vlgmr.msra.gmra.mrb[24].mxu1 %vm5210_vm7, %v6265_v5  ;;  %9042 = vperm.xlu0 %15974, %v18136_v21   ;;  %v6269_v21 = vld [vmem:[#allocation24 + $0x328] sm:$0xff] }
 0x9c9   : > { %8998 = vperm.xlu1 %15975, %v18605_v62   ;;  %14021 = vmatprep.mubr.msk.f32.mxu1 %vm5210_vm7, %v6266_v2  ;;  %v18609_v11 = vpop.permute.xlu1 %7912  ;;  %v18611_v24 = vpop.permute.xlu0 %7940 }
 0x9ca   : > { %20446 = vst [vmem:[#allocation102_spill] sm:$0xff] %v18609_v11  ;;  %20447 = vst [vmem:[#allocation103_spill] sm:$0xff] %v18611_v24  ;;  %v18624_v24 = vld [vmem:[#allocation27 + $0xe8] sm:$0xff] }
 0x9cc   : > { %14022 = vmatmul.mubr.msk.f32.gmra.mrb[26].mxu1 %vm5210_vm7, %v6267_v6  ;;  %9050 = vperm.xlu0 %15974, %v18142_v9   ;;  %v18627_v6 = vld [vmem:[#allocation27 + $0x90] sm:$0xff]  ;;  %v6271_v9 = vld [vmem:[#allocation24 + $0x338] sm:$0xff] }
 0x9cd   : > { %9006 = vperm.xlu1 %15975, %v18615_v57   ;;  %14024 = vmatprep.mubr.msk.f32.mxu1 %vm5210_vm7, %v6268_v41  ;;  %v18619_v5 = vpop.permute.xlu1 %7920  ;;  %v18621_v2 = vpop.permute.xlu0 %7948 }
 0x9ce   : > { %20448 = vst [vmem:[#allocation104_spill] sm:$0xff] %v18619_v5  ;;  %20449 = vst [vmem:[#allocation105_spill] sm:$0xff] %v18621_v2  ;;  %v6272_v5 = vld [vmem:[#allocation24 + $0x340] sm:$0xff]  ;;  %v18636_v2 = vld [vmem:[#allocation27 + $0xf8] sm:$0xff] }
 0x9d0   : > { %14025 = vmatmul.mubr.msk.f32.gmra.mrb[28].mxu1 %vm5210_vm7, %v6269_v21  ;;  %9058 = vperm.xlu0 %15974, %v18624_v24   ;;  %v18639_v21 = vld [vmem:[#allocation27 + $0xa0] sm:$0xff] }
 0x9d1   : > { %9014 = vperm.xlu1 %15975, %v18627_v6   ;;  %14027 = vmatprep.mubr.msk.f32.mxu1 %vm5210_vm7, %v6270_v59  ;;  %v18631_v41 = vpop.permute.xlu1 %7928  ;;  %v18633_v11 = vpop.permute.xlu0 %7956 }
 0x9d2   : > { %20450 = vst [vmem:[#allocation106_spill] sm:$0xff] %v18631_v41  ;;  %20451 = vst [vmem:[#allocation107_spill] sm:$0xff] %v18633_v11  ;;  %v6274_v41 = vld [vmem:[#allocation24 + $0x350] sm:$0xff]  ;;  %v20454_v11 = vmov 5  }
 0x9d4   : > { %14028 = vmatmul.mubr.msk.f32.gmra.mrb[30].mxu1 %vm5210_vm7, %v6271_v9  ;;  %9066 = vperm.xlu0 %15974, %v18636_v2   ;;  %v18649_v9 = vld [vmem:[#allocation27 + $0xb0] sm:$0xff] }
 0x9d5   : > { %9022 = vperm.xlu1 %15975, %v18639_v21   ;;  %14030 = vmatprep.mubr.msk.f32.mxu1 %vm5210_vm7, %v6272_v5  ;;  %v18643_v59 = vpop.permute.xlu1 %7936  ;;  %v18645_v14 = vpop.permute.xlu0 %7964 }
 0x9d6   : > { %20452 = vst [vmem:[#allocation108_spill] sm:$0xff] %v18643_v59  ;;  %20453 = vst [vmem:[#allocation109_spill] sm:$0xff] %v18645_v14  ;;  %v6276_v59 = vld [vmem:[#allocation24 + $0x360] sm:$0xff]  ;;  %v18659_v14 = vld [vmem:[#allocation27 + $0xc0] sm:$0xff] }
 0x9d8   : > { %14031 = vmatmul.mubr.msk.f32.gmra.mrb[32].mxu1 %vm5210_vm7, %v6273_v51  ;;  %15977 = vset.pattern.permute.xlu0 %v20454_v11  ;;  %v18662_v51 = vld [vmem:[#allocation27 + $0x20] sm:$0xff] }
 0x9d9   : > { %9030 = vperm.xlu1 %15975, %v18649_v9   ;;  %9497 = vperm.xlu0 %15977, %v18541_v46   ;;  %v18653_v37 = vpop.permute.xlu1 %7944 }
 0x9da   : > { %20455 = vst [vmem:[#allocation110_spill] sm:$0xff] %v18653_v37  ;;  %14033 = vmatprep.mubr.msk.f32.mxu1 %vm5210_vm7, %v6274_v41  ;;  %v18656_v5 = vpop.permute.xlu0 %8395  ;;  %v6278_v41 = vld [vmem:[#allocation24 + $0x370] sm:$0xff] }
 0x9db   : > { %20456 = vst [vmem:[#allocation111_spill] sm:$0xff] %v18656_v5  ;;  %v18671_v5 = vld [vmem:[#allocation27 + $0xd0] sm:$0xff] }
 0x9dc   : > { %14034 = vmatmul.mubr.msk.f32.gmra.mrb[34].mxu1 %vm5210_vm7, %v6275_v27  ;;  %v18674_v27 = vld [vmem:[#allocation27 + $0x30] sm:$0xff] }
 0x9dd   : > { %9038 = vperm.xlu1 %15975, %v18659_v14   ;;  %9509 = vperm.xlu0 %15977, %v18662_v51   ;;  %v18665_v49 = vpop.permute.xlu1 %7952 }
 0x9de   : > { %20457 = vst [vmem:[#allocation112_spill] sm:$0xff] %v18665_v49  ;;  %14036 = vmatprep.mubr.msk.f32.mxu1 %vm5210_vm7, %v6276_v59  ;;  %v18668_v37 = vpop.permute.xlu0 %8407  ;;  %v6280_v59 = vld [vmem:[#allocation24 + $0x380] sm:$0xff] }
 0x9df   : > { %20458 = vst [vmem:[#allocation113_spill] sm:$0xff] %v18668_v37  ;;  %v18683_v37 = vld [vmem:[#allocation27 + $0xe0] sm:$0xff] }
 0x9e0   : > { %14037 = vmatmul.mubr.msk.f32.gmra.mrb[36].mxu1 %vm5210_vm7, %v6277_v34  ;;  %v18686_v34 = vld [vmem:[#allocation27 + $0x40] sm:$0xff] }
 0x9e1   : > { %9046 = vperm.xlu1 %15975, %v18671_v5   ;;  %9517 = vperm.xlu0 %15977, %v18674_v27   ;;  %v18677_v19 = vpop.permute.xlu1 %7960 }
 0x9e2   : > { %20459 = vst [vmem:[#allocation114_spill] sm:$0xff] %v18677_v19  ;;  %14039 = vmatprep.mubr.msk.f32.mxu1 %vm5210_vm7, %v6278_v41  ;;  %v18680_v49 = vpop.permute.xlu0 %8415  ;;  %v6282_v41 = vld [vmem:[#allocation24 + $0x390] sm:$0xff] }
 0x9e3   : > { %20460 = vst [vmem:[#allocation115_spill] sm:$0xff] %v18680_v49  ;;  %v18695_v49 = vld [vmem:[#allocation27 + $0xf0] sm:$0xff] }
 0x9e4   : > { %14040 = vmatmul.mubr.msk.f32.gmra.mrb[38].mxu1 %vm5210_vm7, %v6279_v16  ;;  %v6283_v16 = vld [vmem:[#allocation24 + $0x398] sm:$0xff] }
 0x9e5   : > { %9054 = vperm.xlu1 %15975, %v18683_v37   ;;  %9525 = vperm.xlu0 %15977, %v18686_v34  }
 0x9e6   : > { %14042 = vmatprep.mubr.msk.f32.mxu1 %vm5210_vm7, %v6280_v59  ;;  %v18690_v35 = vpop.permute.xlu1 %8391  ;;  %v18692_v19 = vpop.permute.xlu0 %8423  ;;  %v6284_v59 = vld [vmem:[#allocation24 + $0x3a0] sm:$0xff] }
 0x9e7   : > { %20461 = vst [vmem:[#allocation116_spill] sm:$0xff] %v18690_v35  ;;  %20462 = vst [vmem:[#allocation117_spill] sm:$0xff] %v18692_v19  ;;  %v18707_v19 = vld [vmem:[#allocation27] sm:$0xff] }
 0x9e8   : > { %14043 = vmatmul.mubr.msk.f32.gmra.mrb[40].mxu1 %vm5210_vm7, %v6281_v28  ;;  %v6285_v28 = vld [vmem:[#allocation24 + $0x3a8] sm:$0xff] }
 0x9e9   : > { %9062 = vperm.xlu1 %15975, %v18695_v49   ;;  %9533 = vperm.xlu0 %15977, %v18585_v42  }
 0x9ea   : > { %14045 = vmatprep.mubr.msk.f32.mxu1 %vm5210_vm7, %v6282_v41  ;;  %v18700_v50 = vpop.permute.xlu1 %8399  ;;  %v18702_v45 = vpop.permute.xlu0 %8431 }
 0x9eb   : > { %20463 = vst [vmem:[#allocation118_spill] sm:$0xff] %v18700_v50  ;;  %20464 = vst [vmem:[#allocation119_spill] sm:$0xff] %v18702_v45  ;;  %v6286_v50 = vld [vmem:[#allocation24 + $0x3b0] sm:$0xff]  ;;  %v6288_v45 = vld [vmem:[#allocation24 + $0x3c0] sm:$0xff] }
 0x9ec   : > { %14046 = vmatmul.mubr.msk.f32.gmra.mrb[42].mxu1 %vm5210_vm7, %v6283_v16 }
 0x9ed   : > { %15976 = vset.pattern.permute.xlu1 %v20454_v11  ;;  %9541 = vperm.xlu0 %15977, %v18595_v20   ;;  %v6287_v11 = vld [vmem:[#allocation24 + $0x3b8] sm:$0xff] }
 0x9ee   : > { %9493 = vperm.xlu1 %15976, %v18707_v19   ;;  %14048 = vmatprep.mubr.msk.f32.mxu1 %vm5210_vm7, %v6284_v59  ;;  %v18711_v35 = vpop.permute.xlu1 %8403  ;;  %v18713_v41 = vpop.permute.xlu0 %8439 }
 0x9ef   : > { %20465 = vst [vmem:[#allocation120_spill] sm:$0xff] %v18711_v35  ;;  %20466 = vst [vmem:[#allocation121_spill] sm:$0xff] %v18713_v41  ;;  %v6289_v41 = vld [vmem:[#allocation24 + $0x3c8] sm:$0xff]  ;;  %v6290_v35 = vld [vmem:[#allocation24 + $0x3d0] sm:$0xff] }
 0x9f0   : > { %14049 = vmatmul.mubr.msk.f32.gmra.mrb[44].mxu1 %vm5210_vm7, %v6285_v28  ;;  %v18726_v28 = vld [vmem:[#allocation27 + $0x18] sm:$0xff] }
 0x9f1   : > { %9549 = vperm.xlu0 %15977, %v18605_v62   ;;  %14051 = vmatprep.mubr.msk.f32.mxu1 %vm5210_vm7, %v6286_v50 }
 0x9f2   : > { %9501 = vperm.xlu1 %15976, %v18551_v39   ;;  %v18719_v16 = vpop.permute.xlu1 %8411  ;;  %v18722_v59 = vpop.permute.xlu0 %8447 }
 0x9f3   : > { %20467 = vst [vmem:[#allocation122_spill] sm:$0xff] %v18719_v16  ;;  %20468 = vst [vmem:[#allocation123_spill] sm:$0xff] %v18722_v59  ;;  %v18734_v59 = vld [vmem:[#allocation27 + $0x28] sm:$0xff] }
 0x9f4   : > { %14052 = vmatmul.mubr.msk.f32.gmra.mrb[46].mxu1 %vm5210_vm7, %v6287_v11  ;;  %v6291_v11 = vld [vmem:[#allocation24 + $0x3d8] sm:$0xff] }
 0x9f5   : > { %9557 = vperm.xlu0 %15977, %v18615_v57   ;;  %14054 = vmatprep.mubr.msk.f32.mxu1 %vm5210_vm7, %v6288_v45 }
 0x9f6   : > { %9505 = vperm.xlu1 %15976, %v18726_v28   ;;  %v18729_v50 = vpop.permute.xlu1 %8419  ;;  %v18737_v45 = vpop.permute.xlu0 %8455 }
 0x9f7   : > { %20469 = vst [vmem:[#allocation124_spill] sm:$0xff] %v18729_v50  ;;  %20470 = vst [vmem:[#allocation125_spill] sm:$0xff] %v18737_v45  ;;  %v18744_v50 = vld [vmem:[#allocation27 + $0x38] sm:$0xff]  ;;  %v18754_v45 = vld [vmem:[#allocation27 + $0x48] sm:$0xff] }
 0x9f8   : > { %14055 = vmatmul.mubr.msk.f32.gmra.mrb[48].mxu1 %vm5210_vm7, %v6289_v41  ;;  %v6293_v41 = vld [vmem:[#allocation24 + $0x3e8] sm:$0xff] }
 0x9f9   : > { %9565 = vperm.xlu0 %15977, %v18627_v6   ;;  %14057 = vmatprep.mubr.msk.f32.mxu1 %vm5210_vm7, %v6290_v35 }
 0x9fa   : > { %9513 = vperm.xlu1 %15976, %v18734_v59   ;;  %v18739_v16 = vpop.permute.xlu1 %8427  ;;  %v18749_v48 = vpop.permute.xlu0 %8463 }
 0x9fb   : > { %20471 = vst [vmem:[#allocation126_spill] sm:$0xff] %v18739_v16  ;;  %20473 = vst [vmem:[#allocation128_spill] sm:$0xff] %v18749_v48  ;;  %v18763_v48 = vld [vmem:[#allocation27 + $0x58] sm:$0xff] }
 0x9fc   : > { %14058 = vmatmul.mubr.msk.f32.gmra.mrb[50].mxu1 %vm5210_vm7, %v6291_v11  ;;  %v6295_v11 = vld [vmem:[#allocation24 + $0x3f8] sm:$0xff] }
 0x9fd   : > { %9573 = vperm.xlu0 %15977, %v18639_v21   ;;  %14060 = vmatprep.mubr.msk.f32.mxu1 %vm5210_vm7, %v6292_v40 }
 0x9fe   : > { %9521 = vperm.xlu1 %15976, %v18744_v50   ;;  %v18747_v35 = vpop.permute.xlu1 %8435 }
 0x9ff   : > { %20472 = vst [vmem:[#allocation127_spill] sm:$0xff] %v18747_v35  ;;  %v18761_v35 = vpop.permute.xlu0 %8471 }
 0xa00   : > { %14061 = vmatmul.mubr.msk.f32.gmra.mrb[52].mxu1 %vm5210_vm7, %v6293_v41  ;;  %20475 = vst [vmem:[#allocation130_spill] sm:$0xff] %v18761_v35 }
 0xa01   : > { %9581 = vperm.xlu0 %15977, %v18649_v9   ;;  %14063 = vmatprep.mubr.msk.f32.mxu1 %vm5210_vm7, %v6294_v60  ;;  %v18769_v60 = vld [vmem:[#allocation27 + $0x68] sm:$0xff] }
 0xa02   : > { %9529 = vperm.xlu1 %15976, %v18754_v45   ;;  %v18757_v40 = vpop.permute.xlu1 %8443 }
 0xa03   : > { %20474 = vst [vmem:[#allocation129_spill] sm:$0xff] %v18757_v40  ;;  %v18774_v40 = vpop.permute.xlu0 %8479 }
 0xa04   : > { %14064 = vmatmul.mubr.msk.f32.gmra.mrb[54].mxu1 %vm5210_vm7, %v6295_v11  ;;  %20478 = vst [vmem:[#allocation133_spill] sm:$0xff] %v18774_v40  ;;  %v18777_v11 = vld [vmem:[#allocation27 + $0x78] sm:$0xff] }
 0xa05   : > { %9589 = vperm.xlu0 %15977, %v18659_v14  }
 0xa06   : > { %9537 = vperm.xlu1 %15976, %v18763_v48   ;;  %v18766_v41 = vpop.permute.xlu1 %8451 }
 0xa07   : > { %20476 = vst [vmem:[#allocation131_spill] sm:$0xff] %v18766_v41  ;;  %v7156_v41 = vld [vmem:[#allocation25 + $0x10] sm:$0xff]  ;;  %v18783_v30 = vpop.permute.xlu0 %8487 }
 0xa08   : > { %20480 = vst [vmem:[#allocation135_spill] sm:$0xff] %v18783_v30  ;;  %v18800_v30 = vld [vmem:[#allocation27 + $0x98] sm:$0xff] }
 0xa09   : > { %9597 = vperm.xlu0 %15977, %v18671_v5  }
 0xa0a   : > { %9545 = vperm.xlu1 %15976, %v18769_v60   ;;  %v18772_v16 = vpop.permute.xlu1 %8459 }
 0xa0b   : > { %20477 = vst [vmem:[#allocation132_spill] sm:$0xff] %v18772_v16  ;;  %v15142_v16 = vpack.c.bf16 %v7157_v18, %v7156_v41  ;;  %v18806_v41 = vpop.permute.xlu0 %8495 }
 0xa0c   : > { %20486 = vst [vmem:[#allocation138_spill] sm:$0xff] %v18806_v41 }
 0xa0d   : > { %9605 = vperm.xlu0 %15977, %v18683_v37   ;;  %15144 = vmatprep.subr.msk.bf16.mxu0 %vm18790_vm11, %v15142_v16 }
 0xa0e   : > { %9553 = vperm.xlu1 %15976, %v18777_v11   ;;  %v18780_v35 = vpop.permute.xlu1 %8467  ;;  %15147 = vmatpush3.bf16.msk.msra.mxu0 %vm18790_vm11, %v15142_v16 }
 0xa0f   : > { %20479 = vst [vmem:[#allocation134_spill] sm:$0xff] %v18780_v35  ;;  %v7124_v35 = vmul.f32 %v18376_v61, %v6964_v43  ;;  %v18809_v43 = vld [vmem:[#allocation27 + $0xa8] sm:$0xff]  ;;  %v18815_v16 = vpop.permute.xlu0 %8503 }
 0xa10   : > { %20488 = vst [vmem:[#allocation140_spill] sm:$0xff] %v18815_v16  ;;  %v18829_v16 = vld [vmem:[#allocation27 + $0xd8] sm:$0xff] }
 0xa11   : > { %9613 = vperm.xlu0 %15977, %v18695_v49   ;;  %14071 = vmatmul.mubr.msk.f32.vlgmr.msra.gmra.mrb[10].mxu0 %vm811_vm8, %v7124_v35 }
 0xa12   : > { %9561 = vperm.xlu1 %15976, %v18785_v3   ;;  %v18788_v40 = vpop.permute.xlu1 %8475 }
 0xa13   : > { %20481 = vst [vmem:[#allocation136_spill] sm:$0xff] %v18788_v40  ;;  %v18817_v40 = vld [vmem:[#allocation27 + $0xb8] sm:$0xff]  ;;  %v18827_v41 = vpop.permute.xlu0 %8511 }
 0xa14   : > { %20490 = vst [vmem:[#allocation142_spill] sm:$0xff] %v18827_v41 }
 0xa15   : > { %15978 = vset.pattern.permute.xlu0 %v20484_v12 }
 0xa16   : > { %9569 = vperm.xlu1 %15976, %v18800_v30   ;;  %10044 = vperm.xlu0 %15978, %v18707_v19   ;;  %v18804_v18 = vpop.permute.xlu1 %8483 }
 0xa17   : > { %20485 = vst [vmem:[#allocation137_spill] sm:$0xff] %v18804_v18  ;;  %v18821_v18 = vld [vmem:[#allocation27 + $0xc8] sm:$0xff] }
 0xa1a   : > { %9577 = vperm.xlu1 %15976, %v18809_v43   ;;  %10056 = vperm.xlu0 %15978, %v18726_v28   ;;  %v18813_v61 = vpop.permute.xlu1 %8491 }
 0xa1b   : > { %20487 = vst [vmem:[#allocation139_spill] sm:$0xff] %v18813_v61  ;;  %v6962_v61 = vld [vmem:[#allocation25 + $0x8] sm:$0xf] }
 0xa1c   : > { %v15148_v13 = vpack.c.bf16 %v6962_v61, %v6961_v7 }
 0xa1e   : > { %9585 = vperm.xlu1 %15976, %v18817_v40   ;;  %10064 = vperm.xlu0 %15978, %v18734_v59   ;;  %v18825_v35 = vpop.permute.xlu1 %8499 }
 0xa1f   : > { %20489 = vst [vmem:[#allocation141_spill] sm:$0xff] %v18825_v35  ;;  %15150 = vmatprep.subr.msk.bf16.mxu0 %vm18790_vm11, %v15148_v13  ;;  %v18839_v35 = vpop.permute.xlu0 %8942 }
 0xa20   : > { %15153 = vmatpush3.bf16.msk.msra.mxu0 %vm18790_vm11, %v15148_v13  ;;  %20492 = vst [vmem:[#allocation144_spill] sm:$0xff] %v18839_v35 }
 0xa22   : > { %9593 = vperm.xlu1 %15976, %v18821_v18   ;;  %10072 = vperm.xlu0 %15978, %v18744_v50   ;;  %v18837_v8 = vpop.permute.xlu1 %8507 }
 0xa23   : > { %20491 = vst [vmem:[#allocation143_spill] sm:$0xff] %v18837_v8  ;;  %v18847_v61 = vpop.permute.xlu0 %8954 }
 0xa24   : > { %20494 = vst [vmem:[#allocation146_spill] sm:$0xff] %v18847_v61 }
 0xa26   : > { %9601 = vperm.xlu1 %15976, %v18829_v16   ;;  %10080 = vperm.xlu0 %15978, %v18754_v45   ;;  %v18845_v7 = vpop.permute.xlu1 %8515 }
 0xa27   : > { %20493 = vst [vmem:[#allocation145_spill] sm:$0xff] %v18845_v7  ;;  %v18854_v35 = vpop.permute.xlu0 %8962 }
 0xa28   : > { %20496 = vst [vmem:[#allocation148_spill] sm:$0xff] %v18854_v35 }
 0xa2a   : > { %9609 = vperm.xlu1 %15976, %v18624_v24   ;;  %10088 = vperm.xlu0 %15978, %v18763_v48  }
 0xa2b   : > { %v18862_v61 = vpop.permute.xlu0 %8970 }
 0xa2c   : > { %v18852_v13 = vpop.permute.xlu1 %8946  ;;  %20498 = vst [vmem:[#allocation150_spill] sm:$0xff] %v18862_v61 }
 0xa2d   : > { %20495 = vst [vmem:[#allocation147_spill] sm:$0xff] %v18852_v13 }
 0xa2e   : > { %9617 = vperm.xlu1 %15976, %v18636_v2   ;;  %10096 = vperm.xlu0 %15978, %v18769_v60  }
 0xa2f   : > { %v18868_v13 = vpop.permute.xlu0 %8978 }
 0xa30   : > { %v18859_v41 = vpop.permute.xlu1 %8950  ;;  %20500 = vst [vmem:[#allocation152_spill] sm:$0xff] %v18868_v13 }
 0xa31   : > { %20497 = vst [vmem:[#allocation149_spill] sm:$0xff] %v18859_v41 }
 0xa32   : > { %15979 = vset.pattern.permute.xlu1 %v20484_v12  ;;  %10104 = vperm.xlu0 %15978, %v18777_v11  }
 0xa33   : > { %10048 = vperm.xlu1 %15979, %v18541_v46   ;;  %v18876_v41 = vpop.permute.xlu0 %8986 }
 0xa34   : > { %v18866_v12 = vpop.permute.xlu1 %8958  ;;  %20502 = vst [vmem:[#allocation154_spill] sm:$0xff] %v18876_v41  ;;  %v20507_v41 = vmov 7  }
 0xa35   : > { %20499 = vst [vmem:[#allocation151_spill] sm:$0xff] %v18866_v12 }
 0xa36   : > { %10112 = vperm.xlu0 %15978, %v18785_v3  }
 0xa37   : > { %10052 = vperm.xlu1 %15979, %v18551_v39   ;;  %v18882_v12 = vpop.permute.xlu0 %8994 }
 0xa38   : > { %v18873_v35 = vpop.permute.xlu1 %8966  ;;  %20504 = vst [vmem:[#allocation156_spill] sm:$0xff] %v18882_v12 }
 0xa39   : > { %20501 = vst [vmem:[#allocation153_spill] sm:$0xff] %v18873_v35 }
 0xa3a   : > { %10120 = vperm.xlu0 %15978, %v18800_v30  }
 0xa3b   : > { %10060 = vperm.xlu1 %15979, %v18662_v51   ;;  %v18890_v35 = vpop.permute.xlu0 %9002 }
 0xa3c   : > { %v18880_v61 = vpop.permute.xlu1 %8974  ;;  %20506 = vst [vmem:[#allocation158_spill] sm:$0xff] %v18890_v35 }
 0xa3d   : > { %20503 = vst [vmem:[#allocation155_spill] sm:$0xff] %v18880_v61 }
 0xa3e   : > { %10128 = vperm.xlu0 %15978, %v18809_v43  }
 0xa3f   : > { %10068 = vperm.xlu1 %15979, %v18674_v27   ;;  %v18897_v12 = vpop.permute.xlu0 %9010 }
 0xa40   : > { %v18887_v13 = vpop.permute.xlu1 %8982  ;;  %20509 = vst [vmem:[#allocation160_spill] sm:$0xff] %v18897_v12 }
 0xa41   : > { %20505 = vst [vmem:[#allocation157_spill] sm:$0xff] %v18887_v13  ;;  %v8000_v13 = vld [vmem:[#allocation25 + $0x20] sm:$0xff] }
 0xa42   : > { %10136 = vperm.xlu0 %15978, %v18817_v40  }
 0xa43   : > { %10076 = vperm.xlu1 %15979, %v18686_v34   ;;  %v18905_v35 = vpop.permute.xlu0 %9018 }
 0xa44   : > { %v18895_v61 = vpop.permute.xlu1 %8990  ;;  %20511 = vst [vmem:[#allocation162_spill] sm:$0xff] %v18905_v35 }
 0xa45   : > { %20508 = vst [vmem:[#allocation159_spill] sm:$0xff] %v18895_v61  ;;  %v8001_v61 = vld [vmem:[#allocation25 + $0x28] sm:$0xf] }
 0xa46   : > { %10144 = vperm.xlu0 %15978, %v18821_v18   ;;  %v18911_v12 = vpack.c.bf16 %v8001_v61, %v8000_v13 }
 0xa47   : > { %10084 = vperm.xlu1 %15979, %v18585_v42   ;;  %v18913_v63 = vpop.permute.xlu0 %9026 }
 0xa48   : > { %v18901_v7 = vpop.permute.xlu1 %8998  ;;  %20513 = vst [vmem:[#allocation164_spill] sm:$0xff] %v18913_v63  ;;  %15156 = vmatprep.subr.msk.bf16.mxu0 %vm18790_vm11, %v18911_v12 }
 0xa49   : > { %20510 = vst [vmem:[#allocation161_spill] sm:$0xff] %v18901_v7 }
 0xa4a   : > { %10152 = vperm.xlu0 %15978, %v18829_v16  }
 0xa4b   : > { %10092 = vperm.xlu1 %15979, %v18595_v20   ;;  %v18924_v7 = vpop.permute.xlu0 %9034 }
 0xa4c   : > { %v18909_v8 = vpop.permute.xlu1 %9006  ;;  %20515 = vst [vmem:[#allocation166_spill] sm:$0xff] %v18924_v7 }
 0xa4d   : > { %20512 = vst [vmem:[#allocation163_spill] sm:$0xff] %v18909_v8 }
 0xa4e   : > { %10160 = vperm.xlu0 %15978, %v18624_v24  }
 0xa4f   : > { %10100 = vperm.xlu1 %15979, %v18605_v62   ;;  %v18930_v13 = vpop.permute.xlu0 %9042 }
 0xa50   : > { %v18920_v35 = vpop.permute.xlu1 %9014  ;;  %20517 = vst [vmem:[#allocation168_spill] sm:$0xff] %v18930_v13 }
 0xa51   : > { %20514 = vst [vmem:[#allocation165_spill] sm:$0xff] %v18920_v35 }
 0xa52   : > { %10168 = vperm.xlu0 %15978, %v18636_v2  }
 0xa53   : > { %10108 = vperm.xlu1 %15979, %v18615_v57   ;;  %v18938_v35 = vpop.permute.xlu0 %9050 }
 0xa54   : > { %v18928_v61 = vpop.permute.xlu1 %9022  ;;  %20519 = vst [vmem:[#allocation170_spill] sm:$0xff] %v18938_v35 }
 0xa55   : > { %20516 = vst [vmem:[#allocation167_spill] sm:$0xff] %v18928_v61 }
 0xa56   : > { %15981 = vset.pattern.permute.xlu0 %v20507_v41 }
 0xa57   : > { %10116 = vperm.xlu1 %15979, %v18627_v6   ;;  %10599 = vperm.xlu0 %15981, %v18541_v46   ;;  %v18945_v13 = vpop.permute.xlu0 %9058 }
 0xa58   : > { %v18935_v63 = vpop.permute.xlu1 %9030  ;;  %20521 = vst [vmem:[#allocation172_spill] sm:$0xff] %v18945_v13 }
 0xa59   : > { %20518 = vst [vmem:[#allocation169_spill] sm:$0xff] %v18935_v63 }
 0xa5b   : > { %10124 = vperm.xlu1 %15979, %v18639_v21   ;;  %10611 = vperm.xlu0 %15981, %v18662_v51   ;;  %v18952_v63 = vpop.permute.xlu0 %9066 }
 0xa5c   : > { %v18943_v7 = vpop.permute.xlu1 %9038  ;;  %20523 = vst [vmem:[#allocation174_spill] sm:$0xff] %v18952_v63  ;;  %v20528_v63 = vmov 8  }
 0xa5d   : > { %20520 = vst [vmem:[#allocation171_spill] sm:$0xff] %v18943_v7 }
 0xa5f   : > { %10132 = vperm.xlu1 %15979, %v18649_v9   ;;  %10619 = vperm.xlu0 %15981, %v18674_v27   ;;  %v18959_v7 = vpop.permute.xlu0 %9497 }
 0xa60   : > { %20525 = vst [vmem:[#allocation176_spill] sm:$0xff] %v18959_v7 }
 0xa63   : > { %10140 = vperm.xlu1 %15979, %v18659_v14   ;;  %10627 = vperm.xlu0 %15981, %v18686_v34  }
 0xa67   : > { %10148 = vperm.xlu1 %15979, %v18671_v5   ;;  %10635 = vperm.xlu0 %15981, %v18585_v42  }
 0xa6b   : > { %10156 = vperm.xlu1 %15979, %v18683_v37   ;;  %10643 = vperm.xlu0 %15981, %v18595_v20  }
 0xa6f   : > { %10164 = vperm.xlu1 %15979, %v18695_v49   ;;  %10651 = vperm.xlu0 %15981, %v18605_v62  }
 0xa73   : > { %15980 = vset.pattern.permute.xlu1 %v20507_v41  ;;  %10659 = vperm.xlu0 %15981, %v18615_v57   ;;  %v18949_v41 = vpop.permute.xlu1 %9046 }
 0xa74   : > { %10595 = vperm.xlu1 %15980, %v18707_v19   ;;  %20522 = vst [vmem:[#allocation173_spill] sm:$0xff] %v18949_v41  ;;  %v18966_v41 = vpop.permute.xlu0 %9509 }
 0xa75   : > { %20527 = vst [vmem:[#allocation178_spill] sm:$0xff] %v18966_v41 }
 0xa77   : > { %10667 = vperm.xlu0 %15981, %v18627_v6   ;;  %v18957_v35 = vpop.permute.xlu1 %9054 }
 0xa78   : > { %10603 = vperm.xlu1 %15980, %v18551_v39   ;;  %20524 = vst [vmem:[#allocation175_spill] sm:$0xff] %v18957_v35  ;;  %v18974_v7 = vpop.permute.xlu0 %9517 }
 0xa79   : > { %20530 = vst [vmem:[#allocation180_spill] sm:$0xff] %v18974_v7 }
 0xa7b   : > { %10675 = vperm.xlu0 %15981, %v18639_v21   ;;  %v18963_v13 = vpop.permute.xlu1 %9062 }
 0xa7c   : > { %10607 = vperm.xlu1 %15980, %v18726_v28   ;;  %20526 = vst [vmem:[#allocation177_spill] sm:$0xff] %v18963_v13  ;;  %v18980_v41 = vpop.permute.xlu0 %9525 }
 0xa7d   : > { %20532 = vst [vmem:[#allocation182_spill] sm:$0xff] %v18980_v41 }
 0xa7f   : > { %10683 = vperm.xlu0 %15981, %v18649_v9   ;;  %v18972_v35 = vpop.permute.xlu1 %9493 }
 0xa80   : > { %10615 = vperm.xlu1 %15980, %v18734_v59   ;;  %20529 = vst [vmem:[#allocation179_spill] sm:$0xff] %v18972_v35 }
 0xa83   : > { %10691 = vperm.xlu0 %15981, %v18659_v14   ;;  %v18978_v13 = vpop.permute.xlu1 %9501 }
 0xa84   : > { %10623 = vperm.xlu1 %15980, %v18744_v50   ;;  %20531 = vst [vmem:[#allocation181_spill] sm:$0xff] %v18978_v13 }
 0xa87   : > { %10699 = vperm.xlu0 %15981, %v18671_v5   ;;  %v18989_v7 = vpop.permute.xlu1 %9505 }
 0xa88   : > { %10631 = vperm.xlu1 %15980, %v18754_v45   ;;  %20533 = vst [vmem:[#allocation183_spill] sm:$0xff] %v18989_v7 }
 0xa8b   : > { %10707 = vperm.xlu0 %15981, %v18683_v37   ;;  %v19000_v7 = vpop.permute.xlu1 %9513 }
 0xa8c   : > { %10639 = vperm.xlu1 %15980, %v18763_v48  }
 0xa8f   : > { %10715 = vperm.xlu0 %15981, %v18695_v49  }
 0xa90   : > { %10647 = vperm.xlu1 %15980, %v18769_v60  }
 0xa93   : > { %15982 = vset.pattern.permute.xlu0 %v20528_v63 }
 0xa94   : > { %10655 = vperm.xlu1 %15980, %v18777_v11   ;;  %11146 = vperm.xlu0 %15982, %v18707_v19  }
 0xa98   : > { %10663 = vperm.xlu1 %15980, %v18785_v3   ;;  %11158 = vperm.xlu0 %15982, %v18726_v28  }
 0xa9b   : > { %v14020_v61 = vpop.f32.mrb[24].mxu1 }
 0xa9c   : > { %6674 = vst.msk [vmem:[#allocation4 + $0x19] sm:$0xff] %vm811_vm8, %v14020_v61  ;;  %10671 = vperm.xlu1 %15980, %v18800_v30   ;;  %v6482_v8 = vpop.f32.mrb[25].mxu1  ;;  %11166 = vperm.xlu0 %15982, %v18734_v59   ;;  %v18992_v61 = vpop.permute.xlu0 %9533 }
 0xa9d   : > { %6673 = vst.msk [vmem:[#allocation4 + $0x11] sm:$0xff] %vm811_vm8, %v6482_v8  ;;  %20534 = vst [vmem:[#allocation184_spill] sm:$0xff] %v18992_v61 }
 0xa9f   : > { %v14023_v19 = vpop.f32.mrb[26].mxu1 }
 0xaa0   : > { %6676 = vst.msk [vmem:[#allocation4 + $0x29] sm:$0xff] %vm811_vm8, %v14023_v19  ;;  %10679 = vperm.xlu1 %15980, %v18809_v43   ;;  %v6492_v28 = vpop.f32.mrb[27].mxu1  ;;  %11174 = vperm.xlu0 %15982, %v18744_v50   ;;  %v19003_v35 = vpop.permute.xlu0 %9541 }
 0xaa1   : > { %6675 = vst.msk [vmem:[#allocation4 + $0x21] sm:$0xff] %vm811_vm8, %v6492_v28 }
 0xaa3   : > { %v14026_v41 = vpop.f32.mrb[28].mxu1  ;;  %v6966_v13 = vld [vmem:[#allocation4 + $0x19] sm:$0xff] }
 0xaa4   : > { %6678 = vst.msk [vmem:[#allocation4 + $0x39] sm:$0xff] %vm811_vm8, %v14026_v41  ;;  %10687 = vperm.xlu1 %15980, %v18817_v40   ;;  %v6502_v8 = vpop.f32.mrb[29].mxu1  ;;  %11182 = vperm.xlu0 %15982, %v18754_v45   ;;  %v6965_v59 = vld [vmem:[#allocation4 + $0x11] sm:$0xff]  ;;  %v7126_v19 = vmul.f32 %v18397_v52, %v6966_v13 }
 0xaa5   : > { %6677 = vst.msk [vmem:[#allocation4 + $0x31] sm:$0xff] %vm811_vm8, %v6502_v8  ;;  %v7125_v50 = vmul.f32 %v18388_v54, %v6965_v59 }
 0xaa7   : > { %v14029_v28 = vpop.f32.mrb[30].mxu1  ;;  %14073 = vmatprep.mubr.msk.f32.mxu0 %vm811_vm8, %v7125_v50  ;;  %v6968_v61 = vld [vmem:[#allocation4 + $0x29] sm:$0xff] }
 0xaa8   : > { %6680 = vst.msk [vmem:[#allocation4 + $0x49] sm:$0xff] %vm811_vm8, %v14029_v28  ;;  %10695 = vperm.xlu1 %15980, %v18821_v18   ;;  %v6512_v45 = vpop.f32.mrb[31].mxu1  ;;  %14074 = vmatmul.mubr.msk.f32.gmra.mrb[12].mxu0 %vm811_vm8, %v7126_v19  ;;  %v6967_v41 = vld [vmem:[#allocation4 + $0x21] sm:$0xff]  ;;  %v7128_v52 = vmul.f32 %v18405_v22, %v6968_v61  ;;  %v19016_v19 = vpop.permute.xlu1 %9521 }
 0xaa9   : > { %6679 = vst.msk [vmem:[#allocation4 + $0x41] sm:$0xff] %vm811_vm8, %v6512_v45  ;;  %11190 = vperm.xlu0 %15982, %v18763_v48   ;;  %v7127_v54 = vmul.f32 %v18382_v0, %v6967_v41  ;;  %v19021_v0 = vpop.permute.xlu0 %9549 }
 0xaab   : > { %v14032_v13 = vpop.f32.mrb[32].mxu1  ;;  %14076 = vmatprep.mubr.msk.f32.mxu0 %vm811_vm8, %v7127_v54  ;;  %v6970_v8 = vld [vmem:[#allocation4 + $0x39] sm:$0xff] }
 0xaac   : > { %6682 = vst.msk [vmem:[#allocation4 + $0x59] sm:$0xff] %vm811_vm8, %v14032_v13  ;;  %10703 = vperm.xlu1 %15980, %v18829_v16   ;;  %v6522_v59 = vpop.f32.mrb[33].mxu1  ;;  %14077 = vmatmul.mubr.msk.f32.gmra.mrb[14].mxu0 %vm811_vm8, %v7128_v52  ;;  %v6969_v50 = vld [vmem:[#allocation4 + $0x31] sm:$0xff]  ;;  %v7130_v22 = vmul.f32 %v18413_v17, %v6970_v8 }
 0xaad   : > { %6681 = vst.msk [vmem:[#allocation4 + $0x51] sm:$0xff] %vm811_vm8, %v6522_v59  ;;  %11198 = vperm.xlu0 %15982, %v18769_v60   ;;  %v7129_v48 = vmul.f32 %v18390_v4, %v6969_v50  ;;  %v19032_v60 = vpop.permute.xlu1 %9529  ;;  %v19035_v13 = vpop.permute.xlu0 %9557 }
 0xaaf   : > { %v14035_v61 = vpop.f32.mrb[34].mxu1  ;;  %14079 = vmatprep.mubr.msk.f32.mxu0 %vm811_vm8, %v7129_v48  ;;  %v6972_v28 = vld [vmem:[#allocation4 + $0x49] sm:$0xff] }
 0xab0   : > { %6684 = vst.msk [vmem:[#allocation4 + $0x69] sm:$0xff] %vm811_vm8, %v14035_v61  ;;  %10711 = vperm.xlu1 %15980, %v18624_v24   ;;  %v6532_v45 = vpop.f32.mrb[35].mxu1  ;;  %14080 = vmatmul.mubr.msk.f32.gmra.mrb[16].mxu0 %vm811_vm8, %v7130_v22  ;;  %v6971_v41 = vld [vmem:[#allocation4 + $0x41] sm:$0xff]  ;;  %v7132_v17 = vmul.f32 %v18421_v53, %v6972_v28 }
 0xab1   : > { %6683 = vst.msk [vmem:[#allocation4 + $0x61] sm:$0xff] %vm811_vm8, %v6532_v45  ;;  %11206 = vperm.xlu0 %15982, %v18777_v11   ;;  %v7131_v4 = vmul.f32 %v18399_v36, %v6971_v41 }
 0xab3   : > { %v14038_v54 = vpop.f32.mrb[36].mxu1  ;;  %14082 = vmatprep.mubr.msk.f32.mxu0 %vm811_vm8, %v7131_v4  ;;  %v6974_v52 = vld [vmem:[#allocation4 + $0x59] sm:$0xff] }
 0xab4   : > { %6686 = vst.msk [vmem:[#allocation4 + $0x79] sm:$0xff] %vm811_vm8, %v14038_v54  ;;  %10719 = vperm.xlu1 %15980, %v18636_v2   ;;  %v6542_v8 = vpop.f32.mrb[37].mxu1  ;;  %14083 = vmatmul.mubr.msk.f32.gmra.mrb[18].mxu0 %vm811_vm8, %v7132_v17  ;;  %v6973_v11 = vld [vmem:[#allocation4 + $0x51] sm:$0xff]  ;;  %v7134_v53 = vmul.f32 %v18429_v58, %v6974_v52 }
 0xab5   : > { %6685 = vst.msk [vmem:[#allocation4 + $0x71] sm:$0xff] %vm811_vm8, %v6542_v8  ;;  %11214 = vperm.xlu0 %15982, %v18785_v3   ;;  %v7133_v36 = vmul.f32 %v18407_v26, %v6973_v11  ;;  %v19049_v3 = vpop.permute.xlu1 %9537  ;;  %v19055_v26 = vpop.permute.xlu0 %9565 }
 0xab6   : > { %20535 = vst [vmem:[#allocation185_spill] sm:$0xff] %v19055_v26 }
 0xab7   : > { %v14041_v59 = vpop.f32.mrb[38].mxu1  ;;  %14085 = vmatprep.mubr.msk.f32.mxu0 %vm811_vm8, %v7133_v36  ;;  %v6976_v50 = vld [vmem:[#allocation4 + $0x69] sm:$0xff] }
 0xab8   : > { %6688 = vst.msk [vmem:[#allocation4 + $0x89] sm:$0xff] %vm811_vm8, %v14041_v59  ;;  %15983 = vset.pattern.permute.xlu1 %v20528_v63  ;;  %v6552_v48 = vpop.f32.mrb[39].mxu1  ;;  %14086 = vmatmul.mubr.msk.f32.gmra.mrb[20].mxu0 %vm811_vm8, %v7134_v53  ;;  %v6975_v22 = vld [vmem:[#allocation4 + $0x61] sm:$0xff]  ;;  %v7136_v58 = vmul.f32 %v18437_v31, %v6976_v50 }
 0xab9   : > { %6687 = vst.msk [vmem:[#allocation4 + $0x81] sm:$0xff] %vm811_vm8, %v6552_v48  ;;  %11222 = vperm.xlu0 %15982, %v18800_v30   ;;  %11150 = vperm.xlu1 %15983, %v18541_v46   ;;  %v7135_v38 = vmul.f32 %v18415_v44, %v6975_v22  ;;  %v19066_v30 = vpop.permute.xlu1 %9545  ;;  %v19069_v4 = vpop.permute.xlu0 %9573 }
 0xaba   : > { %20536 = vst [vmem:[#allocation186_spill] sm:$0xff] %v19069_v4 }
 0xabb   : > { %v14044_v61 = vpop.f32.mrb[40].mxu1  ;;  %14088 = vmatprep.mubr.msk.f32.mxu0 %vm811_vm8, %v7135_v38  ;;  %v6978_v63 = vld [vmem:[#allocation4 + $0x79] sm:$0xff] }
 0xabc   : > { %6690 = vst.msk [vmem:[#allocation4 + $0x99] sm:$0xff] %vm811_vm8, %v14044_v61  ;;  %v6562_v28 = vpop.f32.mrb[41].mxu1  ;;  %14089 = vmatmul.mubr.msk.f32.gmra.mrb[22].mxu0 %vm811_vm8, %v7136_v58  ;;  %v6977_v45 = vld [vmem:[#allocation4 + $0x71] sm:$0xff]  ;;  %v7138_v31 = vmul.f32 %v18445_v25, %v6978_v63 }
 0xabd   : > { %6689 = vst.msk [vmem:[#allocation4 + $0x91] sm:$0xff] %vm811_vm8, %v6562_v28  ;;  %11230 = vperm.xlu0 %15982, %v18809_v43   ;;  %11154 = vperm.xlu1 %15983, %v18551_v39   ;;  %v7137_v44 = vmul.f32 %v18423_v10, %v6977_v45  ;;  %v19081_v11 = vpop.permute.xlu1 %9553 }
 0xabf   : > { %v14047_v46 = vpop.f32.mrb[42].mxu1  ;;  %14091 = vmatprep.mubr.msk.f32.mxu0 %vm811_vm8, %v7137_v44  ;;  %v6980_v41 = vld [vmem:[#allocation4 + $0x89] sm:$0xff] }
 0xac0   : > { %6692 = vst.msk [vmem:[#allocation4 + $0xa9] sm:$0xff] %vm811_vm8, %v14047_v46  ;;  %v6572_v17 = vpop.f32.mrb[43].mxu1  ;;  %14092 = vmatmul.mubr.msk.f32.gmra.mrb[24].mxu0 %vm811_vm8, %v7138_v31  ;;  %v6979_v43 = vld [vmem:[#allocation4 + $0x81] sm:$0xff]  ;;  %v7140_v25 = vmul.f32 %v18455_v29, %v6980_v41 }
 0xac1   : > { %6691 = vst.msk [vmem:[#allocation4 + $0xa1] sm:$0xff] %vm811_vm8, %v6572_v17  ;;  %11238 = vperm.xlu0 %15982, %v18817_v40   ;;  %11162 = vperm.xlu1 %15983, %v18662_v51   ;;  %v7139_v10 = vmul.f32 %v18431_v55, %v6979_v43  ;;  %v19087_v55 = vpop.permute.xlu0 %9581  ;;  %v20544_v17 = vld [vmem:[#allocation78_spill] sm:$0xff] }
 0xac2   : > { %20537 = vst [vmem:[#allocation187_spill] sm:$0xff] %v19087_v55 }
 0xac3   : > { %v14050_v39 = vpop.f32.mrb[44].mxu1  ;;  %14094 = vmatprep.mubr.msk.f32.mxu0 %vm811_vm8, %v7139_v10  ;;  %v6982_v54 = vld [vmem:[#allocation4 + $0x99] sm:$0xff] }
 0xac4   : > { %6694 = vst.msk [vmem:[#allocation4 + $0xb9] sm:$0xff] %vm811_vm8, %v14050_v39  ;;  %v6582_v52 = vpop.f32.mrb[45].mxu1  ;;  %14095 = vmatmul.mubr.msk.f32.gmra.mrb[26].mxu0 %vm811_vm8, %v7140_v25  ;;  %v6981_v8 = vld [vmem:[#allocation4 + $0x91] sm:$0xff]  ;;  %v7142_v51 = vmul.f32 %v18465_v1, %v6982_v54 }
 0xac5   : > { %6693 = vst.msk [vmem:[#allocation4 + $0xb1] sm:$0xff] %vm811_vm8, %v6582_v52  ;;  %11246 = vperm.xlu0 %15982, %v18821_v18   ;;  %11170 = vperm.xlu1 %15983, %v18674_v27   ;;  %v7141_v29 = vmul.f32 %v18439_v47, %v6981_v8  ;;  %v19098_v27 = vpop.permute.xlu1 %9561  ;;  %v19101_v48 = vpop.permute.xlu0 %9589  ;;  %v20547_v8 = vld [vmem:[#allocation80_spill] sm:$0xff] }
 0xac6   : > { %20538 = vst [vmem:[#allocation188_spill] sm:$0xff] %v19101_v48 }
 0xac7   : > { %v14053_v40 = vpop.f32.mrb[46].mxu1  ;;  %14097 = vmatprep.mubr.msk.f32.mxu0 %vm811_vm8, %v7141_v29  ;;  %v6984_v36 = vld [vmem:[#allocation4 + $0xa9] sm:$0xff] }
 0xac8   : > { %6696 = vst.msk [vmem:[#allocation4 + $0xc9] sm:$0xff] %vm811_vm8, %v14053_v40  ;;  %v6592_v53 = vpop.f32.mrb[47].mxu1  ;;  %14098 = vmatmul.mubr.msk.f32.gmra.mrb[28].mxu0 %vm811_vm8, %v7142_v51  ;;  %v6983_v59 = vld [vmem:[#allocation4 + $0xa1] sm:$0xff]  ;;  %v7144_v1 = vmul.f32 %v18476_v33, %v6984_v36 }
 0xac9   : > { %6695 = vst.msk [vmem:[#allocation4 + $0xc1] sm:$0xff] %vm811_vm8, %v6592_v53  ;;  %11254 = vperm.xlu0 %15982, %v18829_v16   ;;  %11178 = vperm.xlu1 %15983, %v18686_v34   ;;  %v7143_v47 = vmul.f32 %v18447_v32, %v6983_v59  ;;  %v19113_v63 = vpop.permute.xlu1 %9569  ;;  %v6737_v40 = vld [vmem:[#allocation4] sm:$0xff] }
 0xaca   : > { %20539 = vst [vmem:[#allocation189_spill] sm:$0xff] %v19113_v63  ;;  %v20549_v59 = vld [vmem:[#allocation77_spill] sm:$0xff] }
 0xacb   : > { %v14056_v18 = vpop.f32.mrb[48].mxu1  ;;  %14100 = vmatprep.mubr.msk.f32.mxu0 %vm811_vm8, %v7143_v47  ;;  %v6986_v50 = vld [vmem:[#allocation4 + $0xb9] sm:$0xff] }
 0xacc   : > { %6698 = vst.msk [vmem:[#allocation4 + $0xd9] sm:$0xff] %vm811_vm8, %v14056_v18  ;;  %v6602_v22 = vpop.f32.mrb[49].mxu1  ;;  %14101 = vmatmul.mubr.msk.f32.gmra.mrb[30].mxu0 %vm811_vm8, %v7144_v1  ;;  %v6985_v16 = vld [vmem:[#allocation4 + $0xb1] sm:$0xff]  ;;  %v7146_v33 = vmul.f32 %v18484_v56, %v6986_v50  ;;  %v20542_v56 = vld [vmem:[#allocation76_spill] sm:$0xff] }
 0xacd   : > { %6697 = vst.msk [vmem:[#allocation4 + $0xd1] sm:$0xff] %vm811_vm8, %v6602_v22  ;;  %11262 = vperm.xlu0 %15982, %v18624_v24   ;;  %11186 = vperm.xlu1 %15983, %v18585_v42   ;;  %v7145_v32 = vmul.f32 %v18457_v15, %v6985_v16  ;;  %v20540_v42 = vld [vmem:[#allocation73_spill] sm:$0xff]  ;;  %v19118_v24 = vpop.permute.xlu0 %9597  ;;  %v19129_v10 = vpop.permute.xlu1 %9577  ;;  %v20550_v1 = vld [vmem:[#allocation82_spill] sm:$0xff] }
 0xace   : > { %20541 = vst [vmem:[#allocation73_spill] sm:$0xff] %v19118_v24  ;;  %20545 = vst [vmem:[#allocation76_spill] sm:$0xff] %v19129_v10  ;;  %v6738_v22 = vld [vmem:[#allocation4 + $0x8] sm:$0xff]  ;;  %v19148_v16 = vld [vmem:[#allocation4 + $0x10] sm:$0xff] }
 0xacf   : > { %v14059_v34 = vpop.f32.mrb[50].mxu1  ;;  %14103 = vmatprep.mubr.msk.f32.mxu0 %vm811_vm8, %v7145_v32  ;;  %v6988_v38 = vld [vmem:[#allocation4 + $0xc9] sm:$0xff] }
 0xad0   : > { %6700 = vst.msk [vmem:[#allocation4 + $0xe9] sm:$0xff] %vm811_vm8, %v14059_v34  ;;  %v6612_v58 = vpop.f32.mrb[51].mxu1  ;;  %14104 = vmatmul.mubr.msk.f32.gmra.mrb[32].mxu0 %vm811_vm8, %v7146_v33  ;;  %v6987_v61 = vld [vmem:[#allocation4 + $0xc1] sm:$0xff]  ;;  %v7148_v28 = vmul.f32 %v20542_v56, %v6988_v38  ;;  %v8552_v33 = vld [vmem:[#allocation25 + $0x38] sm:$0xf] }
 0xad1   : > { %6699 = vst.msk [vmem:[#allocation4 + $0xe1] sm:$0xff] %vm811_vm8, %v6612_v58  ;;  %11194 = vperm.xlu1 %15983, %v18595_v20   ;;  %v7147_v15 = vmul.f32 %v20540_v42, %v6987_v61  ;;  %11270 = vperm.xlu0 %15982, %v18636_v2   ;;  %v20543_v20 = vld [vmem:[#allocation74_spill] sm:$0xff]  ;;  %v19140_v53 = vpop.permute.xlu1 %9585  ;;  %v8551_v32 = vld [vmem:[#allocation25 + $0x30] sm:$0xff]  ;;  %v19157_v42 = vld [vmem:[#allocation4 + $0x18] sm:$0xff] }
 0xad2   : > { %20548 = vst [vmem:[#allocation74_spill] sm:$0xff] %v19140_v53  ;;  %v20554_v58 = vld [vmem:[#allocation50_spill] sm:$0xff]  ;;  %v19162_v56 = vld [vmem:[#allocation4 + $0x20] sm:$0xff] }
 0xad3   : > { %v14062_v45 = vpop.f32.mrb[52].mxu1  ;;  %14106 = vmatprep.mubr.msk.f32.mxu0 %vm811_vm8, %v7147_v15  ;;  %v6990_v44 = vld [vmem:[#allocation4 + $0xd9] sm:$0xff]  ;;  %v6931_v61 = vmul.f32 %v20554_v58, %v19148_v16  ;;  %v19159_v15 = vpack.c.bf16 %v8552_v33, %v8551_v32  ;;  %v19426_v10 = vld [vmem:[#allocation4 + $0xaa] sm:$0xff] }
 0xad4   : > { %6702 = vst.msk [vmem:[#allocation4 + $0xf9] sm:$0xff] %vm811_vm8, %v14062_v45  ;;  %v6622_v31 = vpop.f32.mrb[53].mxu1  ;;  %14107 = vmatmul.mubr.msk.f32.gmra.mrb[34].mxu0 %vm811_vm8, %v7148_v28  ;;  %v6989_v46 = vld [vmem:[#allocation4 + $0xd1] sm:$0xff]  ;;  %v7150_v43 = vmul.f32 %v20544_v17, %v6990_v44  ;;  %v19171_v45 = vld [vmem:[#allocation4 + $0x28] sm:$0xff]  ;;  %v19238_v58 = vld [vmem:[#allocation4 + $0x80] sm:$0xff] }
 0xad5   : > { %6701 = vst.msk [vmem:[#allocation4 + $0xf1] sm:$0xff] %vm811_vm8, %v6622_v31  ;;  %11202 = vperm.xlu1 %15983, %v18605_v62   ;;  %v7149_v41 = vmul.f32 %v20543_v20, %v6989_v46  ;;  %v20546_v62 = vld [vmem:[#allocation75_spill] sm:$0xff]  ;;  %v19153_v38 = vpop.permute.xlu1 %9593 }
 0xad6   : > { %20553 = vst [vmem:[#allocation78_spill] sm:$0xff] %v19153_v38  ;;  %20556 = vst [vmem:[#allocation75_spill] sm:$0xff] %v19171_v45  ;;  %v20557_v44 = vld [vmem:[#allocation51_spill] sm:$0xff]  ;;  %v19406_v38 = vld [vmem:[#allocation4 + $0x8a] sm:$0xff] }
 0xad7   : > { %v14065_v2 = vpop.f32.mrb[54].mxu1  ;;  %14109 = vmatprep.mubr.msk.f32.mxu0 %vm811_vm8, %v7149_v41  ;;  %v6992_v25 = vld [vmem:[#allocation4 + $0xe9] sm:$0xff]  ;;  %v6933_v31 = vmul.f32 %v20557_v44, %v19162_v56  ;;  %v20561_v41 = vld [vmem:[#allocation52_spill] sm:$0xff]  ;;  %v20574_v32 = vld [vmem:[#allocation55_spill] sm:$0xff] }
 0xad8   : > { %6704 = vst.msk [vmem:[#allocation4 + $0x109] sm:$0xff] %vm811_vm8, %v14065_v2  ;;  %v6632_v39 = vpop.f32.mrb[55].mxu1  ;;  %14110 = vmatmul.mubr.msk.f32.gmra.mrb[36].mxu0 %vm811_vm8, %v7150_v43  ;;  %v6991_v54 = vld [vmem:[#allocation4 + $0xe1] sm:$0xff]  ;;  %v7152_v29 = vmul.f32 %v20547_v8, %v6992_v25  ;;  %v19178_v46 = vld [vmem:[#allocation4 + $0x30] sm:$0xff]  ;;  %v19189_v43 = vld [vmem:[#allocation4 + $0x38] sm:$0xff] }
 0xad9   : > { %6703 = vst.msk [vmem:[#allocation4 + $0x101] sm:$0xff] %vm811_vm8, %v6632_v39  ;;  %11210 = vperm.xlu1 %15983, %v18615_v57   ;;  %v7151_v52 = vmul.f32 %v20546_v62, %v6991_v54  ;;  %v20551_v57 = vld [vmem:[#allocation41_spill] sm:$0xff]  ;;  %20558 = vst [vmem:[#allocation80_spill] sm:$0xff] %v19178_v46  ;;  %v6935_v17 = vmul.f32 %v19178_v46, %v20561_v41  ;;  %v19204_v8 = vld [vmem:[#allocation4 + $0x50] sm:$0xff] }
 0xada   : > { %v6929_v50 = vmul.f32 %v20551_v57, %v6737_v40  ;;  %v19191_v2 = vld [vmem:[#allocation4 + $0x40] sm:$0xff] }
 0xadb   : > { %14112 = vmatprep.mubr.msk.f32.mxu0 %vm811_vm8, %v7151_v52  ;;  %v6994_v51 = vld [vmem:[#allocation4 + $0xf9] sm:$0xff]  ;;  %20562 = vst [vmem:[#allocation82_spill] sm:$0xff] %v19191_v2  ;;  %v20565_v54 = vld [vmem:[#allocation45_spill] sm:$0xff] }
 0xadc   : > { %14113 = vmatmul.mubr.msk.f32.gmra.mrb[38].mxu0 %vm811_vm8, %v7152_v29  ;;  %v6993_v36 = vld [vmem:[#allocation4 + $0xf1] sm:$0xff]  ;;  %v7154_v18 = vmul.f32 %v20550_v1, %v6994_v51  ;;  %v6937_v62 = vmul.f32 %v19191_v2, %v20565_v54  ;;  %v19202_v52 = vld [vmem:[#allocation4 + $0x48] sm:$0xff]  ;;  %v19258_v54 = vld [vmem:[#allocation4 + $0xa0] sm:$0xff] }
 0xadd   : > { %11218 = vperm.xlu1 %15983, %v18627_v6   ;;  %v7153_v47 = vmul.f32 %v20549_v59, %v6993_v36  ;;  %v20552_v6 = vld [vmem:[#allocation49_spill] sm:$0xff]  ;;  %v20568_v51 = vld [vmem:[#allocation46_spill] sm:$0xff]  ;;  %v19213_v36 = vld [vmem:[#allocation4 + $0x58] sm:$0xff] }
 0xade   : > { %v6930_v34 = vmul.f32 %v20552_v6, %v6738_v22  ;;  %20566 = vst [vmem:[#allocation49_spill] sm:$0xff] %v19204_v8  ;;  %v6939_v40 = vmul.f32 %v19204_v8, %v20568_v51  ;;  %v19215_v59 = vld [vmem:[#allocation4 + $0x60] sm:$0xff]  ;;  %v19228_v22 = vld [vmem:[#allocation4 + $0x70] sm:$0xff] }
 0xadf   : > { %14115 = vmatprep.mubr.msk.f32.mxu0 %vm811_vm8, %v7153_v47  ;;  %20569 = vst [vmem:[#allocation50_spill] sm:$0xff] %v19215_v59  ;;  %20573 = vst [vmem:[#allocation51_spill] sm:$0xff] %v19228_v22  ;;  %v20575_v6 = vld [vmem:[#allocation57_spill] sm:$0xff]  ;;  %v19376_v46 = vld [vmem:[#allocation4 + $0x5a] sm:$0xff] }
 0xae0   : > { %14116 = vmatmul.mubr.msk.f32.gmra.mrb[40].mxu0 %vm811_vm8, %v7154_v18  ;;  %v20572_v18 = vld [vmem:[#allocation56_spill] sm:$0xff]  ;;  %v19366_v8 = vld [vmem:[#allocation4 + $0x4a] sm:$0xff] }
 0xae1   : > { %11226 = vperm.xlu1 %15983, %v18639_v21   ;;  %14122 = vmatprep.mubr.msk.f32.mxu0 %vm811_vm8, %v6929_v50  ;;  %v20555_v21 = vld [vmem:[#allocation42_spill] sm:$0xff]  ;;  %v6941_v57 = vmul.f32 %v19215_v59, %v20572_v18  ;;  %v19416_v53 = vld [vmem:[#allocation4 + $0x9a] sm:$0xff] }
 0xae2   : > { %v6932_v28 = vmul.f32 %v20555_v21, %v19157_v42  ;;  %v19226_v50 = vld [vmem:[#allocation4 + $0x68] sm:$0xff]  ;;  %v19436_v63 = vld [vmem:[#allocation4 + $0xba] sm:$0xff] }
 0xae3   : > { %v6942_v33 = vmul.f32 %v20574_v32, %v19226_v50 }
 0xae4   : > { %14123 = vmatmul.mubr.msk.f32.vlgmr.msra.gmra.mrb[10].mxu0 %vm811_vm8, %v6930_v34  ;;  %v19236_v34 = vld [vmem:[#allocation4 + $0x78] sm:$0xff] }
 0xae5   : > { %11234 = vperm.xlu1 %15983, %v18649_v9   ;;  %14125 = vmatprep.mubr.msk.f32.mxu0 %vm811_vm8, %v6931_v61  ;;  %v19181_v9 = vpop.permute.xlu1 %9601  ;;  %v20577_v61 = vld [vmem:[#allocation47_spill] sm:$0xff] }
 0xae6   : > { %15159 = vmatpush3.bf16.msk.msra.mxu0 %vm18790_vm11, %v18911_v12  ;;  %20559 = vst [vmem:[#allocation77_spill] sm:$0xff] %v19181_v9  ;;  %v20560_v12 = vld [vmem:[#allocation43_spill] sm:$0xff]  ;;  %v6944_v21 = vmul.f32 %v20577_v61, %v19236_v34 }
 0xae7   : > { %15162 = vmatprep.subr.msk.bf16.mxu0 %vm18790_vm11, %v19159_v15  ;;  %v6934_v20 = vmul.f32 %v19171_v45, %v20560_v12  ;;  %20576 = vst [vmem:[#allocation43_spill] sm:$0xff] %v19238_v58  ;;  %v19248_v12 = vld [vmem:[#allocation4 + $0x90] sm:$0xff]  ;;  %v19396_v9 = vld [vmem:[#allocation4 + $0x7a] sm:$0xff] }
 0xae8   : > { %14126 = vmatmul.mubr.msk.f32.gmra.mrb[12].mxu0 %vm811_vm8, %v6932_v28  ;;  %v20578_v28 = vld [vmem:[#allocation48_spill] sm:$0xff]  ;;  %20579 = vst [vmem:[#allocation52_spill] sm:$0xff] %v19248_v12 }
 0xae9   : > { %11242 = vperm.xlu1 %15983, %v18659_v14   ;;  %14128 = vmatprep.mubr.msk.f32.mxu0 %vm811_vm8, %v6933_v31  ;;  %v20563_v14 = vld [vmem:[#allocation44_spill] sm:$0xff]  ;;  %v19198_v39 = vpop.permute.xlu1 %9609  ;;  %v6945_v44 = vmul.f32 %v19238_v58, %v20578_v28  ;;  %v19246_v31 = vld [vmem:[#allocation4 + $0x88] sm:$0xff] }
 0xaea   : > { %v6936_v25 = vmul.f32 %v20563_v14, %v19189_v43  ;;  %20564 = vst [vmem:[#allocation41_spill] sm:$0xff] %v19198_v39  ;;  %v9103_v58 = vld [vmem:[#allocation25 + $0x48] sm:$0xf]  ;;  %20613 = vst [vmem:[#allocation44_spill] sm:$0xff] %v19416_v53 }
 0xaec   : > { %14129 = vmatmul.mubr.msk.f32.gmra.mrb[14].mxu0 %vm811_vm8, %v6934_v20  ;;  %v20580_v20 = vld [vmem:[#allocation58_spill] sm:$0xff] }
 0xaed   : > { %11250 = vperm.xlu1 %15983, %v18671_v5   ;;  %14131 = vmatprep.mubr.msk.f32.mxu0 %vm811_vm8, %v6935_v17  ;;  %v20567_v5 = vld [vmem:[#allocation53_spill] sm:$0xff]  ;;  %v19218_v47 = vpop.permute.xlu1 %9617  ;;  %v6946_v41 = vmul.f32 %v20580_v20, %v19246_v31  ;;  %v20581_v17 = vld [vmem:[#allocation60_spill] sm:$0xff]  ;;  %v19288_v20 = vld [vmem:[#allocation4 + $0xd0] sm:$0xff] }
 0xaee   : > { %v6938_v29 = vmul.f32 %v20567_v5, %v19202_v52  ;;  %20570 = vst [vmem:[#allocation42_spill] sm:$0xff] %v19218_v47  ;;  %v6947_v14 = vmul.f32 %v19248_v12, %v20581_v17  ;;  %v7808_v12 = vld [vmem:[#allocation4 + $0xa] sm:$0xff]  ;;  %20617 = vst [vmem:[#allocation53_spill] sm:$0xff] %v19426_v10 }
 0xaef   : > { %v19386_v47 = vld [vmem:[#allocation4 + $0x6a] sm:$0xff] }
 0xaf0   : > { %14132 = vmatmul.mubr.msk.f32.gmra.mrb[16].mxu0 %vm811_vm8, %v6936_v25  ;;  %v19256_v25 = vld [vmem:[#allocation4 + $0x98] sm:$0xff] }
 0xaf1   : > { %11258 = vperm.xlu1 %15983, %v18683_v37   ;;  %14134 = vmatprep.mubr.msk.f32.mxu0 %vm811_vm8, %v6937_v62  ;;  %v20571_v37 = vld [vmem:[#allocation54_spill] sm:$0xff]  ;;  %v20582_v62 = vld [vmem:[#allocation59_spill] sm:$0xff] }
 0xaf2   : > { %v6940_v1 = vmul.f32 %v20571_v37, %v19213_v36  ;;  %v6948_v5 = vmul.f32 %v20582_v62, %v19256_v25  ;;  %v19268_v37 = vld [vmem:[#allocation4 + $0xb0] sm:$0xff]  ;;  %20621 = vst [vmem:[#allocation54_spill] sm:$0xff] %v19436_v63 }
 0xaf4   : > { %14135 = vmatmul.mubr.msk.f32.gmra.mrb[18].mxu0 %vm811_vm8, %v6938_v29  ;;  %v20583_v29 = vld [vmem:[#allocation62_spill] sm:$0xff] }
 0xaf5   : > { %14137 = vmatprep.mubr.msk.f32.mxu0 %vm811_vm8, %v6939_v40  ;;  %11266 = vperm.xlu1 %15983, %v18695_v49   ;;  %v6943_v49 = vmul.f32 %v19228_v22, %v20575_v6  ;;  %v6949_v51 = vmul.f32 %v19258_v54, %v20583_v29  ;;  %v19266_v40 = vld [vmem:[#allocation4 + $0xa8] sm:$0xff]  ;;  %v19278_v6 = vld [vmem:[#allocation4 + $0xc0] sm:$0xff] }
 0xaf6   : > { %v19298_v29 = vld [vmem:[#allocation4 + $0xe0] sm:$0xff] }
 0xaf8   : > { %14138 = vmatmul.mubr.msk.f32.gmra.mrb[20].mxu0 %vm811_vm8, %v6940_v1  ;;  %v20584_v1 = vld [vmem:[#allocation61_spill] sm:$0xff] }
 0xaf9   : > { %14140 = vmatprep.mubr.msk.f32.mxu0 %vm811_vm8, %v6941_v57  ;;  %v6950_v18 = vmul.f32 %v20584_v1, %v19266_v40  ;;  %v20585_v57 = vld [vmem:[#allocation64_spill] sm:$0xff] }
 0xafa   : > { %v6951_v32 = vmul.f32 %v19268_v37, %v20585_v57 }
 0xafc   : > { %14141 = vmatmul.mubr.msk.f32.gmra.mrb[22].mxu0 %vm811_vm8, %v6942_v33  ;;  %v19276_v33 = vld [vmem:[#allocation4 + $0xb8] sm:$0xff] }
 0xafd   : > { %14143 = vmatprep.mubr.msk.f32.mxu0 %vm811_vm8, %v6943_v49  ;;  %v20586_v49 = vld [vmem:[#allocation63_spill] sm:$0xff] }
 0xafe   : > { %v6952_v61 = vmul.f32 %v20586_v49, %v19276_v33  ;;  %v19308_v49 = vld [vmem:[#allocation4 + $0xf0] sm:$0xff] }
 0xb00   : > { %14144 = vmatmul.mubr.msk.f32.gmra.mrb[24].mxu0 %vm811_vm8, %v6944_v21  ;;  %v20587_v21 = vld [vmem:[#allocation66_spill] sm:$0xff] }
 0xb01   : > { %14146 = vmatprep.mubr.msk.f32.mxu0 %vm811_vm8, %v6945_v44  ;;  %v6953_v28 = vmul.f32 %v19278_v6, %v20587_v21  ;;  %v19286_v44 = vld [vmem:[#allocation4 + $0xc8] sm:$0xff] }
 0xb02   : > { %v20592_v21 = vld [vmem:[#allocation69_spill] sm:$0xff] }
 0xb04   : > { %14147 = vmatmul.mubr.msk.f32.gmra.mrb[26].mxu0 %vm811_vm8, %v6946_v41  ;;  %v20588_v41 = vld [vmem:[#allocation65_spill] sm:$0xff] }
 0xb05   : > { %14149 = vmatprep.mubr.msk.f32.mxu0 %vm811_vm8, %v6947_v14  ;;  %v6954_v17 = vmul.f32 %v20588_v41, %v19286_v44  ;;  %v20589_v14 = vld [vmem:[#allocation68_spill] sm:$0xff] }
 0xb06   : > { %v6955_v62 = vmul.f32 %v19288_v20, %v20589_v14  ;;  %v20593_v41 = vld [vmem:[#allocation72_spill] sm:$0xff] }
 0xb07   : > { %v19316_v14 = vld [vmem:[#allocation4 + $0xf8] sm:$0xff] }
 0xb08   : > { %14150 = vmatmul.mubr.msk.f32.gmra.mrb[28].mxu0 %vm811_vm8, %v6948_v5  ;;  %v19296_v5 = vld [vmem:[#allocation4 + $0xd8] sm:$0xff] }
 0xb09   : > { %14152 = vmatprep.mubr.msk.f32.mxu0 %vm811_vm8, %v6949_v51  ;;  %v20590_v51 = vld [vmem:[#allocation67_spill] sm:$0xff] }
 0xb0a   : > { %v6956_v1 = vmul.f32 %v20590_v51, %v19296_v5 }
 0xb0c   : > { %14153 = vmatmul.mubr.msk.f32.gmra.mrb[30].mxu0 %vm811_vm8, %v6950_v18  ;;  %v20591_v18 = vld [vmem:[#allocation70_spill] sm:$0xff] }
 0xb0d   : > { %14155 = vmatprep.mubr.msk.f32.mxu0 %vm811_vm8, %v6951_v32  ;;  %v6957_v57 = vmul.f32 %v19298_v29, %v20591_v18  ;;  %v19306_v32 = vld [vmem:[#allocation4 + $0xe8] sm:$0xff]  ;;  %v20595_v18 = vld [vmem:[#allocation71_spill] sm:$0xff] }
 0xb10   : > { %14156 = vmatmul.mubr.msk.f32.gmra.mrb[32].mxu0 %vm811_vm8, %v6952_v61  ;;  %v7807_v61 = vld [vmem:[#allocation4 + $0x2] sm:$0xff] }
 0xb11   : > { %14158 = vmatprep.mubr.msk.f32.mxu0 %vm811_vm8, %v6953_v28  ;;  %v6958_v28 = vmul.f32 %v20592_v21, %v19306_v32  ;;  %v19324_v21 = vld [vmem:[#allocation4 + $0x12] sm:$0xff] }
 0xb14   : > { %14159 = vmatmul.mubr.msk.f32.gmra.mrb[34].mxu0 %vm811_vm8, %v6954_v17  ;;  %v6959_v17 = vmul.f32 %v19308_v49, %v20593_v41  ;;  %v20596_v41 = vld [vmem:[#allocation84_spill] sm:$0xff] }
 0xb15   : > { %14161 = vmatprep.mubr.msk.f32.mxu0 %vm811_vm8, %v6955_v62  ;;  %v20594_v62 = vld [vmem:[#allocation79_spill] sm:$0xff]  ;;  %v7968_v22 = vmul.f32 %v20596_v41, %v7808_v12 }
 0xb16   : > { %v7967_v51 = vmul.f32 %v20594_v62, %v7807_v61  ;;  %v20597_v61 = vld [vmem:[#allocation86_spill] sm:$0xff]  ;;  %v19334_v62 = vld [vmem:[#allocation4 + $0x22] sm:$0xff]  ;;  %v19356_v41 = vld [vmem:[#allocation4 + $0x3a] sm:$0xff] }
 0xb18   : > { %14162 = vmatmul.mubr.msk.f32.gmra.mrb[36].mxu0 %vm811_vm8, %v6956_v1  ;;  %v6960_v1 = vmul.f32 %v20595_v18, %v19316_v14 }
 0xb19   : > { %14164 = vmatprep.mubr.msk.f32.mxu0 %vm811_vm8, %v6957_v57  ;;  %v9102_v57 = vld [vmem:[#allocation25 + $0x40] sm:$0xff] }
 0xb1a   : > { %v19328_v59 = vpack.c.bf16 %v9103_v58, %v9102_v57  ;;  %v20599_v58 = vld [vmem:[#allocation88_spill] sm:$0xff] }
 0xb1b   : > { %v7971_v18 = vmul.f32 %v19334_v62, %v20599_v58  ;;  %v20602_v58 = vld [vmem:[#allocation85_spill] sm:$0xff] }
 0xb1c   : > { %14165 = vmatmul.mubr.msk.f32.gmra.mrb[38].mxu0 %vm811_vm8, %v6958_v28  ;;  %v7969_v28 = vmul.f32 %v20597_v61, %v19324_v21  ;;  %v20601_v61 = vld [vmem:[#allocation90_spill] sm:$0xff] }
 0xb1d   : > { %14167 = vmatprep.mubr.msk.f32.mxu0 %vm811_vm8, %v6959_v17  ;;  %v19332_v17 = vld [vmem:[#allocation4 + $0x1a] sm:$0xff] }
 0xb20   : > { %14168 = vmatmul.mubr.msk.f32.gmra.mrb[40].mxu0 %vm811_vm8, %v6960_v1  ;;  %v19348_v1 = vld [vmem:[#allocation4 + $0x2a] sm:$0xff] }
 0xb21   : > { %14174 = vmatprep.mubr.msk.f32.mxu0 %vm811_vm8, %v7967_v51  ;;  %v20598_v51 = vld [vmem:[#allocation81_spill] sm:$0xff] }
 0xb22   : > { %v7970_v12 = vmul.f32 %v20598_v51, %v19332_v17  ;;  %v19361_v51 = vld [vmem:[#allocation4 + $0x42] sm:$0xff] }
 0xb24   : > { %14175 = vmatmul.mubr.msk.f32.vlgmr.msra.gmra.mrb[10].mxu0 %vm811_vm8, %v7968_v22  ;;  %v19351_v22 = vld [vmem:[#allocation4 + $0x32] sm:$0xff] }
 0xb25   : > { %14177 = vmatprep.mubr.msk.f32.mxu0 %vm811_vm8, %v7969_v28  ;;  %15165 = vmatpush3.bf16.msk.msra.mxu0 %vm18790_vm11, %v19159_v15  ;;  %v20600_v15 = vld [vmem:[#allocation83_spill] sm:$0xff]  ;;  %v7973_v28 = vmul.f32 %v20601_v61, %v19351_v22 }
 0xb26   : > { %15168 = vmatprep.subr.msk.bf16.mxu0 %vm18790_vm11, %v19328_v59  ;;  %v7972_v57 = vmul.f32 %v20600_v15, %v19348_v1  ;;  %v19371_v15 = vld [vmem:[#allocation4 + $0x52] sm:$0xff] }
 0xb27   : > { %v20604_v61 = vld [vmem:[#allocation87_spill] sm:$0xff] }
 0xb28   : > { %14178 = vmatmul.mubr.msk.f32.gmra.mrb[12].mxu0 %vm811_vm8, %v7970_v12  ;;  %v7974_v12 = vmul.f32 %v19356_v41, %v20602_v58  ;;  %v19381_v58 = vld [vmem:[#allocation4 + $0x62] sm:$0xff] }
 0xb29   : > { %14180 = vmatprep.mubr.msk.f32.mxu0 %vm811_vm8, %v7971_v18  ;;  %v20603_v18 = vld [vmem:[#allocation92_spill] sm:$0xff] }
 0xb2a   : > { %v7975_v2 = vmul.f32 %v20603_v18, %v19361_v51  ;;  %v20606_v18 = vld [vmem:[#allocation89_spill] sm:$0xff] }
 0xb2c   : > { %14181 = vmatmul.mubr.msk.f32.gmra.mrb[14].mxu0 %vm811_vm8, %v7972_v57  ;;  %v7976_v57 = vmul.f32 %v19366_v8, %v20604_v61  ;;  %v19391_v61 = vld [vmem:[#allocation4 + $0x72] sm:$0xff] }
 0xb2d   : > { %14183 = vmatprep.mubr.msk.f32.mxu0 %vm811_vm8, %v7973_v28  ;;  %v20605_v28 = vld [vmem:[#allocation94_spill] sm:$0xff] }
 0xb2e   : > { %v7977_v45 = vmul.f32 %v20605_v28, %v19371_v15  ;;  %v20608_v28 = vld [vmem:[#allocation91_spill] sm:$0xff] }
 0xb30   : > { %14184 = vmatmul.mubr.msk.f32.gmra.mrb[16].mxu0 %vm811_vm8, %v7974_v12  ;;  %v7978_v12 = vmul.f32 %v19376_v46, %v20606_v18  ;;  %v19401_v18 = vld [vmem:[#allocation4 + $0x82] sm:$0xff] }
 0xb31   : > { %14186 = vmatprep.mubr.msk.f32.mxu0 %vm811_vm8, %v7975_v2  ;;  %v20607_v2 = vld [vmem:[#allocation96_spill] sm:$0xff] }
 0xb32   : > { %v7979_v39 = vmul.f32 %v20607_v2, %v19381_v58  ;;  %v20610_v2 = vld [vmem:[#allocation93_spill] sm:$0xff] }
 0xb34   : > { %14187 = vmatmul.mubr.msk.f32.gmra.mrb[18].mxu0 %vm811_vm8, %v7976_v57  ;;  %v7980_v57 = vmul.f32 %v19386_v47, %v20608_v28  ;;  %v19411_v28 = vld [vmem:[#allocation4 + $0x92] sm:$0xff] }
 0xb35   : > { %14189 = vmatprep.mubr.msk.f32.mxu0 %vm811_vm8, %v7977_v45  ;;  %v20609_v45 = vld [vmem:[#allocation98_spill] sm:$0xff] }
 0xb36   : > { %v7981_v24 = vmul.f32 %v20609_v45, %v19391_v61  ;;  %v20612_v45 = vld [vmem:[#allocation95_spill] sm:$0xff] }
 0xb38   : > { %14190 = vmatmul.mubr.msk.f32.gmra.mrb[20].mxu0 %vm811_vm8, %v7978_v12  ;;  %v7982_v12 = vmul.f32 %v19396_v9, %v20610_v2  ;;  %v19421_v2 = vld [vmem:[#allocation4 + $0xa2] sm:$0xff] }
 0xb39   : > { %14192 = vmatprep.mubr.msk.f32.mxu0 %vm811_vm8, %v7979_v39  ;;  %v20611_v39 = vld [vmem:[#allocation100_spill] sm:$0xff]  ;;  %20615 = vst [vmem:[#allocation45_spill] sm:$0xff] %v19421_v2 }
 0xb3a   : > { %v7983_v48 = vmul.f32 %v20611_v39, %v19401_v18  ;;  %v20616_v39 = vld [vmem:[#allocation97_spill] sm:$0xff] }
 0xb3c   : > { %14193 = vmatmul.mubr.msk.f32.gmra.mrb[22].mxu0 %vm811_vm8, %v7980_v57  ;;  %v7984_v57 = vmul.f32 %v19406_v38, %v20612_v45  ;;  %v19431_v45 = vld [vmem:[#allocation4 + $0xb2] sm:$0xff] }
 0xb3d   : > { %14195 = vmatprep.mubr.msk.f32.mxu0 %vm811_vm8, %v7981_v24  ;;  %v20614_v24 = vld [vmem:[#allocation102_spill] sm:$0xff]  ;;  %20619 = vst [vmem:[#allocation46_spill] sm:$0xff] %v19431_v45 }
 0xb3e   : > { %v7985_v55 = vmul.f32 %v20614_v24, %v19411_v28  ;;  %v20620_v24 = vld [vmem:[#allocation99_spill] sm:$0xff] }
 0xb40   : > { %14196 = vmatmul.mubr.msk.f32.gmra.mrb[24].mxu0 %vm811_vm8, %v7982_v12  ;;  %v7986_v12 = vmul.f32 %v19416_v53, %v20616_v39  ;;  %v19441_v39 = vld [vmem:[#allocation4 + $0xc2] sm:$0xff] }
 0xb41   : > { %14198 = vmatprep.mubr.msk.f32.mxu0 %vm811_vm8, %v7983_v48  ;;  %v20618_v48 = vld [vmem:[#allocation104_spill] sm:$0xff]  ;;  %20623 = vst [vmem:[#allocation56_spill] sm:$0xff] %v19441_v39 }
 0xb42   : > { %v7987_v4 = vmul.f32 %v20618_v48, %v19421_v2  ;;  %v20624_v48 = vld [vmem:[#allocation101_spill] sm:$0xff] }
 0xb43   : > { %v19446_v2 = vld [vmem:[#allocation4 + $0xca] sm:$0xff] }
 0xb44   : > { %14199 = vmatmul.mubr.msk.f32.gmra.mrb[26].mxu0 %vm811_vm8, %v7984_v57  ;;  %v7988_v57 = vmul.f32 %v19426_v10, %v20620_v24  ;;  %20625 = vst [vmem:[#allocation55_spill] sm:$0xff] %v19446_v2  ;;  %v19451_v24 = vld [vmem:[#allocation4 + $0xd2] sm:$0xff] }
 0xb45   : > { %14201 = vmatprep.mubr.msk.f32.mxu0 %vm811_vm8, %v7985_v55  ;;  %v20622_v55 = vld [vmem:[#allocation106_spill] sm:$0xff]  ;;  %20627 = vst [vmem:[#allocation57_spill] sm:$0xff] %v19451_v24 }
 0xb46   : > { %v7989_v26 = vmul.f32 %v20622_v55, %v19431_v45  ;;  %v20628_v55 = vld [vmem:[#allocation103_spill] sm:$0xff] }
 0xb47   : > { %v19456_v45 = vld [vmem:[#allocation4 + $0xda] sm:$0xff] }
 0xb48   : > { %14202 = vmatmul.mubr.msk.f32.gmra.mrb[28].mxu0 %vm811_vm8, %v7986_v12  ;;  %v7990_v12 = vmul.f32 %v19436_v63, %v20624_v48  ;;  %20629 = vst [vmem:[#allocation47_spill] sm:$0xff] %v19456_v45  ;;  %v19461_v48 = vld [vmem:[#allocation4 + $0xe2] sm:$0xff] }
 0xb49   : > { %14204 = vmatprep.mubr.msk.f32.mxu0 %vm811_vm8, %v7987_v4  ;;  %v20626_v4 = vld [vmem:[#allocation108_spill] sm:$0xff]  ;;  %20631 = vst [vmem:[#allocation48_spill] sm:$0xff] %v19461_v48 }
 0xb4a   : > { %v7991_v53 = vmul.f32 %v20626_v4, %v19441_v39  ;;  %v20632_v4 = vld [vmem:[#allocation105_spill] sm:$0xff] }
 0xb4b   : > { %v19466_v39 = vld [vmem:[#allocation4 + $0xea] sm:$0xff] }
 0xb4c   : > { %14205 = vmatmul.mubr.msk.f32.gmra.mrb[30].mxu0 %vm811_vm8, %v7988_v57  ;;  %v7992_v57 = vmul.f32 %v19446_v2, %v20628_v55  ;;  %20633 = vst [vmem:[#allocation58_spill] sm:$0xff] %v19466_v39  ;;  %v19471_v55 = vld [vmem:[#allocation4 + $0xf2] sm:$0xff] }
 0xb4d   : > { %14207 = vmatprep.mubr.msk.f32.mxu0 %vm811_vm8, %v7989_v26  ;;  %v20630_v26 = vld [vmem:[#allocation110_spill] sm:$0xff]  ;;  %20635 = vst [vmem:[#allocation60_spill] sm:$0xff] %v19471_v55 }
 0xb4e   : > { %v7993_v10 = vmul.f32 %v20630_v26, %v19451_v24  ;;  %v20636_v26 = vld [vmem:[#allocation107_spill] sm:$0xff] }
 0xb4f   : > { %v19476_v24 = vld [vmem:[#allocation4 + $0xfa] sm:$0xff] }
 0xb50   : > { %14208 = vmatmul.mubr.msk.f32.gmra.mrb[32].mxu0 %vm811_vm8, %v7990_v12  ;;  %v7994_v12 = vmul.f32 %v19456_v45, %v20632_v4  ;;  %v20638_v4 = vld [vmem:[#allocation109_spill] sm:$0xff] }
 0xb51   : > { %14210 = vmatprep.mubr.msk.f32.mxu0 %vm811_vm8, %v7991_v53  ;;  %v20634_v53 = vld [vmem:[#allocation112_spill] sm:$0xff] }
 0xb52   : > { %v7995_v63 = vmul.f32 %v20634_v53, %v19461_v48  ;;  %v7998_v53 = vmul.f32 %v19476_v24, %v20638_v4  ;;  %v9653_v45 = vld [vmem:[#allocation25 + $0x50] sm:$0xff]  ;;  %v8362_v4 = vld [vmem:[#allocation4 + $0x30] sm:$0xff] }
 0xb54   : > { %14211 = vmatmul.mubr.msk.f32.gmra.mrb[34].mxu0 %vm811_vm8, %v7992_v57  ;;  %v7996_v57 = vmul.f32 %v19466_v39, %v20636_v26  ;;  %v20640_v26 = vld [vmem:[#allocation111_spill] sm:$0xff] }
 0xb55   : > { %14213 = vmatprep.mubr.msk.f32.mxu0 %vm811_vm8, %v7993_v10  ;;  %v20637_v10 = vld [vmem:[#allocation114_spill] sm:$0xff]  ;;  %v8519_v39 = vmul.f32 %v20640_v26, %v19157_v42  ;;  %v20643_v42 = vld [vmem:[#allocation113_spill] sm:$0xff] }
 0xb56   : > { %v7997_v2 = vmul.f32 %v20637_v10, %v19471_v55  ;;  %v8361_v55 = vld [vmem:[#allocation4 + $0x28] sm:$0xff] }
 0xb58   : > { %14214 = vmatmul.mubr.msk.f32.gmra.mrb[36].mxu0 %vm811_vm8, %v7994_v12  ;;  %v20639_v12 = vld [vmem:[#allocation116_spill] sm:$0xff] }
 0xb59   : > { %14216 = vmatprep.mubr.msk.f32.mxu0 %vm811_vm8, %v7995_v63  ;;  %v8518_v48 = vmul.f32 %v20639_v12, %v19148_v16  ;;  %v9654_v63 = vld [vmem:[#allocation25 + $0x58] sm:$0xf]  ;;  %v20642_v16 = vld [vmem:[#allocation120_spill] sm:$0xff]  ;;  %v20645_v12 = vld [vmem:[#allocation115_spill] sm:$0xff] }
 0xb5a   : > { %v19490_v10 = vpack.c.bf16 %v9654_v63, %v9653_v45  ;;  %v8522_v45 = vmul.f32 %v20643_v42, %v8362_v4  ;;  %v8368_v4 = vld [vmem:[#allocation4 + $0x60] sm:$0xff] }
 0xb5c   : > { %14217 = vmatmul.mubr.msk.f32.gmra.mrb[38].mxu0 %vm811_vm8, %v7996_v57  ;;  %v20641_v57 = vld [vmem:[#allocation118_spill] sm:$0xff] }
 0xb5d   : > { %14219 = vmatprep.mubr.msk.f32.mxu0 %vm811_vm8, %v7997_v2  ;;  %v8520_v2 = vmul.f32 %v20641_v57, %v19162_v56  ;;  %v8364_v56 = vld [vmem:[#allocation4 + $0x40] sm:$0xff] }
 0xb5e   : > { %v8524_v63 = vmul.f32 %v20645_v12, %v8364_v56  ;;  %v20647_v57 = vld [vmem:[#allocation117_spill] sm:$0xff]  ;;  %v20650_v56 = vld [vmem:[#allocation127_spill] sm:$0xff] }
 0xb5f   : > { %v8372_v12 = vld [vmem:[#allocation4 + $0x80] sm:$0xff] }
 0xb60   : > { %14220 = vmatmul.mubr.msk.f32.gmra.mrb[40].mxu0 %vm811_vm8, %v7998_v53 }
 0xb61   : > { %14226 = vmatprep.mubr.msk.f32.mxu0 %vm811_vm8, %v8518_v48  ;;  %v8521_v48 = vmul.f32 %v20642_v16, %v8361_v55  ;;  %v20646_v55 = vld [vmem:[#allocation124_spill] sm:$0xff]  ;;  %v20648_v16 = vld [vmem:[#allocation126_spill] sm:$0xff] }
 0xb62   : > { %v8525_v26 = vmul.f32 %v20646_v55, %v19202_v52  ;;  %v8529_v52 = vmul.f32 %v20650_v56, %v19226_v50 }
 0xb64   : > { %14227 = vmatmul.mubr.msk.f32.vlgmr.msra.gmra.mrb[10].mxu0 %vm811_vm8, %v8519_v39  ;;  %v20644_v39 = vld [vmem:[#allocation122_spill] sm:$0xff] }
 0xb65   : > { %14229 = vmatprep.mubr.msk.f32.mxu0 %vm811_vm8, %v8520_v2  ;;  %15171 = vmatpush3.bf16.msk.msra.mxu0 %vm18790_vm11, %v19328_v59  ;;  %v8523_v53 = vmul.f32 %v20644_v39, %v19189_v43  ;;  %v8366_v59 = vld [vmem:[#allocation4 + $0x50] sm:$0xff]  ;;  %v8527_v43 = vmul.f32 %v20648_v16, %v19213_v36  ;;  %v20651_v39 = vld [vmem:[#allocation121_spill] sm:$0xff]  ;;  %v20656_v16 = vld [vmem:[#allocation132_spill] sm:$0xff] }
 0xb66   : > { %15174 = vmatprep.subr.msk.bf16.mxu0 %vm18790_vm11, %v19490_v10  ;;  %v8526_v2 = vmul.f32 %v20647_v57, %v8366_v59  ;;  %v20653_v59 = vld [vmem:[#allocation123_spill] sm:$0xff] }
 0xb67   : > { %v8532_v55 = vmul.f32 %v20653_v59, %v8372_v12  ;;  %v20654_v57 = vld [vmem:[#allocation131_spill] sm:$0xff]  ;;  %v20662_v12 = vld [vmem:[#allocation137_spill] sm:$0xff] }
 0xb68   : > { %14230 = vmatmul.mubr.msk.f32.gmra.mrb[12].mxu0 %vm811_vm8, %v8521_v48  ;;  %v20649_v48 = vld [vmem:[#allocation119_spill] sm:$0xff]  ;;  %v8533_v50 = vmul.f32 %v20654_v57, %v19246_v31  ;;  %v20659_v31 = vld [vmem:[#allocation130_spill] sm:$0xff]  ;;  %v20666_v57 = vld [vmem:[#allocation141_spill] sm:$0xff] }
 0xb69   : > { %14232 = vmatprep.mubr.msk.f32.mxu0 %vm811_vm8, %v8522_v45  ;;  %v8528_v42 = vmul.f32 %v20649_v48, %v8368_v4  ;;  %v8370_v45 = vld [vmem:[#allocation4 + $0x70] sm:$0xff]  ;;  %v8538_v56 = vmul.f32 %v19268_v37, %v20659_v31  ;;  %v20671_v31 = vld [vmem:[#allocation144_spill] sm:$0xff] }
 0xb6a   : > { %v20664_v59 = vld [vmem:[#allocation139_spill] sm:$0xff] }
 0xb6c   : > { %14233 = vmatmul.mubr.msk.f32.gmra.mrb[14].mxu0 %vm811_vm8, %v8523_v53  ;;  %v8530_v53 = vmul.f32 %v20651_v39, %v8370_v45  ;;  %v20661_v39 = vld [vmem:[#allocation133_spill] sm:$0xff] }
 0xb6d   : > { %14235 = vmatprep.mubr.msk.f32.mxu0 %vm811_vm8, %v8524_v63  ;;  %v20652_v63 = vld [vmem:[#allocation129_spill] sm:$0xff] }
 0xb6e   : > { %v8531_v36 = vmul.f32 %v20652_v63, %v19236_v34  ;;  %v20657_v34 = vld [vmem:[#allocation128_spill] sm:$0xff]  ;;  %v20663_v63 = vld [vmem:[#allocation135_spill] sm:$0xff] }
 0xb6f   : > { %v8536_v48 = vmul.f32 %v19258_v54, %v20657_v34 }
 0xb70   : > { %14236 = vmatmul.mubr.msk.f32.gmra.mrb[16].mxu0 %vm811_vm8, %v8525_v26  ;;  %v8374_v26 = vld [vmem:[#allocation4 + $0x90] sm:$0xff] }
 0xb71   : > { %14238 = vmatprep.mubr.msk.f32.mxu0 %vm811_vm8, %v8526_v2  ;;  %v20655_v2 = vld [vmem:[#allocation125_spill] sm:$0xff] }
 0xb72   : > { %v8534_v4 = vmul.f32 %v20655_v2, %v8374_v26 }
 0xb74   : > { %14239 = vmatmul.mubr.msk.f32.gmra.mrb[18].mxu0 %vm811_vm8, %v8527_v43  ;;  %v8535_v43 = vmul.f32 %v20656_v16, %v19256_v25 }
 0xb75   : > { %14241 = vmatprep.mubr.msk.f32.mxu0 %vm811_vm8, %v8528_v42  ;;  %v20658_v42 = vld [vmem:[#allocation134_spill] sm:$0xff] }
 0xb76   : > { %v8537_v45 = vmul.f32 %v20658_v42, %v19266_v40  ;;  %v8541_v40 = vmul.f32 %v20662_v12, %v19286_v44  ;;  %v8545_v44 = vmul.f32 %v20666_v57, %v19306_v32  ;;  %v8909_v32 = vld [vmem:[#allocation4 + $0x11] sm:$0xff]  ;;  %v20670_v42 = vld [vmem:[#allocation145_spill] sm:$0xff] }
 0xb77   : > { %v20675_v57 = vld [vmem:[#allocation151_spill] sm:$0xff] }
 0xb78   : > { %14242 = vmatmul.mubr.msk.f32.gmra.mrb[20].mxu0 %vm811_vm8, %v8529_v52  ;;  %v20660_v52 = vld [vmem:[#allocation136_spill] sm:$0xff] }
 0xb79   : > { %14244 = vmatprep.mubr.msk.f32.mxu0 %vm811_vm8, %v8530_v53  ;;  %v8539_v25 = vmul.f32 %v20660_v52, %v19276_v33  ;;  %v8540_v53 = vmul.f32 %v19278_v6, %v20661_v39  ;;  %v8543_v33 = vmul.f32 %v20664_v59, %v19296_v5  ;;  %v20668_v5 = vld [vmem:[#allocation143_spill] sm:$0xff]  ;;  %v8912_v59 = vld [vmem:[#allocation4 + $0x29] sm:$0xff] }
 0xb7a   : > { %v8547_v16 = vmul.f32 %v20668_v5, %v19316_v14  ;;  %v8910_v52 = vld [vmem:[#allocation4 + $0x19] sm:$0xff]  ;;  %v8911_v14 = vld [vmem:[#allocation4 + $0x21] sm:$0xff] }
 0xb7b   : > { %v10205_v39 = vld [vmem:[#allocation25 + $0x68] sm:$0xf] }
 0xb7c   : > { %14245 = vmatmul.mubr.msk.f32.gmra.mrb[22].mxu0 %vm811_vm8, %v8531_v36  ;;  %v8542_v36 = vmul.f32 %v19288_v20, %v20663_v63  ;;  %v20673_v63 = vld [vmem:[#allocation149_spill] sm:$0xff]  ;;  %v20676_v5 = vld [vmem:[#allocation148_spill] sm:$0xff] }
 0xb7d   : > { %14247 = vmatprep.mubr.msk.f32.mxu0 %vm811_vm8, %v8532_v55  ;;  %v20665_v55 = vld [vmem:[#allocation138_spill] sm:$0xff] }
 0xb7e   : > { %v8544_v26 = vmul.f32 %v19298_v29, %v20665_v55  ;;  %v20674_v55 = vld [vmem:[#allocation146_spill] sm:$0xff] }
 0xb80   : > { %14248 = vmatmul.mubr.msk.f32.gmra.mrb[24].mxu0 %vm811_vm8, %v8533_v50  ;;  %v20667_v50 = vld [vmem:[#allocation140_spill] sm:$0xff] }
 0xb81   : > { %14250 = vmatprep.mubr.msk.f32.mxu0 %vm811_vm8, %v8534_v4  ;;  %v8546_v2 = vmul.f32 %v19308_v49, %v20667_v50  ;;  %v19570_v4 = vld [vmem:[#allocation4 + $0x100] sm:$0xff] }
 0xb82   : > { %v8914_v50 = vld [vmem:[#allocation4 + $0x39] sm:$0xff] }
 0xb84   : > { %14251 = vmatmul.mubr.msk.f32.gmra.mrb[26].mxu0 %vm811_vm8, %v8535_v43  ;;  %v20669_v43 = vld [vmem:[#allocation142_spill] sm:$0xff] }
 0xb85   : > { %14253 = vmatprep.mubr.msk.f32.mxu0 %vm811_vm8, %v8536_v48  ;;  %v8548_v34 = vmul.f32 %v19570_v4, %v20669_v43  ;;  %v19578_v48 = vld [vmem:[#allocation4 + $0x108] sm:$0xff] }
 0xb86   : > { %v20677_v43 = vld [vmem:[#allocation153_spill] sm:$0xff] }
 0xb88   : > { %14254 = vmatmul.mubr.msk.f32.gmra.mrb[28].mxu0 %vm811_vm8, %v8537_v45  ;;  %v8549_v45 = vmul.f32 %v20670_v42, %v19578_v48  ;;  %v20678_v42 = vld [vmem:[#allocation150_spill] sm:$0xff] }
 0xb89   : > { %14256 = vmatprep.mubr.msk.f32.mxu0 %vm811_vm8, %v8538_v56  ;;  %v9069_v56 = vmul.f32 %v20671_v31, %v8909_v32  ;;  %v8916_v32 = vld [vmem:[#allocation4 + $0x49] sm:$0xff]  ;;  %v20679_v31 = vld [vmem:[#allocation155_spill] sm:$0xff] }
 0xb8c   : > { %14257 = vmatmul.mubr.msk.f32.gmra.mrb[30].mxu0 %vm811_vm8, %v8539_v25  ;;  %v10204_v25 = vld [vmem:[#allocation25 + $0x60] sm:$0xff] }
 0xb8d   : > { %14259 = vmatprep.mubr.msk.f32.mxu0 %vm811_vm8, %v8540_v53  ;;  %v20672_v53 = vld [vmem:[#allocation147_spill] sm:$0xff] }
 0xb8e   : > { %v9070_v12 = vmul.f32 %v20672_v53, %v8910_v52  ;;  %v8918_v52 = vld [vmem:[#allocation4 + $0x59] sm:$0xff]  ;;  %v20681_v53 = vld [vmem:[#allocation157_spill] sm:$0xff] }
 0xb90   : > { %14260 = vmatmul.mubr.msk.f32.gmra.mrb[32].mxu0 %vm811_vm8, %v8541_v40  ;;  %v19588_v40 = vpack.c.bf16 %v10205_v39, %v10204_v25  ;;  %v8919_v25 = vld [vmem:[#allocation4 + $0x61] sm:$0xff] }
 0xb91   : > { %14262 = vmatprep.mubr.msk.f32.mxu0 %vm811_vm8, %v8542_v36  ;;  %v9071_v36 = vmul.f32 %v20673_v63, %v8911_v14  ;;  %v20680_v39 = vld [vmem:[#allocation152_spill] sm:$0xff]  ;;  %v8920_v63 = vld [vmem:[#allocation4 + $0x69] sm:$0xff] }
 0xb92   : > { %v9078_v14 = vmul.f32 %v20680_v39, %v8918_v52  ;;  %v8926_v52 = vld [vmem:[#allocation4 + $0x99] sm:$0xff]  ;;  %v8927_v39 = vld [vmem:[#allocation4 + $0xa1] sm:$0xff] }
 0xb94   : > { %14263 = vmatmul.mubr.msk.f32.gmra.mrb[34].mxu0 %vm811_vm8, %v8543_v33  ;;  %v8913_v33 = vld [vmem:[#allocation4 + $0x31] sm:$0xff] }
 0xb95   : > { %14265 = vmatprep.mubr.msk.f32.mxu0 %vm811_vm8, %v8544_v26  ;;  %v9072_v26 = vmul.f32 %v20674_v55, %v8912_v59  ;;  %v20682_v59 = vld [vmem:[#allocation154_spill] sm:$0xff]  ;;  %v20683_v55 = vld [vmem:[#allocation159_spill] sm:$0xff] }
 0xb98   : > { %14266 = vmatmul.mubr.msk.f32.gmra.mrb[36].mxu0 %vm811_vm8, %v8545_v44  ;;  %v9073_v44 = vmul.f32 %v20675_v57, %v8913_v33  ;;  %v9080_v33 = vmul.f32 %v20682_v59, %v8920_v63  ;;  %v8922_v57 = vld [vmem:[#allocation4 + $0x79] sm:$0xff]  ;;  %v20689_v63 = vld [vmem:[#allocation165_spill] sm:$0xff] }
 0xb99   : > { %14268 = vmatprep.mubr.msk.f32.mxu0 %vm811_vm8, %v8546_v2  ;;  %v8915_v2 = vld [vmem:[#allocation4 + $0x41] sm:$0xff]  ;;  %v8928_v59 = vld [vmem:[#allocation4 + $0xa9] sm:$0xff] }
 0xb9c   : > { %14269 = vmatmul.mubr.msk.f32.gmra.mrb[38].mxu0 %vm811_vm8, %v8547_v16  ;;  %v9074_v16 = vmul.f32 %v20676_v5, %v8914_v50  ;;  %v19619_v50 = vpop.permute.xlu1 %10048 }
 0xb9d   : > { %14271 = vmatprep.mubr.msk.f32.mxu0 %vm811_vm8, %v8548_v34  ;;  %v9075_v34 = vmul.f32 %v20677_v43, %v8915_v2  ;;  %v20684_v2 = vld [vmem:[#allocation156_spill] sm:$0xff] }
 0xb9e   : > { %v9082_v5 = vmul.f32 %v20684_v2, %v8922_v57 }
 0xba0   : > { %14272 = vmatmul.mubr.msk.f32.gmra.mrb[40].mxu0 %vm811_vm8, %v8549_v45  ;;  %v9076_v45 = vmul.f32 %v20678_v42, %v8916_v32  ;;  %v8925_v32 = vld [vmem:[#allocation4 + $0x91] sm:$0xff] }
 0xba1   : > { %14278 = vmatprep.mubr.msk.f32.mxu0 %vm811_vm8, %v9069_v56  ;;  %v20686_v42 = vld [vmem:[#allocation158_spill] sm:$0xff] }
 0xba4   : > { %14279 = vmatmul.mubr.msk.f32.vlgmr.msra.gmra.mrb[10].mxu0 %vm811_vm8, %v9070_v12  ;;  %v9079_v12 = vmul.f32 %v20681_v53, %v8919_v25  ;;  %v19629_v25 = vpop.permute.xlu1 %10052 }
 0xba5   : > { %14281 = vmatprep.mubr.msk.f32.mxu0 %vm811_vm8, %v9071_v36  ;;  %15177 = vmatpush3.bf16.msk.msra.mxu0 %vm18790_vm11, %v19490_v10  ;;  %v8917_v10 = vld [vmem:[#allocation4 + $0x51] sm:$0xff] }
 0xba6   : > { %15180 = vmatprep.subr.msk.bf16.mxu0 %vm18790_vm11, %v19588_v40  ;;  %v9077_v56 = vmul.f32 %v20679_v31, %v8917_v10  ;;  %v8921_v36 = vld [vmem:[#allocation4 + $0x71] sm:$0xff]  ;;  %v19624_v10 = vpop.permute.xlu0 %9605 }
 0xba7   : > { %v20687_v31 = vld [vmem:[#allocation163_spill] sm:$0xff] }
 0xba8   : > { %14282 = vmatmul.mubr.msk.f32.gmra.mrb[12].mxu0 %vm811_vm8, %v9072_v26  ;;  %v9081_v26 = vmul.f32 %v20683_v55, %v8921_v36  ;;  %v9087_v36 = vmul.f32 %v20689_v63, %v8927_v39  ;;  %v19639_v55 = vpop.permute.xlu1 %10060  ;;  %v20694_v39 = vld [vmem:[#allocation166_spill] sm:$0xff]  ;;  %v20695_v63 = vld [vmem:[#allocation171_spill] sm:$0xff] }
 0xba9   : > { %14284 = vmatprep.mubr.msk.f32.mxu0 %vm811_vm8, %v9073_v44  ;;  %v8923_v44 = vld [vmem:[#allocation4 + $0x81] sm:$0xff] }
 0xbac   : > { %14285 = vmatmul.mubr.msk.f32.gmra.mrb[14].mxu0 %vm811_vm8, %v9074_v16  ;;  %v20685_v16 = vld [vmem:[#allocation161_spill] sm:$0xff] }
 0xbad   : > { %14287 = vmatprep.mubr.msk.f32.mxu0 %vm811_vm8, %v9075_v34  ;;  %v9083_v43 = vmul.f32 %v20685_v16, %v8923_v44  ;;  %v8924_v34 = vld [vmem:[#allocation4 + $0x89] sm:$0xff]  ;;  %v20691_v44 = vld [vmem:[#allocation167_spill] sm:$0xff]  ;;  %v8931_v16 = vld [vmem:[#allocation4 + $0xc1] sm:$0xff] }
 0xbb0   : > { %14288 = vmatmul.mubr.msk.f32.gmra.mrb[16].mxu0 %vm811_vm8, %v9076_v45  ;;  %v9084_v45 = vmul.f32 %v20686_v42, %v8924_v34  ;;  %v20692_v34 = vld [vmem:[#allocation164_spill] sm:$0xff]  ;;  %v20693_v42 = vld [vmem:[#allocation169_spill] sm:$0xff] }
 0xbb1   : > { %14290 = vmatprep.mubr.msk.f32.mxu0 %vm811_vm8, %v9077_v56  ;;  %v9085_v56 = vmul.f32 %v20687_v31, %v8925_v32  ;;  %v8932_v31 = vld [vmem:[#allocation4 + $0xc9] sm:$0xff] }
 0xbb4   : > { %14291 = vmatmul.mubr.msk.f32.gmra.mrb[18].mxu0 %vm811_vm8, %v9078_v14  ;;  %v20688_v14 = vld [vmem:[#allocation160_spill] sm:$0xff] }
 0xbb5   : > { %14293 = vmatprep.mubr.msk.f32.mxu0 %vm811_vm8, %v9079_v12  ;;  %v9086_v53 = vmul.f32 %v20688_v14, %v8926_v52  ;;  %v19634_v12 = vpop.permute.xlu0 %9613  ;;  %v8933_v52 = vld [vmem:[#allocation4 + $0xd1] sm:$0xff]  ;;  %v9092_v14 = vmul.f32 %v20694_v39, %v8932_v31  ;;  %v8938_v39 = vld [vmem:[#allocation4 + $0xf9] sm:$0xff] }
 0xbb6   : > { %v20699_v31 = vld [vmem:[#allocation175_spill] sm:$0xff] }
 0xbb8   : > { %14294 = vmatmul.mubr.msk.f32.gmra.mrb[20].mxu0 %vm811_vm8, %v9080_v33  ;;  %v8929_v33 = vld [vmem:[#allocation4 + $0xb1] sm:$0xff] }
 0xbb9   : > { %14296 = vmatprep.mubr.msk.f32.mxu0 %vm811_vm8, %v9081_v26  ;;  %v20690_v26 = vld [vmem:[#allocation162_spill] sm:$0xff]  ;;  %v9089_v2 = vmul.f32 %v20691_v44, %v8929_v33  ;;  %v8935_v33 = vld [vmem:[#allocation4 + $0xe1] sm:$0xff] }
 0xbba   : > { %v9088_v57 = vmul.f32 %v20690_v26, %v8928_v59  ;;  %v8934_v59 = vld [vmem:[#allocation4 + $0xd9] sm:$0xff] }
 0xbbc   : > { %14297 = vmatmul.mubr.msk.f32.gmra.mrb[22].mxu0 %vm811_vm8, %v9082_v5  ;;  %v8930_v5 = vld [vmem:[#allocation4 + $0xb9] sm:$0xff] }
 0xbbd   : > { %14299 = vmatprep.mubr.msk.f32.mxu0 %vm811_vm8, %v9083_v43  ;;  %v19644_v43 = vpop.permute.xlu0 %10044  ;;  %v9090_v32 = vmul.f32 %v20692_v34, %v8930_v5  ;;  %v8937_v34 = vld [vmem:[#allocation4 + $0xf1] sm:$0xff] }
 0xbc0   : > { %14300 = vmatmul.mubr.msk.f32.gmra.mrb[24].mxu0 %vm811_vm8, %v9084_v45  ;;  %v9091_v45 = vmul.f32 %v20693_v42, %v8931_v16  ;;  %v8936_v16 = vld [vmem:[#allocation4 + $0xe9] sm:$0xff] }
 0xbc1   : > { %14302 = vmatprep.mubr.msk.f32.mxu0 %vm811_vm8, %v9085_v56  ;;  %v19649_v56 = vpop.permute.xlu1 %10068  ;;  %v20698_v42 = vld [vmem:[#allocation170_spill] sm:$0xff] }
 0xbc4   : > { %14303 = vmatmul.mubr.msk.f32.gmra.mrb[26].mxu0 %vm811_vm8, %v9086_v53  ;;  %v19654_v53 = vpop.permute.xlu0 %10056 }
 0xbc5   : > { %14305 = vmatprep.mubr.msk.f32.mxu0 %vm811_vm8, %v9087_v36  ;;  %v9093_v36 = vmul.f32 %v20695_v63, %v8933_v52  ;;  %v19659_v26 = vpop.permute.xlu1 %10076  ;;  %v9097_v52 = vmul.f32 %v20699_v31, %v8937_v34  ;;  %v19671_v63 = vld [vmem:[#allocation4 + $0x101] sm:$0xff] }
 0xbc6   : > { %20700 = vst [vmem:[#allocation59_spill] sm:$0xff] %v19671_v63  ;;  %v10755_v31 = vld [vmem:[#allocation25 + $0x70] sm:$0xff] }
 0xbc8   : > { %14306 = vmatmul.mubr.msk.f32.gmra.mrb[28].mxu0 %vm811_vm8, %v9088_v57  ;;  %v20696_v57 = vld [vmem:[#allocation168_spill] sm:$0xff] }
 0xbc9   : > { %14308 = vmatprep.mubr.msk.f32.mxu0 %vm811_vm8, %v9089_v2  ;;  %v9094_v44 = vmul.f32 %v20696_v57, %v8934_v59  ;;  %v20697_v2 = vld [vmem:[#allocation173_spill] sm:$0xff] }
 0xbca   : > { %v9095_v5 = vmul.f32 %v20697_v2, %v8935_v33  ;;  %v19678_v57 = vld [vmem:[#allocation4 + $0x109] sm:$0xff] }
 0xbcc   : > { %14309 = vmatmul.mubr.msk.f32.gmra.mrb[30].mxu0 %vm811_vm8, %v9090_v32  ;;  %v19664_v32 = vpop.permute.xlu0 %10064 }
 0xbcd   : > { %14311 = vmatprep.mubr.msk.f32.mxu0 %vm811_vm8, %v9091_v45  ;;  %v9096_v45 = vmul.f32 %v20698_v42, %v8936_v16  ;;  %v20703_v16 = vld [vmem:[#allocation174_spill] sm:$0xff]  ;;  %v20704_v42 = vld [vmem:[#allocation179_spill] sm:$0xff] }
 0xbce   : > { %v9100_v34 = vmul.f32 %v19678_v57, %v20703_v16 }
 0xbd0   : > { %14312 = vmatmul.mubr.msk.f32.gmra.mrb[32].mxu0 %vm811_vm8, %v9092_v14  ;;  %v19669_v14 = vpop.permute.xlu1 %10084  ;;  %v19676_v33 = vpop.permute.xlu0 %10072 }
 0xbd1   : > { %14314 = vmatprep.mubr.msk.f32.mxu0 %vm811_vm8, %v9093_v36  ;;  %v20701_v36 = vld [vmem:[#allocation172_spill] sm:$0xff] }
 0xbd2   : > { %v9098_v59 = vmul.f32 %v20701_v36, %v8938_v39  ;;  %v20705_v36 = vld [vmem:[#allocation176_spill] sm:$0xff] }
 0xbd4   : > { %14315 = vmatmul.mubr.msk.f32.gmra.mrb[34].mxu0 %vm811_vm8, %v9094_v44  ;;  %v20702_v44 = vld [vmem:[#allocation177_spill] sm:$0xff]  ;;  %v19691_v39 = vpop.permute.xlu0 %10080 }
 0xbd5   : > { %14317 = vmatprep.mubr.msk.f32.mxu0 %vm811_vm8, %v9095_v5  ;;  %v9099_v2 = vmul.f32 %v19671_v63, %v20702_v44  ;;  %v19684_v5 = vpop.permute.xlu1 %10092 }
 0xbd8   : > { %14318 = vmatmul.mubr.msk.f32.gmra.mrb[36].mxu0 %vm811_vm8, %v9096_v45  ;;  %v9620_v45 = vmul.f32 %v20704_v42, %v19324_v21  ;;  %v20707_v21 = vld [vmem:[#allocation183_spill] sm:$0xff] }
 0xbd9   : > { %14320 = vmatprep.mubr.msk.f32.mxu0 %vm811_vm8, %v9097_v52  ;;  %v10756_v52 = vld [vmem:[#allocation25 + $0x78] sm:$0xf]  ;;  %v19700_v16 = vpop.permute.xlu1 %10100 }
 0xbda   : > { %v19696_v44 = vpack.c.bf16 %v10756_v52, %v10755_v31  ;;  %v20710_v52 = vld [vmem:[#allocation182_spill] sm:$0xff] }
 0xbdc   : > { %14321 = vmatmul.mubr.msk.f32.gmra.mrb[38].mxu0 %vm811_vm8, %v9098_v59  ;;  %v9621_v59 = vmul.f32 %v20705_v36, %v19332_v17  ;;  %v19712_v17 = vpop.permute.xlu0 %10088  ;;  %v9628_v36 = vmul.f32 %v20710_v52, %v19371_v15  ;;  %v9632_v15 = vmul.f32 %v19003_v35, %v19391_v61  ;;  %v9635_v35 = vmul.f32 %v19406_v38, %v19081_v11  ;;  %v20713_v61 = vld [vmem:[#allocation45_spill] sm:$0xff] }
 0xbdd   : > { %14323 = vmatprep.mubr.msk.f32.mxu0 %vm811_vm8, %v9099_v2  ;;  %v20706_v2 = vld [vmem:[#allocation181_spill] sm:$0xff] }
 0xbde   : > { %v9622_v63 = vmul.f32 %v19334_v62, %v20706_v2  ;;  %v20708_v62 = vld [vmem:[#allocation178_spill] sm:$0xff]  ;;  %v20715_v38 = vld [vmem:[#allocation189_spill] sm:$0xff] }
 0xbdf   : > { %v9624_v42 = vmul.f32 %v20708_v62, %v19351_v22  ;;  %v9627_v22 = vmul.f32 %v19366_v8, %v19016_v19  ;;  %v9631_v8 = vmul.f32 %v19386_v47, %v19049_v3  ;;  %v9636_v47 = vmul.f32 %v19035_v13, %v19411_v28  ;;  %v20716_v13 = vld [vmem:[#allocation53_spill] sm:$0xff]  ;;  %v20717_v62 = vld [vmem:[#allocation46_spill] sm:$0xff] }
 0xbe0   : > { %14324 = vmatmul.mubr.msk.f32.gmra.mrb[40].mxu0 %vm811_vm8, %v9100_v34  ;;  %v9623_v34 = vmul.f32 %v20707_v21, %v19348_v1  ;;  %v20709_v1 = vld [vmem:[#allocation180_spill] sm:$0xff]  ;;  %v19725_v31 = vpop.permute.xlu0 %10096  ;;  %v9639_v28 = vmul.f32 %v20716_v13, %v20715_v38  ;;  %v20730_v38 = vld [vmem:[#allocation73_spill] sm:$0xff] }
 0xbe1   : > { %14330 = vmatprep.mubr.msk.f32.mxu0 %vm811_vm8, %v9620_v45  ;;  %v9626_v45 = vmul.f32 %v20709_v1, %v19361_v51  ;;  %v20711_v51 = vld [vmem:[#allocation184_spill] sm:$0xff] }
 0xbe2   : > { %v9630_v2 = vmul.f32 %v20711_v51, %v19381_v58  ;;  %v9634_v58 = vmul.f32 %v19021_v0, %v19401_v18  ;;  %v20712_v0 = vld [vmem:[#allocation44_spill] sm:$0xff]  ;;  %v20714_v18 = vld [vmem:[#allocation185_spill] sm:$0xff] }
 0xbe4   : > { %14331 = vmatmul.mubr.msk.f32.vlgmr.msra.gmra.mrb[10].mxu0 %vm811_vm8, %v9621_v59 }
 0xbe5   : > { %14333 = vmatprep.mubr.msk.f32.mxu0 %vm811_vm8, %v9622_v63  ;;  %15183 = vmatpush3.bf16.msk.msra.mxu0 %vm18790_vm11, %v19588_v40  ;;  %v19718_v63 = vpop.permute.xlu1 %10108  ;;  %v9625_v40 = vmul.f32 %v19356_v41, %v19000_v7  ;;  %v9629_v7 = vmul.f32 %v19376_v46, %v19032_v60  ;;  %v19738_v41 = vpop.permute.xlu0 %10104  ;;  %v9633_v46 = vmul.f32 %v19396_v9, %v19066_v30 }
 0xbe6   : > { %15186 = vmatprep.subr.msk.bf16.mxu0 %vm18790_vm11, %v19696_v44  ;;  %v9637_v9 = vmul.f32 %v20712_v0, %v19098_v27  ;;  %v20719_v27 = vld [vmem:[#allocation76_spill] sm:$0xff] }
 0xbe8   : > { %14334 = vmatmul.mubr.msk.f32.gmra.mrb[12].mxu0 %vm811_vm8, %v9623_v34  ;;  %v9638_v34 = vmul.f32 %v20714_v18, %v20713_v61  ;;  %v20728_v61 = vld [vmem:[#allocation47_spill] sm:$0xff] }
 0xbe9   : > { %14336 = vmatprep.mubr.msk.f32.mxu0 %vm811_vm8, %v9624_v42  ;;  %v19732_v59 = vpop.permute.xlu1 %10116  ;;  %v19751_v60 = vpop.permute.xlu0 %10112  ;;  %v20718_v42 = vld [vmem:[#allocation186_spill] sm:$0xff] }
 0xbec   : > { %14337 = vmatmul.mubr.msk.f32.gmra.mrb[14].mxu0 %vm811_vm8, %v9625_v40  ;;  %v9640_v40 = vmul.f32 %v20718_v42, %v20717_v62  ;;  %v20731_v62 = vld [vmem:[#allocation77_spill] sm:$0xff]  ;;  %v20732_v42 = vld [vmem:[#allocation58_spill] sm:$0xff] }
 0xbed   : > { %14339 = vmatprep.mubr.msk.f32.mxu0 %vm811_vm8, %v9626_v45  ;;  %v19744_v19 = vpop.permute.xlu1 %10124  ;;  %v19764_v3 = vpop.permute.xlu0 %10120  ;;  %v20720_v45 = vld [vmem:[#allocation54_spill] sm:$0xff] }
 0xbf0   : > { %14340 = vmatmul.mubr.msk.f32.gmra.mrb[16].mxu0 %vm811_vm8, %v9627_v22  ;;  %v9641_v22 = vmul.f32 %v20720_v45, %v20719_v27  ;;  %v20733_v45 = vld [vmem:[#allocation60_spill] sm:$0xff] }
 0xbf1   : > { %14342 = vmatprep.mubr.msk.f32.mxu0 %vm811_vm8, %v9628_v36  ;;  %v19758_v21 = vpop.permute.xlu1 %10132  ;;  %v19777_v11 = vpop.permute.xlu0 %10128  ;;  %v20721_v36 = vld [vmem:[#allocation56_spill] sm:$0xff] }
 0xbf4   : > { %14343 = vmatmul.mubr.msk.f32.gmra.mrb[18].mxu0 %vm811_vm8, %v9629_v7  ;;  %v20722_v7 = vld [vmem:[#allocation187_spill] sm:$0xff] }
 0xbf5   : > { %14345 = vmatprep.mubr.msk.f32.mxu0 %vm811_vm8, %v9630_v2  ;;  %v19770_v30 = vpop.permute.xlu1 %10140  ;;  %v19790_v52 = vpop.permute.xlu0 %10136  ;;  %v9642_v51 = vmul.f32 %v20722_v7, %v20721_v36  ;;  %v19820_v36 = vld [vmem:[#allocation4 + $0x102] sm:$0xff] }
 0xbf8   : > { %14346 = vmatmul.mubr.msk.f32.gmra.mrb[20].mxu0 %vm811_vm8, %v9631_v8  ;;  %v20723_v8 = vld [vmem:[#allocation74_spill] sm:$0xff] }
 0xbf9   : > { %14348 = vmatprep.mubr.msk.f32.mxu0 %vm811_vm8, %v9632_v15  ;;  %v19784_v1 = vpop.permute.xlu1 %10148  ;;  %v20724_v15 = vld [vmem:[#allocation55_spill] sm:$0xff]  ;;  %v19803_v0 = vpop.permute.xlu0 %10144 }
 0xbfc   : > { %14349 = vmatmul.mubr.msk.f32.gmra.mrb[22].mxu0 %vm811_vm8, %v9633_v46  ;;  %v9643_v46 = vmul.f32 %v20724_v15, %v20723_v8  ;;  %v19828_v15 = vld [vmem:[#allocation4 + $0x10a] sm:$0xff] }
 0xbfd   : > { %14351 = vmatprep.mubr.msk.f32.mxu0 %vm811_vm8, %v9634_v58  ;;  %v19796_v2 = vpop.permute.xlu1 %10156  ;;  %v20725_v58 = vld [vmem:[#allocation57_spill] sm:$0xff]  ;;  %v19816_v27 = vpop.permute.xlu0 %10152 }
 0xc00   : > { %14352 = vmatmul.mubr.msk.f32.gmra.mrb[24].mxu0 %vm811_vm8, %v9635_v35  ;;  %v20726_v35 = vld [vmem:[#allocation188_spill] sm:$0xff] }
 0xc01   : > { %14354 = vmatprep.mubr.msk.f32.mxu0 %vm811_vm8, %v9636_v47  ;;  %v9644_v47 = vmul.f32 %v20726_v35, %v20725_v58  ;;  %v10011_v58 = vld [vmem:[#allocation4 + $0x20] sm:$0xff]  ;;  %v20735_v35 = vld [vmem:[#allocation42_spill] sm:$0xff] }
 0xc04   : > { %14355 = vmatmul.mubr.msk.f32.gmra.mrb[26].mxu0 %vm811_vm8, %v9637_v9  ;;  %v20727_v9 = vld [vmem:[#allocation78_spill] sm:$0xff] }
 0xc05   : > { %14357 = vmatprep.mubr.msk.f32.mxu0 %vm811_vm8, %v9638_v34  ;;  %v9645_v18 = vmul.f32 %v20728_v61, %v20727_v9  ;;  %v20729_v34 = vld [vmem:[#allocation48_spill] sm:$0xff]  ;;  %v10171_v9 = vmul.f32 %v19644_v43, %v10011_v58  ;;  %v11306_v61 = vld [vmem:[#allocation25 + $0x80] sm:$0xff] }
 0xc06   : > { %v9646_v13 = vmul.f32 %v20730_v38, %v20729_v34 }
 0xc08   : > { %14358 = vmatmul.mubr.msk.f32.gmra.mrb[28].mxu0 %vm811_vm8, %v9639_v28  ;;  %v19810_v28 = vpop.permute.xlu1 %10164 }
 0xc09   : > { %14360 = vmatprep.mubr.msk.f32.mxu0 %vm811_vm8, %v9640_v40  ;;  %v9647_v40 = vmul.f32 %v20732_v42, %v20731_v62 }
 0xc0c   : > { %14361 = vmatmul.mubr.msk.f32.gmra.mrb[30].mxu0 %vm811_vm8, %v9641_v22  ;;  %v9648_v22 = vmul.f32 %v19624_v10, %v20733_v45  ;;  %v19824_v7 = vpop.permute.xlu1 %10595  ;;  %v19833_v10 = vpop.permute.xlu0 %10160 }
 0xc0d   : > { %14363 = vmatprep.mubr.msk.f32.mxu0 %vm811_vm8, %v9642_v51  ;;  %v20734_v51 = vld [vmem:[#allocation41_spill] sm:$0xff] }
 0xc0e   : > { %v9649_v8 = vmul.f32 %v19476_v24, %v20734_v51 }
 0xc10   : > { %14364 = vmatmul.mubr.msk.f32.gmra.mrb[32].mxu0 %vm811_vm8, %v9643_v46  ;;  %v9650_v46 = vmul.f32 %v19820_v36, %v19634_v12  ;;  %v19839_v24 = vpop.permute.xlu1 %10603  ;;  %v20736_v12 = vld [vmem:[#allocation75_spill] sm:$0xff]  ;;  %v19849_v42 = vpop.permute.xlu0 %10168 }
 0xc11   : > { %14366 = vmatprep.mubr.msk.f32.mxu0 %vm811_vm8, %v9644_v47  ;;  %v9651_v47 = vmul.f32 %v19828_v15, %v20735_v35  ;;  %v10172_v34 = vmul.f32 %v19619_v50, %v20736_v12  ;;  %v20740_v35 = vld [vmem:[#allocation50_spill] sm:$0xff] }
 0xc14   : > { %14367 = vmatmul.mubr.msk.f32.gmra.mrb[34].mxu0 %vm811_vm8, %v9645_v18  ;;  %v11307_v18 = vld [vmem:[#allocation25 + $0x88] sm:$0xf]  ;;  %v19856_v43 = vpop.permute.xlu1 %10607  ;;  %v19865_v51 = vpop.permute.xlu0 %10599 }
 0xc15   : > { %14369 = vmatprep.mubr.msk.f32.mxu0 %vm811_vm8, %v9646_v13  ;;  %v19845_v38 = vpack.c.bf16 %v11307_v18, %v11306_v61  ;;  %v20737_v13 = vld [vmem:[#allocation80_spill] sm:$0xff]  ;;  %v10020_v61 = vld [vmem:[#allocation4 + $0x68] sm:$0xff]  ;;  %v20741_v18 = vld [vmem:[#allocation51_spill] sm:$0xff] }
 0xc16   : > { %v10173_v62 = vmul.f32 %v19629_v25, %v20737_v13  ;;  %v20738_v25 = vld [vmem:[#allocation82_spill] sm:$0xff]  ;;  %v10181_v12 = vmul.f32 %v19669_v14, %v20741_v18  ;;  %v20742_v13 = vld [vmem:[#allocation43_spill] sm:$0xff] }
 0xc17   : > { %v10175_v45 = vmul.f32 %v19639_v55, %v20738_v25  ;;  %v10038_v18 = vld [vmem:[#allocation4 + $0xf8] sm:$0xff] }
 0xc18   : > { %14370 = vmatmul.mubr.msk.f32.gmra.mrb[36].mxu0 %vm811_vm8, %v9647_v40  ;;  %v10014_v40 = vld [vmem:[#allocation4 + $0x38] sm:$0xff]  ;;  %v19871_v58 = vpop.permute.xlu1 %10615 }
 0xc19   : > { %14372 = vmatprep.mubr.msk.f32.mxu0 %vm811_vm8, %v9648_v22  ;;  %v10174_v50 = vmul.f32 %v19654_v53, %v10014_v40  ;;  %v10016_v22 = vld [vmem:[#allocation4 + $0x48] sm:$0xff]  ;;  %v10018_v53 = vld [vmem:[#allocation4 + $0x58] sm:$0xff] }
 0xc1a   : > { %v10178_v55 = vmul.f32 %v19676_v33, %v10018_v53  ;;  %v10024_v40 = vld [vmem:[#allocation4 + $0x88] sm:$0xff]  ;;  %v10030_v53 = vld [vmem:[#allocation4 + $0xb8] sm:$0xff] }
 0xc1b   : > { %v10184_v14 = vmul.f32 %v19725_v31, %v10024_v40 }
 0xc1c   : > { %14373 = vmatmul.mubr.msk.f32.gmra.mrb[38].mxu0 %vm811_vm8, %v9649_v8  ;;  %v20739_v8 = vld [vmem:[#allocation49_spill] sm:$0xff] }
 0xc1d   : > { %14375 = vmatprep.mubr.msk.f32.mxu0 %vm811_vm8, %v9650_v46  ;;  %v10177_v46 = vmul.f32 %v19649_v56, %v20739_v8  ;;  %v19882_v56 = vpop.permute.xlu1 %10623  ;;  %v10028_v8 = vld [vmem:[#allocation4 + $0xa8] sm:$0xff] }
 0xc20   : > { %14376 = vmatmul.mubr.msk.f32.gmra.mrb[40].mxu0 %vm811_vm8, %v9651_v47  ;;  %v10179_v47 = vmul.f32 %v19659_v26, %v20740_v35  ;;  %v10032_v35 = vld [vmem:[#allocation4 + $0xc8] sm:$0xff] }
 0xc21   : > { %14382 = vmatprep.mubr.msk.f32.mxu0 %vm811_vm8, %v10171_v9  ;;  %v19878_v9 = vpop.permute.xlu0 %10611 }
 0xc24   : > { %14383 = vmatmul.mubr.msk.f32.vlgmr.msra.gmra.mrb[10].mxu0 %vm811_vm8, %v10172_v34  ;;  %v10022_v34 = vld [vmem:[#allocation4 + $0x78] sm:$0xff] }
 0xc25   : > { %14385 = vmatprep.mubr.msk.f32.mxu0 %vm811_vm8, %v10173_v62  ;;  %15189 = vmatpush3.bf16.msk.msra.mxu0 %vm18790_vm11, %v19696_v44  ;;  %v10176_v44 = vmul.f32 %v19664_v32, %v10016_v22  ;;  %v10180_v32 = vmul.f32 %v19691_v39, %v10020_v61  ;;  %v19888_v33 = vpop.permute.xlu0 %10619  ;;  %v10182_v26 = vmul.f32 %v19712_v17, %v10022_v34  ;;  %v20743_v39 = vld [vmem:[#allocation52_spill] sm:$0xff]  ;;  %v10036_v61 = vld [vmem:[#allocation4 + $0xe8] sm:$0xff] }
 0xc26   : > { %15192 = vmatprep.subr.msk.bf16.mxu0 %vm18790_vm11, %v19845_v38  ;;  %v10183_v62 = vmul.f32 %v19684_v5, %v20742_v13  ;;  %v10185_v25 = vmul.f32 %v19700_v16, %v20743_v39  ;;  %v10026_v22 = vld [vmem:[#allocation4 + $0x98] sm:$0xff]  ;;  %v10188_v16 = vmul.f32 %v19751_v60, %v10028_v8  ;;  %v10193_v60 = vmul.f32 %v19758_v21, %v19288_v20  ;;  %v16148_v39 = vld [vmem:[#allocation4 + $0x41] sm:$0xff] }
 0xc27   : > { %v10186_v17 = vmul.f32 %v19738_v41, %v10026_v22  ;;  %v10196_v20 = vmul.f32 %v19803_v0, %v10036_v61  ;;  %v10197_v21 = vmul.f32 %v19784_v1, %v19308_v49  ;;  %v10041_v49 = vld [vmem:[#allocation4 + $0x110] sm:$0xff]  ;;  %v10200_v1 = vmul.f32 %v19833_v10, %v19578_v48  ;;  %v16152_v8 = vld [vmem:[#allocation4 + $0x61] sm:$0xff] }
 0xc28   : > { %14386 = vmatmul.mubr.msk.f32.gmra.mrb[12].mxu0 %vm811_vm8, %v10174_v50  ;;  %v19894_v50 = vpop.permute.xlu1 %10631  ;;  %v10201_v34 = vmul.f32 %v19810_v28, %v10041_v49  ;;  %v16145_v48 = vld [vmem:[#allocation4 + $0x29] sm:$0xff] }
 0xc29   : > { %14388 = vmatprep.mubr.msk.f32.mxu0 %vm811_vm8, %v10175_v45  ;;  %v19901_v45 = vpop.permute.xlu0 %10627  ;;  %v10723_v28 = vmul.f32 %v16145_v48, %v19865_v51  ;;  %v10726_v51 = vmul.f32 %v16148_v39, %v19878_v9 }
 0xc2c   : > { %14389 = vmatmul.mubr.msk.f32.gmra.mrb[14].mxu0 %vm811_vm8, %v10176_v44  ;;  %v19905_v5 = vpop.permute.xlu1 %10639  ;;  %v10187_v44 = vmul.f32 %v19718_v63, %v19258_v54  ;;  %v10190_v54 = vmul.f32 %v19764_v3, %v10030_v53  ;;  %v10191_v63 = vmul.f32 %v19744_v19, %v19278_v6  ;;  %v10195_v19 = vmul.f32 %v19770_v30, %v19298_v29  ;;  %v16154_v53 = vld [vmem:[#allocation4 + $0x71] sm:$0xff] }
 0xc2d   : > { %14391 = vmatprep.mubr.msk.f32.mxu0 %vm811_vm8, %v10177_v46  ;;  %v19911_v31 = vpop.permute.xlu0 %10635  ;;  %v10189_v46 = vmul.f32 %v19732_v59, %v19268_v37  ;;  %v10192_v59 = vmul.f32 %v19777_v11, %v10032_v35  ;;  %v10198_v30 = vmul.f32 %v19816_v27, %v10038_v18  ;;  %v16156_v35 = vld [vmem:[#allocation4 + $0x81] sm:$0xff] }
 0xc30   : > { %14392 = vmatmul.mubr.msk.f32.gmra.mrb[16].mxu0 %vm811_vm8, %v10178_v55  ;;  %v19917_v55 = vpop.permute.xlu1 %10647 }
 0xc31   : > { %14394 = vmatprep.mubr.msk.f32.mxu0 %vm811_vm8, %v10179_v47  ;;  %v19924_v41 = vpop.permute.xlu0 %10643  ;;  %v10034_v47 = vld [vmem:[#allocation4 + $0xd8] sm:$0xff] }
 0xc32   : > { %v10194_v6 = vmul.f32 %v19790_v52, %v10034_v47  ;;  %v10199_v52 = vmul.f32 %v19796_v2, %v19570_v4  ;;  %v16144_v2 = vld [vmem:[#allocation4 + $0x21] sm:$0xff] }
 0xc33   : > { %v10722_v27 = vmul.f32 %v16144_v2, %v19824_v7  ;;  %v16147_v7 = vld [vmem:[#allocation4 + $0x39] sm:$0xff]  ;;  %v16166_v2 = vld [vmem:[#allocation4 + $0xd1] sm:$0xff] }
 0xc34   : > { %14395 = vmatmul.mubr.msk.f32.gmra.mrb[18].mxu0 %vm811_vm8, %v10180_v32  ;;  %v19928_v37 = vpop.permute.xlu1 %10655 }
 0xc35   : > { %14397 = vmatprep.mubr.msk.f32.mxu0 %vm811_vm8, %v10181_v12  ;;  %v19934_v3 = vpop.permute.xlu0 %10651  ;;  %v10042_v12 = vld [vmem:[#allocation4 + $0x118] sm:$0xff] }
 0xc36   : > { %v10202_v4 = vmul.f32 %v19849_v42, %v10042_v12  ;;  %v16164_v12 = vld [vmem:[#allocation4 + $0xc1] sm:$0xff] }
 0xc38   : > { %14398 = vmatmul.mubr.msk.f32.gmra.mrb[20].mxu0 %vm811_vm8, %v10182_v26  ;;  %v19940_v32 = vpop.permute.xlu1 %10663 }
 0xc39   : > { %14400 = vmatprep.mubr.msk.f32.mxu0 %vm811_vm8, %v10183_v62  ;;  %v19947_v11 = vpop.permute.xlu0 %10659  ;;  %v16146_v62 = vld [vmem:[#allocation4 + $0x31] sm:$0xff] }
 0xc3a   : > { %v10724_v40 = vmul.f32 %v16146_v62, %v19839_v24  ;;  %v16149_v24 = vld [vmem:[#allocation4 + $0x49] sm:$0xff] }
 0xc3b   : > { %v10727_v22 = vmul.f32 %v16149_v24, %v19871_v58 }
 0xc3c   : > { %14401 = vmatmul.mubr.msk.f32.gmra.mrb[22].mxu0 %vm811_vm8, %v10184_v14  ;;  %v19951_v29 = vpop.permute.xlu1 %10671  ;;  %v10725_v14 = vmul.f32 %v16147_v7, %v19856_v43 }
 0xc3d   : > { %14403 = vmatprep.mubr.msk.f32.mxu0 %vm811_vm8, %v10185_v25  ;;  %v19957_v0 = vpop.permute.xlu0 %10667 }
 0xc40   : > { %14404 = vmatmul.mubr.msk.f32.gmra.mrb[24].mxu0 %vm811_vm8, %v10186_v17  ;;  %v19963_v26 = vpop.permute.xlu1 %10679  ;;  %v16150_v17 = vld [vmem:[#allocation4 + $0x51] sm:$0xff] }
 0xc41   : > { %14406 = vmatprep.mubr.msk.f32.mxu0 %vm811_vm8, %v10187_v44  ;;  %v19969_v13 = vpop.permute.xlu0 %10675  ;;  %v10728_v44 = vmul.f32 %v16150_v17, %v19888_v33  ;;  %v16153_v33 = vld [vmem:[#allocation4 + $0x69] sm:$0xff] }
 0xc44   : > { %14407 = vmatmul.mubr.msk.f32.gmra.mrb[26].mxu0 %vm811_vm8, %v10188_v16  ;;  %v19974_v10 = vpop.permute.xlu1 %10687  ;;  %v10730_v16 = vmul.f32 %v16152_v8, %v19901_v45  ;;  %v10593_v8 = vld [vmem:[#allocation4 + $0x119] sm:$0xff] }
 0xc45   : > { %14409 = vmatprep.mubr.msk.f32.mxu0 %vm811_vm8, %v10189_v46  ;;  %v19978_v42 = vpop.permute.xlu0 %10683  ;;  %v10731_v46 = vmul.f32 %v16153_v33, %v19894_v50  ;;  %v16157_v50 = vld [vmem:[#allocation4 + $0x89] sm:$0xff] }
 0xc48   : > { %14410 = vmatmul.mubr.msk.f32.gmra.mrb[28].mxu0 %vm811_vm8, %v10190_v54  ;;  %v19986_v25 = vpop.permute.xlu1 %10695  ;;  %v10732_v54 = vmul.f32 %v16154_v53, %v19911_v31  ;;  %v10735_v31 = vmul.f32 %v16157_v50, %v19917_v55  ;;  %v16161_v55 = vld [vmem:[#allocation4 + $0xa9] sm:$0xff] }
 0xc49   : > { %14412 = vmatprep.mubr.msk.f32.mxu0 %vm811_vm8, %v10191_v63  ;;  %v19992_v23 = vpop.permute.xlu0 %10691  ;;  %v16173_v53 = vld [vmem:[#allocation4 + $0x2a] sm:$0xff] }
 0xc4c   : > { %14413 = vmatmul.mubr.msk.f32.gmra.mrb[30].mxu0 %vm811_vm8, %v10192_v59  ;;  %v19997_v9 = vpop.permute.xlu1 %10703  ;;  %v10734_v59 = vmul.f32 %v16156_v35, %v19924_v41 }
 0xc4d   : > { %14415 = vmatprep.mubr.msk.f32.mxu0 %vm811_vm8, %v10193_v60  ;;  %v20001_v58 = vpop.permute.xlu0 %10699 }
 0xc50   : > { %14416 = vmatmul.mubr.msk.f32.gmra.mrb[32].mxu0 %vm811_vm8, %v10194_v6  ;;  %v20006_v63 = vpop.permute.xlu1 %10711  ;;  %v16158_v6 = vld [vmem:[#allocation4 + $0x91] sm:$0xff] }
 0xc51   : > { %14418 = vmatprep.mubr.msk.f32.mxu0 %vm811_vm8, %v10195_v19  ;;  %v10708_v60 = vpop.permute.xlu0 %10707  ;;  %v10736_v19 = vmul.f32 %v16158_v6, %v19934_v3  ;;  %v16162_v3 = vld [vmem:[#allocation4 + $0xb1] sm:$0xff] }
 0xc54   : > { %14419 = vmatmul.mubr.msk.f32.gmra.mrb[34].mxu0 %vm811_vm8, %v10196_v20  ;;  %v20015_v47 = vpop.permute.xlu1 %10719  ;;  %v16160_v20 = vld [vmem:[#allocation4 + $0xa1] sm:$0xff] }
 0xc55   : > { %14421 = vmatprep.mubr.msk.f32.mxu0 %vm811_vm8, %v10197_v21  ;;  %v10716_v61 = vpop.permute.xlu0 %10715  ;;  %v10738_v21 = vmul.f32 %v16160_v20, %v19947_v11 }
 0xc58   : > { %14422 = vmatmul.mubr.msk.f32.gmra.mrb[36].mxu0 %vm811_vm8, %v10198_v30  ;;  %v11151_v18 = vpop.permute.xlu1 %11150  ;;  %v10739_v30 = vmul.f32 %v16161_v55, %v19940_v32  ;;  %v16165_v32 = vld [vmem:[#allocation4 + $0xc9] sm:$0xff] }
 0xc59   : > { %14424 = vmatprep.mubr.msk.f32.mxu0 %vm811_vm8, %v10199_v52  ;;  %v10740_v52 = vmul.f32 %v16162_v3, %v19957_v0  ;;  %v11147_v49 = vpop.permute.xlu0 %11146  ;;  %v10743_v0 = vmul.f32 %v16165_v32, %v19963_v26  ;;  %v16169_v26 = vld [vmem:[#allocation4 + $0xe9] sm:$0xff] }
 0xc5a   : > { %v10747_v7 = vmul.f32 %v16169_v26, %v19986_v25  ;;  %v10751_v25 = vmul.f32 %v20006_v63, %v19678_v57  ;;  %v16174_v57 = vld [vmem:[#allocation4 + $0x32] sm:$0xff] }
 0xc5c   : > { %14425 = vmatmul.mubr.msk.f32.gmra.mrb[38].mxu0 %vm811_vm8, %v10200_v1  ;;  %v11155_v11 = vpop.permute.xlu1 %11154 }
 0xc5d   : > { %14427 = vmatprep.mubr.msk.f32.mxu0 %vm811_vm8, %v10201_v34  ;;  %v10742_v34 = vmul.f32 %v16164_v12, %v19969_v13  ;;  %v16168_v13 = vld [vmem:[#allocation4 + $0xe1] sm:$0xff]  ;;  %v11275_v63 = vmul.f32 %v16174_v57, %v11155_v11  ;;  %v16197_v57 = vld [vmem:[#allocation4 + $0xea] sm:$0xff] }
 0xc5e   : > { %v10746_v62 = vmul.f32 %v16168_v13, %v19992_v23 }
 0xc60   : > { %14428 = vmatmul.mubr.msk.f32.gmra.mrb[40].mxu0 %vm811_vm8, %v10202_v4  ;;  %v11159_v4 = vpop.permute.xlu0 %11158  ;;  %v11163_v48 = vpop.permute.xlu1 %11162 }
 0xc61   : > { %14434 = vmatprep.mubr.msk.f32.mxu0 %vm811_vm8, %v10722_v27  ;;  %v10744_v27 = vmul.f32 %v16166_v2, %v19978_v42 }
 0xc64   : > { %14435 = vmatmul.mubr.msk.f32.vlgmr.msra.gmra.mrb[10].mxu0 %vm811_vm8, %v10723_v28  ;;  %v11171_v42 = vpop.permute.xlu1 %11170 }
 0xc65   : > { %14437 = vmatprep.mubr.msk.f32.mxu0 %vm811_vm8, %v10724_v40  ;;  %15195 = vmatpush3.bf16.msk.msra.mxu0 %vm18790_vm11, %v19845_v38  ;;  %v16151_v38 = vld [vmem:[#allocation4 + $0x59] sm:$0xff]  ;;  %v11167_v40 = vpop.permute.xlu0 %11166 }
 0xc66   : > { %v10729_v43 = vmul.f32 %v16151_v38, %v19882_v56  ;;  %v16155_v56 = vld [vmem:[#allocation4 + $0x79] sm:$0xff] }
 0xc67   : > { %v10733_v45 = vmul.f32 %v16155_v56, %v19905_v5  ;;  %v16159_v5 = vld [vmem:[#allocation4 + $0x99] sm:$0xff] }
 0xc68   : > { %14438 = vmatmul.mubr.msk.f32.gmra.mrb[12].mxu0 %vm811_vm8, %v10725_v14  ;;  %v10737_v41 = vmul.f32 %v16159_v5, %v19928_v37  ;;  %v16163_v37 = vld [vmem:[#allocation4 + $0xb9] sm:$0xff]  ;;  %v16170_v14 = vld [vmem:[#allocation4 + $0xf1] sm:$0xff]  ;;  %v11179_v23 = vpop.permute.xlu1 %11178 }
 0xc69   : > { %14440 = vmatprep.mubr.msk.f32.mxu0 %vm811_vm8, %v10726_v51  ;;  %v10741_v1 = vmul.f32 %v16163_v37, %v19951_v29  ;;  %v16167_v29 = vld [vmem:[#allocation4 + $0xd9] sm:$0xff]  ;;  %v10748_v39 = vmul.f32 %v16170_v14, %v20001_v58  ;;  %v11175_v51 = vpop.permute.xlu0 %11174  ;;  %v16172_v58 = vld [vmem:[#allocation4 + $0x22] sm:$0xff] }
 0xc6a   : > { %v10745_v28 = vmul.f32 %v16167_v29, %v19974_v10  ;;  %v16171_v10 = vld [vmem:[#allocation4 + $0xf9] sm:$0xff]  ;;  %v11273_v33 = vmul.f32 %v16172_v58, %v11147_v49 }
 0xc6b   : > { %v10749_v24 = vmul.f32 %v16171_v10, %v19997_v9  ;;  %v10753_v9 = vmul.f32 %v20015_v47, %v10593_v8  ;;  %v16182_v49 = vld [vmem:[#allocation4 + $0x72] sm:$0xff] }
 0xc6c   : > { %14441 = vmatmul.mubr.msk.f32.gmra.mrb[14].mxu0 %vm811_vm8, %v10727_v22  ;;  %v20744_v22 = vld [vmem:[#allocation59_spill] sm:$0xff] }
 0xc6d   : > { %14443 = vmatprep.mubr.msk.f32.mxu0 %vm811_vm8, %v10728_v44  ;;  %v10750_v17 = vmul.f32 %v10708_v60, %v20744_v22  ;;  %v10592_v44 = vld [vmem:[#allocation4 + $0x111] sm:$0xff]  ;;  %v16176_v60 = vld [vmem:[#allocation4 + $0x42] sm:$0xff] }
 0xc6e   : > { %v10752_v38 = vmul.f32 %v10716_v61, %v10592_v44  ;;  %v11277_v50 = vmul.f32 %v16176_v60, %v11163_v48  ;;  %v16194_v8 = vld [vmem:[#allocation4 + $0xd2] sm:$0xff] }
 0xc70   : > { %14444 = vmatmul.mubr.msk.f32.gmra.mrb[16].mxu0 %vm811_vm8, %v10729_v43  ;;  %v11183_v43 = vpop.permute.xlu0 %11182 }
 0xc71   : > { %14446 = vmatprep.mubr.msk.f32.mxu0 %vm811_vm8, %v10730_v16  ;;  %v11187_v16 = vpop.permute.xlu1 %11186 }
 0xc72   : > { %v11283_v37 = vmul.f32 %v16182_v49, %v11187_v16  ;;  %v16195_v16 = vld [vmem:[#allocation4 + $0xda] sm:$0xff] }
 0xc74   : > { %14447 = vmatmul.mubr.msk.f32.gmra.mrb[18].mxu0 %vm811_vm8, %v10731_v46  ;;  %v11191_v46 = vpop.permute.xlu0 %11190 }
 0xc75   : > { %14449 = vmatprep.mubr.msk.f32.mxu0 %vm811_vm8, %v10732_v54  ;;  %v11274_v54 = vmul.f32 %v16173_v53, %v11151_v18  ;;  %v11195_v56 = vpop.permute.xlu1 %11194 }
 0xc78   : > { %14450 = vmatmul.mubr.msk.f32.gmra.mrb[20].mxu0 %vm811_vm8, %v10733_v45  ;;  %v16175_v45 = vld [vmem:[#allocation4 + $0x3a] sm:$0xff] }
 0xc79   : > { %14452 = vmatprep.mubr.msk.f32.mxu0 %vm811_vm8, %v10734_v59  ;;  %v11276_v35 = vmul.f32 %v16175_v45, %v11159_v4  ;;  %v11199_v59 = vpop.permute.xlu0 %11198  ;;  %v11203_v6 = vpop.permute.xlu1 %11202 }
 0xc7c   : > { %14453 = vmatmul.mubr.msk.f32.gmra.mrb[22].mxu0 %vm811_vm8, %v10735_v31  ;;  %v16177_v31 = vld [vmem:[#allocation4 + $0x4a] sm:$0xff] }
 0xc7d   : > { %14455 = vmatprep.mubr.msk.f32.mxu0 %vm811_vm8, %v10736_v19  ;;  %v11278_v47 = vmul.f32 %v16177_v31, %v11167_v40  ;;  %v16178_v19 = vld [vmem:[#allocation4 + $0x52] sm:$0xff]  ;;  %v11207_v5 = vpop.permute.xlu0 %11206  ;;  %v11211_v55 = vpop.permute.xlu1 %11210  ;;  %v16188_v40 = vld [vmem:[#allocation4 + $0xa2] sm:$0xff] }
 0xc7e   : > { %v11279_v61 = vmul.f32 %v16178_v19, %v11171_v42  ;;  %v11289_v26 = vmul.f32 %v16188_v40, %v11211_v55 }
 0xc80   : > { %14456 = vmatmul.mubr.msk.f32.gmra.mrb[24].mxu0 %vm811_vm8, %v10737_v41  ;;  %v16179_v41 = vld [vmem:[#allocation4 + $0x5a] sm:$0xff] }
 0xc81   : > { %14458 = vmatprep.mubr.msk.f32.mxu0 %vm811_vm8, %v10738_v21  ;;  %v11280_v20 = vmul.f32 %v16179_v41, %v11175_v51  ;;  %v16180_v21 = vld [vmem:[#allocation4 + $0x62] sm:$0xff]  ;;  %v11219_v12 = vpop.permute.xlu1 %11218 }
 0xc82   : > { %v11281_v18 = vmul.f32 %v16180_v21, %v11179_v23 }
 0xc84   : > { %14459 = vmatmul.mubr.msk.f32.gmra.mrb[26].mxu0 %vm811_vm8, %v10739_v30  ;;  %v16181_v30 = vld [vmem:[#allocation4 + $0x6a] sm:$0xff] }
 0xc85   : > { %14461 = vmatprep.mubr.msk.f32.mxu0 %vm811_vm8, %v10740_v52  ;;  %v11282_v3 = vmul.f32 %v16181_v30, %v11183_v43  ;;  %v11215_v52 = vpop.permute.xlu0 %11214  ;;  %v11227_v29 = vpop.permute.xlu1 %11226 }
 0xc88   : > { %14462 = vmatmul.mubr.msk.f32.gmra.mrb[28].mxu0 %vm811_vm8, %v10741_v1  ;;  %v16183_v1 = vld [vmem:[#allocation4 + $0x7a] sm:$0xff] }
 0xc89   : > { %14464 = vmatprep.mubr.msk.f32.mxu0 %vm811_vm8, %v10742_v34  ;;  %v11284_v11 = vmul.f32 %v16183_v1, %v11191_v46  ;;  %v16184_v34 = vld [vmem:[#allocation4 + $0x82] sm:$0xff]  ;;  %v11223_v32 = vpop.permute.xlu0 %11222  ;;  %v11235_v14 = vpop.permute.xlu1 %11234 }
 0xc8a   : > { %v11285_v4 = vmul.f32 %v16184_v34, %v11195_v56  ;;  %v16196_v46 = vld [vmem:[#allocation4 + $0xe2] sm:$0xff]  ;;  %v16198_v56 = vld [vmem:[#allocation4 + $0xf2] sm:$0xff] }
 0xc8c   : > { %14465 = vmatmul.mubr.msk.f32.gmra.mrb[30].mxu0 %vm811_vm8, %v10743_v0  ;;  %v16185_v0 = vld [vmem:[#allocation4 + $0x8a] sm:$0xff] }
 0xc8d   : > { %14467 = vmatprep.mubr.msk.f32.mxu0 %vm811_vm8, %v10744_v27  ;;  %v11286_v2 = vmul.f32 %v16185_v0, %v11199_v59  ;;  %v16186_v27 = vld [vmem:[#allocation4 + $0x92] sm:$0xff]  ;;  %v11243_v23 = vpop.permute.xlu1 %11242  ;;  %v16199_v59 = vld [vmem:[#allocation4 + $0xfa] sm:$0xff] }
 0xc8e   : > { %v11287_v48 = vmul.f32 %v16186_v27, %v11203_v6  ;;  %v11297_v53 = vmul.f32 %v16196_v46, %v11243_v23 }
 0xc90   : > { %14468 = vmatmul.mubr.msk.f32.gmra.mrb[32].mxu0 %vm811_vm8, %v10745_v28  ;;  %v16187_v28 = vld [vmem:[#allocation4 + $0x9a] sm:$0xff] }
 0xc91   : > { %14470 = vmatprep.mubr.msk.f32.mxu0 %vm811_vm8, %v10746_v62  ;;  %v11288_v13 = vmul.f32 %v16187_v28, %v11207_v5  ;;  %v11231_v62 = vpop.permute.xlu0 %11230 }
 0xc94   : > { %14471 = vmatmul.mubr.msk.f32.gmra.mrb[34].mxu0 %vm811_vm8, %v10747_v7  ;;  %v16189_v7 = vld [vmem:[#allocation4 + $0xaa] sm:$0xff] }
 0xc95   : > { %14473 = vmatprep.mubr.msk.f32.mxu0 %vm811_vm8, %v10748_v39  ;;  %v11290_v42 = vmul.f32 %v16189_v7, %v11215_v52  ;;  %v16190_v39 = vld [vmem:[#allocation4 + $0xb2] sm:$0xff]  ;;  %v11239_v10 = vpop.permute.xlu0 %11238 }
 0xc96   : > { %v11291_v51 = vmul.f32 %v16190_v39, %v11219_v12  ;;  %v11296_v58 = vmul.f32 %v16195_v16, %v11239_v10 }
 0xc98   : > { %14474 = vmatmul.mubr.msk.f32.gmra.mrb[36].mxu0 %vm811_vm8, %v10749_v24  ;;  %v16191_v24 = vld [vmem:[#allocation4 + $0xba] sm:$0xff] }
 0xc99   : > { %14476 = vmatprep.mubr.msk.f32.mxu0 %vm811_vm8, %v10750_v17  ;;  %v11292_v22 = vmul.f32 %v16191_v24, %v11223_v32  ;;  %v16192_v17 = vld [vmem:[#allocation4 + $0xc2] sm:$0xff]  ;;  %v11247_v43 = vpop.permute.xlu0 %11246 }
 0xc9a   : > { %v11293_v44 = vmul.f32 %v16192_v17, %v11227_v29 }
 0xc9c   : > { %14477 = vmatmul.mubr.msk.f32.gmra.mrb[38].mxu0 %vm811_vm8, %v10751_v25  ;;  %v16193_v25 = vld [vmem:[#allocation4 + $0xca] sm:$0xff] }
 0xc9d   : > { %14479 = vmatprep.mubr.msk.f32.mxu0 %vm811_vm8, %v10752_v38  ;;  %v11294_v38 = vmul.f32 %v16193_v25, %v11231_v62 }
 0xca0   : > { %14480 = vmatmul.mubr.msk.f32.gmra.mrb[40].mxu0 %vm811_vm8, %v10753_v9  ;;  %v11295_v9 = vmul.f32 %v16194_v8, %v11235_v14 }
 0xca1   : > { %14486 = vmatprep.mubr.msk.f32.mxu0 %vm811_vm8, %v11273_v33  ;;  %v11251_v33 = vpop.permute.xlu1 %11250 }
 0xca2   : > { %v11299_v45 = vmul.f32 %v16198_v56, %v11251_v33 }
 0xca4   : > { %14487 = vmatmul.mubr.msk.f32.vlgmr.msra.gmra.mrb[10].mxu0 %vm811_vm8, %v11274_v54  ;;  %v11255_v54 = vpop.permute.xlu0 %11254 }
 0xca5   : > { %14489 = vmatprep.mubr.msk.f32.mxu0 %vm811_vm8, %v11275_v63  ;;  %v11298_v63 = vmul.f32 %v16197_v57, %v11247_v43  ;;  %v11300_v60 = vmul.f32 %v16199_v59, %v11255_v54 }
 0xca8   : > { %14490 = vmatmul.mubr.msk.f32.gmra.mrb[12].mxu0 %vm811_vm8, %v11276_v35  ;;  %v11259_v35 = vpop.permute.xlu1 %11258 }
 0xca9   : > { %14492 = vmatprep.mubr.msk.f32.mxu0 %vm811_vm8, %v11277_v50  ;;  %v11263_v50 = vpop.permute.xlu0 %11262  ;;  %v11301_v31 = vmul.f32 %v11259_v35, %v19820_v36  ;;  %v20091_v36 = vld [vmem:[%s20745_s18] ss:$0 sm:$0xff] }
 0xcaa   : > { %v11302_v19 = vmul.f32 %v11263_v50, %v19828_v15 }
 0xcac   : > { %14493 = vmatmul.mubr.msk.f32.gmra.mrb[14].mxu0 %vm811_vm8, %v11278_v47  ;;  %v11143_v47 = vld [vmem:[#allocation4 + $0x112] sm:$0xff]  ;;  %v11267_v6 = vpop.permute.xlu1 %11266 }
 0xcad   : > { %14495 = vmatprep.mubr.msk.f32.mxu0 %vm811_vm8, %v11279_v61  ;;  %v11144_v61 = vld [vmem:[#allocation4 + $0x11a] sm:$0xff]  ;;  %v11271_v5 = vpop.permute.xlu0 %11270  ;;  %v11303_v41 = vmul.f32 %v11267_v6, %v11143_v47 }
 0xcb0   : > { %14496 = vmatmul.mubr.msk.f32.gmra.mrb[16].mxu0 %vm811_vm8, %v11280_v20  ;;  %v11304_v20 = vmul.f32 %v11271_v5, %v11144_v61 }
 0xcb1   : > { %14498 = vmatprep.mubr.msk.f32.mxu0 %vm811_vm8, %v11281_v18  ;;  %v20093_v18 = vld [vmem:[#allocation28] ss:$0 sm:$0xff] }
 0xcb4   : > { %14499 = vmatmul.mubr.msk.f32.gmra.mrb[18].mxu0 %vm811_vm8, %v11282_v3 }
 0xcb5   : > { %14501 = vmatprep.mubr.msk.f32.mxu0 %vm811_vm8, %v11283_v37 }
 0xcb8   : > { %14502 = vmatmul.mubr.msk.f32.gmra.mrb[20].mxu0 %vm811_vm8, %v11284_v11 }
 0xcb9   : > { %14504 = vmatprep.mubr.msk.f32.mxu0 %vm811_vm8, %v11285_v4 }
 0xcbc   : > { %14505 = vmatmul.mubr.msk.f32.gmra.mrb[22].mxu0 %vm811_vm8, %v11286_v2 }
 0xcbd   : > { %14507 = vmatprep.mubr.msk.f32.mxu0 %vm811_vm8, %v11287_v48 }
 0xcc0   : > { %14508 = vmatmul.mubr.msk.f32.gmra.mrb[24].mxu0 %vm811_vm8, %v11288_v13 }
 0xcc1   : > { %14510 = vmatprep.mubr.msk.f32.mxu0 %vm811_vm8, %v11289_v26 }
 0xcc4   : > { %14511 = vmatmul.mubr.msk.f32.gmra.mrb[26].mxu0 %vm811_vm8, %v11290_v42 }
 0xcc5   : > { %14513 = vmatprep.mubr.msk.f32.mxu0 %vm811_vm8, %v11291_v51 }
 0xcc8   : > { %14514 = vmatmul.mubr.msk.f32.gmra.mrb[28].mxu0 %vm811_vm8, %v11292_v22 }
 0xcc9   : > { %14516 = vmatprep.mubr.msk.f32.mxu0 %vm811_vm8, %v11293_v44 }
 0xccc   : > { %14517 = vmatmul.mubr.msk.f32.gmra.mrb[30].mxu0 %vm811_vm8, %v11294_v38 }
 0xccd   : > { %14519 = vmatprep.mubr.msk.f32.mxu0 %vm811_vm8, %v11295_v9 }
 0xcd0   : > { %14520 = vmatmul.mubr.msk.f32.gmra.mrb[32].mxu0 %vm811_vm8, %v11296_v58 }
 0xcd1   : > { %14522 = vmatprep.mubr.msk.f32.mxu0 %vm811_vm8, %v11297_v53 }
 0xcd4   : > { %14523 = vmatmul.mubr.msk.f32.gmra.mrb[34].mxu0 %vm811_vm8, %v11298_v63 }
 0xcd5   : > { %14525 = vmatprep.mubr.msk.f32.mxu0 %vm811_vm8, %v11299_v45 }
 0xcd8   : > { %14526 = vmatmul.mubr.msk.f32.gmra.mrb[36].mxu0 %vm811_vm8, %v11300_v60 }
 0xcd9   : > { %14528 = vmatprep.mubr.msk.f32.mxu0 %vm811_vm8, %v11301_v31 }
 0xcdc   : > { %14529 = vmatmul.mubr.msk.f32.gmra.mrb[38].mxu0 %vm811_vm8, %v11302_v19 }
 0xcdd   : > { %14531 = vmatprep.mubr.msk.f32.mxu0 %vm811_vm8, %v11303_v41 }
 0xce0   : > { %14532 = vmatmul.mubr.msk.f32.gmra.mrb[40].mxu0 %vm811_vm8, %v11304_v20 }
 0xd77   : > { %v14488_v21 = vpop.f32.mrb[10].mxu0 }
 0xd78   : > { %v11672_v15 = vmul.f32 %v14488_v21, %v20091_v36  ;;  %v11473_v55 = vpop.f32.mrb[11].mxu0 }
 0xd79   : > { %v11671_v30 = vmul.f32 %v20091_v36, %v11473_v55 }
 0xd7a   : > { %v11711_v3 = vadd.f32 %v20093_v18, %v11672_v15 }
 0xd7b   : > { %v11710_v52 = vadd.f32 %v20093_v18, %v11671_v30  ;;  %v14491_v49 = vpop.f32.mrb[12].mxu0 }
 0xd7c   : > { %v11743_v37 = vsub.f32 0.0, %v11711_v3  ;;  %v11674_v1 = vmul.f32 %v14491_v49, %v20091_v36  ;;  %v11483_v11 = vpop.f32.mrb[13].mxu0 }
 0xd7d   : > { %v11742_v12 = vsub.f32 0.0, %v11710_v52  ;;  %v11673_v34 = vmul.f32 %v20091_v36, %v11483_v11 }
 0xd7e   : > { %v11776_v4 = vmul.f32 1.442695, %v11743_v37  ;;  %v11713_v32 = vadd.f32 %v20093_v18, %v11674_v1 }
 0xd7f   : > { %v11774_v0 = vmul.f32 1.442695, %v11742_v12  ;;  %v11712_v2 = vadd.f32 %v20093_v18, %v11673_v34  ;;  %v14494_v27 = vpop.f32.mrb[14].mxu0 }
 0xd80   : > { %15984 = vpow2.f32 %v11776_v4  ;;  %v11745_v48 = vsub.f32 0.0, %v11713_v32  ;;  %v11676_v29 = vmul.f32 %v14494_v27, %v20091_v36  ;;  %v11493_v28 = vpop.f32.mrb[15].mxu0 }
 0xd81   : > { %15986 = vpow2.f32 %v11774_v0  ;;  %v11744_v13 = vsub.f32 0.0, %v11712_v2  ;;  %v11675_v62 = vmul.f32 %v20091_v36, %v11493_v28 }
 0xd82   : > { %v11780_v40 = vmul.f32 1.442695, %v11745_v48  ;;  %v11715_v26 = vadd.f32 %v20093_v18, %v11676_v29 }
 0xd83   : > { %v11778_v7 = vmul.f32 1.442695, %v11744_v13  ;;  %v11714_v42 = vadd.f32 %v20093_v18, %v11675_v62  ;;  %v14497_v14 = vpop.f32.mrb[16].mxu0 }
 0xd84   : > { %15988 = vpow2.f32 %v11780_v40  ;;  %v11747_v39 = vsub.f32 0.0, %v11715_v26  ;;  %v11678_v51 = vmul.f32 %v14497_v14, %v20091_v36  ;;  %v11503_v10 = vpop.f32.mrb[17].mxu0 }
 0xd85   : > { %15990 = vpow2.f32 %v11778_v7  ;;  %v11746_v24 = vsub.f32 0.0, %v11714_v42  ;;  %v11677_v22 = vmul.f32 %v20091_v36, %v11503_v10 }
 0xd86   : > { %v11784_v17 = vmul.f32 1.442695, %v11747_v39  ;;  %v11717_v44 = vadd.f32 %v20093_v18, %v11678_v51 }
 0xd87   : > { %v11782_v23 = vmul.f32 1.442695, %v11746_v24  ;;  %v11716_v25 = vadd.f32 %v20093_v18, %v11677_v22  ;;  %v14500_v38 = vpop.f32.mrb[18].mxu0 }
 0xd88   : > { %15992 = vpow2.f32 %v11784_v17  ;;  %v11749_v43 = vsub.f32 0.0, %v11717_v44  ;;  %v11680_v8 = vmul.f32 %v14500_v38, %v20091_v36  ;;  %v11513_v9 = vpop.f32.mrb[19].mxu0 }
 0xd89   : > { %15994 = vpow2.f32 %v11782_v23  ;;  %v11748_v16 = vsub.f32 0.0, %v11716_v25  ;;  %v11679_v58 = vmul.f32 %v20091_v36, %v11513_v9 }
 0xd8a   : > { %v15985_v33 = vpop.eup %15984  ;;  %v11788_v46 = vmul.f32 1.442695, %v11749_v43  ;;  %v11719_v53 = vadd.f32 %v20093_v18, %v11680_v8 }
 0xd8b   : > { %v15987_v54 = vpop.eup %15986  ;;  %v11839_v57 = vadd.f32 1.0, %v15985_v33  ;;  %v11786_v63 = vmul.f32 1.442695, %v11748_v16  ;;  %v11718_v56 = vadd.f32 %v20093_v18, %v11679_v58  ;;  %v14503_v45 = vpop.f32.mrb[20].mxu0 }
 0xd8c   : > { %v11838_v35 = vadd.f32 1.0, %v15987_v54  ;;  %15996 = vpow2.f32 %v11788_v46  ;;  %v11751_v59 = vsub.f32 0.0, %v11719_v53  ;;  %v11682_v60 = vmul.f32 %v14503_v45, %v20091_v36  ;;  %v11523_v50 = vpop.f32.mrb[21].mxu0 }
 0xd8d   : > { %15998 = vrcp.f32 %v11839_v57  ;;  %v11750_v31 = vsub.f32 0.0, %v11718_v56  ;;  %v11681_v47 = vmul.f32 %v20091_v36, %v11523_v50 }
 0xd8e   : > { %v15989_v6 = vpop.eup %15988  ;;  %16000 = vrcp.f32 %v11838_v35  ;;  %v11792_v19 = vmul.f32 1.442695, %v11751_v59  ;;  %v11721_v61 = vadd.f32 %v20093_v18, %v11682_v60 }
 0xd8f   : > { %v15991_v5 = vpop.eup %15990  ;;  %v11841_v41 = vadd.f32 1.0, %v15989_v6  ;;  %16002 = vpow2.f32 %v11786_v63  ;;  %v11790_v20 = vmul.f32 1.442695, %v11750_v31  ;;  %v11720_v21 = vadd.f32 %v20093_v18, %v11681_v47  ;;  %v14506_v15 = vpop.f32.mrb[22].mxu0 }
 0xd90   : > { %v11840_v55 = vadd.f32 1.0, %v15991_v5  ;;  %16004 = vpow2.f32 %v11792_v19  ;;  %v11753_v30 = vsub.f32 0.0, %v11721_v61  ;;  %v11684_v3 = vmul.f32 %v14506_v15, %v20091_v36  ;;  %v11533_v52 = vpop.f32.mrb[23].mxu0 }
 0xd91   : > { %16006 = vrcp.f32 %v11841_v41  ;;  %v11752_v49 = vsub.f32 0.0, %v11720_v21  ;;  %v11683_v37 = vmul.f32 %v20091_v36, %v11533_v52 }
 0xd92   : > { %v15993_v1 = vpop.eup %15992  ;;  %16008 = vrcp.f32 %v11840_v55  ;;  %v11796_v11 = vmul.f32 1.442695, %v11753_v30  ;;  %v11723_v12 = vadd.f32 %v20093_v18, %v11684_v3 }
 0xd93   : > { %v15995_v34 = vpop.eup %15994  ;;  %v11843_v4 = vadd.f32 1.0, %v15993_v1  ;;  %16010 = vpow2.f32 %v11790_v20  ;;  %v11794_v32 = vmul.f32 1.442695, %v11752_v49  ;;  %v11722_v0 = vadd.f32 %v20093_v18, %v11683_v37  ;;  %v14509_v2 = vpop.f32.mrb[24].mxu0 }
 0xd94   : > { %v11842_v27 = vadd.f32 1.0, %v15995_v34  ;;  %16012 = vpow2.f32 %v11796_v11  ;;  %v11755_v48 = vsub.f32 0.0, %v11723_v12  ;;  %v11686_v29 = vmul.f32 %v14509_v2, %v20091_v36  ;;  %v11543_v28 = vpop.f32.mrb[25].mxu0 }
 0xd95   : > { %16014 = vrcp.f32 %v11843_v4  ;;  %v11754_v13 = vsub.f32 0.0, %v11722_v0  ;;  %v11685_v62 = vmul.f32 %v20091_v36, %v11543_v28 }
 0xd96   : > { %v15997_v40 = vpop.eup %15996  ;;  %16016 = vrcp.f32 %v11842_v27  ;;  %v11800_v26 = vmul.f32 1.442695, %v11755_v48  ;;  %v11725_v7 = vadd.f32 %v20093_v18, %v11686_v29 }
 0xd97   : > { %v15999_v42 = vpop.eup %15998  ;;  %v11845_v14 = vadd.f32 1.0, %v15997_v40  ;;  %16018 = vpow2.f32 %v11794_v32  ;;  %v11798_v39 = vmul.f32 1.442695, %v11754_v13  ;;  %v11724_v51 = vadd.f32 %v20093_v18, %v11685_v62  ;;  %v14512_v10 = vpop.f32.mrb[26].mxu0 }
 0xd98   : > { %v16001_v24 = vpop.eup %16000  ;;  %11935 = vst.msk [vmem:[%s20128_s30 + $0x8] sm:$0xff] %vm811_vm8, %v15999_v42  ;;  %16020 = vpow2.f32 %v11800_v26  ;;  %v11757_v22 = vsub.f32 0.0, %v11725_v7  ;;  %v11688_v17 = vmul.f32 %v14512_v10, %v20091_v36  ;;  %v11553_v44 = vpop.f32.mrb[27].mxu0 }
 0xd99   : > { %v16003_v23 = vpop.eup %16002  ;;  %11934 = vst.msk [vmem:[%s20128_s30] sm:$0xff] %vm811_vm8, %v16001_v24  ;;  %16022 = vrcp.f32 %v11845_v14  ;;  %v11756_v25 = vsub.f32 0.0, %v11724_v51  ;;  %v11687_v38 = vmul.f32 %v20091_v36, %v11553_v44 }
 0xd9a   : > { %v16005_v43 = vpop.eup %16004  ;;  %v11844_v8 = vadd.f32 1.0, %v16003_v23  ;;  %16024 = vpow2.f32 %v11798_v39  ;;  %v11804_v9 = vmul.f32 1.442695, %v11757_v22  ;;  %v11727_v16 = vadd.f32 %v20093_v18, %v11688_v17 }
 0xd9b   : > { %v16007_v58 = vpop.eup %16006  ;;  %v11847_v33 = vadd.f32 1.0, %v16005_v43  ;;  %v11802_v46 = vmul.f32 1.442695, %v11756_v25  ;;  %v11726_v53 = vadd.f32 %v20093_v18, %v11687_v38  ;;  %v14515_v54 = vpop.f32.mrb[28].mxu0 }
 0xd9c   : > { %v16009_v57 = vpop.eup %16008  ;;  %11937 = vst.msk [vmem:[%s20128_s30 + $0x18] sm:$0xff] %vm811_vm8, %v16007_v58  ;;  %16026 = vrcp.f32 %v11844_v8  ;;  %v11759_v63 = vsub.f32 0.0, %v11727_v16  ;;  %v11690_v56 = vmul.f32 %v14515_v54, %v20091_v36  ;;  %v11563_v45 = vpop.f32.mrb[29].mxu0 }
 0xd9d   : > { %v16011_v35 = vpop.eup %16010  ;;  %11936 = vst.msk [vmem:[%s20128_s30 + $0x10] sm:$0xff] %vm811_vm8, %v16009_v57  ;;  %16028 = vrcp.f32 %v11847_v33  ;;  %v11758_v59 = vsub.f32 0.0, %v11726_v53  ;;  %v11689_v60 = vmul.f32 %v20091_v36, %v11563_v45 }
 0xd9e   : > { %v16013_v50 = vpop.eup %16012  ;;  %v11846_v31 = vadd.f32 1.0, %v16011_v35  ;;  %16030 = vpow2.f32 %v11804_v9  ;;  %v11808_v47 = vmul.f32 1.442695, %v11759_v63  ;;  %v11729_v6 = vadd.f32 %v20093_v18, %v11690_v56 }
 0xd9f   : > { %v16015_v19 = vpop.eup %16014  ;;  %v11849_v61 = vadd.f32 1.0, %v16013_v50  ;;  %16032 = vpow2.f32 %v11802_v46  ;;  %v11806_v5 = vmul.f32 1.442695, %v11758_v59  ;;  %v11728_v41 = vadd.f32 %v20093_v18, %v11689_v60  ;;  %v14518_v20 = vpop.f32.mrb[30].mxu0 }
 0xda0   : > { %v16017_v21 = vpop.eup %16016  ;;  %11939 = vst.msk [vmem:[%s20128_s30 + $0x28] sm:$0xff] %vm811_vm8, %v16015_v19  ;;  %16034 = vrcp.f32 %v11846_v31  ;;  %v11761_v15 = vsub.f32 0.0, %v11729_v6  ;;  %v11692_v55 = vmul.f32 %v14518_v20, %v20091_v36  ;;  %v11573_v30 = vpop.f32.mrb[31].mxu0 }
 0xda1   : > { %v16019_v3 = vpop.eup %16018  ;;  %11938 = vst.msk [vmem:[%s20128_s30 + $0x20] sm:$0xff] %vm811_vm8, %v16017_v21  ;;  %16036 = vrcp.f32 %v11849_v61  ;;  %v11760_v52 = vsub.f32 0.0, %v11728_v41  ;;  %v11691_v49 = vmul.f32 %v20091_v36, %v11573_v30 }
 0xda2   : > { %v16021_v37 = vpop.eup %16020  ;;  %v11848_v1 = vadd.f32 1.0, %v16019_v3  ;;  %16038 = vpow2.f32 %v11808_v47  ;;  %v11812_v11 = vmul.f32 1.442695, %v11761_v15  ;;  %v11731_v12 = vadd.f32 %v20093_v18, %v11692_v55 }
 0xda3   : > { %v16023_v34 = vpop.eup %16022  ;;  %v11851_v4 = vadd.f32 1.0, %v16021_v37  ;;  %16040 = vpow2.f32 %v11806_v5  ;;  %v11730_v32 = vadd.f32 %v20093_v18, %v11691_v49  ;;  %v14521_v0 = vpop.f32.mrb[32].mxu0  ;;  %v11810_v27 = vmul.f32 1.442695, %v11760_v52 }
 0xda4   : > { %v16025_v2 = vpop.eup %16024  ;;  %11941 = vst.msk [vmem:[%s20128_s30 + $0x38] sm:$0xff] %vm811_vm8, %v16023_v34  ;;  %16042 = vrcp.f32 %v11848_v1  ;;  %v11763_v48 = vsub.f32 0.0, %v11731_v12  ;;  %v11694_v29 = vmul.f32 %v14521_v0, %v20091_v36  ;;  %v11583_v28 = vpop.f32.mrb[33].mxu0 }
 0xda5   : > { %16044 = vrcp.f32 %v11851_v4  ;;  %v11850_v13 = vadd.f32 1.0, %v16025_v2  ;;  %v11762_v62 = vsub.f32 0.0, %v11730_v32  ;;  %v11693_v40 = vmul.f32 %v20091_v36, %v11583_v28 }
 0xda6   : > { %v16027_v26 = vpop.eup %16026  ;;  %16046 = vpow2.f32 %v11812_v11  ;;  %v11816_v7 = vmul.f32 1.442695, %v11763_v48  ;;  %v11733_v42 = vadd.f32 %v20093_v18, %v11694_v29 }
 0xda7   : > { %v16029_v14 = vpop.eup %16028  ;;  %11940 = vst.msk [vmem:[%s20128_s30 + $0x30] sm:$0xff] %vm811_vm8, %v16027_v26  ;;  %16048 = vrcp.f32 %v11850_v13  ;;  %v11814_v39 = vmul.f32 1.442695, %v11762_v62  ;;  %v11732_v51 = vadd.f32 %v20093_v18, %v11693_v40  ;;  %v14524_v10 = vpop.f32.mrb[34].mxu0 }
 0xda8   : > { %v16031_v24 = vpop.eup %16030  ;;  %11943 = vst.msk [vmem:[%s20128_s30 + $0x48] sm:$0xff] %vm811_vm8, %v16029_v14  ;;  %16050 = vpow2.f32 %v11810_v27  ;;  %v11765_v22 = vsub.f32 0.0, %v11733_v42  ;;  %v11696_v17 = vmul.f32 %v14524_v10, %v20091_v36  ;;  %v11593_v44 = vpop.f32.mrb[35].mxu0 }
 0xda9   : > { %v16033_v23 = vpop.eup %16032  ;;  %v11853_v25 = vadd.f32 1.0, %v16031_v24  ;;  %16052 = vpow2.f32 %v11816_v7  ;;  %v11764_v38 = vsub.f32 0.0, %v11732_v51  ;;  %v11695_v43 = vmul.f32 %v20091_v36, %v11593_v44 }
 0xdaa   : > { %v16035_v8 = vpop.eup %16034  ;;  %v11852_v9 = vadd.f32 1.0, %v16033_v23  ;;  %16054 = vpow2.f32 %v11814_v39  ;;  %v11820_v16 = vmul.f32 1.442695, %v11765_v22  ;;  %v11735_v58 = vadd.f32 %v20093_v18, %v11696_v17 }
 0xdab   : > { %v16037_v33 = vpop.eup %16036  ;;  %11942 = vst.msk [vmem:[%s20128_s30 + $0x40] sm:$0xff] %vm811_vm8, %v16035_v8  ;;  %16056 = vrcp.f32 %v11853_v25  ;;  %v11818_v46 = vmul.f32 1.442695, %v11764_v38  ;;  %v11734_v53 = vadd.f32 %v20093_v18, %v11695_v43  ;;  %v14527_v54 = vpop.f32.mrb[36].mxu0 }
 0xdac   : > { %v16039_v57 = vpop.eup %16038  ;;  %11945 = vst.msk [vmem:[%s20128_s30 + $0x58] sm:$0xff] %vm811_vm8, %v16037_v33  ;;  %16058 = vrcp.f32 %v11852_v9  ;;  %v11767_v63 = vsub.f32 0.0, %v11735_v58  ;;  %v11698_v56 = vmul.f32 %v14527_v54, %v20091_v36  ;;  %v11603_v45 = vpop.f32.mrb[37].mxu0 }
 0xdad   : > { %v16041_v35 = vpop.eup %16040  ;;  %v11855_v59 = vadd.f32 1.0, %v16039_v57  ;;  %16060 = vpow2.f32 %v11820_v16  ;;  %v11766_v60 = vsub.f32 0.0, %v11734_v53  ;;  %v11697_v50 = vmul.f32 %v20091_v36, %v11603_v45 }
 0xdae   : > { %v16043_v31 = vpop.eup %16042  ;;  %v11854_v47 = vadd.f32 1.0, %v16041_v35  ;;  %16062 = vpow2.f32 %v11818_v46  ;;  %v11824_v6 = vmul.f32 1.442695, %v11767_v63  ;;  %v11737_v19 = vadd.f32 %v20093_v18, %v11698_v56 }
 0xdaf   : > { %v16045_v61 = vpop.eup %16044  ;;  %11944 = vst.msk [vmem:[%s20128_s30 + $0x50] sm:$0xff] %vm811_vm8, %v16043_v31  ;;  %16064 = vrcp.f32 %v11855_v59  ;;  %v11822_v5 = vmul.f32 1.442695, %v11766_v60  ;;  %v11736_v41 = vadd.f32 %v20093_v18, %v11697_v50  ;;  %v14530_v20 = vpop.f32.mrb[38].mxu0 }
 0xdb0   : > { %v16047_v21 = vpop.eup %16046  ;;  %11947 = vst.msk [vmem:[%s20128_s30 + $0x68] sm:$0xff] %vm811_vm8, %v16045_v61  ;;  %16066 = vrcp.f32 %v11854_v47  ;;  %v11769_v15 = vsub.f32 0.0, %v11737_v19  ;;  %v11700_v55 = vmul.f32 %v14530_v20, %v20091_v36  ;;  %v11613_v30 = vpop.f32.mrb[39].mxu0 }
 0xdb1   : > { %v16049_v3 = vpop.eup %16048  ;;  %v11857_v52 = vadd.f32 1.0, %v16047_v21  ;;  %16068 = vpow2.f32 %v11824_v6  ;;  %v11768_v49 = vsub.f32 0.0, %v11736_v41  ;;  %v11699_v37 = vmul.f32 %v20091_v36, %v11613_v30 }
 0xdb2   : > { %v16051_v1 = vpop.eup %16050  ;;  %11946 = vst.msk [vmem:[%s20128_s30 + $0x60] sm:$0xff] %vm811_vm8, %v16049_v3  ;;  %16070 = vpow2.f32 %v11822_v5  ;;  %v11828_v11 = vmul.f32 1.442695, %v11769_v15  ;;  %v11739_v12 = vadd.f32 %v20093_v18, %v11700_v55 }
 0xdb3   : > { %v16053_v34 = vpop.eup %16052  ;;  %16072 = vrcp.f32 %v11857_v52  ;;  %v11856_v4 = vadd.f32 1.0, %v16051_v1  ;;  %v11826_v32 = vmul.f32 1.442695, %v11768_v49  ;;  %v11738_v0 = vadd.f32 %v20093_v18, %v11699_v37  ;;  %v14533_v2 = vpop.f32.mrb[40].mxu0 }
 0xdb4   : > { %v16055_v27 = vpop.eup %16054  ;;  %v11859_v48 = vadd.f32 1.0, %v16053_v34  ;;  %16074 = vpow2.f32 %v11828_v11  ;;  %v11771_v29 = vsub.f32 0.0, %v11739_v12  ;;  %v11702_v28 = vmul.f32 %v14533_v2, %v20091_v36  ;;  %v11623_v13 = vpop.f32.mrb[41].mxu0 }
 0xdb5   : > { %v16057_v62 = vpop.eup %16056  ;;  %16076 = vrcp.f32 %v11856_v4  ;;  %v11858_v40 = vadd.f32 1.0, %v16055_v27  ;;  %v11770_v26 = vsub.f32 0.0, %v11738_v0  ;;  %v11701_v7 = vmul.f32 %v20091_v36, %v11623_v13 }
 0xdb6   : > { %v16059_v42 = vpop.eup %16058  ;;  %11949 = vst.msk [vmem:[%s20128_s30 + $0x78] sm:$0xff] %vm811_vm8, %v16057_v62  ;;  %16078 = vrcp.f32 %v11859_v48  ;;  %v11832_v14 = vmul.f32 1.442695, %v11771_v29  ;;  %v11741_v39 = vadd.f32 %v20093_v18, %v11702_v28 }
 0xdb7   : > { %v16061_v51 = vpop.eup %16060  ;;  %11948 = vst.msk [vmem:[%s20128_s30 + $0x70] sm:$0xff] %vm811_vm8, %v16059_v42  ;;  %16080 = vrcp.f32 %v11858_v40  ;;  %v11740_v10 = vadd.f32 %v20093_v18, %v11701_v7  ;;  %v11830_v17 = vmul.f32 1.442695, %v11770_v26 }
 0xdb8   : > { %v16063_v24 = vpop.eup %16062  ;;  %v11861_v22 = vadd.f32 1.0, %v16061_v51  ;;  %16082 = vpow2.f32 %v11826_v32  ;;  %v11773_v36 = vsub.f32 0.0, %v11741_v39 }
 0xdb9   : > { %v16065_v44 = vpop.eup %16064  ;;  %v11860_v23 = vadd.f32 1.0, %v16063_v24  ;;  %16084 = vpow2.f32 %v11832_v14  ;;  %v11772_v25 = vsub.f32 0.0, %v11740_v10 }
 0xdba   : > { %v16067_v38 = vpop.eup %16066  ;;  %11951 = vst.msk [vmem:[%s20128_s30 + $0x88] sm:$0xff] %vm811_vm8, %v16065_v44  ;;  %16086 = vrcp.f32 %v11861_v22  ;;  %v11836_v43 = vmul.f32 1.442695, %v11773_v36 }
 0xdbb   : > { %v16069_v8 = vpop.eup %16068  ;;  %11950 = vst.msk [vmem:[%s20128_s30 + $0x80] sm:$0xff] %vm811_vm8, %v16067_v38  ;;  %16088 = vrcp.f32 %v11860_v23  ;;  %v11834_v16 = vmul.f32 1.442695, %v11772_v25 }
 0xdbc   : > { %v16071_v18 = vpop.eup %16070  ;;  %v11863_v9 = vadd.f32 1.0, %v16069_v8  ;;  %16090 = vpow2.f32 %v11830_v17 }
 0xdbd   : > { %v16073_v58 = vpop.eup %16072  ;;  %v11862_v33 = vadd.f32 1.0, %v16071_v18  ;;  %16092 = vpow2.f32 %v11836_v43 }
 0xdbe   : > { %v16075_v46 = vpop.eup %16074  ;;  %11953 = vst.msk [vmem:[%s20128_s30 + $0x98] sm:$0xff] %vm811_vm8, %v16073_v58  ;;  %16094 = vrcp.f32 %v11863_v9 }
 0xdbf   : > { %v16077_v53 = vpop.eup %16076  ;;  %16096 = vrcp.f32 %v11862_v33  ;;  %v11865_v54 = vadd.f32 1.0, %v16075_v46 }
 0xdc0   : > { %v16079_v57 = vpop.eup %16078  ;;  %11952 = vst.msk [vmem:[%s20128_s30 + $0x90] sm:$0xff] %vm811_vm8, %v16077_v53  ;;  %16098 = vpow2.f32 %v11834_v16 }
 0xdc1   : > { %v16081_v63 = vpop.eup %16080  ;;  %11955 = vst.msk [vmem:[%s20128_s30 + $0xa8] sm:$0xff] %vm811_vm8, %v16079_v57  ;;  %16100 = vrcp.f32 %v11865_v54 }
 0xdc2   : > { %v16083_v56 = vpop.eup %16082  ;;  %11954 = vst.msk [vmem:[%s20128_s30 + $0xa0] sm:$0xff] %vm811_vm8, %v16081_v63 }
 0xdc3   : > { %v16085_v45 = vpop.eup %16084  ;;  %v11864_v35 = vadd.f32 1.0, %v16083_v56 }
 0xdc4   : > { %v16087_v59 = vpop.eup %16086  ;;  %v11867_v60 = vadd.f32 1.0, %v16085_v45 }
 0xdc5   : > { %v16089_v50 = vpop.eup %16088  ;;  %11957 = vst.msk [vmem:[%s20128_s30 + $0xb8] sm:$0xff] %vm811_vm8, %v16087_v59  ;;  %16102 = vrcp.f32 %v11864_v35 }
 0xdc6   : > { %v16091_v31 = vpop.eup %16090  ;;  %11956 = vst.msk [vmem:[%s20128_s30 + $0xb0] sm:$0xff] %vm811_vm8, %v16089_v50  ;;  %16104 = vrcp.f32 %v11867_v60 }
 0xdc7   : > { %v16093_v47 = vpop.eup %16092  ;;  %v11866_v6 = vadd.f32 1.0, %v16091_v31 }
 0xdc8   : > { %v16095_v19 = vpop.eup %16094  ;;  %v11869_v61 = vadd.f32 1.0, %v16093_v47 }
 0xdc9   : > { %v16097_v5 = vpop.eup %16096  ;;  %11959 = vst.msk [vmem:[%s20128_s30 + $0xc8] sm:$0xff] %vm811_vm8, %v16095_v19  ;;  %16106 = vrcp.f32 %v11866_v6 }
 0xdca   : > { %v16099_v41 = vpop.eup %16098  ;;  %11958 = vst.msk [vmem:[%s20128_s30 + $0xc0] sm:$0xff] %vm811_vm8, %v16097_v5  ;;  %16108 = vrcp.f32 %v11869_v61 }
 0xdcb   : > { %v16101_v20 = vpop.eup %16100  ;;  %v11868_v21 = vadd.f32 1.0, %v16099_v41 }
 0xdcc   : > { %11961 = vst.msk [vmem:[%s20128_s30 + $0xd8] sm:$0xff] %vm811_vm8, %v16101_v20 }
 0xdcd   : > { %16110 = vrcp.f32 %v11868_v21 }
 0xdcf   : > { %v16103_v15 = vpop.eup %16102 }
 0xdd0   : > { %v16105_v55 = vpop.eup %16104  ;;  %11960 = vst.msk [vmem:[%s20128_s30 + $0xd0] sm:$0xff] %vm811_vm8, %v16103_v15 }
 0xdd1   : > { %11963 = vst.msk [vmem:[%s20128_s30 + $0xe8] sm:$0xff] %vm811_vm8, %v16105_v55 }
 0xdd3   : > { %v16107_v30 = vpop.eup %16106 }
 0xdd4   : > { %v16109_v3 = vpop.eup %16108  ;;  %11962 = vst.msk [vmem:[%s20128_s30 + $0xe0] sm:$0xff] %vm811_vm8, %v16107_v30 }
 0xdd5   : > { %11965 = vst.msk [vmem:[%s20128_s30 + $0xf8] sm:$0xff] %vm811_vm8, %v16109_v3 }
 0xdd7   : > { %v16111_v52 = vpop.eup %16110 }
 0xdd8   : > { %11964 = vst.msk [vmem:[%s20128_s30 + $0xf0] sm:$0xff] %vm811_vm8, %v16111_v52 }
 0xdd9 PF: > { %s20747_s21 = sld [smem:[#allocation39_spill]] }
 0xddf   : > { %s37_s27 = sadd.s32 1, %s20747_s21  }
 0xde0   : > { %p34_p5 = scmp.ge.s32.totalorder %s37_s27, 4  }
 0xde2   :  { %36 = sbr.rel (!%p34_p5) target bundleno = 18 (0x12), region = 217 }
 0xde9   :  { %11987 = vsyncpa [#allocation6], 1 }
 0xdea   :  { %11989 = vsyncpa [#allocation6 + $0x1], 1 }
 0xdeb   :  { %11990 = vsyncpa [#allocation8], 1 }
 0xdec   :  { %11991 = vsyncpa [#allocation11], 1 }
 0xded   :  { %11992 = vsyncpa [#allocation14], 1 }
 0xdee   :  { %11993 = vsyncpa [#allocation17], 1 }
 0xdef   :  { %11994 = vsyncpa [#allocation20], 1 }
 0xdf0   :  { %11995 = vsyncpa [#allocation23], 1 }
 0xdf1   :  { %11996 = vsyncpa [#allocation26], 1 }
 0xdf2   :  { %11997 = vsyncpa [#allocation29], 1 }

</bundles_post_ra>
